<compile_context>
chip_gen: v7x
topology: tpu7x:2x2x1
jax: 0.10.0
libtpu: 0.0.40
codegen_flags: <defaults>
</compile_context>

<pallas_src>
import math
from functools import partial

import jax
import jax.numpy as jnp
from jax.experimental import pallas as pl
from jax.experimental.pallas import tpu as pltpu

_CHUNK = 256                           # row-chunk for the stem convolutions
_GELU_K = math.sqrt(2.0 / math.pi)


# ----------------------------------------------------------------------------
# In-kernel helpers
# ----------------------------------------------------------------------------
def _gelu(x):
    # tanh-approximate GELU (tanh goes to the EUP slot).
    return 0.5 * x * (1.0 + jnp.tanh(_GELU_K * (x + 0.044715 * x * x * x)))


def _chunk_ranges(total, max_chunk=_CHUNK):
    """Static (start, size) chunks; short tail handled (no divisibility assert).
    Sizes stay multiples of the pool widths because both max_chunk and total
    are multiples of 8."""
    out, c0 = [], 0
    while c0 < total:
        cn = min(max_chunk, total - c0)
        out.append((c0, cn))
        c0 += cn
    return out


def _pool_max(hc_ref, cn, p):
    """MaxPool1d(kernel=stride=p) over the first cn rows of the chunk scratch;
    channels stay on lanes."""
    m = hc_ref[pl.ds(0, cn // p, stride=p), :]
    for i in range(1, p):
        m = jnp.maximum(m, hc_ref[pl.ds(i, cn // p, stride=p), :])
    return m


def _conv_bn_pool(g_ref, w_ref, b_ref, hc_ref, *, K, L_out, C_out, p, emit):
    """'Same' conv (taps read from the zero-framed g_ref) + folded BN + pool.
    Chunked along L to bound the live accumulator; each chunk's pooled result
    is handed to `emit(row0, rows, value)`."""
    for c0, cn in _chunk_ranges(L_out):
        acc = jnp.zeros((cn, C_out), jnp.float32)
        for k in range(K):
            tap = g_ref[pl.ds(c0 + k, cn), :].astype(jnp.bfloat16)
            acc = acc + jnp.dot(tap, w_ref[k],
                                preferred_element_type=jnp.float32)
        hc_ref[pl.ds(0, cn), :] = acc + b_ref[...]
        emit(c0 // p, cn // p, _pool_max(hc_ref, cn, p))


# ----------------------------------------------------------------------------
# Fused Basenji forward kernel (one batch element per grid step)
# ----------------------------------------------------------------------------
def _basenji_kernel(x_ref, w1_ref, b1_ref, w2_ref, b2_ref, w3_ref, b3_ref,
                    wda_ref, bda_ref, wdb_ref, bdb_ref,
                    w4_ref, b4_ref, w5t_ref, wl_ref, blf_ref,
                    o_ref,
                    g2_ref, g3_ref, gt_ref, cur_ref,
                    hc1_ref, hc2_ref, hc3_ref,
                    *, L, convdc):
    L2, L3, L4 = L // 8, L // 32, L // 128
    maxd = 2 ** (convdc - 1)
    f32 = jnp.float32

    # ---- zero the conv-padding frames once -------------------------------
    g2_ref[pl.ds(0, 3), :] = jnp.zeros((3, 64), f32)
    g2_ref[pl.ds(3 + L2, 3), :] = jnp.zeros((3, 64), f32)
    g3_ref[pl.ds(0, 3), :] = jnp.zeros((3, 64), f32)
    g3_ref[pl.ds(3 + L3, 3), :] = jnp.zeros((3, 64), f32)
    gt_ref[...] = jnp.zeros(gt_ref.shape, f32)   # frame stays zero; interior
                                                 # is overwritten every block

    # ---- conv_block_1: GELU folded into the bf16 im2col input; one K=75
    #      MXU matmul per chunk; BN folded; MaxPool(8); next block's GELU ---
    for c0, cn in _chunk_ranges(L):
        h = jnp.dot(x_ref[pl.ds(c0, cn), :], w1_ref[...],
                    preferred_element_type=f32) + b1_ref[...]
        hc1_ref[pl.ds(0, cn), :] = h
        g2_ref[pl.ds(3 + c0 // 8, cn // 8), :] = _gelu(_pool_max(hc1_ref, cn, 8))

    # ---- conv_block_2: Conv1d(k5, pad3) + BN -> MaxPool(4); next GELU -----
    def emit2(r0, rn, m):
        g3_ref[pl.ds(3 + r0, rn), :] = _gelu(m)
    _conv_bn_pool(g2_ref, w2_ref, b2_ref, hc2_ref,
                  K=5, L_out=L2, C_out=64, p=4, emit=emit2)

    # ---- conv_block_3: Conv1d(k5, pad3, 64->72) + BN -> MaxPool(4) --------
    def emit3(r0, rn, m):
        cur_ref[pl.ds(r0, rn), :] = m            # tower applies its own GELU
    _conv_bn_pool(g3_ref, w3_ref, b3_ref, hc3_ref,
                  K=5, L_out=L3, C_out=72, p=4, emit=emit3)

    # ---- dilated residual tower -------------------------------------------
    for b in range(convdc):
        d = 2 ** b
        gt_ref[pl.ds(maxd, L4), :] = _gelu(cur_ref[...])
        acc = jnp.zeros((L4, 32), f32)
        for k in range(3):
            tap = gt_ref[pl.ds(maxd + (k - 1) * d, L4), :].astype(jnp.bfloat16)
            acc = acc + jnp.dot(tap, wda_ref[b, k],
                                preferred_element_type=f32)
        hmid = _gelu(acc + bda_ref[b])                       # (L4, 32)
        r = jnp.dot(hmid.astype(jnp.bfloat16), wdb_ref[b],
                    preferred_element_type=f32) + bdb_ref[b]
        cur_ref[...] = cur_ref[...] + r                      # residual add

    # ---- head: conv_block_4 (1x1 + BN), conv_block_5 (Linear), logit ------
    g4 = _gelu(cur_ref[...]).astype(jnp.bfloat16)            # (L4, 72)
    h4 = jnp.dot(g4, w4_ref[...], preferred_element_type=f32) + b4_ref[...]
    g5 = _gelu(h4)                                           # (L4, 64)
    # logit reordered to contract over L4 first: 64-lane axis stays dense.
    v = jnp.sum(g5 * wl_ref[...], axis=0, keepdims=True)     # (1, 64)
    o_ref[0] = jnp.sum(v * w5t_ref[...], axis=1, keepdims=True) + blf_ref[...]


def _full_spec(arr):
    n = arr.ndim
    return pl.BlockSpec(arr.shape, lambda b, n=n: (0,) * n)


# ----------------------------------------------------------------------------
# Wrapper
# ----------------------------------------------------------------------------
def basenji_forward(params, seq_ncw, *, convdc=6):
    p = params
    B, Cin, L = seq_ncw.shape
    assert L % 128 == 0, "sequence length must be a multiple of 2**7"
    L2, L3, L4 = L // 8, L // 32, L // 128
    maxd = 2 ** (convdc - 1)

    # Wrapper-side prep (all tiny): NCW->NLC, exact-erf GELU of the raw input,
    # zero-pad 7, im2col expansion to (B, L, 15*Cin) bf16, logit-bias folding.
    x = jnp.transpose(seq_ncw, (0, 2, 1)).astype(jnp.float32)      # (B, L, Cin)
    xg = jax.nn.gelu(x, approximate=False)
    xp = jnp.pad(xg, ((0, 0), (7, 7), (0, 0))).astype(jnp.bfloat16)
    patches = jnp.concatenate([xp[:, k:k + L, :] for k in range(15)], axis=-1)
    KC = 15 * Cin                                                  # 75

    w5t = jnp.transpose(p["w5"]).astype(jnp.float32)               # (1, 64)
    blf = p["bl"] + p["b5"] * jnp.sum(p["wl"])                     # (1, 1)

    kernel = partial(_basenji_kernel, L=L, convdc=convdc)
    out = pl.pallas_call(
        kernel,
        out_shape=jax.ShapeDtypeStruct((B, 1, 1), jnp.float32),
        grid=(B,),
        in_specs=[
            pl.BlockSpec((None, L, KC), lambda b: (b, 0, 0)),
            _full_spec(p["w1"]), _full_spec(p["b1"]),
            _full_spec(p["w2"]), _full_spec(p["b2"]),
            _full_spec(p["w3"]), _full_spec(p["b3"]),
            _full_spec(p["wda"]), _full_spec(p["bda"]),
            _full_spec(p["wdb"]), _full_spec(p["bdb"]),
            _full_spec(p["w4"]), _full_spec(p["b4"]),
            _full_spec(w5t), _full_spec(p["wl"]), _full_spec(blf),
        ],
        out_specs=pl.BlockSpec((1, 1, 1), lambda b: (b, 0, 0)),
        scratch_shapes=[
            pltpu.VMEM((L2 + 6, 64), jnp.float32),            # g2 (padded)
            pltpu.VMEM((L3 + 6, 64), jnp.float32),            # g3 (padded)
            pltpu.VMEM((L4 + 2 * maxd, 72), jnp.float32),     # gt (padded)
            pltpu.VMEM((L4, 72), jnp.float32),                # cur (tower state)
            pltpu.VMEM((min(_CHUNK, L), 64), jnp.float32),    # hc1 chunk buf
            pltpu.VMEM((min(_CHUNK, L2), 64), jnp.float32),   # hc2 chunk buf
            pltpu.VMEM((min(_CHUNK, L3), 72), jnp.float32),   # hc3 chunk buf
        ],
        compiler_params=pltpu.CompilerParams(
            dimension_semantics=("parallel",),
            vmem_limit_bytes=64 * 1024 * 1024),
    )(patches, p["w1"], p["b1"], p["w2"], p["b2"], p["w3"], p["b3"],
      p["wda"], p["bda"], p["wdb"], p["bdb"],
      p["w4"], p["b4"], w5t, p["wl"], blf)
    return out.reshape(B, 1)


# ----------------------------------------------------------------------------
# Deterministic parameter construction (shapes / init match Basenji.__init__;
# eval-mode BatchNorm is folded into the bias-free conv weights).
# ----------------------------------------------------------------------------
def _trunc_normal(key, shape, std):
    return jax.random.truncated_normal(key, -2.28, 2.28, shape,
                                       jnp.float32) * std


def _fold_bn(w, gamma, eps=1e-5):
    # running_mean=0, running_var=1, beta=0 => folded shift is zero.
    return (w * (gamma / math.sqrt(1.0 + eps))).astype(jnp.bfloat16)


def init_basenji_params(key, *, max_seq_len, n_channel=5, num_targets=1,
                        convdc=6):
    assert num_targets == 1, "logit layer requires num_targets == 1"
    L4 = max_seq_len // 128
    keys = iter(jax.random.split(key, 24))
    p = {}
    # conv_block_1 weight packed for the im2col layout: (K*Cin, 64)
    w1 = _trunc_normal(next(keys), (15, n_channel, 64), math.sqrt(2 / 60))
    p["w1"] = _fold_bn(w1, 1.0).reshape(15 * n_channel, 64)
    p["b1"] = jnp.zeros((1, 64), jnp.float32)
    p["w2"] = _fold_bn(_trunc_normal(next(keys), (5, 64, 64),
                                     math.sqrt(2 / 322)), 1.0)
    p["b2"] = jnp.zeros((1, 64), jnp.float32)
    p["w3"] = _fold_bn(_trunc_normal(next(keys), (5, 64, 72),
                                     math.sqrt(2 / 322)), 1.0)
    p["b3"] = jnp.zeros((1, 72), jnp.float32)
    wda, wdb = [], []
    for _ in range(convdc):
        wda.append(_fold_bn(_trunc_normal(next(keys), (3, 72, 32),
                                          math.sqrt(2 / 218)), 1.0))
        # second BN of each dilation block is zero-init (gamma=0) in the
        # reference model -> folded 1x1 weight is exactly zero (faithful).
        wdb.append(_fold_bn(_trunc_normal(next(keys), (32, 72),
                                          math.sqrt(2 / 32)), 0.0))
    p["wda"] = jnp.stack(wda)
    p["bda"] = jnp.zeros((convdc, 1, 32), jnp.float32)
    p["wdb"] = jnp.stack(wdb)
    p["bdb"] = jnp.zeros((convdc, 1, 72), jnp.float32)
    p["w4"] = _fold_bn(_trunc_normal(next(keys), (72, 64),
                                     math.sqrt(2 / 72)), 1.0)
    p["b4"] = jnp.zeros((1, 64), jnp.float32)
    # conv_block_5: Linear(64 -> num_targets), bias=True
    p["w5"] = _trunc_normal(next(keys), (64, num_targets), math.sqrt(2 / 64))
    p["b5"] = jax.random.uniform(next(keys), (1, num_targets), jnp.float32,
                                 -1 / math.sqrt(64), 1 / math.sqrt(64))
    # logit: Linear(L4 -> 1), weight stored transposed (L4, 1)
    p["wl"] = jax.random.uniform(next(keys), (L4, num_targets), jnp.float32,
                                 -1 / math.sqrt(L4), 1 / math.sqrt(L4))
    p["bl"] = jax.random.uniform(next(keys), (1, 1), jnp.float32,
                                 -1 / math.sqrt(L4), 1 / math.sqrt(L4))
    return p


if __name__ == "__main__":
    key = jax.random.PRNGKey(0)
    k_params, k_seq = jax.random.split(key)

    # Small but structurally consistent shapes: length must be a multiple of
    # 2**7 so the logit Linear(max_seq_len / 2**7, 1) lines up exactly.
    batch, n_channel, max_seq_len = 2, 5, 1024

    params = init_basenji_params(k_params, max_seq_len=max_seq_len,
                                 n_channel=n_channel)
    seq = jax.random.normal(k_seq, (batch, n_channel, max_seq_len),
                            jnp.float32)

    fwd = jax.jit(partial(basenji_forward, convdc=6))
    out = jax.block_until_ready(fwd(params, seq))
    assert out.shape == (batch, 1), out.shape
    assert bool(jnp.all(jnp.isfinite(out)))
    print("KERNEL_OK")
</pallas_src>

<mosaic_0001>
module attributes {stable_mosaic.version = 11 : i64} {
  func.func @_basenji_kernel(%arg0: i32, %arg1: memref<1x1024x75xbf16, #tpu.memory_space<vmem>>, %arg2: memref<75x64xbf16, #tpu.memory_space<vmem>>, %arg3: memref<1x64xf32, #tpu.memory_space<vmem>>, %arg4: memref<5x64x64xbf16, #tpu.memory_space<vmem>>, %arg5: memref<1x64xf32, #tpu.memory_space<vmem>>, %arg6: memref<5x64x72xbf16, #tpu.memory_space<vmem>>, %arg7: memref<1x72xf32, #tpu.memory_space<vmem>>, %arg8: memref<6x3x72x32xbf16, #tpu.memory_space<vmem>>, %arg9: memref<6x1x32xf32, #tpu.memory_space<vmem>>, %arg10: memref<6x32x72xbf16, #tpu.memory_space<vmem>>, %arg11: memref<6x1x72xf32, #tpu.memory_space<vmem>>, %arg12: memref<72x64xbf16, #tpu.memory_space<vmem>>, %arg13: memref<1x64xf32, #tpu.memory_space<vmem>>, %arg14: memref<1x64xf32, #tpu.memory_space<vmem>>, %arg15: memref<8x1xf32, #tpu.memory_space<vmem>>, %arg16: memref<1x1xf32, #tpu.memory_space<vmem>>, %arg17: memref<1x1x1xf32, #tpu.memory_space<vmem>>, %arg18: memref<134x64xf32, #tpu.memory_space<vmem>>, %arg19: memref<38x64xf32, #tpu.memory_space<vmem>>, %arg20: memref<72x72xf32, #tpu.memory_space<vmem>>, %arg21: memref<8x72xf32, #tpu.memory_space<vmem>>, %arg22: memref<256x64xf32, #tpu.memory_space<vmem>>, %arg23: memref<128x64xf32, #tpu.memory_space<vmem>>, %arg24: memref<32x72xf32, #tpu.memory_space<vmem>>) attributes {dimension_semantics = [#tpu.dimension_semantics<parallel>], iteration_bounds = array<i64: 2>, scalar_prefetch = 0 : i64, scratch_operands = 7 : i64, tpu.core_type = #tpu.core_type<tc>, window_params = [{transform_indices = @transform_0, window_bounds = array<i64: 1, 1024, 75>}, {pipeline_mode = #tpu.pipeline_mode<synchronous>, transform_indices = @transform_1, window_bounds = array<i64: 75, 64>}, {pipeline_mode = #tpu.pipeline_mode<synchronous>, transform_indices = @transform_2, window_bounds = array<i64: 1, 64>}, {pipeline_mode = #tpu.pipeline_mode<synchronous>, transform_indices = @transform_3, window_bounds = array<i64: 5, 64, 64>}, {pipeline_mode = #tpu.pipeline_mode<synchronous>, transform_indices = @transform_4, window_bounds = array<i64: 1, 64>}, {pipeline_mode = #tpu.pipeline_mode<synchronous>, transform_indices = @transform_5, window_bounds = array<i64: 5, 64, 72>}, {pipeline_mode = #tpu.pipeline_mode<synchronous>, transform_indices = @transform_6, window_bounds = array<i64: 1, 72>}, {pipeline_mode = #tpu.pipeline_mode<synchronous>, transform_indices = @transform_7, window_bounds = array<i64: 6, 3, 72, 32>}, {pipeline_mode = #tpu.pipeline_mode<synchronous>, transform_indices = @transform_8, window_bounds = array<i64: 6, 1, 32>}, {pipeline_mode = #tpu.pipeline_mode<synchronous>, transform_indices = @transform_9, window_bounds = array<i64: 6, 32, 72>}, {pipeline_mode = #tpu.pipeline_mode<synchronous>, transform_indices = @transform_10, window_bounds = array<i64: 6, 1, 72>}, {pipeline_mode = #tpu.pipeline_mode<synchronous>, transform_indices = @transform_11, window_bounds = array<i64: 72, 64>}, {pipeline_mode = #tpu.pipeline_mode<synchronous>, transform_indices = @transform_12, window_bounds = array<i64: 1, 64>}, {pipeline_mode = #tpu.pipeline_mode<synchronous>, transform_indices = @transform_13, window_bounds = array<i64: 1, 64>}, {pipeline_mode = #tpu.pipeline_mode<synchronous>, transform_indices = @transform_14, window_bounds = array<i64: 8, 1>}, {pipeline_mode = #tpu.pipeline_mode<synchronous>, transform_indices = @transform_15, window_bounds = array<i64: 1, 1>}, {transform_indices = @transform_16, window_bounds = array<i64: 1, 1, 1>}]} {
    %cst = arith.constant 0.000000e+00 : f32
    %0 = vector.broadcast %cst : f32 to vector<3x64xf32>
    %c0 = arith.constant 0 : index
    %c0_0 = arith.constant 0 : index
    %1 = vector.load %arg18[%c0, %c0_0] : memref<134x64xf32, #tpu.memory_space<vmem>>, vector<3x64xf32>
    tpu.vector_store %arg18[%c0, %c0_0], %0 {strides = array<i32>} : memref<134x64xf32, #tpu.memory_space<vmem>>, vector<3x64xf32>,
    %cst_1 = arith.constant 0.000000e+00 : f32
    %2 = vector.broadcast %cst_1 : f32 to vector<3x64xf32>
    %c131 = arith.constant 131 : index
    %c0_2 = arith.constant 0 : index
    %3 = vector.load %arg18[%c131, %c0_2] : memref<134x64xf32, #tpu.memory_space<vmem>>, vector<3x64xf32>
    tpu.vector_store %arg18[%c131, %c0_2], %2 {strides = array<i32>} : memref<134x64xf32, #tpu.memory_space<vmem>>, vector<3x64xf32>,
    %cst_3 = arith.constant 0.000000e+00 : f32
    %4 = vector.broadcast %cst_3 : f32 to vector<3x64xf32>
    %c0_4 = arith.constant 0 : index
    %c0_5 = arith.constant 0 : index
    %5 = vector.load %arg19[%c0_4, %c0_5] : memref<38x64xf32, #tpu.memory_space<vmem>>, vector<3x64xf32>
    tpu.vector_store %arg19[%c0_4, %c0_5], %4 {strides = array<i32>} : memref<38x64xf32, #tpu.memory_space<vmem>>, vector<3x64xf32>,
    %cst_6 = arith.constant 0.000000e+00 : f32
    %6 = vector.broadcast %cst_6 : f32 to vector<3x64xf32>
    %c35 = arith.constant 35 : index
    %c0_7 = arith.constant 0 : index
    %7 = vector.load %arg19[%c35, %c0_7] : memref<38x64xf32, #tpu.memory_space<vmem>>, vector<3x64xf32>
    tpu.vector_store %arg19[%c35, %c0_7], %6 {strides = array<i32>} : memref<38x64xf32, #tpu.memory_space<vmem>>, vector<3x64xf32>,
    %cst_8 = arith.constant 0.000000e+00 : f32
    %8 = vector.broadcast %cst_8 : f32 to vector<72x72xf32>
    %c0_9 = arith.constant 0 : index
    %c0_10 = arith.constant 0 : index
    %9 = vector.load %arg20[%c0_9, %c0_10] : memref<72x72xf32, #tpu.memory_space<vmem>>, vector<72x72xf32>
    tpu.vector_store %arg20[%c0_9, %c0_10], %8 {strides = array<i32>} : memref<72x72xf32, #tpu.memory_space<vmem>>, vector<72x72xf32>,
    %c0_11 = arith.constant 0 : index
    %c0_12 = arith.constant 0 : index
    %c0_13 = arith.constant 0 : index
    %10 = vector.load %arg1[%c0_11, %c0_12, %c0_13] : memref<1x1024x75xbf16, #tpu.memory_space<vmem>>, vector<1x256x75xbf16>
    %11 = vector.shape_cast %10 : vector<1x256x75xbf16> to vector<256x75xbf16>
    %c0_14 = arith.constant 0 : index
    %c0_15 = arith.constant 0 : index
    %12 = vector.load %arg2[%c0_14, %c0_15] : memref<75x64xbf16, #tpu.memory_space<vmem>>, vector<75x64xbf16>
    %cst_16 = arith.constant dense<0.000000e+00> : vector<256x64xf32>
    %13 = tpu.matmul %11, %12, %cst_16 {dimension_numbers = #tpu.dot_dimension_numbers<[1], [0], [0], [1], [0, 0, 1, 1], [], []>} : vector<256x75xbf16>, vector<75x64xbf16>, vector<256x64xf32> -> vector<256x64xf32>
    %c0_17 = arith.constant 0 : index
    %c0_18 = arith.constant 0 : index
    %14 = vector.load %arg3[%c0_17, %c0_18] : memref<1x64xf32, #tpu.memory_space<vmem>>, vector<1x64xf32>
    %15 = vector.broadcast %14 : vector<1x64xf32> to vector<256x64xf32>
    %16 = arith.addf %13, %15 : vector<256x64xf32>
    %c0_19 = arith.constant 0 : index
    %c0_20 = arith.constant 0 : index
    %17 = vector.load %arg22[%c0_19, %c0_20] : memref<256x64xf32, #tpu.memory_space<vmem>>, vector<256x64xf32>
    tpu.vector_store %arg22[%c0_19, %c0_20], %16 {strides = array<i32>} : memref<256x64xf32, #tpu.memory_space<vmem>>, vector<256x64xf32>,
    %c0_21 = arith.constant 0 : index
    %c0_22 = arith.constant 0 : index
    %18 = tpu.strided_load %arg22[%c0_21, %c0_22] {strides = array<i32: 8, 1>} : memref<256x64xf32, #tpu.memory_space<vmem>>, vector<32x64xf32>
    %c1 = arith.constant 1 : index
    %c0_23 = arith.constant 0 : index
    %19 = tpu.strided_load %arg22[%c1, %c0_23] {strides = array<i32: 8, 1>} : memref<256x64xf32, #tpu.memory_space<vmem>>, vector<32x64xf32>
    %20 = arith.maximumf %18, %19 : vector<32x64xf32>
    %c2 = arith.constant 2 : index
    %c0_24 = arith.constant 0 : index
    %21 = tpu.strided_load %arg22[%c2, %c0_24] {strides = array<i32: 8, 1>} : memref<256x64xf32, #tpu.memory_space<vmem>>, vector<32x64xf32>
    %22 = arith.maximumf %20, %21 : vector<32x64xf32>
    %c3 = arith.constant 3 : index
    %c0_25 = arith.constant 0 : index
    %23 = tpu.strided_load %arg22[%c3, %c0_25] {strides = array<i32: 8, 1>} : memref<256x64xf32, #tpu.memory_space<vmem>>, vector<32x64xf32>
    %24 = arith.maximumf %22, %23 : vector<32x64xf32>
    %c4 = arith.constant 4 : index
    %c0_26 = arith.constant 0 : index
    %25 = tpu.strided_load %arg22[%c4, %c0_26] {strides = array<i32: 8, 1>} : memref<256x64xf32, #tpu.memory_space<vmem>>, vector<32x64xf32>
    %26 = arith.maximumf %24, %25 : vector<32x64xf32>
    %c5 = arith.constant 5 : index
    %c0_27 = arith.constant 0 : index
    %27 = tpu.strided_load %arg22[%c5, %c0_27] {strides = array<i32: 8, 1>} : memref<256x64xf32, #tpu.memory_space<vmem>>, vector<32x64xf32>
    %28 = arith.maximumf %26, %27 : vector<32x64xf32>
    %c6 = arith.constant 6 : index
    %c0_28 = arith.constant 0 : index
    %29 = tpu.strided_load %arg22[%c6, %c0_28] {strides = array<i32: 8, 1>} : memref<256x64xf32, #tpu.memory_space<vmem>>, vector<32x64xf32>
    %30 = arith.maximumf %28, %29 : vector<32x64xf32>
    %c7 = arith.constant 7 : index
    %c0_29 = arith.constant 0 : index
    %31 = tpu.strided_load %arg22[%c7, %c0_29] {strides = array<i32: 8, 1>} : memref<256x64xf32, #tpu.memory_space<vmem>>, vector<32x64xf32>
    %32 = arith.maximumf %30, %31 : vector<32x64xf32>
    %cst_30 = arith.constant 5.000000e-01 : f32
    %33 = vector.broadcast %cst_30 : f32 to vector<32x64xf32>
    %34 = arith.mulf %33, %32 : vector<32x64xf32>
    %cst_31 = arith.constant 4.471500e-02 : f32
    %35 = vector.broadcast %cst_31 : f32 to vector<32x64xf32>
    %36 = arith.mulf %35, %32 : vector<32x64xf32>
    %37 = arith.mulf %36, %32 : vector<32x64xf32>
    %38 = arith.mulf %37, %32 : vector<32x64xf32>
    %39 = arith.addf %32, %38 : vector<32x64xf32>
    %cst_32 = arith.constant 0.797884583 : f32
    %40 = vector.broadcast %cst_32 : f32 to vector<32x64xf32>
    %41 = arith.mulf %40, %39 : vector<32x64xf32>
    %42 = math.tanh %41 : vector<32x64xf32>
    %cst_33 = arith.constant 1.000000e+00 : f32
    %43 = vector.broadcast %cst_33 : f32 to vector<32x64xf32>
    %44 = arith.addf %43, %42 : vector<32x64xf32>
    %45 = arith.mulf %34, %44 : vector<32x64xf32>
    %c3_34 = arith.constant 3 : index
    %c0_35 = arith.constant 0 : index
    %46 = vector.load %arg18[%c3_34, %c0_35] : memref<134x64xf32, #tpu.memory_space<vmem>>, vector<32x64xf32>
    tpu.vector_store %arg18[%c3_34, %c0_35], %45 {strides = array<i32>} : memref<134x64xf32, #tpu.memory_space<vmem>>, vector<32x64xf32>,
    %c0_36 = arith.constant 0 : index
    %c256 = arith.constant 256 : index
    %c0_37 = arith.constant 0 : index
    %47 = vector.load %arg1[%c0_36, %c256, %c0_37] : memref<1x1024x75xbf16, #tpu.memory_space<vmem>>, vector<1x256x75xbf16>
    %48 = vector.shape_cast %47 : vector<1x256x75xbf16> to vector<256x75xbf16>
    %c0_38 = arith.constant 0 : index
    %c0_39 = arith.constant 0 : index
    %49 = vector.load %arg2[%c0_38, %c0_39] : memref<75x64xbf16, #tpu.memory_space<vmem>>, vector<75x64xbf16>
    %cst_40 = arith.constant dense<0.000000e+00> : vector<256x64xf32>
    %50 = tpu.matmul %48, %49, %cst_40 {dimension_numbers = #tpu.dot_dimension_numbers<[1], [0], [0], [1], [0, 0, 1, 1], [], []>} : vector<256x75xbf16>, vector<75x64xbf16>, vector<256x64xf32> -> vector<256x64xf32>
    %c0_41 = arith.constant 0 : index
    %c0_42 = arith.constant 0 : index
    %51 = vector.load %arg3[%c0_41, %c0_42] : memref<1x64xf32, #tpu.memory_space<vmem>>, vector<1x64xf32>
    %52 = vector.broadcast %51 : vector<1x64xf32> to vector<256x64xf32>
    %53 = arith.addf %50, %52 : vector<256x64xf32>
    %c0_43 = arith.constant 0 : index
    %c0_44 = arith.constant 0 : index
    %54 = vector.load %arg22[%c0_43, %c0_44] : memref<256x64xf32, #tpu.memory_space<vmem>>, vector<256x64xf32>
    tpu.vector_store %arg22[%c0_43, %c0_44], %53 {strides = array<i32>} : memref<256x64xf32, #tpu.memory_space<vmem>>, vector<256x64xf32>,
    %c0_45 = arith.constant 0 : index
    %c0_46 = arith.constant 0 : index
    %55 = tpu.strided_load %arg22[%c0_45, %c0_46] {strides = array<i32: 8, 1>} : memref<256x64xf32, #tpu.memory_space<vmem>>, vector<32x64xf32>
    %c1_47 = arith.constant 1 : index
    %c0_48 = arith.constant 0 : index
    %56 = tpu.strided_load %arg22[%c1_47, %c0_48] {strides = array<i32: 8, 1>} : memref<256x64xf32, #tpu.memory_space<vmem>>, vector<32x64xf32>
    %57 = arith.maximumf %55, %56 : vector<32x64xf32>
    %c2_49 = arith.constant 2 : index
    %c0_50 = arith.constant 0 : index
    %58 = tpu.strided_load %arg22[%c2_49, %c0_50] {strides = array<i32: 8, 1>} : memref<256x64xf32, #tpu.memory_space<vmem>>, vector<32x64xf32>
    %59 = arith.maximumf %57, %58 : vector<32x64xf32>
    %c3_51 = arith.constant 3 : index
    %c0_52 = arith.constant 0 : index
    %60 = tpu.strided_load %arg22[%c3_51, %c0_52] {strides = array<i32: 8, 1>} : memref<256x64xf32, #tpu.memory_space<vmem>>, vector<32x64xf32>
    %61 = arith.maximumf %59, %60 : vector<32x64xf32>
    %c4_53 = arith.constant 4 : index
    %c0_54 = arith.constant 0 : index
    %62 = tpu.strided_load %arg22[%c4_53, %c0_54] {strides = array<i32: 8, 1>} : memref<256x64xf32, #tpu.memory_space<vmem>>, vector<32x64xf32>
    %63 = arith.maximumf %61, %62 : vector<32x64xf32>
    %c5_55 = arith.constant 5 : index
    %c0_56 = arith.constant 0 : index
    %64 = tpu.strided_load %arg22[%c5_55, %c0_56] {strides = array<i32: 8, 1>} : memref<256x64xf32, #tpu.memory_space<vmem>>, vector<32x64xf32>
    %65 = arith.maximumf %63, %64 : vector<32x64xf32>
    %c6_57 = arith.constant 6 : index
    %c0_58 = arith.constant 0 : index
    %66 = tpu.strided_load %arg22[%c6_57, %c0_58] {strides = array<i32: 8, 1>} : memref<256x64xf32, #tpu.memory_space<vmem>>, vector<32x64xf32>
    %67 = arith.maximumf %65, %66 : vector<32x64xf32>
    %c7_59 = arith.constant 7 : index
    %c0_60 = arith.constant 0 : index
    %68 = tpu.strided_load %arg22[%c7_59, %c0_60] {strides = array<i32: 8, 1>} : memref<256x64xf32, #tpu.memory_space<vmem>>, vector<32x64xf32>
    %69 = arith.maximumf %67, %68 : vector<32x64xf32>
    %cst_61 = arith.constant 5.000000e-01 : f32
    %70 = vector.broadcast %cst_61 : f32 to vector<32x64xf32>
    %71 = arith.mulf %70, %69 : vector<32x64xf32>
    %cst_62 = arith.constant 4.471500e-02 : f32
    %72 = vector.broadcast %cst_62 : f32 to vector<32x64xf32>
    %73 = arith.mulf %72, %69 : vector<32x64xf32>
    %74 = arith.mulf %73, %69 : vector<32x64xf32>
    %75 = arith.mulf %74, %69 : vector<32x64xf32>
    %76 = arith.addf %69, %75 : vector<32x64xf32>
    %cst_63 = arith.constant 0.797884583 : f32
    %77 = vector.broadcast %cst_63 : f32 to vector<32x64xf32>
    %78 = arith.mulf %77, %76 : vector<32x64xf32>
    %79 = math.tanh %78 : vector<32x64xf32>
    %cst_64 = arith.constant 1.000000e+00 : f32
    %80 = vector.broadcast %cst_64 : f32 to vector<32x64xf32>
    %81 = arith.addf %80, %79 : vector<32x64xf32>
    %82 = arith.mulf %71, %81 : vector<32x64xf32>
    %c35_65 = arith.constant 35 : index
    %c0_66 = arith.constant 0 : index
    %83 = vector.load %arg18[%c35_65, %c0_66] : memref<134x64xf32, #tpu.memory_space<vmem>>, vector<32x64xf32>
    tpu.vector_store %arg18[%c35_65, %c0_66], %82 {strides = array<i32>} : memref<134x64xf32, #tpu.memory_space<vmem>>, vector<32x64xf32>,
    %c0_67 = arith.constant 0 : index
    %c512 = arith.constant 512 : index
    %c0_68 = arith.constant 0 : index
    %84 = vector.load %arg1[%c0_67, %c512, %c0_68] : memref<1x1024x75xbf16, #tpu.memory_space<vmem>>, vector<1x256x75xbf16>
    %85 = vector.shape_cast %84 : vector<1x256x75xbf16> to vector<256x75xbf16>
    %c0_69 = arith.constant 0 : index
    %c0_70 = arith.constant 0 : index
    %86 = vector.load %arg2[%c0_69, %c0_70] : memref<75x64xbf16, #tpu.memory_space<vmem>>, vector<75x64xbf16>
    %cst_71 = arith.constant dense<0.000000e+00> : vector<256x64xf32>
    %87 = tpu.matmul %85, %86, %cst_71 {dimension_numbers = #tpu.dot_dimension_numbers<[1], [0], [0], [1], [0, 0, 1, 1], [], []>} : vector<256x75xbf16>, vector<75x64xbf16>, vector<256x64xf32> -> vector<256x64xf32>
    %c0_72 = arith.constant 0 : index
    %c0_73 = arith.constant 0 : index
    %88 = vector.load %arg3[%c0_72, %c0_73] : memref<1x64xf32, #tpu.memory_space<vmem>>, vector<1x64xf32>
    %89 = vector.broadcast %88 : vector<1x64xf32> to vector<256x64xf32>
    %90 = arith.addf %87, %89 : vector<256x64xf32>
    %c0_74 = arith.constant 0 : index
    %c0_75 = arith.constant 0 : index
    %91 = vector.load %arg22[%c0_74, %c0_75] : memref<256x64xf32, #tpu.memory_space<vmem>>, vector<256x64xf32>
    tpu.vector_store %arg22[%c0_74, %c0_75], %90 {strides = array<i32>} : memref<256x64xf32, #tpu.memory_space<vmem>>, vector<256x64xf32>,
    %c0_76 = arith.constant 0 : index
    %c0_77 = arith.constant 0 : index
    %92 = tpu.strided_load %arg22[%c0_76, %c0_77] {strides = array<i32: 8, 1>} : memref<256x64xf32, #tpu.memory_space<vmem>>, vector<32x64xf32>
    %c1_78 = arith.constant 1 : index
    %c0_79 = arith.constant 0 : index
    %93 = tpu.strided_load %arg22[%c1_78, %c0_79] {strides = array<i32: 8, 1>} : memref<256x64xf32, #tpu.memory_space<vmem>>, vector<32x64xf32>
    %94 = arith.maximumf %92, %93 : vector<32x64xf32>
    %c2_80 = arith.constant 2 : index
    %c0_81 = arith.constant 0 : index
    %95 = tpu.strided_load %arg22[%c2_80, %c0_81] {strides = array<i32: 8, 1>} : memref<256x64xf32, #tpu.memory_space<vmem>>, vector<32x64xf32>
    %96 = arith.maximumf %94, %95 : vector<32x64xf32>
    %c3_82 = arith.constant 3 : index
    %c0_83 = arith.constant 0 : index
    %97 = tpu.strided_load %arg22[%c3_82, %c0_83] {strides = array<i32: 8, 1>} : memref<256x64xf32, #tpu.memory_space<vmem>>, vector<32x64xf32>
    %98 = arith.maximumf %96, %97 : vector<32x64xf32>
    %c4_84 = arith.constant 4 : index
    %c0_85 = arith.constant 0 : index
    %99 = tpu.strided_load %arg22[%c4_84, %c0_85] {strides = array<i32: 8, 1>} : memref<256x64xf32, #tpu.memory_space<vmem>>, vector<32x64xf32>
    %100 = arith.maximumf %98, %99 : vector<32x64xf32>
    %c5_86 = arith.constant 5 : index
    %c0_87 = arith.constant 0 : index
    %101 = tpu.strided_load %arg22[%c5_86, %c0_87] {strides = array<i32: 8, 1>} : memref<256x64xf32, #tpu.memory_space<vmem>>, vector<32x64xf32>
    %102 = arith.maximumf %100, %101 : vector<32x64xf32>
    %c6_88 = arith.constant 6 : index
    %c0_89 = arith.constant 0 : index
    %103 = tpu.strided_load %arg22[%c6_88, %c0_89] {strides = array<i32: 8, 1>} : memref<256x64xf32, #tpu.memory_space<vmem>>, vector<32x64xf32>
    %104 = arith.maximumf %102, %103 : vector<32x64xf32>
    %c7_90 = arith.constant 7 : index
    %c0_91 = arith.constant 0 : index
    %105 = tpu.strided_load %arg22[%c7_90, %c0_91] {strides = array<i32: 8, 1>} : memref<256x64xf32, #tpu.memory_space<vmem>>, vector<32x64xf32>
    %106 = arith.maximumf %104, %105 : vector<32x64xf32>
    %cst_92 = arith.constant 5.000000e-01 : f32
    %107 = vector.broadcast %cst_92 : f32 to vector<32x64xf32>
    %108 = arith.mulf %107, %106 : vector<32x64xf32>
    %cst_93 = arith.constant 4.471500e-02 : f32
    %109 = vector.broadcast %cst_93 : f32 to vector<32x64xf32>
    %110 = arith.mulf %109, %106 : vector<32x64xf32>
    %111 = arith.mulf %110, %106 : vector<32x64xf32>
    %112 = arith.mulf %111, %106 : vector<32x64xf32>
    %113 = arith.addf %106, %112 : vector<32x64xf32>
    %cst_94 = arith.constant 0.797884583 : f32
    %114 = vector.broadcast %cst_94 : f32 to vector<32x64xf32>
    %115 = arith.mulf %114, %113 : vector<32x64xf32>
    %116 = math.tanh %115 : vector<32x64xf32>
    %cst_95 = arith.constant 1.000000e+00 : f32
    %117 = vector.broadcast %cst_95 : f32 to vector<32x64xf32>
    %118 = arith.addf %117, %116 : vector<32x64xf32>
    %119 = arith.mulf %108, %118 : vector<32x64xf32>
    %c67 = arith.constant 67 : index
    %c0_96 = arith.constant 0 : index
    %120 = vector.load %arg18[%c67, %c0_96] : memref<134x64xf32, #tpu.memory_space<vmem>>, vector<32x64xf32>
    tpu.vector_store %arg18[%c67, %c0_96], %119 {strides = array<i32>} : memref<134x64xf32, #tpu.memory_space<vmem>>, vector<32x64xf32>,
    %c0_97 = arith.constant 0 : index
    %c768 = arith.constant 768 : index
    %c0_98 = arith.constant 0 : index
    %121 = vector.load %arg1[%c0_97, %c768, %c0_98] : memref<1x1024x75xbf16, #tpu.memory_space<vmem>>, vector<1x256x75xbf16>
    %122 = vector.shape_cast %121 : vector<1x256x75xbf16> to vector<256x75xbf16>
    %c0_99 = arith.constant 0 : index
    %c0_100 = arith.constant 0 : index
    %123 = vector.load %arg2[%c0_99, %c0_100] : memref<75x64xbf16, #tpu.memory_space<vmem>>, vector<75x64xbf16>
    %cst_101 = arith.constant dense<0.000000e+00> : vector<256x64xf32>
    %124 = tpu.matmul %122, %123, %cst_101 {dimension_numbers = #tpu.dot_dimension_numbers<[1], [0], [0], [1], [0, 0, 1, 1], [], []>} : vector<256x75xbf16>, vector<75x64xbf16>, vector<256x64xf32> -> vector<256x64xf32>
    %c0_102 = arith.constant 0 : index
    %c0_103 = arith.constant 0 : index
    %125 = vector.load %arg3[%c0_102, %c0_103] : memref<1x64xf32, #tpu.memory_space<vmem>>, vector<1x64xf32>
    %126 = vector.broadcast %125 : vector<1x64xf32> to vector<256x64xf32>
    %127 = arith.addf %124, %126 : vector<256x64xf32>
    %c0_104 = arith.constant 0 : index
    %c0_105 = arith.constant 0 : index
    %128 = vector.load %arg22[%c0_104, %c0_105] : memref<256x64xf32, #tpu.memory_space<vmem>>, vector<256x64xf32>
    tpu.vector_store %arg22[%c0_104, %c0_105], %127 {strides = array<i32>} : memref<256x64xf32, #tpu.memory_space<vmem>>, vector<256x64xf32>,
    %c0_106 = arith.constant 0 : index
    %c0_107 = arith.constant 0 : index
    %129 = tpu.strided_load %arg22[%c0_106, %c0_107] {strides = array<i32: 8, 1>} : memref<256x64xf32, #tpu.memory_space<vmem>>, vector<32x64xf32>
    %c1_108 = arith.constant 1 : index
    %c0_109 = arith.constant 0 : index
    %130 = tpu.strided_load %arg22[%c1_108, %c0_109] {strides = array<i32: 8, 1>} : memref<256x64xf32, #tpu.memory_space<vmem>>, vector<32x64xf32>
    %131 = arith.maximumf %129, %130 : vector<32x64xf32>
    %c2_110 = arith.constant 2 : index
    %c0_111 = arith.constant 0 : index
    %132 = tpu.strided_load %arg22[%c2_110, %c0_111] {strides = array<i32: 8, 1>} : memref<256x64xf32, #tpu.memory_space<vmem>>, vector<32x64xf32>
    %133 = arith.maximumf %131, %132 : vector<32x64xf32>
    %c3_112 = arith.constant 3 : index
    %c0_113 = arith.constant 0 : index
    %134 = tpu.strided_load %arg22[%c3_112, %c0_113] {strides = array<i32: 8, 1>} : memref<256x64xf32, #tpu.memory_space<vmem>>, vector<32x64xf32>
    %135 = arith.maximumf %133, %134 : vector<32x64xf32>
    %c4_114 = arith.constant 4 : index
    %c0_115 = arith.constant 0 : index
    %136 = tpu.strided_load %arg22[%c4_114, %c0_115] {strides = array<i32: 8, 1>} : memref<256x64xf32, #tpu.memory_space<vmem>>, vector<32x64xf32>
    %137 = arith.maximumf %135, %136 : vector<32x64xf32>
    %c5_116 = arith.constant 5 : index
    %c0_117 = arith.constant 0 : index
    %138 = tpu.strided_load %arg22[%c5_116, %c0_117] {strides = array<i32: 8, 1>} : memref<256x64xf32, #tpu.memory_space<vmem>>, vector<32x64xf32>
    %139 = arith.maximumf %137, %138 : vector<32x64xf32>
    %c6_118 = arith.constant 6 : index
    %c0_119 = arith.constant 0 : index
    %140 = tpu.strided_load %arg22[%c6_118, %c0_119] {strides = array<i32: 8, 1>} : memref<256x64xf32, #tpu.memory_space<vmem>>, vector<32x64xf32>
    %141 = arith.maximumf %139, %140 : vector<32x64xf32>
    %c7_120 = arith.constant 7 : index
    %c0_121 = arith.constant 0 : index
    %142 = tpu.strided_load %arg22[%c7_120, %c0_121] {strides = array<i32: 8, 1>} : memref<256x64xf32, #tpu.memory_space<vmem>>, vector<32x64xf32>
    %143 = arith.maximumf %141, %142 : vector<32x64xf32>
    %cst_122 = arith.constant 5.000000e-01 : f32
    %144 = vector.broadcast %cst_122 : f32 to vector<32x64xf32>
    %145 = arith.mulf %144, %143 : vector<32x64xf32>
    %cst_123 = arith.constant 4.471500e-02 : f32
    %146 = vector.broadcast %cst_123 : f32 to vector<32x64xf32>
    %147 = arith.mulf %146, %143 : vector<32x64xf32>
    %148 = arith.mulf %147, %143 : vector<32x64xf32>
    %149 = arith.mulf %148, %143 : vector<32x64xf32>
    %150 = arith.addf %143, %149 : vector<32x64xf32>
    %cst_124 = arith.constant 0.797884583 : f32
    %151 = vector.broadcast %cst_124 : f32 to vector<32x64xf32>
    %152 = arith.mulf %151, %150 : vector<32x64xf32>
    %153 = math.tanh %152 : vector<32x64xf32>
    %cst_125 = arith.constant 1.000000e+00 : f32
    %154 = vector.broadcast %cst_125 : f32 to vector<32x64xf32>
    %155 = arith.addf %154, %153 : vector<32x64xf32>
    %156 = arith.mulf %145, %155 : vector<32x64xf32>
    %c99 = arith.constant 99 : index
    %c0_126 = arith.constant 0 : index
    %157 = vector.load %arg18[%c99, %c0_126] : memref<134x64xf32, #tpu.memory_space<vmem>>, vector<32x64xf32>
    tpu.vector_store %arg18[%c99, %c0_126], %156 {strides = array<i32>} : memref<134x64xf32, #tpu.memory_space<vmem>>, vector<32x64xf32>,
    %cst_127 = arith.constant 0.000000e+00 : f32
    %158 = vector.broadcast %cst_127 : f32 to vector<128x64xf32>
    %c0_128 = arith.constant 0 : index
    %c0_129 = arith.constant 0 : index
    %159 = vector.load %arg18[%c0_128, %c0_129] : memref<134x64xf32, #tpu.memory_space<vmem>>, vector<128x64xf32>
    %160 = arith.truncf %159 : vector<128x64xf32> to vector<128x64xbf16>
    %c0_130 = arith.constant 0 : index
    %c0_131 = arith.constant 0 : index
    %c0_132 = arith.constant 0 : index
    %161 = vector.load %arg4[%c0_130, %c0_131, %c0_132] : memref<5x64x64xbf16, #tpu.memory_space<vmem>>, vector<1x64x64xbf16>
    %162 = vector.shape_cast %161 : vector<1x64x64xbf16> to vector<64x64xbf16>
    %cst_133 = arith.constant dense<0.000000e+00> : vector<128x64xf32>
    %163 = tpu.matmul %160, %162, %cst_133 {dimension_numbers = #tpu.dot_dimension_numbers<[1], [0], [0], [1], [0, 0, 1, 1], [], []>} : vector<128x64xbf16>, vector<64x64xbf16>, vector<128x64xf32> -> vector<128x64xf32>
    %164 = arith.addf %158, %163 : vector<128x64xf32>
    %c1_134 = arith.constant 1 : index
    %c0_135 = arith.constant 0 : index
    %165 = vector.load %arg18[%c1_134, %c0_135] : memref<134x64xf32, #tpu.memory_space<vmem>>, vector<128x64xf32>
    %166 = arith.truncf %165 : vector<128x64xf32> to vector<128x64xbf16>
    %c1_136 = arith.constant 1 : index
    %c0_137 = arith.constant 0 : index
    %c0_138 = arith.constant 0 : index
    %167 = vector.load %arg4[%c1_136, %c0_137, %c0_138] : memref<5x64x64xbf16, #tpu.memory_space<vmem>>, vector<1x64x64xbf16>
    %168 = vector.shape_cast %167 : vector<1x64x64xbf16> to vector<64x64xbf16>
    %cst_139 = arith.constant dense<0.000000e+00> : vector<128x64xf32>
    %169 = tpu.matmul %166, %168, %cst_139 {dimension_numbers = #tpu.dot_dimension_numbers<[1], [0], [0], [1], [0, 0, 1, 1], [], []>} : vector<128x64xbf16>, vector<64x64xbf16>, vector<128x64xf32> -> vector<128x64xf32>
    %170 = arith.addf %164, %169 : vector<128x64xf32>
    %c2_140 = arith.constant 2 : index
    %c0_141 = arith.constant 0 : index
    %171 = vector.load %arg18[%c2_140, %c0_141] : memref<134x64xf32, #tpu.memory_space<vmem>>, vector<128x64xf32>
    %172 = arith.truncf %171 : vector<128x64xf32> to vector<128x64xbf16>
    %c2_142 = arith.constant 2 : index
    %c0_143 = arith.constant 0 : index
    %c0_144 = arith.constant 0 : index
    %173 = vector.load %arg4[%c2_142, %c0_143, %c0_144] : memref<5x64x64xbf16, #tpu.memory_space<vmem>>, vector<1x64x64xbf16>
    %174 = vector.shape_cast %173 : vector<1x64x64xbf16> to vector<64x64xbf16>
    %cst_145 = arith.constant dense<0.000000e+00> : vector<128x64xf32>
    %175 = tpu.matmul %172, %174, %cst_145 {dimension_numbers = #tpu.dot_dimension_numbers<[1], [0], [0], [1], [0, 0, 1, 1], [], []>} : vector<128x64xbf16>, vector<64x64xbf16>, vector<128x64xf32> -> vector<128x64xf32>
    %176 = arith.addf %170, %175 : vector<128x64xf32>
    %c3_146 = arith.constant 3 : index
    %c0_147 = arith.constant 0 : index
    %177 = vector.load %arg18[%c3_146, %c0_147] : memref<134x64xf32, #tpu.memory_space<vmem>>, vector<128x64xf32>
    %178 = arith.truncf %177 : vector<128x64xf32> to vector<128x64xbf16>
    %c3_148 = arith.constant 3 : index
    %c0_149 = arith.constant 0 : index
    %c0_150 = arith.constant 0 : index
    %179 = vector.load %arg4[%c3_148, %c0_149, %c0_150] : memref<5x64x64xbf16, #tpu.memory_space<vmem>>, vector<1x64x64xbf16>
    %180 = vector.shape_cast %179 : vector<1x64x64xbf16> to vector<64x64xbf16>
    %cst_151 = arith.constant dense<0.000000e+00> : vector<128x64xf32>
    %181 = tpu.matmul %178, %180, %cst_151 {dimension_numbers = #tpu.dot_dimension_numbers<[1], [0], [0], [1], [0, 0, 1, 1], [], []>} : vector<128x64xbf16>, vector<64x64xbf16>, vector<128x64xf32> -> vector<128x64xf32>
    %182 = arith.addf %176, %181 : vector<128x64xf32>
    %c4_152 = arith.constant 4 : index
    %c0_153 = arith.constant 0 : index
    %183 = vector.load %arg18[%c4_152, %c0_153] : memref<134x64xf32, #tpu.memory_space<vmem>>, vector<128x64xf32>
    %184 = arith.truncf %183 : vector<128x64xf32> to vector<128x64xbf16>
    %c4_154 = arith.constant 4 : index
    %c0_155 = arith.constant 0 : index
    %c0_156 = arith.constant 0 : index
    %185 = vector.load %arg4[%c4_154, %c0_155, %c0_156] : memref<5x64x64xbf16, #tpu.memory_space<vmem>>, vector<1x64x64xbf16>
    %186 = vector.shape_cast %185 : vector<1x64x64xbf16> to vector<64x64xbf16>
    %cst_157 = arith.constant dense<0.000000e+00> : vector<128x64xf32>
    %187 = tpu.matmul %184, %186, %cst_157 {dimension_numbers = #tpu.dot_dimension_numbers<[1], [0], [0], [1], [0, 0, 1, 1], [], []>} : vector<128x64xbf16>, vector<64x64xbf16>, vector<128x64xf32> -> vector<128x64xf32>
    %188 = arith.addf %182, %187 : vector<128x64xf32>
    %c0_158 = arith.constant 0 : index
    %c0_159 = arith.constant 0 : index
    %189 = vector.load %arg5[%c0_158, %c0_159] : memref<1x64xf32, #tpu.memory_space<vmem>>, vector<1x64xf32>
    %190 = vector.broadcast %189 : vector<1x64xf32> to vector<128x64xf32>
    %191 = arith.addf %188, %190 : vector<128x64xf32>
    %c0_160 = arith.constant 0 : index
    %c0_161 = arith.constant 0 : index
    %192 = vector.load %arg23[%c0_160, %c0_161] : memref<128x64xf32, #tpu.memory_space<vmem>>, vector<128x64xf32>
    tpu.vector_store %arg23[%c0_160, %c0_161], %191 {strides = array<i32>} : memref<128x64xf32, #tpu.memory_space<vmem>>, vector<128x64xf32>,
    %c0_162 = arith.constant 0 : index
    %c0_163 = arith.constant 0 : index
    %193 = tpu.strided_load %arg23[%c0_162, %c0_163] {strides = array<i32: 4, 1>} : memref<128x64xf32, #tpu.memory_space<vmem>>, vector<32x64xf32>
    %c1_164 = arith.constant 1 : index
    %c0_165 = arith.constant 0 : index
    %194 = tpu.strided_load %arg23[%c1_164, %c0_165] {strides = array<i32: 4, 1>} : memref<128x64xf32, #tpu.memory_space<vmem>>, vector<32x64xf32>
    %195 = arith.maximumf %193, %194 : vector<32x64xf32>
    %c2_166 = arith.constant 2 : index
    %c0_167 = arith.constant 0 : index
    %196 = tpu.strided_load %arg23[%c2_166, %c0_167] {strides = array<i32: 4, 1>} : memref<128x64xf32, #tpu.memory_space<vmem>>, vector<32x64xf32>
    %197 = arith.maximumf %195, %196 : vector<32x64xf32>
    %c3_168 = arith.constant 3 : index
    %c0_169 = arith.constant 0 : index
    %198 = tpu.strided_load %arg23[%c3_168, %c0_169] {strides = array<i32: 4, 1>} : memref<128x64xf32, #tpu.memory_space<vmem>>, vector<32x64xf32>
    %199 = arith.maximumf %197, %198 : vector<32x64xf32>
    %cst_170 = arith.constant 5.000000e-01 : f32
    %200 = vector.broadcast %cst_170 : f32 to vector<32x64xf32>
    %201 = arith.mulf %200, %199 : vector<32x64xf32>
    %cst_171 = arith.constant 4.471500e-02 : f32
    %202 = vector.broadcast %cst_171 : f32 to vector<32x64xf32>
    %203 = arith.mulf %202, %199 : vector<32x64xf32>
    %204 = arith.mulf %203, %199 : vector<32x64xf32>
    %205 = arith.mulf %204, %199 : vector<32x64xf32>
    %206 = arith.addf %199, %205 : vector<32x64xf32>
    %cst_172 = arith.constant 0.797884583 : f32
    %207 = vector.broadcast %cst_172 : f32 to vector<32x64xf32>
    %208 = arith.mulf %207, %206 : vector<32x64xf32>
    %209 = math.tanh %208 : vector<32x64xf32>
    %cst_173 = arith.constant 1.000000e+00 : f32
    %210 = vector.broadcast %cst_173 : f32 to vector<32x64xf32>
    %211 = arith.addf %210, %209 : vector<32x64xf32>
    %212 = arith.mulf %201, %211 : vector<32x64xf32>
    %c3_174 = arith.constant 3 : index
    %c0_175 = arith.constant 0 : index
    %213 = vector.load %arg19[%c3_174, %c0_175] : memref<38x64xf32, #tpu.memory_space<vmem>>, vector<32x64xf32>
    tpu.vector_store %arg19[%c3_174, %c0_175], %212 {strides = array<i32>} : memref<38x64xf32, #tpu.memory_space<vmem>>, vector<32x64xf32>,
    %cst_176 = arith.constant 0.000000e+00 : f32
    %214 = vector.broadcast %cst_176 : f32 to vector<32x72xf32>
    %c0_177 = arith.constant 0 : index
    %c0_178 = arith.constant 0 : index
    %215 = vector.load %arg19[%c0_177, %c0_178] : memref<38x64xf32, #tpu.memory_space<vmem>>, vector<32x64xf32>
    %216 = arith.truncf %215 : vector<32x64xf32> to vector<32x64xbf16>
    %c0_179 = arith.constant 0 : index
    %c0_180 = arith.constant 0 : index
    %c0_181 = arith.constant 0 : index
    %217 = vector.load %arg6[%c0_179, %c0_180, %c0_181] : memref<5x64x72xbf16, #tpu.memory_space<vmem>>, vector<1x64x72xbf16>
    %218 = vector.shape_cast %217 : vector<1x64x72xbf16> to vector<64x72xbf16>
    %cst_182 = arith.constant dense<0.000000e+00> : vector<32x72xf32>
    %219 = tpu.matmul %216, %218, %cst_182 {dimension_numbers = #tpu.dot_dimension_numbers<[1], [0], [0], [1], [0, 0, 1, 1], [], []>} : vector<32x64xbf16>, vector<64x72xbf16>, vector<32x72xf32> -> vector<32x72xf32>
    %220 = arith.addf %214, %219 : vector<32x72xf32>
    %c1_183 = arith.constant 1 : index
    %c0_184 = arith.constant 0 : index
    %221 = vector.load %arg19[%c1_183, %c0_184] : memref<38x64xf32, #tpu.memory_space<vmem>>, vector<32x64xf32>
    %222 = arith.truncf %221 : vector<32x64xf32> to vector<32x64xbf16>
    %c1_185 = arith.constant 1 : index
    %c0_186 = arith.constant 0 : index
    %c0_187 = arith.constant 0 : index
    %223 = vector.load %arg6[%c1_185, %c0_186, %c0_187] : memref<5x64x72xbf16, #tpu.memory_space<vmem>>, vector<1x64x72xbf16>
    %224 = vector.shape_cast %223 : vector<1x64x72xbf16> to vector<64x72xbf16>
    %cst_188 = arith.constant dense<0.000000e+00> : vector<32x72xf32>
    %225 = tpu.matmul %222, %224, %cst_188 {dimension_numbers = #tpu.dot_dimension_numbers<[1], [0], [0], [1], [0, 0, 1, 1], [], []>} : vector<32x64xbf16>, vector<64x72xbf16>, vector<32x72xf32> -> vector<32x72xf32>
    %226 = arith.addf %220, %225 : vector<32x72xf32>
    %c2_189 = arith.constant 2 : index
    %c0_190 = arith.constant 0 : index
    %227 = vector.load %arg19[%c2_189, %c0_190] : memref<38x64xf32, #tpu.memory_space<vmem>>, vector<32x64xf32>
    %228 = arith.truncf %227 : vector<32x64xf32> to vector<32x64xbf16>
    %c2_191 = arith.constant 2 : index
    %c0_192 = arith.constant 0 : index
    %c0_193 = arith.constant 0 : index
    %229 = vector.load %arg6[%c2_191, %c0_192, %c0_193] : memref<5x64x72xbf16, #tpu.memory_space<vmem>>, vector<1x64x72xbf16>
    %230 = vector.shape_cast %229 : vector<1x64x72xbf16> to vector<64x72xbf16>
    %cst_194 = arith.constant dense<0.000000e+00> : vector<32x72xf32>
    %231 = tpu.matmul %228, %230, %cst_194 {dimension_numbers = #tpu.dot_dimension_numbers<[1], [0], [0], [1], [0, 0, 1, 1], [], []>} : vector<32x64xbf16>, vector<64x72xbf16>, vector<32x72xf32> -> vector<32x72xf32>
    %232 = arith.addf %226, %231 : vector<32x72xf32>
    %c3_195 = arith.constant 3 : index
    %c0_196 = arith.constant 0 : index
    %233 = vector.load %arg19[%c3_195, %c0_196] : memref<38x64xf32, #tpu.memory_space<vmem>>, vector<32x64xf32>
    %234 = arith.truncf %233 : vector<32x64xf32> to vector<32x64xbf16>
    %c3_197 = arith.constant 3 : index
    %c0_198 = arith.constant 0 : index
    %c0_199 = arith.constant 0 : index
    %235 = vector.load %arg6[%c3_197, %c0_198, %c0_199] : memref<5x64x72xbf16, #tpu.memory_space<vmem>>, vector<1x64x72xbf16>
    %236 = vector.shape_cast %235 : vector<1x64x72xbf16> to vector<64x72xbf16>
    %cst_200 = arith.constant dense<0.000000e+00> : vector<32x72xf32>
    %237 = tpu.matmul %234, %236, %cst_200 {dimension_numbers = #tpu.dot_dimension_numbers<[1], [0], [0], [1], [0, 0, 1, 1], [], []>} : vector<32x64xbf16>, vector<64x72xbf16>, vector<32x72xf32> -> vector<32x72xf32>
    %238 = arith.addf %232, %237 : vector<32x72xf32>
    %c4_201 = arith.constant 4 : index
    %c0_202 = arith.constant 0 : index
    %239 = vector.load %arg19[%c4_201, %c0_202] : memref<38x64xf32, #tpu.memory_space<vmem>>, vector<32x64xf32>
    %240 = arith.truncf %239 : vector<32x64xf32> to vector<32x64xbf16>
    %c4_203 = arith.constant 4 : index
    %c0_204 = arith.constant 0 : index
    %c0_205 = arith.constant 0 : index
    %241 = vector.load %arg6[%c4_203, %c0_204, %c0_205] : memref<5x64x72xbf16, #tpu.memory_space<vmem>>, vector<1x64x72xbf16>
    %242 = vector.shape_cast %241 : vector<1x64x72xbf16> to vector<64x72xbf16>
    %cst_206 = arith.constant dense<0.000000e+00> : vector<32x72xf32>
    %243 = tpu.matmul %240, %242, %cst_206 {dimension_numbers = #tpu.dot_dimension_numbers<[1], [0], [0], [1], [0, 0, 1, 1], [], []>} : vector<32x64xbf16>, vector<64x72xbf16>, vector<32x72xf32> -> vector<32x72xf32>
    %244 = arith.addf %238, %243 : vector<32x72xf32>
    %c0_207 = arith.constant 0 : index
    %c0_208 = arith.constant 0 : index
    %245 = vector.load %arg7[%c0_207, %c0_208] : memref<1x72xf32, #tpu.memory_space<vmem>>, vector<1x72xf32>
    %246 = vector.broadcast %245 : vector<1x72xf32> to vector<32x72xf32>
    %247 = arith.addf %244, %246 : vector<32x72xf32>
    %c0_209 = arith.constant 0 : index
    %c0_210 = arith.constant 0 : index
    %248 = vector.load %arg24[%c0_209, %c0_210] : memref<32x72xf32, #tpu.memory_space<vmem>>, vector<32x72xf32>
    tpu.vector_store %arg24[%c0_209, %c0_210], %247 {strides = array<i32>} : memref<32x72xf32, #tpu.memory_space<vmem>>, vector<32x72xf32>,
    %c0_211 = arith.constant 0 : index
    %c0_212 = arith.constant 0 : index
    %249 = tpu.strided_load %arg24[%c0_211, %c0_212] {strides = array<i32: 4, 1>} : memref<32x72xf32, #tpu.memory_space<vmem>>, vector<8x72xf32>
    %c1_213 = arith.constant 1 : index
    %c0_214 = arith.constant 0 : index
    %250 = tpu.strided_load %arg24[%c1_213, %c0_214] {strides = array<i32: 4, 1>} : memref<32x72xf32, #tpu.memory_space<vmem>>, vector<8x72xf32>
    %251 = arith.maximumf %249, %250 : vector<8x72xf32>
    %c2_215 = arith.constant 2 : index
    %c0_216 = arith.constant 0 : index
    %252 = tpu.strided_load %arg24[%c2_215, %c0_216] {strides = array<i32: 4, 1>} : memref<32x72xf32, #tpu.memory_space<vmem>>, vector<8x72xf32>
    %253 = arith.maximumf %251, %252 : vector<8x72xf32>
    %c3_217 = arith.constant 3 : index
    %c0_218 = arith.constant 0 : index
    %254 = tpu.strided_load %arg24[%c3_217, %c0_218] {strides = array<i32: 4, 1>} : memref<32x72xf32, #tpu.memory_space<vmem>>, vector<8x72xf32>
    %255 = arith.maximumf %253, %254 : vector<8x72xf32>
    %c0_219 = arith.constant 0 : index
    %c0_220 = arith.constant 0 : index
    %256 = vector.load %arg21[%c0_219, %c0_220] : memref<8x72xf32, #tpu.memory_space<vmem>>, vector<8x72xf32>
    tpu.vector_store %arg21[%c0_219, %c0_220], %255 {strides = array<i32>} : memref<8x72xf32, #tpu.memory_space<vmem>>, vector<8x72xf32>,
    %c0_221 = arith.constant 0 : index
    %c0_222 = arith.constant 0 : index
    %257 = vector.load %arg21[%c0_221, %c0_222] : memref<8x72xf32, #tpu.memory_space<vmem>>, vector<8x72xf32>
    %cst_223 = arith.constant 5.000000e-01 : f32
    %258 = vector.broadcast %cst_223 : f32 to vector<8x72xf32>
    %259 = arith.mulf %258, %257 : vector<8x72xf32>
    %cst_224 = arith.constant 4.471500e-02 : f32
    %260 = vector.broadcast %cst_224 : f32 to vector<8x72xf32>
    %261 = arith.mulf %260, %257 : vector<8x72xf32>
    %262 = arith.mulf %261, %257 : vector<8x72xf32>
    %263 = arith.mulf %262, %257 : vector<8x72xf32>
    %264 = arith.addf %257, %263 : vector<8x72xf32>
    %cst_225 = arith.constant 0.797884583 : f32
    %265 = vector.broadcast %cst_225 : f32 to vector<8x72xf32>
    %266 = arith.mulf %265, %264 : vector<8x72xf32>
    %267 = math.tanh %266 : vector<8x72xf32>
    %cst_226 = arith.constant 1.000000e+00 : f32
    %268 = vector.broadcast %cst_226 : f32 to vector<8x72xf32>
    %269 = arith.addf %268, %267 : vector<8x72xf32>
    %270 = arith.mulf %259, %269 : vector<8x72xf32>
    %c32 = arith.constant 32 : index
    %c0_227 = arith.constant 0 : index
    %271 = vector.load %arg20[%c32, %c0_227] : memref<72x72xf32, #tpu.memory_space<vmem>>, vector<8x72xf32>
    tpu.vector_store %arg20[%c32, %c0_227], %270 {strides = array<i32>} : memref<72x72xf32, #tpu.memory_space<vmem>>, vector<8x72xf32>,
    %cst_228 = arith.constant 0.000000e+00 : f32
    %272 = vector.broadcast %cst_228 : f32 to vector<8x32xf32>
    %c31 = arith.constant 31 : index
    %c0_229 = arith.constant 0 : index
    %273 = vector.load %arg20[%c31, %c0_229] : memref<72x72xf32, #tpu.memory_space<vmem>>, vector<8x72xf32>
    %274 = arith.truncf %273 : vector<8x72xf32> to vector<8x72xbf16>
    %c0_230 = arith.constant 0 : index
    %c0_231 = arith.constant 0 : index
    %c0_232 = arith.constant 0 : index
    %c0_233 = arith.constant 0 : index
    %275 = vector.load %arg8[%c0_230, %c0_231, %c0_232, %c0_233] : memref<6x3x72x32xbf16, #tpu.memory_space<vmem>>, vector<1x1x72x32xbf16>
    %276 = vector.shape_cast %275 : vector<1x1x72x32xbf16> to vector<72x32xbf16>
    %cst_234 = arith.constant dense<0.000000e+00> : vector<8x32xf32>
    %277 = tpu.matmul %274, %276, %cst_234 {dimension_numbers = #tpu.dot_dimension_numbers<[1], [0], [0], [1], [0, 0, 1, 1], [], []>} : vector<8x72xbf16>, vector<72x32xbf16>, vector<8x32xf32> -> vector<8x32xf32>
    %278 = arith.addf %272, %277 : vector<8x32xf32>
    %c32_235 = arith.constant 32 : index
    %c0_236 = arith.constant 0 : index
    %279 = vector.load %arg20[%c32_235, %c0_236] : memref<72x72xf32, #tpu.memory_space<vmem>>, vector<8x72xf32>
    %280 = arith.truncf %279 : vector<8x72xf32> to vector<8x72xbf16>
    %c0_237 = arith.constant 0 : index
    %c1_238 = arith.constant 1 : index
    %c0_239 = arith.constant 0 : index
    %c0_240 = arith.constant 0 : index
    %281 = vector.load %arg8[%c0_237, %c1_238, %c0_239, %c0_240] : memref<6x3x72x32xbf16, #tpu.memory_space<vmem>>, vector<1x1x72x32xbf16>
    %282 = vector.shape_cast %281 : vector<1x1x72x32xbf16> to vector<72x32xbf16>
    %cst_241 = arith.constant dense<0.000000e+00> : vector<8x32xf32>
    %283 = tpu.matmul %280, %282, %cst_241 {dimension_numbers = #tpu.dot_dimension_numbers<[1], [0], [0], [1], [0, 0, 1, 1], [], []>} : vector<8x72xbf16>, vector<72x32xbf16>, vector<8x32xf32> -> vector<8x32xf32>
    %284 = arith.addf %278, %283 : vector<8x32xf32>
    %c33 = arith.constant 33 : index
    %c0_242 = arith.constant 0 : index
    %285 = vector.load %arg20[%c33, %c0_242] : memref<72x72xf32, #tpu.memory_space<vmem>>, vector<8x72xf32>
    %286 = arith.truncf %285 : vector<8x72xf32> to vector<8x72xbf16>
    %c0_243 = arith.constant 0 : index
    %c2_244 = arith.constant 2 : index
    %c0_245 = arith.constant 0 : index
    %c0_246 = arith.constant 0 : index
    %287 = vector.load %arg8[%c0_243, %c2_244, %c0_245, %c0_246] : memref<6x3x72x32xbf16, #tpu.memory_space<vmem>>, vector<1x1x72x32xbf16>
    %288 = vector.shape_cast %287 : vector<1x1x72x32xbf16> to vector<72x32xbf16>
    %cst_247 = arith.constant dense<0.000000e+00> : vector<8x32xf32>
    %289 = tpu.matmul %286, %288, %cst_247 {dimension_numbers = #tpu.dot_dimension_numbers<[1], [0], [0], [1], [0, 0, 1, 1], [], []>} : vector<8x72xbf16>, vector<72x32xbf16>, vector<8x32xf32> -> vector<8x32xf32>
    %290 = arith.addf %284, %289 : vector<8x32xf32>
    %c0_248 = arith.constant 0 : index
    %c0_249 = arith.constant 0 : index
    %c0_250 = arith.constant 0 : index
    %291 = vector.load %arg9[%c0_248, %c0_249, %c0_250] : memref<6x1x32xf32, #tpu.memory_space<vmem>>, vector<1x1x32xf32>
    %292 = vector.shape_cast %291 : vector<1x1x32xf32> to vector<1x32xf32>
    %293 = vector.broadcast %292 : vector<1x32xf32> to vector<8x32xf32>
    %294 = arith.addf %290, %293 : vector<8x32xf32>
    %cst_251 = arith.constant 5.000000e-01 : f32
    %295 = vector.broadcast %cst_251 : f32 to vector<8x32xf32>
    %296 = arith.mulf %295, %294 : vector<8x32xf32>
    %cst_252 = arith.constant 4.471500e-02 : f32
    %297 = vector.broadcast %cst_252 : f32 to vector<8x32xf32>
    %298 = arith.mulf %297, %294 : vector<8x32xf32>
    %299 = arith.mulf %298, %294 : vector<8x32xf32>
    %300 = arith.mulf %299, %294 : vector<8x32xf32>
    %301 = arith.addf %294, %300 : vector<8x32xf32>
    %cst_253 = arith.constant 0.797884583 : f32
    %302 = vector.broadcast %cst_253 : f32 to vector<8x32xf32>
    %303 = arith.mulf %302, %301 : vector<8x32xf32>
    %304 = math.tanh %303 : vector<8x32xf32>
    %cst_254 = arith.constant 1.000000e+00 : f32
    %305 = vector.broadcast %cst_254 : f32 to vector<8x32xf32>
    %306 = arith.addf %305, %304 : vector<8x32xf32>
    %307 = arith.mulf %296, %306 : vector<8x32xf32>
    %308 = arith.truncf %307 : vector<8x32xf32> to vector<8x32xbf16>
    %c0_255 = arith.constant 0 : index
    %c0_256 = arith.constant 0 : index
    %c0_257 = arith.constant 0 : index
    %309 = vector.load %arg10[%c0_255, %c0_256, %c0_257] : memref<6x32x72xbf16, #tpu.memory_space<vmem>>, vector<1x32x72xbf16>
    %310 = vector.shape_cast %309 : vector<1x32x72xbf16> to vector<32x72xbf16>
    %cst_258 = arith.constant dense<0.000000e+00> : vector<8x72xf32>
    %311 = tpu.matmul %308, %310, %cst_258 {dimension_numbers = #tpu.dot_dimension_numbers<[1], [0], [0], [1], [0, 0, 1, 1], [], []>} : vector<8x32xbf16>, vector<32x72xbf16>, vector<8x72xf32> -> vector<8x72xf32>
    %c0_259 = arith.constant 0 : index
    %c0_260 = arith.constant 0 : index
    %c0_261 = arith.constant 0 : index
    %312 = vector.load %arg11[%c0_259, %c0_260, %c0_261] : memref<6x1x72xf32, #tpu.memory_space<vmem>>, vector<1x1x72xf32>
    %313 = vector.shape_cast %312 : vector<1x1x72xf32> to vector<1x72xf32>
    %314 = vector.broadcast %313 : vector<1x72xf32> to vector<8x72xf32>
    %315 = arith.addf %311, %314 : vector<8x72xf32>
    %c0_262 = arith.constant 0 : index
    %c0_263 = arith.constant 0 : index
    %316 = vector.load %arg21[%c0_262, %c0_263] : memref<8x72xf32, #tpu.memory_space<vmem>>, vector<8x72xf32>
    %317 = arith.addf %316, %315 : vector<8x72xf32>
    %c0_264 = arith.constant 0 : index
    %c0_265 = arith.constant 0 : index
    %318 = vector.load %arg21[%c0_264, %c0_265] : memref<8x72xf32, #tpu.memory_space<vmem>>, vector<8x72xf32>
    tpu.vector_store %arg21[%c0_264, %c0_265], %317 {strides = array<i32>} : memref<8x72xf32, #tpu.memory_space<vmem>>, vector<8x72xf32>,
    %c0_266 = arith.constant 0 : index
    %c0_267 = arith.constant 0 : index
    %319 = vector.load %arg21[%c0_266, %c0_267] : memref<8x72xf32, #tpu.memory_space<vmem>>, vector<8x72xf32>
    %cst_268 = arith.constant 5.000000e-01 : f32
    %320 = vector.broadcast %cst_268 : f32 to vector<8x72xf32>
    %321 = arith.mulf %320, %319 : vector<8x72xf32>
    %cst_269 = arith.constant 4.471500e-02 : f32
    %322 = vector.broadcast %cst_269 : f32 to vector<8x72xf32>
    %323 = arith.mulf %322, %319 : vector<8x72xf32>
    %324 = arith.mulf %323, %319 : vector<8x72xf32>
    %325 = arith.mulf %324, %319 : vector<8x72xf32>
    %326 = arith.addf %319, %325 : vector<8x72xf32>
    %cst_270 = arith.constant 0.797884583 : f32
    %327 = vector.broadcast %cst_270 : f32 to vector<8x72xf32>
    %328 = arith.mulf %327, %326 : vector<8x72xf32>
    %329 = math.tanh %328 : vector<8x72xf32>
    %cst_271 = arith.constant 1.000000e+00 : f32
    %330 = vector.broadcast %cst_271 : f32 to vector<8x72xf32>
    %331 = arith.addf %330, %329 : vector<8x72xf32>
    %332 = arith.mulf %321, %331 : vector<8x72xf32>
    %c32_272 = arith.constant 32 : index
    %c0_273 = arith.constant 0 : index
    %333 = vector.load %arg20[%c32_272, %c0_273] : memref<72x72xf32, #tpu.memory_space<vmem>>, vector<8x72xf32>
    tpu.vector_store %arg20[%c32_272, %c0_273], %332 {strides = array<i32>} : memref<72x72xf32, #tpu.memory_space<vmem>>, vector<8x72xf32>,
    %cst_274 = arith.constant 0.000000e+00 : f32
    %334 = vector.broadcast %cst_274 : f32 to vector<8x32xf32>
    %c30 = arith.constant 30 : index
    %c0_275 = arith.constant 0 : index
    %335 = vector.load %arg20[%c30, %c0_275] : memref<72x72xf32, #tpu.memory_space<vmem>>, vector<8x72xf32>
    %336 = arith.truncf %335 : vector<8x72xf32> to vector<8x72xbf16>
    %c1_276 = arith.constant 1 : index
    %c0_277 = arith.constant 0 : index
    %c0_278 = arith.constant 0 : index
    %c0_279 = arith.constant 0 : index
    %337 = vector.load %arg8[%c1_276, %c0_277, %c0_278, %c0_279] : memref<6x3x72x32xbf16, #tpu.memory_space<vmem>>, vector<1x1x72x32xbf16>
    %338 = vector.shape_cast %337 : vector<1x1x72x32xbf16> to vector<72x32xbf16>
    %cst_280 = arith.constant dense<0.000000e+00> : vector<8x32xf32>
    %339 = tpu.matmul %336, %338, %cst_280 {dimension_numbers = #tpu.dot_dimension_numbers<[1], [0], [0], [1], [0, 0, 1, 1], [], []>} : vector<8x72xbf16>, vector<72x32xbf16>, vector<8x32xf32> -> vector<8x32xf32>
    %340 = arith.addf %334, %339 : vector<8x32xf32>
    %c32_281 = arith.constant 32 : index
    %c0_282 = arith.constant 0 : index
    %341 = vector.load %arg20[%c32_281, %c0_282] : memref<72x72xf32, #tpu.memory_space<vmem>>, vector<8x72xf32>
    %342 = arith.truncf %341 : vector<8x72xf32> to vector<8x72xbf16>
    %c1_283 = arith.constant 1 : index
    %c1_284 = arith.constant 1 : index
    %c0_285 = arith.constant 0 : index
    %c0_286 = arith.constant 0 : index
    %343 = vector.load %arg8[%c1_283, %c1_284, %c0_285, %c0_286] : memref<6x3x72x32xbf16, #tpu.memory_space<vmem>>, vector<1x1x72x32xbf16>
    %344 = vector.shape_cast %343 : vector<1x1x72x32xbf16> to vector<72x32xbf16>
    %cst_287 = arith.constant dense<0.000000e+00> : vector<8x32xf32>
    %345 = tpu.matmul %342, %344, %cst_287 {dimension_numbers = #tpu.dot_dimension_numbers<[1], [0], [0], [1], [0, 0, 1, 1], [], []>} : vector<8x72xbf16>, vector<72x32xbf16>, vector<8x32xf32> -> vector<8x32xf32>
    %346 = arith.addf %340, %345 : vector<8x32xf32>
    %c34 = arith.constant 34 : index
    %c0_288 = arith.constant 0 : index
    %347 = vector.load %arg20[%c34, %c0_288] : memref<72x72xf32, #tpu.memory_space<vmem>>, vector<8x72xf32>
    %348 = arith.truncf %347 : vector<8x72xf32> to vector<8x72xbf16>
    %c1_289 = arith.constant 1 : index
    %c2_290 = arith.constant 2 : index
    %c0_291 = arith.constant 0 : index
    %c0_292 = arith.constant 0 : index
    %349 = vector.load %arg8[%c1_289, %c2_290, %c0_291, %c0_292] : memref<6x3x72x32xbf16, #tpu.memory_space<vmem>>, vector<1x1x72x32xbf16>
    %350 = vector.shape_cast %349 : vector<1x1x72x32xbf16> to vector<72x32xbf16>
    %cst_293 = arith.constant dense<0.000000e+00> : vector<8x32xf32>
    %351 = tpu.matmul %348, %350, %cst_293 {dimension_numbers = #tpu.dot_dimension_numbers<[1], [0], [0], [1], [0, 0, 1, 1], [], []>} : vector<8x72xbf16>, vector<72x32xbf16>, vector<8x32xf32> -> vector<8x32xf32>
    %352 = arith.addf %346, %351 : vector<8x32xf32>
    %c1_294 = arith.constant 1 : index
    %c0_295 = arith.constant 0 : index
    %c0_296 = arith.constant 0 : index
    %353 = vector.load %arg9[%c1_294, %c0_295, %c0_296] : memref<6x1x32xf32, #tpu.memory_space<vmem>>, vector<1x1x32xf32>
    %354 = vector.shape_cast %353 : vector<1x1x32xf32> to vector<1x32xf32>
    %355 = vector.broadcast %354 : vector<1x32xf32> to vector<8x32xf32>
    %356 = arith.addf %352, %355 : vector<8x32xf32>
    %cst_297 = arith.constant 5.000000e-01 : f32
    %357 = vector.broadcast %cst_297 : f32 to vector<8x32xf32>
    %358 = arith.mulf %357, %356 : vector<8x32xf32>
    %cst_298 = arith.constant 4.471500e-02 : f32
    %359 = vector.broadcast %cst_298 : f32 to vector<8x32xf32>
    %360 = arith.mulf %359, %356 : vector<8x32xf32>
    %361 = arith.mulf %360, %356 : vector<8x32xf32>
    %362 = arith.mulf %361, %356 : vector<8x32xf32>
    %363 = arith.addf %356, %362 : vector<8x32xf32>
    %cst_299 = arith.constant 0.797884583 : f32
    %364 = vector.broadcast %cst_299 : f32 to vector<8x32xf32>
    %365 = arith.mulf %364, %363 : vector<8x32xf32>
    %366 = math.tanh %365 : vector<8x32xf32>
    %cst_300 = arith.constant 1.000000e+00 : f32
    %367 = vector.broadcast %cst_300 : f32 to vector<8x32xf32>
    %368 = arith.addf %367, %366 : vector<8x32xf32>
    %369 = arith.mulf %358, %368 : vector<8x32xf32>
    %370 = arith.truncf %369 : vector<8x32xf32> to vector<8x32xbf16>
    %c1_301 = arith.constant 1 : index
    %c0_302 = arith.constant 0 : index
    %c0_303 = arith.constant 0 : index
    %371 = vector.load %arg10[%c1_301, %c0_302, %c0_303] : memref<6x32x72xbf16, #tpu.memory_space<vmem>>, vector<1x32x72xbf16>
    %372 = vector.shape_cast %371 : vector<1x32x72xbf16> to vector<32x72xbf16>
    %cst_304 = arith.constant dense<0.000000e+00> : vector<8x72xf32>
    %373 = tpu.matmul %370, %372, %cst_304 {dimension_numbers = #tpu.dot_dimension_numbers<[1], [0], [0], [1], [0, 0, 1, 1], [], []>} : vector<8x32xbf16>, vector<32x72xbf16>, vector<8x72xf32> -> vector<8x72xf32>
    %c1_305 = arith.constant 1 : index
    %c0_306 = arith.constant 0 : index
    %c0_307 = arith.constant 0 : index
    %374 = vector.load %arg11[%c1_305, %c0_306, %c0_307] : memref<6x1x72xf32, #tpu.memory_space<vmem>>, vector<1x1x72xf32>
    %375 = vector.shape_cast %374 : vector<1x1x72xf32> to vector<1x72xf32>
    %376 = vector.broadcast %375 : vector<1x72xf32> to vector<8x72xf32>
    %377 = arith.addf %373, %376 : vector<8x72xf32>
    %c0_308 = arith.constant 0 : index
    %c0_309 = arith.constant 0 : index
    %378 = vector.load %arg21[%c0_308, %c0_309] : memref<8x72xf32, #tpu.memory_space<vmem>>, vector<8x72xf32>
    %379 = arith.addf %378, %377 : vector<8x72xf32>
    %c0_310 = arith.constant 0 : index
    %c0_311 = arith.constant 0 : index
    %380 = vector.load %arg21[%c0_310, %c0_311] : memref<8x72xf32, #tpu.memory_space<vmem>>, vector<8x72xf32>
    tpu.vector_store %arg21[%c0_310, %c0_311], %379 {strides = array<i32>} : memref<8x72xf32, #tpu.memory_space<vmem>>, vector<8x72xf32>,
    %c0_312 = arith.constant 0 : index
    %c0_313 = arith.constant 0 : index
    %381 = vector.load %arg21[%c0_312, %c0_313] : memref<8x72xf32, #tpu.memory_space<vmem>>, vector<8x72xf32>
    %cst_314 = arith.constant 5.000000e-01 : f32
    %382 = vector.broadcast %cst_314 : f32 to vector<8x72xf32>
    %383 = arith.mulf %382, %381 : vector<8x72xf32>
    %cst_315 = arith.constant 4.471500e-02 : f32
    %384 = vector.broadcast %cst_315 : f32 to vector<8x72xf32>
    %385 = arith.mulf %384, %381 : vector<8x72xf32>
    %386 = arith.mulf %385, %381 : vector<8x72xf32>
    %387 = arith.mulf %386, %381 : vector<8x72xf32>
    %388 = arith.addf %381, %387 : vector<8x72xf32>
    %cst_316 = arith.constant 0.797884583 : f32
    %389 = vector.broadcast %cst_316 : f32 to vector<8x72xf32>
    %390 = arith.mulf %389, %388 : vector<8x72xf32>
    %391 = math.tanh %390 : vector<8x72xf32>
    %cst_317 = arith.constant 1.000000e+00 : f32
    %392 = vector.broadcast %cst_317 : f32 to vector<8x72xf32>
    %393 = arith.addf %392, %391 : vector<8x72xf32>
    %394 = arith.mulf %383, %393 : vector<8x72xf32>
    %c32_318 = arith.constant 32 : index
    %c0_319 = arith.constant 0 : index
    %395 = vector.load %arg20[%c32_318, %c0_319] : memref<72x72xf32, #tpu.memory_space<vmem>>, vector<8x72xf32>
    tpu.vector_store %arg20[%c32_318, %c0_319], %394 {strides = array<i32>} : memref<72x72xf32, #tpu.memory_space<vmem>>, vector<8x72xf32>,
    %cst_320 = arith.constant 0.000000e+00 : f32
    %396 = vector.broadcast %cst_320 : f32 to vector<8x32xf32>
    %c28 = arith.constant 28 : index
    %c0_321 = arith.constant 0 : index
    %397 = vector.load %arg20[%c28, %c0_321] : memref<72x72xf32, #tpu.memory_space<vmem>>, vector<8x72xf32>
    %398 = arith.truncf %397 : vector<8x72xf32> to vector<8x72xbf16>
    %c2_322 = arith.constant 2 : index
    %c0_323 = arith.constant 0 : index
    %c0_324 = arith.constant 0 : index
    %c0_325 = arith.constant 0 : index
    %399 = vector.load %arg8[%c2_322, %c0_323, %c0_324, %c0_325] : memref<6x3x72x32xbf16, #tpu.memory_space<vmem>>, vector<1x1x72x32xbf16>
    %400 = vector.shape_cast %399 : vector<1x1x72x32xbf16> to vector<72x32xbf16>
    %cst_326 = arith.constant dense<0.000000e+00> : vector<8x32xf32>
    %401 = tpu.matmul %398, %400, %cst_326 {dimension_numbers = #tpu.dot_dimension_numbers<[1], [0], [0], [1], [0, 0, 1, 1], [], []>} : vector<8x72xbf16>, vector<72x32xbf16>, vector<8x32xf32> -> vector<8x32xf32>
    %402 = arith.addf %396, %401 : vector<8x32xf32>
    %c32_327 = arith.constant 32 : index
    %c0_328 = arith.constant 0 : index
    %403 = vector.load %arg20[%c32_327, %c0_328] : memref<72x72xf32, #tpu.memory_space<vmem>>, vector<8x72xf32>
    %404 = arith.truncf %403 : vector<8x72xf32> to vector<8x72xbf16>
    %c2_329 = arith.constant 2 : index
    %c1_330 = arith.constant 1 : index
    %c0_331 = arith.constant 0 : index
    %c0_332 = arith.constant 0 : index
    %405 = vector.load %arg8[%c2_329, %c1_330, %c0_331, %c0_332] : memref<6x3x72x32xbf16, #tpu.memory_space<vmem>>, vector<1x1x72x32xbf16>
    %406 = vector.shape_cast %405 : vector<1x1x72x32xbf16> to vector<72x32xbf16>
    %cst_333 = arith.constant dense<0.000000e+00> : vector<8x32xf32>
    %407 = tpu.matmul %404, %406, %cst_333 {dimension_numbers = #tpu.dot_dimension_numbers<[1], [0], [0], [1], [0, 0, 1, 1], [], []>} : vector<8x72xbf16>, vector<72x32xbf16>, vector<8x32xf32> -> vector<8x32xf32>
    %408 = arith.addf %402, %407 : vector<8x32xf32>
    %c36 = arith.constant 36 : index
    %c0_334 = arith.constant 0 : index
    %409 = vector.load %arg20[%c36, %c0_334] : memref<72x72xf32, #tpu.memory_space<vmem>>, vector<8x72xf32>
    %410 = arith.truncf %409 : vector<8x72xf32> to vector<8x72xbf16>
    %c2_335 = arith.constant 2 : index
    %c2_336 = arith.constant 2 : index
    %c0_337 = arith.constant 0 : index
    %c0_338 = arith.constant 0 : index
    %411 = vector.load %arg8[%c2_335, %c2_336, %c0_337, %c0_338] : memref<6x3x72x32xbf16, #tpu.memory_space<vmem>>, vector<1x1x72x32xbf16>
    %412 = vector.shape_cast %411 : vector<1x1x72x32xbf16> to vector<72x32xbf16>
    %cst_339 = arith.constant dense<0.000000e+00> : vector<8x32xf32>
    %413 = tpu.matmul %410, %412, %cst_339 {dimension_numbers = #tpu.dot_dimension_numbers<[1], [0], [0], [1], [0, 0, 1, 1], [], []>} : vector<8x72xbf16>, vector<72x32xbf16>, vector<8x32xf32> -> vector<8x32xf32>
    %414 = arith.addf %408, %413 : vector<8x32xf32>
    %c2_340 = arith.constant 2 : index
    %c0_341 = arith.constant 0 : index
    %c0_342 = arith.constant 0 : index
    %415 = vector.load %arg9[%c2_340, %c0_341, %c0_342] : memref<6x1x32xf32, #tpu.memory_space<vmem>>, vector<1x1x32xf32>
    %416 = vector.shape_cast %415 : vector<1x1x32xf32> to vector<1x32xf32>
    %417 = vector.broadcast %416 : vector<1x32xf32> to vector<8x32xf32>
    %418 = arith.addf %414, %417 : vector<8x32xf32>
    %cst_343 = arith.constant 5.000000e-01 : f32
    %419 = vector.broadcast %cst_343 : f32 to vector<8x32xf32>
    %420 = arith.mulf %419, %418 : vector<8x32xf32>
    %cst_344 = arith.constant 4.471500e-02 : f32
    %421 = vector.broadcast %cst_344 : f32 to vector<8x32xf32>
    %422 = arith.mulf %421, %418 : vector<8x32xf32>
    %423 = arith.mulf %422, %418 : vector<8x32xf32>
    %424 = arith.mulf %423, %418 : vector<8x32xf32>
    %425 = arith.addf %418, %424 : vector<8x32xf32>
    %cst_345 = arith.constant 0.797884583 : f32
    %426 = vector.broadcast %cst_345 : f32 to vector<8x32xf32>
    %427 = arith.mulf %426, %425 : vector<8x32xf32>
    %428 = math.tanh %427 : vector<8x32xf32>
    %cst_346 = arith.constant 1.000000e+00 : f32
    %429 = vector.broadcast %cst_346 : f32 to vector<8x32xf32>
    %430 = arith.addf %429, %428 : vector<8x32xf32>
    %431 = arith.mulf %420, %430 : vector<8x32xf32>
    %432 = arith.truncf %431 : vector<8x32xf32> to vector<8x32xbf16>
    %c2_347 = arith.constant 2 : index
    %c0_348 = arith.constant 0 : index
    %c0_349 = arith.constant 0 : index
    %433 = vector.load %arg10[%c2_347, %c0_348, %c0_349] : memref<6x32x72xbf16, #tpu.memory_space<vmem>>, vector<1x32x72xbf16>
    %434 = vector.shape_cast %433 : vector<1x32x72xbf16> to vector<32x72xbf16>
    %cst_350 = arith.constant dense<0.000000e+00> : vector<8x72xf32>
    %435 = tpu.matmul %432, %434, %cst_350 {dimension_numbers = #tpu.dot_dimension_numbers<[1], [0], [0], [1], [0, 0, 1, 1], [], []>} : vector<8x32xbf16>, vector<32x72xbf16>, vector<8x72xf32> -> vector<8x72xf32>
    %c2_351 = arith.constant 2 : index
    %c0_352 = arith.constant 0 : index
    %c0_353 = arith.constant 0 : index
    %436 = vector.load %arg11[%c2_351, %c0_352, %c0_353] : memref<6x1x72xf32, #tpu.memory_space<vmem>>, vector<1x1x72xf32>
    %437 = vector.shape_cast %436 : vector<1x1x72xf32> to vector<1x72xf32>
    %438 = vector.broadcast %437 : vector<1x72xf32> to vector<8x72xf32>
    %439 = arith.addf %435, %438 : vector<8x72xf32>
    %c0_354 = arith.constant 0 : index
    %c0_355 = arith.constant 0 : index
    %440 = vector.load %arg21[%c0_354, %c0_355] : memref<8x72xf32, #tpu.memory_space<vmem>>, vector<8x72xf32>
    %441 = arith.addf %440, %439 : vector<8x72xf32>
    %c0_356 = arith.constant 0 : index
    %c0_357 = arith.constant 0 : index
    %442 = vector.load %arg21[%c0_356, %c0_357] : memref<8x72xf32, #tpu.memory_space<vmem>>, vector<8x72xf32>
    tpu.vector_store %arg21[%c0_356, %c0_357], %441 {strides = array<i32>} : memref<8x72xf32, #tpu.memory_space<vmem>>, vector<8x72xf32>,
    %c0_358 = arith.constant 0 : index
    %c0_359 = arith.constant 0 : index
    %443 = vector.load %arg21[%c0_358, %c0_359] : memref<8x72xf32, #tpu.memory_space<vmem>>, vector<8x72xf32>
    %cst_360 = arith.constant 5.000000e-01 : f32
    %444 = vector.broadcast %cst_360 : f32 to vector<8x72xf32>
    %445 = arith.mulf %444, %443 : vector<8x72xf32>
    %cst_361 = arith.constant 4.471500e-02 : f32
    %446 = vector.broadcast %cst_361 : f32 to vector<8x72xf32>
    %447 = arith.mulf %446, %443 : vector<8x72xf32>
    %448 = arith.mulf %447, %443 : vector<8x72xf32>
    %449 = arith.mulf %448, %443 : vector<8x72xf32>
    %450 = arith.addf %443, %449 : vector<8x72xf32>
    %cst_362 = arith.constant 0.797884583 : f32
    %451 = vector.broadcast %cst_362 : f32 to vector<8x72xf32>
    %452 = arith.mulf %451, %450 : vector<8x72xf32>
    %453 = math.tanh %452 : vector<8x72xf32>
    %cst_363 = arith.constant 1.000000e+00 : f32
    %454 = vector.broadcast %cst_363 : f32 to vector<8x72xf32>
    %455 = arith.addf %454, %453 : vector<8x72xf32>
    %456 = arith.mulf %445, %455 : vector<8x72xf32>
    %c32_364 = arith.constant 32 : index
    %c0_365 = arith.constant 0 : index
    %457 = vector.load %arg20[%c32_364, %c0_365] : memref<72x72xf32, #tpu.memory_space<vmem>>, vector<8x72xf32>
    tpu.vector_store %arg20[%c32_364, %c0_365], %456 {strides = array<i32>} : memref<72x72xf32, #tpu.memory_space<vmem>>, vector<8x72xf32>,
    %cst_366 = arith.constant 0.000000e+00 : f32
    %458 = vector.broadcast %cst_366 : f32 to vector<8x32xf32>
    %c24 = arith.constant 24 : index
    %c0_367 = arith.constant 0 : index
    %459 = vector.load %arg20[%c24, %c0_367] : memref<72x72xf32, #tpu.memory_space<vmem>>, vector<8x72xf32>
    %460 = arith.truncf %459 : vector<8x72xf32> to vector<8x72xbf16>
    %c3_368 = arith.constant 3 : index
    %c0_369 = arith.constant 0 : index
    %c0_370 = arith.constant 0 : index
    %c0_371 = arith.constant 0 : index
    %461 = vector.load %arg8[%c3_368, %c0_369, %c0_370, %c0_371] : memref<6x3x72x32xbf16, #tpu.memory_space<vmem>>, vector<1x1x72x32xbf16>
    %462 = vector.shape_cast %461 : vector<1x1x72x32xbf16> to vector<72x32xbf16>
    %cst_372 = arith.constant dense<0.000000e+00> : vector<8x32xf32>
    %463 = tpu.matmul %460, %462, %cst_372 {dimension_numbers = #tpu.dot_dimension_numbers<[1], [0], [0], [1], [0, 0, 1, 1], [], []>} : vector<8x72xbf16>, vector<72x32xbf16>, vector<8x32xf32> -> vector<8x32xf32>
    %464 = arith.addf %458, %463 : vector<8x32xf32>
    %c32_373 = arith.constant 32 : index
    %c0_374 = arith.constant 0 : index
    %465 = vector.load %arg20[%c32_373, %c0_374] : memref<72x72xf32, #tpu.memory_space<vmem>>, vector<8x72xf32>
    %466 = arith.truncf %465 : vector<8x72xf32> to vector<8x72xbf16>
    %c3_375 = arith.constant 3 : index
    %c1_376 = arith.constant 1 : index
    %c0_377 = arith.constant 0 : index
    %c0_378 = arith.constant 0 : index
    %467 = vector.load %arg8[%c3_375, %c1_376, %c0_377, %c0_378] : memref<6x3x72x32xbf16, #tpu.memory_space<vmem>>, vector<1x1x72x32xbf16>
    %468 = vector.shape_cast %467 : vector<1x1x72x32xbf16> to vector<72x32xbf16>
    %cst_379 = arith.constant dense<0.000000e+00> : vector<8x32xf32>
    %469 = tpu.matmul %466, %468, %cst_379 {dimension_numbers = #tpu.dot_dimension_numbers<[1], [0], [0], [1], [0, 0, 1, 1], [], []>} : vector<8x72xbf16>, vector<72x32xbf16>, vector<8x32xf32> -> vector<8x32xf32>
    %470 = arith.addf %464, %469 : vector<8x32xf32>
    %c40 = arith.constant 40 : index
    %c0_380 = arith.constant 0 : index
    %471 = vector.load %arg20[%c40, %c0_380] : memref<72x72xf32, #tpu.memory_space<vmem>>, vector<8x72xf32>
    %472 = arith.truncf %471 : vector<8x72xf32> to vector<8x72xbf16>
    %c3_381 = arith.constant 3 : index
    %c2_382 = arith.constant 2 : index
    %c0_383 = arith.constant 0 : index
    %c0_384 = arith.constant 0 : index
    %473 = vector.load %arg8[%c3_381, %c2_382, %c0_383, %c0_384] : memref<6x3x72x32xbf16, #tpu.memory_space<vmem>>, vector<1x1x72x32xbf16>
    %474 = vector.shape_cast %473 : vector<1x1x72x32xbf16> to vector<72x32xbf16>
    %cst_385 = arith.constant dense<0.000000e+00> : vector<8x32xf32>
    %475 = tpu.matmul %472, %474, %cst_385 {dimension_numbers = #tpu.dot_dimension_numbers<[1], [0], [0], [1], [0, 0, 1, 1], [], []>} : vector<8x72xbf16>, vector<72x32xbf16>, vector<8x32xf32> -> vector<8x32xf32>
    %476 = arith.addf %470, %475 : vector<8x32xf32>
    %c3_386 = arith.constant 3 : index
    %c0_387 = arith.constant 0 : index
    %c0_388 = arith.constant 0 : index
    %477 = vector.load %arg9[%c3_386, %c0_387, %c0_388] : memref<6x1x32xf32, #tpu.memory_space<vmem>>, vector<1x1x32xf32>
    %478 = vector.shape_cast %477 : vector<1x1x32xf32> to vector<1x32xf32>
    %479 = vector.broadcast %478 : vector<1x32xf32> to vector<8x32xf32>
    %480 = arith.addf %476, %479 : vector<8x32xf32>
    %cst_389 = arith.constant 5.000000e-01 : f32
    %481 = vector.broadcast %cst_389 : f32 to vector<8x32xf32>
    %482 = arith.mulf %481, %480 : vector<8x32xf32>
    %cst_390 = arith.constant 4.471500e-02 : f32
    %483 = vector.broadcast %cst_390 : f32 to vector<8x32xf32>
    %484 = arith.mulf %483, %480 : vector<8x32xf32>
    %485 = arith.mulf %484, %480 : vector<8x32xf32>
    %486 = arith.mulf %485, %480 : vector<8x32xf32>
    %487 = arith.addf %480, %486 : vector<8x32xf32>
    %cst_391 = arith.constant 0.797884583 : f32
    %488 = vector.broadcast %cst_391 : f32 to vector<8x32xf32>
    %489 = arith.mulf %488, %487 : vector<8x32xf32>
    %490 = math.tanh %489 : vector<8x32xf32>
    %cst_392 = arith.constant 1.000000e+00 : f32
    %491 = vector.broadcast %cst_392 : f32 to vector<8x32xf32>
    %492 = arith.addf %491, %490 : vector<8x32xf32>
    %493 = arith.mulf %482, %492 : vector<8x32xf32>
    %494 = arith.truncf %493 : vector<8x32xf32> to vector<8x32xbf16>
    %c3_393 = arith.constant 3 : index
    %c0_394 = arith.constant 0 : index
    %c0_395 = arith.constant 0 : index
    %495 = vector.load %arg10[%c3_393, %c0_394, %c0_395] : memref<6x32x72xbf16, #tpu.memory_space<vmem>>, vector<1x32x72xbf16>
    %496 = vector.shape_cast %495 : vector<1x32x72xbf16> to vector<32x72xbf16>
    %cst_396 = arith.constant dense<0.000000e+00> : vector<8x72xf32>
    %497 = tpu.matmul %494, %496, %cst_396 {dimension_numbers = #tpu.dot_dimension_numbers<[1], [0], [0], [1], [0, 0, 1, 1], [], []>} : vector<8x32xbf16>, vector<32x72xbf16>, vector<8x72xf32> -> vector<8x72xf32>
    %c3_397 = arith.constant 3 : index
    %c0_398 = arith.constant 0 : index
    %c0_399 = arith.constant 0 : index
    %498 = vector.load %arg11[%c3_397, %c0_398, %c0_399] : memref<6x1x72xf32, #tpu.memory_space<vmem>>, vector<1x1x72xf32>
    %499 = vector.shape_cast %498 : vector<1x1x72xf32> to vector<1x72xf32>
    %500 = vector.broadcast %499 : vector<1x72xf32> to vector<8x72xf32>
    %501 = arith.addf %497, %500 : vector<8x72xf32>
    %c0_400 = arith.constant 0 : index
    %c0_401 = arith.constant 0 : index
    %502 = vector.load %arg21[%c0_400, %c0_401] : memref<8x72xf32, #tpu.memory_space<vmem>>, vector<8x72xf32>
    %503 = arith.addf %502, %501 : vector<8x72xf32>
    %c0_402 = arith.constant 0 : index
    %c0_403 = arith.constant 0 : index
    %504 = vector.load %arg21[%c0_402, %c0_403] : memref<8x72xf32, #tpu.memory_space<vmem>>, vector<8x72xf32>
    tpu.vector_store %arg21[%c0_402, %c0_403], %503 {strides = array<i32>} : memref<8x72xf32, #tpu.memory_space<vmem>>, vector<8x72xf32>,
    %c0_404 = arith.constant 0 : index
    %c0_405 = arith.constant 0 : index
    %505 = vector.load %arg21[%c0_404, %c0_405] : memref<8x72xf32, #tpu.memory_space<vmem>>, vector<8x72xf32>
    %cst_406 = arith.constant 5.000000e-01 : f32
    %506 = vector.broadcast %cst_406 : f32 to vector<8x72xf32>
    %507 = arith.mulf %506, %505 : vector<8x72xf32>
    %cst_407 = arith.constant 4.471500e-02 : f32
    %508 = vector.broadcast %cst_407 : f32 to vector<8x72xf32>
    %509 = arith.mulf %508, %505 : vector<8x72xf32>
    %510 = arith.mulf %509, %505 : vector<8x72xf32>
    %511 = arith.mulf %510, %505 : vector<8x72xf32>
    %512 = arith.addf %505, %511 : vector<8x72xf32>
    %cst_408 = arith.constant 0.797884583 : f32
    %513 = vector.broadcast %cst_408 : f32 to vector<8x72xf32>
    %514 = arith.mulf %513, %512 : vector<8x72xf32>
    %515 = math.tanh %514 : vector<8x72xf32>
    %cst_409 = arith.constant 1.000000e+00 : f32
    %516 = vector.broadcast %cst_409 : f32 to vector<8x72xf32>
    %517 = arith.addf %516, %515 : vector<8x72xf32>
    %518 = arith.mulf %507, %517 : vector<8x72xf32>
    %c32_410 = arith.constant 32 : index
    %c0_411 = arith.constant 0 : index
    %519 = vector.load %arg20[%c32_410, %c0_411] : memref<72x72xf32, #tpu.memory_space<vmem>>, vector<8x72xf32>
    tpu.vector_store %arg20[%c32_410, %c0_411], %518 {strides = array<i32>} : memref<72x72xf32, #tpu.memory_space<vmem>>, vector<8x72xf32>,
    %cst_412 = arith.constant 0.000000e+00 : f32
    %520 = vector.broadcast %cst_412 : f32 to vector<8x32xf32>
    %c16 = arith.constant 16 : index
    %c0_413 = arith.constant 0 : index
    %521 = vector.load %arg20[%c16, %c0_413] : memref<72x72xf32, #tpu.memory_space<vmem>>, vector<8x72xf32>
    %522 = arith.truncf %521 : vector<8x72xf32> to vector<8x72xbf16>
    %c4_414 = arith.constant 4 : index
    %c0_415 = arith.constant 0 : index
    %c0_416 = arith.constant 0 : index
    %c0_417 = arith.constant 0 : index
    %523 = vector.load %arg8[%c4_414, %c0_415, %c0_416, %c0_417] : memref<6x3x72x32xbf16, #tpu.memory_space<vmem>>, vector<1x1x72x32xbf16>
    %524 = vector.shape_cast %523 : vector<1x1x72x32xbf16> to vector<72x32xbf16>
    %cst_418 = arith.constant dense<0.000000e+00> : vector<8x32xf32>
    %525 = tpu.matmul %522, %524, %cst_418 {dimension_numbers = #tpu.dot_dimension_numbers<[1], [0], [0], [1], [0, 0, 1, 1], [], []>} : vector<8x72xbf16>, vector<72x32xbf16>, vector<8x32xf32> -> vector<8x32xf32>
    %526 = arith.addf %520, %525 : vector<8x32xf32>
    %c32_419 = arith.constant 32 : index
    %c0_420 = arith.constant 0 : index
    %527 = vector.load %arg20[%c32_419, %c0_420] : memref<72x72xf32, #tpu.memory_space<vmem>>, vector<8x72xf32>
    %528 = arith.truncf %527 : vector<8x72xf32> to vector<8x72xbf16>
    %c4_421 = arith.constant 4 : index
    %c1_422 = arith.constant 1 : index
    %c0_423 = arith.constant 0 : index
    %c0_424 = arith.constant 0 : index
    %529 = vector.load %arg8[%c4_421, %c1_422, %c0_423, %c0_424] : memref<6x3x72x32xbf16, #tpu.memory_space<vmem>>, vector<1x1x72x32xbf16>
    %530 = vector.shape_cast %529 : vector<1x1x72x32xbf16> to vector<72x32xbf16>
    %cst_425 = arith.constant dense<0.000000e+00> : vector<8x32xf32>
    %531 = tpu.matmul %528, %530, %cst_425 {dimension_numbers = #tpu.dot_dimension_numbers<[1], [0], [0], [1], [0, 0, 1, 1], [], []>} : vector<8x72xbf16>, vector<72x32xbf16>, vector<8x32xf32> -> vector<8x32xf32>
    %532 = arith.addf %526, %531 : vector<8x32xf32>
    %c48 = arith.constant 48 : index
    %c0_426 = arith.constant 0 : index
    %533 = vector.load %arg20[%c48, %c0_426] : memref<72x72xf32, #tpu.memory_space<vmem>>, vector<8x72xf32>
    %534 = arith.truncf %533 : vector<8x72xf32> to vector<8x72xbf16>
    %c4_427 = arith.constant 4 : index
    %c2_428 = arith.constant 2 : index
    %c0_429 = arith.constant 0 : index
    %c0_430 = arith.constant 0 : index
    %535 = vector.load %arg8[%c4_427, %c2_428, %c0_429, %c0_430] : memref<6x3x72x32xbf16, #tpu.memory_space<vmem>>, vector<1x1x72x32xbf16>
    %536 = vector.shape_cast %535 : vector<1x1x72x32xbf16> to vector<72x32xbf16>
    %cst_431 = arith.constant dense<0.000000e+00> : vector<8x32xf32>
    %537 = tpu.matmul %534, %536, %cst_431 {dimension_numbers = #tpu.dot_dimension_numbers<[1], [0], [0], [1], [0, 0, 1, 1], [], []>} : vector<8x72xbf16>, vector<72x32xbf16>, vector<8x32xf32> -> vector<8x32xf32>
    %538 = arith.addf %532, %537 : vector<8x32xf32>
    %c4_432 = arith.constant 4 : index
    %c0_433 = arith.constant 0 : index
    %c0_434 = arith.constant 0 : index
    %539 = vector.load %arg9[%c4_432, %c0_433, %c0_434] : memref<6x1x32xf32, #tpu.memory_space<vmem>>, vector<1x1x32xf32>
    %540 = vector.shape_cast %539 : vector<1x1x32xf32> to vector<1x32xf32>
    %541 = vector.broadcast %540 : vector<1x32xf32> to vector<8x32xf32>
    %542 = arith.addf %538, %541 : vector<8x32xf32>
    %cst_435 = arith.constant 5.000000e-01 : f32
    %543 = vector.broadcast %cst_435 : f32 to vector<8x32xf32>
    %544 = arith.mulf %543, %542 : vector<8x32xf32>
    %cst_436 = arith.constant 4.471500e-02 : f32
    %545 = vector.broadcast %cst_436 : f32 to vector<8x32xf32>
    %546 = arith.mulf %545, %542 : vector<8x32xf32>
    %547 = arith.mulf %546, %542 : vector<8x32xf32>
    %548 = arith.mulf %547, %542 : vector<8x32xf32>
    %549 = arith.addf %542, %548 : vector<8x32xf32>
    %cst_437 = arith.constant 0.797884583 : f32
    %550 = vector.broadcast %cst_437 : f32 to vector<8x32xf32>
    %551 = arith.mulf %550, %549 : vector<8x32xf32>
    %552 = math.tanh %551 : vector<8x32xf32>
    %cst_438 = arith.constant 1.000000e+00 : f32
    %553 = vector.broadcast %cst_438 : f32 to vector<8x32xf32>
    %554 = arith.addf %553, %552 : vector<8x32xf32>
    %555 = arith.mulf %544, %554 : vector<8x32xf32>
    %556 = arith.truncf %555 : vector<8x32xf32> to vector<8x32xbf16>
    %c4_439 = arith.constant 4 : index
    %c0_440 = arith.constant 0 : index
    %c0_441 = arith.constant 0 : index
    %557 = vector.load %arg10[%c4_439, %c0_440, %c0_441] : memref<6x32x72xbf16, #tpu.memory_space<vmem>>, vector<1x32x72xbf16>
    %558 = vector.shape_cast %557 : vector<1x32x72xbf16> to vector<32x72xbf16>
    %cst_442 = arith.constant dense<0.000000e+00> : vector<8x72xf32>
    %559 = tpu.matmul %556, %558, %cst_442 {dimension_numbers = #tpu.dot_dimension_numbers<[1], [0], [0], [1], [0, 0, 1, 1], [], []>} : vector<8x32xbf16>, vector<32x72xbf16>, vector<8x72xf32> -> vector<8x72xf32>
    %c4_443 = arith.constant 4 : index
    %c0_444 = arith.constant 0 : index
    %c0_445 = arith.constant 0 : index
    %560 = vector.load %arg11[%c4_443, %c0_444, %c0_445] : memref<6x1x72xf32, #tpu.memory_space<vmem>>, vector<1x1x72xf32>
    %561 = vector.shape_cast %560 : vector<1x1x72xf32> to vector<1x72xf32>
    %562 = vector.broadcast %561 : vector<1x72xf32> to vector<8x72xf32>
    %563 = arith.addf %559, %562 : vector<8x72xf32>
    %c0_446 = arith.constant 0 : index
    %c0_447 = arith.constant 0 : index
    %564 = vector.load %arg21[%c0_446, %c0_447] : memref<8x72xf32, #tpu.memory_space<vmem>>, vector<8x72xf32>
    %565 = arith.addf %564, %563 : vector<8x72xf32>
    %c0_448 = arith.constant 0 : index
    %c0_449 = arith.constant 0 : index
    %566 = vector.load %arg21[%c0_448, %c0_449] : memref<8x72xf32, #tpu.memory_space<vmem>>, vector<8x72xf32>
    tpu.vector_store %arg21[%c0_448, %c0_449], %565 {strides = array<i32>} : memref<8x72xf32, #tpu.memory_space<vmem>>, vector<8x72xf32>,
    %c0_450 = arith.constant 0 : index
    %c0_451 = arith.constant 0 : index
    %567 = vector.load %arg21[%c0_450, %c0_451] : memref<8x72xf32, #tpu.memory_space<vmem>>, vector<8x72xf32>
    %cst_452 = arith.constant 5.000000e-01 : f32
    %568 = vector.broadcast %cst_452 : f32 to vector<8x72xf32>
    %569 = arith.mulf %568, %567 : vector<8x72xf32>
    %cst_453 = arith.constant 4.471500e-02 : f32
    %570 = vector.broadcast %cst_453 : f32 to vector<8x72xf32>
    %571 = arith.mulf %570, %567 : vector<8x72xf32>
    %572 = arith.mulf %571, %567 : vector<8x72xf32>
    %573 = arith.mulf %572, %567 : vector<8x72xf32>
    %574 = arith.addf %567, %573 : vector<8x72xf32>
    %cst_454 = arith.constant 0.797884583 : f32
    %575 = vector.broadcast %cst_454 : f32 to vector<8x72xf32>
    %576 = arith.mulf %575, %574 : vector<8x72xf32>
    %577 = math.tanh %576 : vector<8x72xf32>
    %cst_455 = arith.constant 1.000000e+00 : f32
    %578 = vector.broadcast %cst_455 : f32 to vector<8x72xf32>
    %579 = arith.addf %578, %577 : vector<8x72xf32>
    %580 = arith.mulf %569, %579 : vector<8x72xf32>
    %c32_456 = arith.constant 32 : index
    %c0_457 = arith.constant 0 : index
    %581 = vector.load %arg20[%c32_456, %c0_457] : memref<72x72xf32, #tpu.memory_space<vmem>>, vector<8x72xf32>
    tpu.vector_store %arg20[%c32_456, %c0_457], %580 {strides = array<i32>} : memref<72x72xf32, #tpu.memory_space<vmem>>, vector<8x72xf32>,
    %cst_458 = arith.constant 0.000000e+00 : f32
    %582 = vector.broadcast %cst_458 : f32 to vector<8x32xf32>
    %c0_459 = arith.constant 0 : index
    %c0_460 = arith.constant 0 : index
    %583 = vector.load %arg20[%c0_459, %c0_460] : memref<72x72xf32, #tpu.memory_space<vmem>>, vector<8x72xf32>
    %584 = arith.truncf %583 : vector<8x72xf32> to vector<8x72xbf16>
    %c5_461 = arith.constant 5 : index
    %c0_462 = arith.constant 0 : index
    %c0_463 = arith.constant 0 : index
    %c0_464 = arith.constant 0 : index
    %585 = vector.load %arg8[%c5_461, %c0_462, %c0_463, %c0_464] : memref<6x3x72x32xbf16, #tpu.memory_space<vmem>>, vector<1x1x72x32xbf16>
    %586 = vector.shape_cast %585 : vector<1x1x72x32xbf16> to vector<72x32xbf16>
    %cst_465 = arith.constant dense<0.000000e+00> : vector<8x32xf32>
    %587 = tpu.matmul %584, %586, %cst_465 {dimension_numbers = #tpu.dot_dimension_numbers<[1], [0], [0], [1], [0, 0, 1, 1], [], []>} : vector<8x72xbf16>, vector<72x32xbf16>, vector<8x32xf32> -> vector<8x32xf32>
    %588 = arith.addf %582, %587 : vector<8x32xf32>
    %c32_466 = arith.constant 32 : index
    %c0_467 = arith.constant 0 : index
    %589 = vector.load %arg20[%c32_466, %c0_467] : memref<72x72xf32, #tpu.memory_space<vmem>>, vector<8x72xf32>
    %590 = arith.truncf %589 : vector<8x72xf32> to vector<8x72xbf16>
    %c5_468 = arith.constant 5 : index
    %c1_469 = arith.constant 1 : index
    %c0_470 = arith.constant 0 : index
    %c0_471 = arith.constant 0 : index
    %591 = vector.load %arg8[%c5_468, %c1_469, %c0_470, %c0_471] : memref<6x3x72x32xbf16, #tpu.memory_space<vmem>>, vector<1x1x72x32xbf16>
    %592 = vector.shape_cast %591 : vector<1x1x72x32xbf16> to vector<72x32xbf16>
    %cst_472 = arith.constant dense<0.000000e+00> : vector<8x32xf32>
    %593 = tpu.matmul %590, %592, %cst_472 {dimension_numbers = #tpu.dot_dimension_numbers<[1], [0], [0], [1], [0, 0, 1, 1], [], []>} : vector<8x72xbf16>, vector<72x32xbf16>, vector<8x32xf32> -> vector<8x32xf32>
    %594 = arith.addf %588, %593 : vector<8x32xf32>
    %c64 = arith.constant 64 : index
    %c0_473 = arith.constant 0 : index
    %595 = vector.load %arg20[%c64, %c0_473] : memref<72x72xf32, #tpu.memory_space<vmem>>, vector<8x72xf32>
    %596 = arith.truncf %595 : vector<8x72xf32> to vector<8x72xbf16>
    %c5_474 = arith.constant 5 : index
    %c2_475 = arith.constant 2 : index
    %c0_476 = arith.constant 0 : index
    %c0_477 = arith.constant 0 : index
    %597 = vector.load %arg8[%c5_474, %c2_475, %c0_476, %c0_477] : memref<6x3x72x32xbf16, #tpu.memory_space<vmem>>, vector<1x1x72x32xbf16>
    %598 = vector.shape_cast %597 : vector<1x1x72x32xbf16> to vector<72x32xbf16>
    %cst_478 = arith.constant dense<0.000000e+00> : vector<8x32xf32>
    %599 = tpu.matmul %596, %598, %cst_478 {dimension_numbers = #tpu.dot_dimension_numbers<[1], [0], [0], [1], [0, 0, 1, 1], [], []>} : vector<8x72xbf16>, vector<72x32xbf16>, vector<8x32xf32> -> vector<8x32xf32>
    %600 = arith.addf %594, %599 : vector<8x32xf32>
    %c5_479 = arith.constant 5 : index
    %c0_480 = arith.constant 0 : index
    %c0_481 = arith.constant 0 : index
    %601 = vector.load %arg9[%c5_479, %c0_480, %c0_481] : memref<6x1x32xf32, #tpu.memory_space<vmem>>, vector<1x1x32xf32>
    %602 = vector.shape_cast %601 : vector<1x1x32xf32> to vector<1x32xf32>
    %603 = vector.broadcast %602 : vector<1x32xf32> to vector<8x32xf32>
    %604 = arith.addf %600, %603 : vector<8x32xf32>
    %cst_482 = arith.constant 5.000000e-01 : f32
    %605 = vector.broadcast %cst_482 : f32 to vector<8x32xf32>
    %606 = arith.mulf %605, %604 : vector<8x32xf32>
    %cst_483 = arith.constant 4.471500e-02 : f32
    %607 = vector.broadcast %cst_483 : f32 to vector<8x32xf32>
    %608 = arith.mulf %607, %604 : vector<8x32xf32>
    %609 = arith.mulf %608, %604 : vector<8x32xf32>
    %610 = arith.mulf %609, %604 : vector<8x32xf32>
    %611 = arith.addf %604, %610 : vector<8x32xf32>
    %cst_484 = arith.constant 0.797884583 : f32
    %612 = vector.broadcast %cst_484 : f32 to vector<8x32xf32>
    %613 = arith.mulf %612, %611 : vector<8x32xf32>
    %614 = math.tanh %613 : vector<8x32xf32>
    %cst_485 = arith.constant 1.000000e+00 : f32
    %615 = vector.broadcast %cst_485 : f32 to vector<8x32xf32>
    %616 = arith.addf %615, %614 : vector<8x32xf32>
    %617 = arith.mulf %606, %616 : vector<8x32xf32>
    %618 = arith.truncf %617 : vector<8x32xf32> to vector<8x32xbf16>
    %c5_486 = arith.constant 5 : index
    %c0_487 = arith.constant 0 : index
    %c0_488 = arith.constant 0 : index
    %619 = vector.load %arg10[%c5_486, %c0_487, %c0_488] : memref<6x32x72xbf16, #tpu.memory_space<vmem>>, vector<1x32x72xbf16>
    %620 = vector.shape_cast %619 : vector<1x32x72xbf16> to vector<32x72xbf16>
    %cst_489 = arith.constant dense<0.000000e+00> : vector<8x72xf32>
    %621 = tpu.matmul %618, %620, %cst_489 {dimension_numbers = #tpu.dot_dimension_numbers<[1], [0], [0], [1], [0, 0, 1, 1], [], []>} : vector<8x32xbf16>, vector<32x72xbf16>, vector<8x72xf32> -> vector<8x72xf32>
    %c5_490 = arith.constant 5 : index
    %c0_491 = arith.constant 0 : index
    %c0_492 = arith.constant 0 : index
    %622 = vector.load %arg11[%c5_490, %c0_491, %c0_492] : memref<6x1x72xf32, #tpu.memory_space<vmem>>, vector<1x1x72xf32>
    %623 = vector.shape_cast %622 : vector<1x1x72xf32> to vector<1x72xf32>
    %624 = vector.broadcast %623 : vector<1x72xf32> to vector<8x72xf32>
    %625 = arith.addf %621, %624 : vector<8x72xf32>
    %c0_493 = arith.constant 0 : index
    %c0_494 = arith.constant 0 : index
    %626 = vector.load %arg21[%c0_493, %c0_494] : memref<8x72xf32, #tpu.memory_space<vmem>>, vector<8x72xf32>
    %627 = arith.addf %626, %625 : vector<8x72xf32>
    %c0_495 = arith.constant 0 : index
    %c0_496 = arith.constant 0 : index
    %628 = vector.load %arg21[%c0_495, %c0_496] : memref<8x72xf32, #tpu.memory_space<vmem>>, vector<8x72xf32>
    tpu.vector_store %arg21[%c0_495, %c0_496], %627 {strides = array<i32>} : memref<8x72xf32, #tpu.memory_space<vmem>>, vector<8x72xf32>,
    %c0_497 = arith.constant 0 : index
    %c0_498 = arith.constant 0 : index
    %629 = vector.load %arg21[%c0_497, %c0_498] : memref<8x72xf32, #tpu.memory_space<vmem>>, vector<8x72xf32>
    %cst_499 = arith.constant 5.000000e-01 : f32
    %630 = vector.broadcast %cst_499 : f32 to vector<8x72xf32>
    %631 = arith.mulf %630, %629 : vector<8x72xf32>
    %cst_500 = arith.constant 4.471500e-02 : f32
    %632 = vector.broadcast %cst_500 : f32 to vector<8x72xf32>
    %633 = arith.mulf %632, %629 : vector<8x72xf32>
    %634 = arith.mulf %633, %629 : vector<8x72xf32>
    %635 = arith.mulf %634, %629 : vector<8x72xf32>
    %636 = arith.addf %629, %635 : vector<8x72xf32>
    %cst_501 = arith.constant 0.797884583 : f32
    %637 = vector.broadcast %cst_501 : f32 to vector<8x72xf32>
    %638 = arith.mulf %637, %636 : vector<8x72xf32>
    %639 = math.tanh %638 : vector<8x72xf32>
    %cst_502 = arith.constant 1.000000e+00 : f32
    %640 = vector.broadcast %cst_502 : f32 to vector<8x72xf32>
    %641 = arith.addf %640, %639 : vector<8x72xf32>
    %642 = arith.mulf %631, %641 : vector<8x72xf32>
    %643 = arith.truncf %642 : vector<8x72xf32> to vector<8x72xbf16>
    %c0_503 = arith.constant 0 : index
    %c0_504 = arith.constant 0 : index
    %644 = vector.load %arg12[%c0_503, %c0_504] : memref<72x64xbf16, #tpu.memory_space<vmem>>, vector<72x64xbf16>
    %cst_505 = arith.constant dense<0.000000e+00> : vector<8x64xf32>
    %645 = tpu.matmul %643, %644, %cst_505 {dimension_numbers = #tpu.dot_dimension_numbers<[1], [0], [0], [1], [0, 0, 1, 1], [], []>} : vector<8x72xbf16>, vector<72x64xbf16>, vector<8x64xf32> -> vector<8x64xf32>
    %c0_506 = arith.constant 0 : index
    %c0_507 = arith.constant 0 : index
    %646 = vector.load %arg13[%c0_506, %c0_507] : memref<1x64xf32, #tpu.memory_space<vmem>>, vector<1x64xf32>
    %647 = vector.broadcast %646 : vector<1x64xf32> to vector<8x64xf32>
    %648 = arith.addf %645, %647 : vector<8x64xf32>
    %cst_508 = arith.constant 5.000000e-01 : f32
    %649 = vector.broadcast %cst_508 : f32 to vector<8x64xf32>
    %650 = arith.mulf %649, %648 : vector<8x64xf32>
    %cst_509 = arith.constant 4.471500e-02 : f32
    %651 = vector.broadcast %cst_509 : f32 to vector<8x64xf32>
    %652 = arith.mulf %651, %648 : vector<8x64xf32>
    %653 = arith.mulf %652, %648 : vector<8x64xf32>
    %654 = arith.mulf %653, %648 : vector<8x64xf32>
    %655 = arith.addf %648, %654 : vector<8x64xf32>
    %cst_510 = arith.constant 0.797884583 : f32
    %656 = vector.broadcast %cst_510 : f32 to vector<8x64xf32>
    %657 = arith.mulf %656, %655 : vector<8x64xf32>
    %658 = math.tanh %657 : vector<8x64xf32>
    %cst_511 = arith.constant 1.000000e+00 : f32
    %659 = vector.broadcast %cst_511 : f32 to vector<8x64xf32>
    %660 = arith.addf %659, %658 : vector<8x64xf32>
    %661 = arith.mulf %650, %660 : vector<8x64xf32>
    %c0_512 = arith.constant 0 : index
    %c0_513 = arith.constant 0 : index
    %662 = vector.load %arg15[%c0_512, %c0_513] : memref<8x1xf32, #tpu.memory_space<vmem>>, vector<8x1xf32>
    %663 = vector.broadcast %662 : vector<8x1xf32> to vector<8x64xf32>
    %664 = arith.mulf %661, %663 : vector<8x64xf32>
    %cst_514 = arith.constant dense<0.000000e+00> : vector<64xf32>
    %665 = vector.multi_reduction <add>, %664, %cst_514 [0] : vector<8x64xf32> to vector<64xf32>
    %666 = vector.shape_cast %665 : vector<64xf32> to vector<1x64xf32>
    %c0_515 = arith.constant 0 : index
    %c0_516 = arith.constant 0 : index
    %667 = vector.load %arg14[%c0_515, %c0_516] : memref<1x64xf32, #tpu.memory_space<vmem>>, vector<1x64xf32>
    %668 = arith.mulf %666, %667 : vector<1x64xf32>
    %cst_517 = arith.constant dense<0.000000e+00> : vector<1xf32>
    %669 = vector.multi_reduction <add>, %668, %cst_517 [1] : vector<1x64xf32> to vector<1xf32>
    %670 = vector.shape_cast %669 : vector<1xf32> to vector<1x1xf32>
    %c0_518 = arith.constant 0 : index
    %c0_519 = arith.constant 0 : index
    %671 = vector.load %arg16[%c0_518, %c0_519] : memref<1x1xf32, #tpu.memory_space<vmem>>, vector<1x1xf32>
    %672 = arith.addf %670, %671 : vector<1x1xf32>
    %c0_520 = arith.constant 0 : index
    %c0_521 = arith.constant 0 : index
    %c0_522 = arith.constant 0 : index
    %673 = vector.load %arg17[%c0_520, %c0_521, %c0_522] : memref<1x1x1xf32, #tpu.memory_space<vmem>>, vector<1x1x1xf32>
    %674 = vector.shape_cast %673 : vector<1x1x1xf32> to vector<1x1xf32>
    %675 = vector.shape_cast %672 : vector<1x1xf32> to vector<1x1x1xf32>
    tpu.vector_store %arg17[%c0_520, %c0_521, %c0_522], %675 {strides = array<i32>} : memref<1x1x1xf32, #tpu.memory_space<vmem>>, vector<1x1x1xf32>,
    return
  }
  func.func @transform_0(%arg0: i32) -> (i32, i32, i32) {
    %c0_i32 = arith.constant 0 : i32
    %c0_i32_0 = arith.constant 0 : i32
    %c0_i32_1 = arith.constant 0 : i32
    return %arg0, %c0_i32, %c0_i32_0 : i32, i32, i32
  }
  func.func @transform_1(%arg0: i32) -> (i32, i32) {
    %c0_i32 = arith.constant 0 : i32
    %c0_i32_0 = arith.constant 0 : i32
    %c0_i32_1 = arith.constant 0 : i32
    return %c0_i32, %c0_i32_0 : i32, i32
  }
  func.func @transform_2(%arg0: i32) -> (i32, i32) {
    %c0_i32 = arith.constant 0 : i32
    %c0_i32_0 = arith.constant 0 : i32
    %c0_i32_1 = arith.constant 0 : i32
    return %c0_i32, %c0_i32_0 : i32, i32
  }
  func.func @transform_3(%arg0: i32) -> (i32, i32, i32) {
    %c0_i32 = arith.constant 0 : i32
    %c0_i32_0 = arith.constant 0 : i32
    %c0_i32_1 = arith.constant 0 : i32
    %c0_i32_2 = arith.constant 0 : i32
    return %c0_i32, %c0_i32_0, %c0_i32_1 : i32, i32, i32
  }
  func.func @transform_4(%arg0: i32) -> (i32, i32) {
    %c0_i32 = arith.constant 0 : i32
    %c0_i32_0 = arith.constant 0 : i32
    %c0_i32_1 = arith.constant 0 : i32
    return %c0_i32, %c0_i32_0 : i32, i32
  }
  func.func @transform_5(%arg0: i32) -> (i32, i32, i32) {
    %c0_i32 = arith.constant 0 : i32
    %c0_i32_0 = arith.constant 0 : i32
    %c0_i32_1 = arith.constant 0 : i32
    %c0_i32_2 = arith.constant 0 : i32
    return %c0_i32, %c0_i32_0, %c0_i32_1 : i32, i32, i32
  }
  func.func @transform_6(%arg0: i32) -> (i32, i32) {
    %c0_i32 = arith.constant 0 : i32
    %c0_i32_0 = arith.constant 0 : i32
    %c0_i32_1 = arith.constant 0 : i32
    return %c0_i32, %c0_i32_0 : i32, i32
  }
  func.func @transform_7(%arg0: i32) -> (i32, i32, i32, i32) {
    %c0_i32 = arith.constant 0 : i32
    %c0_i32_0 = arith.constant 0 : i32
    %c0_i32_1 = arith.constant 0 : i32
    %c0_i32_2 = arith.constant 0 : i32
    %c0_i32_3 = arith.constant 0 : i32
    return %c0_i32, %c0_i32_0, %c0_i32_1, %c0_i32_2 : i32, i32, i32, i32
  }
  func.func @transform_8(%arg0: i32) -> (i32, i32, i32) {
    %c0_i32 = arith.constant 0 : i32
    %c0_i32_0 = arith.constant 0 : i32
    %c0_i32_1 = arith.constant 0 : i32
    %c0_i32_2 = arith.constant 0 : i32
    return %c0_i32, %c0_i32_0, %c0_i32_1 : i32, i32, i32
  }
  func.func @transform_9(%arg0: i32) -> (i32, i32, i32) {
    %c0_i32 = arith.constant 0 : i32
    %c0_i32_0 = arith.constant 0 : i32
    %c0_i32_1 = arith.constant 0 : i32
    %c0_i32_2 = arith.constant 0 : i32
    return %c0_i32, %c0_i32_0, %c0_i32_1 : i32, i32, i32
  }
  func.func @transform_10(%arg0: i32) -> (i32, i32, i32) {
    %c0_i32 = arith.constant 0 : i32
    %c0_i32_0 = arith.constant 0 : i32
    %c0_i32_1 = arith.constant 0 : i32
    %c0_i32_2 = arith.constant 0 : i32
    return %c0_i32, %c0_i32_0, %c0_i32_1 : i32, i32, i32
  }
  func.func @transform_11(%arg0: i32) -> (i32, i32) {
    %c0_i32 = arith.constant 0 : i32
    %c0_i32_0 = arith.constant 0 : i32
    %c0_i32_1 = arith.constant 0 : i32
    return %c0_i32, %c0_i32_0 : i32, i32
  }
  func.func @transform_12(%arg0: i32) -> (i32, i32) {
    %c0_i32 = arith.constant 0 : i32
    %c0_i32_0 = arith.constant 0 : i32
    %c0_i32_1 = arith.constant 0 : i32
    return %c0_i32, %c0_i32_0 : i32, i32
  }
  func.func @transform_13(%arg0: i32) -> (i32, i32) {
    %c0_i32 = arith.constant 0 : i32
    %c0_i32_0 = arith.constant 0 : i32
    %c0_i32_1 = arith.constant 0 : i32
    return %c0_i32, %c0_i32_0 : i32, i32
  }
  func.func @transform_14(%arg0: i32) -> (i32, i32) {
    %c0_i32 = arith.constant 0 : i32
    %c0_i32_0 = arith.constant 0 : i32
    %c0_i32_1 = arith.constant 0 : i32
    return %c0_i32, %c0_i32_0 : i32, i32
  }
  func.func @transform_15(%arg0: i32) -> (i32, i32) {
    %c0_i32 = arith.constant 0 : i32
    %c0_i32_0 = arith.constant 0 : i32
    %c0_i32_1 = arith.constant 0 : i32
    return %c0_i32, %c0_i32_0 : i32, i32
  }
  func.func @transform_16(%arg0: i32) -> (i32, i32, i32) {
    %c0_i32 = arith.constant 0 : i32
    %c0_i32_0 = arith.constant 0 : i32
    %c0_i32_1 = arith.constant 0 : i32
    return %arg0, %c0_i32, %c0_i32_0 : i32, i32, i32
  }
}

</mosaic_0001>

<bundles_post_ra>
// kernel: basenji_forward.1
= control target key start
LH: loop header
LB: loop body
LE: loop exit
PB: predicated region body
PF: predicated region fallthrough
CT: control target
= control target key end

     0   :  { %s11362_s0 = inlined_call_operand.hbm [shape: bf16[2,1024,75], index: 0, kind: input, shape index: {}]   ;;  %s11363_s1 = inlined_call_operand.hbm [shape: bf16[75,64], index: 1, kind: input, shape index: {}]   ;;  %s11364_s2 = inlined_call_operand.hbm [shape: f32[1,64], index: 2, kind: input, shape index: {}]   ;;  %s11365_s3 = inlined_call_operand.hbm [shape: bf16[5,64,64], index: 3, kind: input, shape index: {}]   ;;  %s11366_s4 = inlined_call_operand.hbm [shape: f32[1,64], index: 4, kind: input, shape index: {}]   ;;  %s11367_s5 = inlined_call_operand.hbm [shape: bf16[5,64,72], index: 5, kind: input, shape index: {}]   ;;  %s11368_s6 = inlined_call_operand.hbm [shape: f32[1,72], index: 6, kind: input, shape index: {}]   ;;  %s11369_s7 = inlined_call_operand.hbm [shape: bf16[6,3,72,32], index: 7, kind: input, shape index: {}]   ;;  %s11370_s8 = inlined_call_operand.hbm [shape: f32[6,1,32], index: 8, kind: input, shape index: {}]   ;;  %s11371_s9 = inlined_call_operand.hbm [shape: bf16[6,32,72], index: 9, kind: input, shape index: {}]   ;;  %s11372_s10 = inlined_call_operand.hbm [shape: f32[6,1,72], index: 10, kind: input, shape index: {}]   ;;  %s11373_s11 = inlined_call_operand.hbm [shape: bf16[72,64], index: 11, kind: input, shape index: {}]   ;;  %s11374_s12 = inlined_call_operand.hbm [shape: f32[1,64], index: 12, kind: input, shape index: {}]   ;;  %s11375_s13 = inlined_call_operand.hbm [shape: f32[1,64], index: 13, kind: input, shape index: {}]   ;;  %s11376_s14 = inlined_call_operand.hbm [shape: f32[8,1], index: 14, kind: input, shape index: {}]   ;;  %s11377_s15 = inlined_call_operand.<no memory space> [shape: f32[1,1], index: 15, kind: input, shape index: {}]   ;;  %s11378_s16 = inlined_call_operand.hbm [shape: f32[2,1,1], index: 16, kind: output, shape index: {}]  }
   0x1   :  { %11392 = sst [smem:[#allocation49_spill]] %s11362_s0  ;;  %v21_v0 = vstv %s11377_s15 }
   0x2   :  { %11393 = sst [smem:[#allocation50_spill]] %s11363_s1  ;;  %22 = vst [vmem:[#allocation9] sm:$0x1] %v21_v0 }
   0x3   :  { %11394 = sst [smem:[#allocation51_spill]] %s11364_s2 }
   0x4   :  { %11395 = sst [smem:[#allocation52_spill]] %s11378_s16 }
   0x5   :  { %23 = vsyncpa [#allocation11], 0 }
   0x6   :  { %25 = vsyncpa [#allocation11 + $0x1], 0 }
   0x7   :  { %26 = vsyncpa [#allocation14], 0 }
   0x8   :  { %27 = vsyncpa [#allocation17], 0 }
   0x9   :  { %28 = vsyncpa [#allocation20], 0 }
   0xa   :  { %29 = vsyncpa [#allocation23], 0 }
   0xb   :  { %30 = vsyncpa [#allocation26], 0 }
   0xc   :  { %31 = vsyncpa [#allocation29], 0 }
   0xd   :  { %32 = vsyncpa [#allocation32], 0 }
   0xe   :  { %33 = vsyncpa [#allocation12], 0 }
   0xf   :  { %35 = vsyncpa [#allocation12 + $0x1], 0  ;;  %s9703_s23 = smov 0   ;;  %s9705_s24 = smov 0  }
  0x10   :  { %s9707_s25 = smov 0   ;;  %s9709_s26 = smov 0  }
  0x11 LB: > { %11396 = sst [smem:[#allocation44_spill]] %s9577_s23  ;;  %s9591_s15 = smov [#allocation13]   ;;  %s9589_s26 = sphi %s9709_s26, %s11445_s26   ;;  %s9585_s25 = sphi %s9707_s25, %s11444_s25   ;;  %s9581_s24 = sphi %s9705_s24, %s11443_s24   ;;  %s9577_s23 = sphi %s9703_s23, %s11442_s23  }
  0x12   : > { %11397 = sst [smem:[#allocation45_spill]] %s9581_s24  ;;  %s425_s27 = sshll.u32 %s9591_s15, 4  ;;  %s9729_s27 = int_to_ptr.vmem [resolvable:$true] %s425_s27 }
  0x13   : > { %11398 = sst [smem:[#allocation46_spill]] %s9585_s25  ;;  %s9724_s28 = sadd.s32 4294967295, %s9589_s26  }
  0x14   : > { %11399 = sst [smem:[#allocation47_spill]] %s9724_s28  ;;  %p7101_p0 = scmp.ge.s32.totalorder %s9589_s26, 1 }
  0x15   : > { %p11387_p1 = scmp.eq.s32.totalorder %s9724_s28, 0  ;;  %p413_p2 = scmp.lt.s32.totalorder %s9589_s26, 3 }
  0x16   : > { %s9592_s30 = smov [#allocation16]   ;;  %s9593_s18 = smov [#allocation19]  }
  0x17   : > { %p9731_p3 = pnand %p7101_p0, %p413_p2  ;;  %s449_s0 = sshll.u32 %s9592_s30, 4  ;;  %s9744_s0 = int_to_ptr.vmem [resolvable:$true] %s449_s0 }
  0x18   : > { %s473_s19 = sshll.u32 %s9593_s18, 4  ;;  %s11403_s1 = sld [smem:[#allocation50_spill]]  ;;  %s9746_s19 = int_to_ptr.vmem [resolvable:$true] %s473_s19 }
  0x19   : > { %s11400_s29 = scalar_select %p9731_p3, 1, 0 }
  0x1a   : > { %p8637_p5 = pneg %p9731_p3 }
  0x1b   : > { %11401 = sst [smem:[#allocation48_spill]] %s11400_s29 }
  0x1c   : > { %p9740_p6 = pnand %p8637_p5, %p11387_p1 }
  0x1e   : > { %s9073_s22 = scalar_lea.hbm %s11403_s1, 640  ;;  %p9756_p8 = pneg %p9740_p6 }
  0x1f   : > { %p9074_p7 = scmp.ne.s32.totalorder %s11403_s1, %s9073_s22  ;;  %p9080_p11 = scmp.lt.u32.totalorder %s9073_s22, %s11403_s1 }
  0x21   : > { %p9076_p9 = pnand %p9756_p8, %p9074_p7 }
  0x23   : > { %p9077_p10 = pneg %p9076_p9 }
  0x25   : > { %p9082_p12 = pnand %p9080_p11, %p9077_p10 }
  0x27   : > { %9085 = shalt.err (!%p9082_p12)
}
  0x28   : > { %s9086_s16 = scalar_lea.vmem %s9729_s27, 640  ;;  %p9094_p5 = scmp.lt.s32.totalorder %s9729_s27, %s9729_s27 }
  0x29   : > { %p9087_p13 = scmp.ne.s32.totalorder %s9729_s27, %s9086_s16  ;;  %p9095_p4 = scmp.lt.s32.totalorder %s9086_s16, %s9086_s16 }
  0x2b   : > { %p9089_p0 = pnand %p9087_p13, %p9756_p8  ;;  %p9096_p7 = por %p9095_p4, %p9094_p5 }
  0x2d   : > { %p9090_p2 = pneg %p9089_p0 }
  0x2f   : > { %p9097_p9 = pnand %p9096_p7, %p9090_p2 }
  0x31   : > { %9100 = shalt.err (!%p9097_p9)
}
  0x32   : > { %s11389_s20 = smov 64   ;;  %s11390_s29 = smov 4  }
  0x33   : > { %8640 = dma.hbm_to_vmem [thread:$0]  (!%p9740_p6), %s11403_s1, 640, %s9729_s27, [#allocation14], %s11389_s20, %s11389_s20, %s11390_s29  }
  0x34   : > { %s9101_s16 = scalar_lea.hbm %s11365_s3, 2560 }
  0x35   : > { %p9102_p4 = scmp.ne.s32.totalorder %s11365_s3, %s9101_s16  ;;  %p9108_p12 = scmp.lt.u32.totalorder %s9101_s16, %s11365_s3 }
  0x37   : > { %p9104_p10 = pnand %p9102_p4, %p9756_p8 }
  0x39   : > { %p9105_p11 = pneg %p9104_p10 }
  0x3b   : > { %p9110_p13 = pnand %p9108_p12, %p9105_p11 }
  0x3d   : > { %9113 = shalt.err (!%p9110_p13)
}
  0x3e   : > { %s9114_s27 = scalar_lea.vmem %s9744_s0, 2560  ;;  %p9122_p7 = scmp.lt.s32.totalorder %s9744_s0, %s9744_s0 }
  0x3f   : > { %p9115_p0 = scmp.ne.s32.totalorder %s9744_s0, %s9114_s27  ;;  %p9123_p9 = scmp.lt.s32.totalorder %s9114_s27, %s9114_s27 }
  0x41   : > { %p9117_p2 = pnand %p9115_p0, %p9756_p8  ;;  %p9124_p4 = por %p9123_p9, %p9122_p7 }
  0x43   : > { %p9118_p5 = pneg %p9117_p2 }
  0x45   : > { %p9125_p10 = pnand %p9124_p4, %p9118_p5 }
  0x47   : > { %9128 = shalt.err (!%p9125_p10)
}
  0x48   : > { %8646 = dma.hbm_to_vmem [thread:$0]  (!%p9740_p6), %s11365_s3, 2560, %s9744_s0, [#allocation17], %s11389_s20, %s11389_s20, %s11390_s29  }
  0x49   : > { %s9129_s21 = scalar_lea.hbm %s11367_s5, 2560 }
  0x4a   : > { %p9130_p11 = scmp.ne.s32.totalorder %s11367_s5, %s9129_s21  ;;  %p9136_p0 = scmp.lt.u32.totalorder %s9129_s21, %s11367_s5 }
  0x4c   : > { %p9132_p12 = pnand %p9130_p11, %p9756_p8 }
  0x4e   : > { %p9133_p13 = pneg %p9132_p12 }
  0x50   : > { %p9138_p2 = pnand %p9136_p0, %p9133_p13 }
  0x52   : > { %9141 = shalt.err (!%p9138_p2)
}
  0x53   : > { %s9142_s0 = scalar_lea.vmem %s9746_s19, 2560  ;;  %p9150_p4 = scmp.lt.s32.totalorder %s9746_s19, %s9746_s19 }
  0x54   : > { %p9143_p5 = scmp.ne.s32.totalorder %s9746_s19, %s9142_s0  ;;  %p9151_p10 = scmp.lt.s32.totalorder %s9142_s0, %s9142_s0 }
  0x56   : > { %p9145_p7 = pnand %p9143_p5, %p9756_p8  ;;  %p9152_p11 = por %p9151_p10, %p9150_p4 }
  0x58   : > { %p9146_p9 = pneg %p9145_p7 }
  0x5a   : > { %p9153_p12 = pnand %p9152_p11, %p9146_p9 }
  0x5c   : > { %9156 = shalt.err (!%p9153_p12)
}
  0x5d   : > { %8652 = dma.hbm_to_vmem [thread:$0]  (!%p9740_p6), %s11367_s5, 2560, %s9746_s19, [#allocation20], %s11389_s20, %s11389_s20, %s11390_s29  }
  0x5e   : > { %s9596_s24 = smov [#allocation22]   ;;  %s9597_s28 = smov [#allocation25]  }
  0x5f   : > { %s497_s25 = sshll.u32 %s9596_s24, 4  ;;  %s523_s21 = sshll.u32 %s9597_s28, 4  ;;  %s498_s25 = int_to_ptr.vmem [resolvable:$true] %s497_s25  ;;  %s524_s21 = int_to_ptr.vmem [resolvable:$true] %s523_s21 }
  0x60   : > { %s9157_s18 = scalar_lea.hbm %s11369_s7, 10368 }
  0x61   : > { %p9158_p13 = scmp.ne.s32.totalorder %s11369_s7, %s9157_s18  ;;  %p9164_p5 = scmp.lt.u32.totalorder %s9157_s18, %s11369_s7 }
  0x63   : > { %p9160_p0 = pnand %p9158_p13, %p9756_p8 }
  0x65   : > { %p9161_p2 = pneg %p9160_p0 }
  0x67   : > { %p9166_p7 = pnand %p9164_p5, %p9161_p2 }
  0x69   : > { %9169 = shalt.err (!%p9166_p7)
}
  0x6a   : > { %s9170_s19 = scalar_lea.vmem %s498_s25, 10368  ;;  %p9178_p11 = scmp.lt.s32.totalorder %s498_s25, %s498_s25 }
  0x6b   : > { %p9171_p9 = scmp.ne.s32.totalorder %s498_s25, %s9170_s19  ;;  %p9179_p12 = scmp.lt.s32.totalorder %s9170_s19, %s9170_s19 }
  0x6d   : > { %p9173_p4 = pnand %p9171_p9, %p9756_p8  ;;  %p9180_p1 = por %p9179_p12, %p9178_p11 }
  0x6f   : > { %p9174_p10 = pneg %p9173_p4 }
  0x71   : > { %p9181_p3 = pnand %p9180_p1, %p9174_p10 }
  0x73   : > { %9184 = shalt.err (!%p9181_p3)
}
  0x74   : > { %8658 = dma.hbm_to_vmem [thread:$0]  (!%p9740_p6), %s11369_s7, 10368, %s498_s25, [#allocation23], %s11389_s20, %s11389_s20, %s11390_s29  }
  0x75   : > { %s9185_s22 = scalar_lea.hbm %s11371_s9, 1536 }
  0x76   : > { %p9186_p1 = scmp.ne.s32.totalorder %s11371_s9, %s9185_s22  ;;  %p9192_p0 = scmp.lt.u32.totalorder %s9185_s22, %s11371_s9 }
  0x78   : > { %p9188_p3 = pnand %p9186_p1, %p9756_p8 }
  0x7a   : > { %p9189_p13 = pneg %p9188_p3 }
  0x7c   : > { %p9194_p2 = pnand %p9192_p0, %p9189_p13 }
  0x7e   : > { %9197 = shalt.err (!%p9194_p2)
}
  0x7f   : > { %s9198_s27 = scalar_lea.vmem %s524_s21, 1536  ;;  %p9206_p4 = scmp.lt.s32.totalorder %s524_s21, %s524_s21 }
  0x80   : > { %p9199_p5 = scmp.ne.s32.totalorder %s524_s21, %s9198_s27  ;;  %p9207_p10 = scmp.lt.s32.totalorder %s9198_s27, %s9198_s27 }
  0x82   : > { %p9201_p7 = pnand %p9199_p5, %p9756_p8  ;;  %p9208_p11 = por %p9207_p10, %p9206_p4 }
  0x84   : > { %p9202_p9 = pneg %p9201_p7 }
  0x86   : > { %p9209_p12 = pnand %p9208_p11, %p9202_p9 }
  0x88   : > { %9212 = shalt.err (!%p9209_p12)
}
  0x89   : > { %8664 = dma.hbm_to_vmem [thread:$0]  (!%p9740_p6), %s11371_s9, 1536, %s524_s21, [#allocation26], %s11389_s20, %s11389_s20, %s11390_s29  }
  0x8a   : > { %s9598_s1 = smov [#allocation28]   ;;  %s9599_s24 = smov [#allocation31]  }
  0x8b   : > { %s549_s23 = sshll.u32 %s9598_s1, 4  ;;  %s574_s28 = sshll.u32 %s9599_s24, 4  ;;  %s550_s23 = int_to_ptr.vmem [resolvable:$true] %s549_s23  ;;  %s575_s28 = int_to_ptr.vmem [resolvable:$true] %s574_s28 }
  0x8c   : > { %s9213_s18 = scalar_lea.hbm %s11373_s11, 576 }
  0x8d   : > { %p9214_p1 = scmp.ne.s32.totalorder %s11373_s11, %s9213_s18  ;;  %p9220_p0 = scmp.lt.u32.totalorder %s9213_s18, %s11373_s11 }
  0x8f   : > { %p9216_p3 = pnand %p9214_p1, %p9756_p8 }
  0x91   : > { %p9217_p13 = pneg %p9216_p3 }
  0x93   : > { %p9222_p2 = pnand %p9220_p0, %p9217_p13 }
  0x95   : > { %9225 = shalt.err (!%p9222_p2)
}
  0x96   : > { %s9226_s21 = scalar_lea.vmem %s550_s23, 576  ;;  %p9234_p4 = scmp.lt.s32.totalorder %s550_s23, %s550_s23 }
  0x97   : > { %p9227_p5 = scmp.ne.s32.totalorder %s550_s23, %s9226_s21  ;;  %p9235_p10 = scmp.lt.s32.totalorder %s9226_s21, %s9226_s21 }
  0x99   : > { %p9229_p7 = pnand %p9227_p5, %p9756_p8  ;;  %p9236_p11 = por %p9235_p10, %p9234_p4 }
  0x9b   : > { %p9230_p9 = pneg %p9229_p7 }
  0x9d   : > { %p9237_p12 = pnand %p9236_p11, %p9230_p9 }
  0x9f   : > { %9240 = shalt.err (!%p9237_p12)
}
  0xa0   : > { %8670 = dma.hbm_to_vmem [thread:$0]  (!%p9740_p6), %s11373_s11, 576, %s550_s23, [#allocation29], %s11389_s20, %s11389_s20, %s11390_s29  }
  0xa1   : > { %s9241_s15 = scalar_lea.hbm %s11375_s13, 16 }
  0xa2   : > { %p9242_p1 = scmp.ne.s32.totalorder %s11375_s13, %s9241_s15  ;;  %p9248_p0 = scmp.lt.u32.totalorder %s9241_s15, %s11375_s13 }
  0xa4   : > { %p9244_p3 = pnand %p9242_p1, %p9756_p8 }
  0xa6   : > { %p9245_p13 = pneg %p9244_p3 }
  0xa8   : > { %p9250_p2 = pnand %p9248_p0, %p9245_p13 }
  0xaa   : > { %9253 = shalt.err (!%p9250_p2)
}
  0xab   : > { %s9254_s25 = scalar_lea.vmem %s575_s28, 16  ;;  %s9261_s23 = scalar_lea.vmem %s575_s28, 32 }
  0xac   : > { %p9255_p5 = scmp.ne.s32.totalorder %s575_s28, %s9254_s25  ;;  %p9262_p4 = scmp.lt.s32.totalorder %s575_s28, %s575_s28 }
  0xad   : > { %p9263_p10 = scmp.lt.s32.totalorder %s9261_s23, %s9254_s25 }
  0xae   : > { %p9257_p7 = pnand %p9255_p5, %p9756_p8 }
  0xaf   : > { %p9264_p11 = por %p9263_p10, %p9262_p4 }
  0xb0   : > { %p9258_p9 = pneg %p9257_p7 }
  0xb2   : > { %p9265_p12 = pnand %p9264_p11, %p9258_p9 }
  0xb4   : > { %9268 = shalt.err (!%p9265_p12)
}
  0xb5   : > { %8676 = dma.hbm_to_vmem [thread:$0]  (!%p9740_p6), %s11375_s13, 16, %s575_s28, [#allocation32]  }
  0xb6   : > { %s9600_s1 = smov [#allocation15]   ;;  %s9601_s22 = smov [#allocation18]  }
  0xb7   : > { %s439_s24 = sshll.u32 %s9600_s1, 4  ;;  %s463_s15 = sshll.u32 %s9601_s22, 4  ;;  %s440_s24 = int_to_ptr.vmem [resolvable:$true] %s439_s24  ;;  %s464_s15 = int_to_ptr.vmem [resolvable:$true] %s463_s15 }
  0xb8   : > { %s11405_s2 = sld [smem:[#allocation51_spill]] }
  0xbe   : > { %s9269_s0 = scalar_lea.hbm %s11405_s2, 16 }
  0xbf   : > { %p9270_p1 = scmp.ne.s32.totalorder %s11405_s2, %s9269_s0  ;;  %p9276_p0 = scmp.lt.u32.totalorder %s9269_s0, %s11405_s2 }
  0xc1   : > { %p9272_p3 = pnand %p9270_p1, %p9756_p8 }
  0xc3   : > { %p9273_p13 = pneg %p9272_p3 }
  0xc5   : > { %p9278_p2 = pnand %p9276_p0, %p9273_p13 }
  0xc7   : > { %9281 = shalt.err (!%p9278_p2)
}
  0xc8   : > { %s9282_s28 = scalar_lea.vmem %s440_s24, 16  ;;  %s9289_s19 = scalar_lea.vmem %s440_s24, 32 }
  0xc9   : > { %p9283_p5 = scmp.ne.s32.totalorder %s440_s24, %s9282_s28  ;;  %p9290_p4 = scmp.lt.s32.totalorder %s440_s24, %s440_s24 }
  0xca   : > { %p9291_p10 = scmp.lt.s32.totalorder %s9289_s19, %s9282_s28 }
  0xcb   : > { %p9285_p7 = pnand %p9283_p5, %p9756_p8 }
  0xcc   : > { %p9292_p11 = por %p9291_p10, %p9290_p4 }
  0xcd   : > { %p9286_p9 = pneg %p9285_p7 }
  0xcf   : > { %p9293_p12 = pnand %p9292_p11, %p9286_p9 }
  0xd1   : > { %9296 = shalt.err (!%p9293_p12)
}
  0xd2   : > { %8643 = dma.hbm_to_vmem [thread:$0]  (!%p9740_p6), %s11405_s2, 16, %s440_s24, [#allocation14]  }
  0xd3   : > { %s9297_s0 = scalar_lea.hbm %s11366_s4, 16 }
  0xd4   : > { %p9298_p1 = scmp.ne.s32.totalorder %s11366_s4, %s9297_s0  ;;  %p9304_p0 = scmp.lt.u32.totalorder %s9297_s0, %s11366_s4 }
  0xd6   : > { %p9300_p3 = pnand %p9298_p1, %p9756_p8 }
  0xd8   : > { %p9301_p13 = pneg %p9300_p3 }
  0xda   : > { %p9306_p2 = pnand %p9304_p0, %p9301_p13 }
  0xdc   : > { %9309 = shalt.err (!%p9306_p2)
}
  0xdd   : > { %s9310_s28 = scalar_lea.vmem %s464_s15, 16  ;;  %s9317_s24 = scalar_lea.vmem %s464_s15, 32 }
  0xde   : > { %p9311_p5 = scmp.ne.s32.totalorder %s464_s15, %s9310_s28  ;;  %p9318_p4 = scmp.lt.s32.totalorder %s464_s15, %s464_s15 }
  0xdf   : > { %p9319_p10 = scmp.lt.s32.totalorder %s9317_s24, %s9310_s28 }
  0xe0   : > { %p9313_p7 = pnand %p9311_p5, %p9756_p8 }
  0xe1   : > { %p9320_p11 = por %p9319_p10, %p9318_p4 }
  0xe2   : > { %p9314_p9 = pneg %p9313_p7 }
  0xe4   : > { %p9321_p12 = pnand %p9320_p11, %p9314_p9 }
  0xe6   : > { %9324 = shalt.err (!%p9321_p12)
}
  0xe7   : > { %8649 = dma.hbm_to_vmem [thread:$0]  (!%p9740_p6), %s11366_s4, 16, %s464_s15, [#allocation17]  }
  0xe8   : > { %s9602_s22 = smov [#allocation21]   ;;  %s9603_s16 = smov [#allocation24]  }
  0xe9   : > { %s487_s18 = sshll.u32 %s9602_s22, 4  ;;  %s510_s0 = sshll.u32 %s9603_s16, 4  ;;  %s488_s18 = int_to_ptr.vmem [resolvable:$true] %s487_s18  ;;  %s511_s0 = int_to_ptr.vmem [resolvable:$true] %s510_s0 }
  0xea   : > { %s9325_s23 = scalar_lea.hbm %s11368_s6, 16 }
  0xeb   : > { %p9326_p1 = scmp.ne.s32.totalorder %s11368_s6, %s9325_s23  ;;  %p9332_p0 = scmp.lt.u32.totalorder %s9325_s23, %s11368_s6 }
  0xed   : > { %p9328_p3 = pnand %p9326_p1, %p9756_p8 }
  0xef   : > { %p9329_p13 = pneg %p9328_p3 }
  0xf1   : > { %p9334_p2 = pnand %p9332_p0, %p9329_p13 }
  0xf3   : > { %9337 = shalt.err (!%p9334_p2)
}
  0xf4   : > { %s9338_s15 = scalar_lea.vmem %s488_s18, 16  ;;  %s9345_s1 = scalar_lea.vmem %s488_s18, 32 }
  0xf5   : > { %p9339_p5 = scmp.ne.s32.totalorder %s488_s18, %s9338_s15  ;;  %p9346_p4 = scmp.lt.s32.totalorder %s488_s18, %s488_s18 }
  0xf6   : > { %p9347_p10 = scmp.lt.s32.totalorder %s9345_s1, %s9338_s15 }
  0xf7   : > { %p9341_p7 = pnand %p9339_p5, %p9756_p8 }
  0xf8   : > { %p9348_p11 = por %p9347_p10, %p9346_p4 }
  0xf9   : > { %p9342_p9 = pneg %p9341_p7 }
  0xfb   : > { %p9349_p12 = pnand %p9348_p11, %p9342_p9 }
  0xfd   : > { %9352 = shalt.err (!%p9349_p12)
}
  0xfe   : > { %8655 = dma.hbm_to_vmem [thread:$0]  (!%p9740_p6), %s11368_s6, 16, %s488_s18, [#allocation20]  }
  0xff   : > { %s9353_s23 = scalar_lea.hbm %s11370_s8, 96 }
 0x100   : > { %p9354_p1 = scmp.ne.s32.totalorder %s11370_s8, %s9353_s23  ;;  %p9360_p0 = scmp.lt.u32.totalorder %s9353_s23, %s11370_s8 }
 0x102   : > { %p9356_p3 = pnand %p9354_p1, %p9756_p8 }
 0x104   : > { %p9357_p13 = pneg %p9356_p3 }
 0x106   : > { %p9362_p2 = pnand %p9360_p0, %p9357_p13 }
 0x108   : > { %9365 = shalt.err (!%p9362_p2)
}
 0x109   : > { %s9366_s15 = scalar_lea.vmem %s511_s0, 96  ;;  %p9374_p4 = scmp.lt.s32.totalorder %s511_s0, %s511_s0 }
 0x10a   : > { %p9367_p5 = scmp.ne.s32.totalorder %s511_s0, %s9366_s15  ;;  %p9375_p10 = scmp.lt.s32.totalorder %s9366_s15, %s9366_s15 }
 0x10c   : > { %p9369_p7 = pnand %p9367_p5, %p9756_p8  ;;  %p9376_p11 = por %p9375_p10, %p9374_p4 }
 0x10e   : > { %p9370_p9 = pneg %p9369_p7 }
 0x110   : > { %p9377_p12 = pnand %p9376_p11, %p9370_p9 }
 0x112   : > { %9380 = shalt.err (!%p9377_p12)
}
 0x113   : > { %s9604_s18 = smov 16   ;;  %s9605_s1 = smov 1  }
 0x114   : > { %8661 = dma.hbm_to_vmem [thread:$0]  (!%p9740_p6), %s11370_s8, 96, %s511_s0, [#allocation23], %s9604_s18, %s9604_s18, %s9605_s1  }
 0x115   : > { %s9606_s27 = smov [#allocation27]   ;;  %s9607_s23 = smov [#allocation30]  }
 0x116   : > { %s536_s25 = sshll.u32 %s9606_s27, 4  ;;  %s563_s21 = sshll.u32 %s9607_s23, 4  ;;  %s537_s25 = int_to_ptr.vmem [resolvable:$true] %s536_s25  ;;  %s564_s21 = int_to_ptr.vmem [resolvable:$true] %s563_s21 }
 0x117   : > { %s9381_s19 = scalar_lea.hbm %s11372_s10, 96 }
 0x118   : > { %p9382_p1 = scmp.ne.s32.totalorder %s11372_s10, %s9381_s19  ;;  %p9388_p0 = scmp.lt.u32.totalorder %s9381_s19, %s11372_s10 }
 0x11a   : > { %p9384_p3 = pnand %p9382_p1, %p9756_p8 }
 0x11c   : > { %p9385_p13 = pneg %p9384_p3 }
 0x11e   : > { %p9390_p2 = pnand %p9388_p0, %p9385_p13 }
 0x120   : > { %9393 = shalt.err (!%p9390_p2)
}
 0x121   : > { %s9394_s0 = scalar_lea.vmem %s537_s25, 96  ;;  %p9402_p4 = scmp.lt.s32.totalorder %s537_s25, %s537_s25 }
 0x122   : > { %p9395_p5 = scmp.ne.s32.totalorder %s537_s25, %s9394_s0  ;;  %p9403_p10 = scmp.lt.s32.totalorder %s9394_s0, %s9394_s0 }
 0x124   : > { %p9397_p7 = pnand %p9395_p5, %p9756_p8  ;;  %p9404_p11 = por %p9403_p10, %p9402_p4 }
 0x126   : > { %p9398_p9 = pneg %p9397_p7 }
 0x128   : > { %p9405_p12 = pnand %p9404_p11, %p9398_p9 }
 0x12a   : > { %9408 = shalt.err (!%p9405_p12)
}
 0x12b   : > { %8667 = dma.hbm_to_vmem [thread:$0]  (!%p9740_p6), %s11372_s10, 96, %s537_s25, [#allocation26], %s9604_s18, %s9604_s18, %s9605_s1  }
 0x12c   : > { %s9409_s16 = scalar_lea.hbm %s11374_s12, 16 }
 0x12d   : > { %p9410_p1 = scmp.ne.s32.totalorder %s11374_s12, %s9409_s16  ;;  %p9416_p0 = scmp.lt.u32.totalorder %s9409_s16, %s11374_s12 }
 0x12f   : > { %p9412_p3 = pnand %p9410_p1, %p9756_p8 }
 0x131   : > { %p9413_p13 = pneg %p9412_p3 }
 0x133   : > { %p9418_p2 = pnand %p9416_p0, %p9413_p13 }
 0x135   : > { %9421 = shalt.err (!%p9418_p2)
}
 0x136   : > { %s9422_s19 = scalar_lea.vmem %s564_s21, 16  ;;  %s9429_s18 = scalar_lea.vmem %s564_s21, 32 }
 0x137   : > { %p9423_p5 = scmp.ne.s32.totalorder %s564_s21, %s9422_s19  ;;  %p9430_p4 = scmp.lt.s32.totalorder %s564_s21, %s564_s21 }
 0x138   : > { %p9431_p10 = scmp.lt.s32.totalorder %s9429_s18, %s9422_s19 }
 0x139   : > { %p9425_p7 = pnand %p9423_p5, %p9756_p8 }
 0x13a   : > { %p9432_p11 = por %p9431_p10, %p9430_p4 }
 0x13b   : > { %p9426_p9 = pneg %p9425_p7 }
 0x13d   : > { %p9433_p12 = pnand %p9432_p11, %p9426_p9 }
 0x13f   : > { %9436 = shalt.err (!%p9433_p12)
}
 0x140   : > { %8673 = dma.hbm_to_vmem [thread:$0]  (!%p9740_p6), %s11374_s12, 16, %s564_s21, [#allocation29]  }
 0x141   : > { %s9608_s15 = smov [#allocation33]   ;;  %s9437_s2 = scalar_lea.hbm %s11376_s14, 128 }
 0x142   : > { %s585_s0 = sshll.u32 %s9608_s15, 4  ;;  %p9438_p1 = scmp.ne.s32.totalorder %s11376_s14, %s9437_s2  ;;  %s586_s0 = int_to_ptr.vmem [resolvable:$true] %s585_s0 }
 0x143   : > { %p9444_p0 = scmp.lt.u32.totalorder %s9437_s2, %s11376_s14 }
 0x144   : > { %p9440_p3 = pnand %p9438_p1, %p9756_p8 }
 0x146   : > { %p9441_p13 = pneg %p9440_p3 }
 0x148   : > { %p9446_p2 = pnand %p9444_p0, %p9441_p13 }
 0x14a   : > { %9449 = shalt.err (!%p9446_p2)
}
 0x14b   : > { %s9450_s21 = scalar_lea.vmem %s586_s0, 128  ;;  %p9458_p4 = scmp.lt.s32.totalorder %s586_s0, %s586_s0 }
 0x14c   : > { %p9451_p5 = scmp.ne.s32.totalorder %s586_s0, %s9450_s21  ;;  %p9459_p10 = scmp.lt.s32.totalorder %s9450_s21, %s9450_s21 }
 0x14e   : > { %p9453_p7 = pnand %p9451_p5, %p9756_p8  ;;  %p9460_p11 = por %p9459_p10, %p9458_p4 }
 0x150   : > { %p9454_p9 = pneg %p9453_p7 }
 0x152   : > { %p9461_p12 = pnand %p9460_p11, %p9454_p9 }
 0x154   : > { %9464 = shalt.err (!%p9461_p12)
}
 0x155   : > { %s11406_s19 = sld [smem:[#allocation46_spill]]  ;;  %s11407_s18 = sld [smem:[#allocation45_spill]] }
 0x156   : > { %s11408_s30 = sld [smem:[#allocation44_spill]]  ;;  %s11409_s1 = sld [smem:[#allocation47_spill]] }
 0x157   : > { %8679 = dma.hbm_to_vmem [thread:$0]  (!%p9740_p6), %s11376_s14, 128, %s586_s0, [#allocation32]  }
 0x158   : > { %s7100_s25 = sadd.s32 4294967294, %s9589_s26   ;;  %s10041_s17 = sadd.s32 1, %s9589_s26  }
 0x159   : > { %s45_s15 = ssub.s32 %s9589_s26, %s10041_s17  ;;  %p56_p3 = scmp.eq.s32.totalorder %s9589_s26, 0 }
 0x15a   : > { %p46_p8 = scmp.eq.s32.totalorder %s45_s15, 0  ;;  %p406_p7 = scmp.eq.s32.totalorder %s7100_s25, 1 }
 0x15b   : > { %s48_s20 = sadd.s32 1, %s11406_s19  ;;  %p55_p1 = scmp.ne.s32.totalorder %s11406_s19, %s11407_s18 }
 0x15c   : > { %p61_p13 = scmp.ne.s32.totalorder %s11407_s18, %s11408_s30  ;;  %p11411_p2 = scmp.eq.s32.totalorder %s11409_s1, 0 }
 0x15d   : > { %s10052_s22 = scalar_select %p46_p8, %s11406_s19, %s48_s20  }
 0x15e   : > { %p10054_p0 = por %p56_p3, %p55_p1  ;;  %p10060_p6 = por %p11411_p2, %p61_p13 }
 0x15f   : > { %p400_p5 = scmp.eq.s32.totalorder %s11409_s1, 1  ;;  %p8702_p9 = scmp.lt.s32.totalorder %s9589_s26, 2 }
 0x160   : > { %s599_s29 = sand.u32 1, %s11406_s19   ;;  %p10071_p10 = por %p406_p7, %p61_p13 }
 0x161   : > { %p10067_p4 = por %p400_p5, %p55_p1  ;;  %s7117_s23 = sshll.u32 %s599_s29, 9 }
 0x162   : > { %s11414_s27 = scalar_select %p10071_p10, 1, 0 }
 0x163   : > { %s11413_s16 = scalar_select %p10067_p4, 1, 0 }
 0x164   : > { %s7528_s21 = sshll.u32 %s9589_s26, 13  ;;  %s11415_s18 = sld [smem:[#allocation49_spill]] }
 0x165   : > { %s603_s19 = scalar_lea.vmem [#allocation10], %s7117_s23  ;;  %p10085_p11 = pnand %p8702_p9, %p10054_p0 }
 0x166   : > { %s610_s1 = sshll.u32 %s603_s19, 4  ;;  %s10089_s15 = scalar_lea.sflag [#allocation11], %s599_s29  ;;  %s10081_s1 = int_to_ptr.vmem [resolvable:$true] %s610_s1 }
 0x167   : > { %p9467_p8 = pneg %p10085_p11 }
 0x16a   : > { %s10079_s30 = scalar_lea.hbm %s11415_s18, %s7528_s21  ;;  %s9470_s2 = scalar_lea.hbm %s11415_s18, 16384 }
 0x16b   : > { %s9465_s20 = scalar_lea.hbm %s10079_s30, 8192  ;;  %p9471_p13 = scmp.lt.u32.totalorder %s10079_s30, %s11415_s18 }
 0x16c   : > { %p9466_p12 = scmp.ne.s32.totalorder %s10079_s30, %s9465_s20  ;;  %p9472_p0 = scmp.lt.u32.totalorder %s9470_s2, %s9465_s20 }
 0x16d   : > { %p9474_p5 = scmp.lt.u32.totalorder %s9465_s20, %s10079_s30 }
 0x16e   : > { %p9468_p1 = pnand %p9467_p8, %p9466_p12  ;;  %p9473_p2 = por %p9472_p0, %p9471_p13 }
 0x170   : > { %p9469_p3 = pneg %p9468_p1  ;;  %p9475_p7 = por %p9474_p5, %p9473_p2 }
 0x172   : > { %p9476_p9 = pnand %p9475_p7, %p9469_p3 }
 0x174   : > { %9479 = shalt.err (!%p9476_p9)
}
 0x175   : > { %s9480_s29 = scalar_lea.vmem %s10081_s1, 8192  ;;  %s9609_s19 = smov [#allocation10]  }
 0x176   : > { %p9481_p12 = scmp.ne.s32.totalorder %s10081_s1, %s9480_s29  ;;  %s9485_s23 = sshll.u32 %s9609_s19, 4  ;;  %s9486_s23 = int_to_ptr.vmem [resolvable:$false] %s9485_s23 }
 0x177   : > { %s9487_s21 = scalar_lea.vmem %s9486_s23, 16384  ;;  %p9488_p4 = scmp.lt.s32.totalorder %s10081_s1, %s9486_s23 }
 0x178   : > { %p9483_p1 = pnand %p9481_p12, %p9467_p8  ;;  %p9489_p13 = scmp.lt.s32.totalorder %s9487_s21, %s9480_s29 }
 0x17a   : > { %p9484_p10 = pneg %p9483_p1  ;;  %p9490_p0 = por %p9489_p13, %p9488_p4 }
 0x17c   : > { %p9491_p2 = pnand %p9490_p0, %p9484_p10 }
 0x17e   : > { %9494 = shalt.err (!%p9491_p2)
}
 0x17f   : > { %s11417_s20 = smov 4   ;;  %s11418_s2 = smov 64  }
 0x180   : > { %8683 = dma.hbm_to_vmem [thread:$0]  (!%p10085_p11), %s10079_s30, 8192, %s10081_s1, %s10089_s15, %s11418_s2, %s11418_s2, %s11417_s20  }
 0x181   : > { %s11419_s28 = sld [smem:[#allocation48_spill]] }
 0x187   : > { %p11420_p8 = scmp.ne.s32.totalorder %s11419_s28, 0 }
 0x188   : > { %s11421_s24 = sld [smem:[#allocation45_spill]] (!%p11420_p8) }
 0x189   : > { %622 = sbr.rel (%p11420_p8) target bundleno = 5208 (0x1458), region = 84 }
 0x18e   : > { %s10123_s19 = sand.u32 (!%p11420_p8), 1, %s11421_s24  }
 0x18f   : > { %s7121_s29 = sshll.u32 (!%p11420_p8), %s10123_s19, 9  ;;  %s625_s23 = scalar_lea.sflag (!%p11420_p8), [#allocation11], %s10123_s19 }
 0x190   : > { %s10127_s21 = scalar_lea.vmem [#allocation10], %s7121_s29 }
 0x191   : > { %9540 = dma.done.wait (%p10060_p6), %s625_s23, 8192  }
 0x192   : > { %9542 = vsyncadd (%p10060_p6), %s625_s23, 4294959104  ;;  %s11422_s25 = sld [smem:[#allocation47_spill]] }
 0x198   : > { %p11423_p4 = scmp.eq.s32.totalorder %s11422_s25, 0 }
 0x19a   : > { %9544 = dma.done.wait (%p11423_p4), [#allocation14], 656   ;;  %p11424_p10 = pmov %p11423_p4 }
 0x19b   : > { %p11425_p11 = pmov %p11423_p4 }
 0x19c   : > { %9546 = vsyncadd (%p11424_p10), [#allocation14], 4294966640 }
 0x19d   : > { %9548 = dma.done.wait (%p11425_p11), [#allocation17], 2576   ;;  %p11426_p3 = pmov %p11423_p4 }
 0x19f   : > { %9550 = vsyncadd (%p11426_p3), [#allocation17], 4294964720  ;;  %p11427_p5 = pmov %p11426_p3 }
 0x1a0   : > { %p11428_p7 = pmov %p11426_p3 }
 0x1a1   : > { %9552 = dma.done.wait (%p11427_p5), [#allocation20], 2576  }
 0x1a2   : > { %9554 = vsyncadd (%p11428_p7), [#allocation20], 4294964720  ;;  %p11429_p6 = pmov %p11426_p3 }
 0x1a3   : > { %p11430_p9 = pmov %p11426_p3 }
 0x1a4   : > { %9556 = dma.done.wait (%p11429_p6), [#allocation23], 10464  }
 0x1a5   : > { %9558 = vsyncadd (%p11430_p9), [#allocation23], 4294956832  ;;  %p11431_p12 = pmov %p11426_p3 }
 0x1a6   : > { %p11432_p1 = pmov %p11426_p3 }
 0x1a7   : > { %9560 = dma.done.wait (%p11431_p12), [#allocation26], 1632  }
 0x1a8   : > { %9562 = vsyncadd (%p11432_p1), [#allocation26], 4294965664  ;;  %p11433_p13 = pmov %p11432_p1 }
 0x1a9   : > { %p11434_p0 = pmov %p11432_p1 }
 0x1aa   : > { %9564 = dma.done.wait (%p11433_p13), [#allocation29], 592  }
 0x1ab   : > { %9566 = vsyncadd (%p11434_p0), [#allocation29], 4294966704  ;;  %p11435_p2 = pmov %p11434_p0 }
 0x1ac   : > { %p11436_p8 = pmov %p11434_p0 }
 0x1ad   : > { %9568 = dma.done.wait (%p11435_p2), [#allocation32], 144  }
 0x1ae   : > { %9570 = vsyncadd (%p11436_p8), [#allocation32], 4294967152  ;;  %vm738_vm0 = vcmask 588800   ;;  %v9610_v1 = vmov 0.0   ;;  %v8773_v2 = vld [vmem:[#allocation13] sm:$0xff]   ;;  %v8774_v3 = vld [vmem:[#allocation13 + $0x8] sm:$0xff]  }
 0x1af   : > { %739 = vst.msk [vmem:[#allocation4] sm:$0xff] %vm738_vm0, %v9610_v1  ;;  %741 = vst.msk [vmem:[#allocation4 + $0x10] sm:$0xff] %vm738_vm0, %v9610_v1  ;;  %7835 = vmatprep.subr.bf16.mxu0 %v8773_v2  ;;  %v8775_v4 = vld [vmem:[#allocation13] sm:$0xff]   ;;  %vm955_vm1 = vcmask 1044480   ;;  %v8776_v5 = vld [vmem:[#allocation13 + $0x10] sm:$0xff]   ;;  %vm956_vm2 = vcmask 1045504  }
 0x1b0   : > { %742 = vst.msk [vmem:[#allocation4 + $0x18] sm:$0xff] %vm738_vm0, %v9610_v1  ;;  %743 = vst.msk [vmem:[#allocation4 + $0x20] sm:$0xff] %vm738_vm0, %v9610_v1  ;;  %7836 = vmatpush3.bf16.msra.mxu0 %v8773_v2  ;;  %7877 = vmatprep.subr.bf16.mxu1 %v8775_v4  ;;  %v8777_v6 = vld [vmem:[#allocation13 + $0x8] sm:$0xff]   ;;  %v8779_v7 = vld [vmem:[#allocation13 + $0x10] sm:$0xff]   ;;  %v9611_v8 = vmov 65535   ;;  %vm906_vm3 = vcmask 613376  }
 0x1b1   : > { %744 = vst.msk [vmem:[#allocation4 + $0x28] sm:$0xff] %vm738_vm0, %v9610_v1  ;;  %745 = vst.msk [vmem:[#allocation4 + $0x30] sm:$0xff] %vm738_vm0, %v9610_v1  ;;  %7837 = vmatprep.subr.bf16.mxu0 %v8774_v3  ;;  %7878 = vmatpush3.bf16.msra.mxu1 %v8775_v4  ;;  %v957_v9 = vsel %vm955_vm1, 4294967295, %v9611_v8  ;;  %v8778_v10 = vld [vmem:[#allocation13 + $0x18] sm:$0xff]   ;;  %v8780_v11 = vld [vmem:[#allocation13 + $0x20] sm:$0x3f]  }
 0x1b2   : > { %747 = vst.msk [vmem:[#allocation4 + $0x40] sm:$0xff] %vm738_vm0, %v9610_v1  ;;  %7879 = vmatprep.subr.bf16.mxu1 %v8777_v6  ;;  %v10175_v12 = vsel %vm956_vm2, %v957_v9, 0  ;;  %v8782_v13 = vld [vmem:[%s10127_s21] sm:$0xff]   ;;  %v8781_v14 = vld [vmem:[#allocation13 + $0x18] sm:$0xff]   ;;  %v8783_v20 = vld [vmem:[%s10127_s21 + $0x8] sm:$0xff]   ;;  %vm733_vm4 = vcmask 518144  }
 0x1b3   : > { %7845 = vmatprep.mubr.msk.bf16.mxu0 %vm906_vm3, %v8782_v13  ;;  %v960_v15 = vand.u32 %v8780_v11, %v10175_v12  ;;  %v8785_v16 = vld [vmem:[#allocation13 + $0x20] sm:$0x3f]   ;;  %v8787_v21 = vld [vmem:[%s10127_s21 + $0x88] sm:$0xff]   ;;  %v8788_v23 = vld [vmem:[%s10127_s21 + $0x10] sm:$0xff]   ;;  %734 = vst.msk [vmem:[#allocation2] sm:$0x7] %vm733_vm4, %v9610_v1 }
 0x1b4   : > { %7838 = vmatpush3.bf16.msra.mxu0 %v8774_v3  ;;  %v8786_v17 = vld [vmem:[%s10127_s21 + $0x80] sm:$0xff]   ;;  %v1558_v18 = vand.u32 %v8785_v16, %v10175_v12  ;;  %v8792_v24 = vld [vmem:[#allocation13 + $0x8] sm:$0xff]   ;;  %v8791_v25 = vld [vmem:[%s10127_s21 + $0x90] sm:$0xff]   ;;  %735 = vst.msk [vmem:[#allocation2 + $0x83] sm:$0x7] %vm733_vm4, %v9610_v1  ;;  %vm1123_vm5 = vcmask 523264  }
 0x1b5   : > { %7839 = vmatprep.subr.bf16.mxu0 %v8776_v5  ;;  %7880 = vmatpush3.bf16.msra.mxu1 %v8777_v6  ;;  %v8784_v19 = vld [vmem:[#allocation13] sm:$0xff]   ;;  %v8797_v26 = vld [vmem:[#allocation13 + $0x8] sm:$0xff]   ;;  %v8789_v27 = vld [vmem:[%s10127_s21 + $0x18] sm:$0xff]   ;;  %736 = vst.msk [vmem:[#allocation3] sm:$0x7] %vm733_vm4, %v9610_v1  ;;  %vm9612_vm6 = vmmov 0  }
 0x1b6   : > { %7881 = vmatprep.subr.bf16.mxu1 %v8779_v7  ;;  %7887 = vmatprep.mubr.msk.bf16.mxu1 %vm906_vm3, %v8786_v17  ;;  %v8790_v22 = vld [vmem:[#allocation13] sm:$0xff]   ;;  %v8793_v28 = vld [vmem:[%s10127_s21 + $0x98] sm:$0xff]   ;;  %v8801_v30 = vld [vmem:[#allocation13 + $0x10] sm:$0xff]   ;;  %737 = vst.msk [vmem:[#allocation3 + $0x23] sm:$0x7] %vm733_vm4, %v9610_v1  ;;  %vm4679_vm7 = vcmask 1043456  }
 0x1b7   : > { %v8794_v29 = vld [vmem:[%s10127_s21 + $0x20] sm:$0xff]   ;;  %v8795_v32 = vld [vmem:[%s10127_s21 + $0x28] sm:$0xff]   ;;  %v8806_v33 = vld [vmem:[#allocation13 + $0x10] sm:$0xff]   ;;  %vm4923_vm8 = vcmask 261120   ;;  %vm6880_vm9 = vcmask 516096   ;;  %s7525_s0 = sshll.u32 %s11422_s25, 4 }
 0x1b8   : > { %7840 = vmatpush3.bf16.msra.mxu0 %v8776_v5  ;;  %v8796_v31 = vld [vmem:[%s10127_s21 + $0xa0] sm:$0xff]   ;;  %v8798_v34 = vld [vmem:[%s10127_s21 + $0xa8] sm:$0xff]   ;;  %v8799_v35 = vld [vmem:[%s10127_s21 + $0x30] sm:$0xff]   ;;  %s731_s30 = scalar_lea.vmem [#allocation34], %s10123_s19  ;;  %vm6886_vm10 = vcmask 0   ;;  %s11437_s2 = sld [smem:[#allocation52_spill]] }
 0x1b9   : > { %7841 = vmatprep.subr.bf16.mxu0 %v8778_v10  ;;  %7882 = vmatpush3.bf16.msra.mxu1 %v8779_v7  ;;  %v8802_v36 = vld [vmem:[%s10127_s21 + $0xb0] sm:$0xff]   ;;  %v8810_v37 = vld [vmem:[#allocation13 + $0x18] sm:$0xff]   ;;  %v8804_v41 = vld [vmem:[%s10127_s21 + $0x40] sm:$0xff]   ;;  %s6901_s1 = sshll.u32 %s731_s30, 4  ;;  %s6889_s24 = scalar_lea.sflag [#allocation12], %s10123_s19  ;;  %s11320_s1 = int_to_ptr.vmem [resolvable:$true] %s6901_s1 }
 0x1ba   : > { %7883 = vmatprep.subr.bf16.mxu1 %v8781_v14  ;;  %v8800_v38 = vld [vmem:[%s10127_s21 + $0x38] sm:$0xff]   ;;  %v8817_v42 = vld [vmem:[#allocation13 + $0x20] sm:$0x3f]   ;;  %v8805_v46 = vld [vmem:[%s10127_s21 + $0x48] sm:$0xff]   ;;  %s9495_s29 = scalar_lea.vmem %s11320_s1, 16  ;;  %p11438_p10 = scmp.ne.s32.totalorder %s11413_s16, 0 }
 0x1bb   : > { %v8803_v39 = vld [vmem:[%s10127_s21 + $0xb8] sm:$0xff]   ;;  %v8807_v43 = vld [vmem:[%s10127_s21 + $0xc0] sm:$0xff]   ;;  %v2124_v44 = vand.u32 %v8817_v42, %v10175_v12  ;;  %v8809_v47 = vld [vmem:[%s10127_s21 + $0x50] sm:$0xff]   ;;  %p9496_p4 = scmp.ne.s32.totalorder %s11320_s1, %s9495_s29  ;;  %s9614_s23 = smov [#allocation34]  }
 0x1bc   : > { %7842 = vmatpush3.bf16.msra.mxu0 %v8778_v10  ;;  %v8815_v40 = vld [vmem:[#allocation13 + $0x18] sm:$0xff]   ;;  %v8822_v45 = vld [vmem:[#allocation13 + $0x20] sm:$0x3f]   ;;  %v8808_v49 = vld [vmem:[%s10127_s21 + $0xc8] sm:$0xff]  }
 0x1bd   : > { %7843 = vmatprep.subr.bf16.mxu0 %v960_v15  ;;  %7884 = vmatpush3.bf16.msra.mxu1 %v8781_v14  ;;  %v2690_v48 = vand.u32 %v8822_v45, %v10175_v12  ;;  %v8812_v50 = vld [vmem:[%s10127_s21 + $0xd0] sm:$0xff]   ;;  %v8811_v51 = vld [vmem:[%s10127_s21 + $0x58] sm:$0xff]   ;;  %v8814_v52 = vld [vmem:[%s10127_s21 + $0x60] sm:$0xff]   ;;  %p9497_p11 = pnand %p9496_p4, %p11438_p10 }
 0x1be   : > { %7885 = vmatprep.subr.bf16.mxu1 %v1558_v18  ;;  %v8813_v53 = vld [vmem:[%s10127_s21 + $0xd8] sm:$0xff]   ;;  %v8818_v54 = vld [vmem:[%s10127_s21 + $0xe0] sm:$0xff]   ;;  %v8816_v55 = vld [vmem:[%s10127_s21 + $0x68] sm:$0xff]   ;;  %s11318_s28 = scalar_lea.hbm %s11437_s2, %s7525_s0 }
 0x1bf   : > { %v8820_v56 = vld [vmem:[%s10127_s21 + $0x70] sm:$0xff]   ;;  %v8819_v57 = vld [vmem:[%s10127_s21 + $0xe8] sm:$0xff]   ;;  %v8821_v59 = vld [vmem:[%s10127_s21 + $0x78] sm:$0xff]   ;;  %p9498_p3 = pneg %p9497_p11 }
 0x1c0   : > { %7844 = vmatpush3.bf16.msra.mxu0 %v960_v15  ;;  %v8823_v58 = vld [vmem:[%s10127_s21 + $0xf0] sm:$0xff]   ;;  %v8825_v60 = vld [vmem:[%s10127_s21 + $0x100] sm:$0xff]   ;;  %v8824_v61 = vld [vmem:[%s10127_s21 + $0xf8] sm:$0xff]  }
 0x1c1   : > { %7919 = vmatprep.subr.bf16.mxu0 %v8784_v19  ;;  %7886 = vmatpush3.bf16.msra.mxu1 %v1558_v18  ;;  %v8827_v62 = vld [vmem:[%s10127_s21 + $0x180] sm:$0xff]   ;;  %v8826_v63 = vld [vmem:[%s10127_s21 + $0x108] sm:$0xff]   ;;  %v8829_v2 = vld [vmem:[%s10127_s21 + $0x110] sm:$0xff]  }
 0x1c2   : > { %7961 = vmatprep.subr.bf16.mxu1 %v8790_v22  ;;  %v8828_v0 = vld [vmem:[%s10127_s21 + $0x188] sm:$0xff]   ;;  %v8831_v3 = vld [vmem:[%s10127_s21 + $0x190] sm:$0xff]   ;;  %v8830_v4 = vld [vmem:[%s10127_s21 + $0x118] sm:$0xff]  }
 0x1c3   : > { %7846 = vmatmul.mubr.msk.bf16.vlgmr.msra.gmra.mrb[0].mxu0 %vm906_vm3, %v8783_v20  ;;  %v8833_v5 = vld [vmem:[%s10127_s21 + $0x120] sm:$0xff]   ;;  %v8832_v6 = vld [vmem:[%s10127_s21 + $0x198] sm:$0xff]   ;;  %v8834_v8 = vld [vmem:[%s10127_s21 + $0x128] sm:$0xff]  }
 0x1c4   : > { %7920 = vmatpush3.bf16.msra.mxu0 %v8784_v19  ;;  %7849 = vmatprep.mubr.msk.bf16.mxu0 %vm906_vm3, %v8788_v23  ;;  %v8835_v7 = vld [vmem:[%s10127_s21 + $0x1a0] sm:$0xff]   ;;  %v8837_v9 = vld [vmem:[%s10127_s21 + $0x130] sm:$0xff]   ;;  %v8836_v10 = vld [vmem:[%s10127_s21 + $0x1a8] sm:$0xff]  }
 0x1c5   : > { %7888 = vmatmul.mubr.msk.bf16.vlgmr.msra.gmra.mrb[0].mxu1 %vm906_vm3, %v8787_v21  ;;  %7921 = vmatprep.subr.bf16.mxu0 %v8792_v24  ;;  %v8839_v11 = vld [vmem:[%s10127_s21 + $0x1b0] sm:$0xff]   ;;  %v8838_v12 = vld [vmem:[%s10127_s21 + $0x138] sm:$0xff]   ;;  %v8841_v14 = vld [vmem:[%s10127_s21 + $0x140] sm:$0xff]  }
 0x1c6   : > { %7962 = vmatpush3.bf16.msra.mxu1 %v8790_v22  ;;  %7891 = vmatprep.mubr.msk.bf16.mxu1 %vm906_vm3, %v8791_v25  ;;  %v8840_v13 = vld [vmem:[%s10127_s21 + $0x1b8] sm:$0xff]   ;;  %v8843_v15 = vld [vmem:[%s10127_s21 + $0x1c0] sm:$0xff]   ;;  %v8842_v16 = vld [vmem:[%s10127_s21 + $0x148] sm:$0xff]  }
 0x1c7   : > { %7963 = vmatprep.subr.bf16.mxu1 %v8797_v26  ;;  %v8845_v17 = vld [vmem:[%s10127_s21 + $0x150] sm:$0xff]   ;;  %v8844_v18 = vld [vmem:[%s10127_s21 + $0x1c8] sm:$0xff]   ;;  %v8846_v20 = vld [vmem:[%s10127_s21 + $0x158] sm:$0xff]  }
 0x1c8   : > { %7922 = vmatpush3.bf16.msra.mxu0 %v8792_v24  ;;  %v8847_v19 = vld [vmem:[%s10127_s21 + $0x1d0] sm:$0xff]   ;;  %v8849_v21 = vld [vmem:[%s10127_s21 + $0x160] sm:$0xff]   ;;  %v8848_v22 = vld [vmem:[%s10127_s21 + $0x1d8] sm:$0xff]  }
 0x1c9   : > { %7923 = vmatprep.subr.bf16.mxu0 %v8801_v30  ;;  %v8851_v23 = vld [vmem:[%s10127_s21 + $0x1e0] sm:$0xff]   ;;  %v8850_v24 = vld [vmem:[%s10127_s21 + $0x168] sm:$0xff]   ;;  %v8853_v25 = vld [vmem:[%s10127_s21 + $0x170] sm:$0xff]  }
 0x1ca   : > { %7964 = vmatpush3.bf16.msra.mxu1 %v8797_v26  ;;  %v8852_v26 = vld [vmem:[%s10127_s21 + $0x1e8] sm:$0xff]  }
 0x1cb   : > { %7850 = vmatmul.mubr.msk.bf16.gmra.mrb[4].mxu0 %vm906_vm3, %v8789_v27  ;;  %7965 = vmatprep.subr.bf16.mxu1 %v8806_v33  ;;  %v8855_v27 = vld [vmem:[%s10127_s21 + $0x1f0] sm:$0xff]  }
 0x1cc   : > { %7853 = vmatprep.mubr.msk.bf16.mxu0 %vm906_vm3, %v8794_v29  ;;  %7924 = vmatpush3.bf16.msra.mxu0 %v8801_v30  ;;  %v8856_v29 = vld [vmem:[%s10127_s21 + $0x1f8] sm:$0xff]   ;;  %v8857_v30 = vld [vmem:[#allocation16 + $0x20] sm:$0xff]  }
 0x1cd   : > { %7892 = vmatmul.mubr.msk.bf16.gmra.mrb[4].mxu1 %vm906_vm3, %v8793_v28  ;;  %7925 = vmatprep.subr.bf16.mxu0 %v8810_v37  ;;  %v8854_v28 = vld [vmem:[%s10127_s21 + $0x178] sm:$0xff]   ;;  %s9499_s21 = sshll.u32 %s9614_s23, 4  ;;  %s9500_s21 = int_to_ptr.vmem [resolvable:$false] %s9499_s21 }
 0x1ce   : > { %7895 = vmatprep.mubr.msk.bf16.mxu1 %vm906_vm3, %v8796_v31  ;;  %7966 = vmatpush3.bf16.msra.mxu1 %v8806_v33  ;;  %v8858_v31 = vld [vmem:[#allocation16 + $0x28] sm:$0xff]   ;;  %v8860_v33 = vld [vmem:[#allocation16 + $0x38] sm:$0xff]   ;;  %s9501_s25 = scalar_lea.vmem %s9500_s21, 32  ;;  %p9502_p5 = scmp.lt.s32.totalorder %s11320_s1, %s9500_s21 }
 0x1cf   : > { %7967 = vmatprep.subr.bf16.mxu1 %v8815_v40  ;;  %p9503_p7 = scmp.lt.s32.totalorder %s9501_s25, %s9495_s29 }
 0x1d0   : > { %7926 = vmatpush3.bf16.msra.mxu0 %v8810_v37 }
 0x1d1   : > { %7927 = vmatprep.subr.bf16.mxu0 %v2124_v44  ;;  %p9504_p6 = por %p9503_p7, %p9502_p5 }
 0x1d2   : > { %7968 = vmatpush3.bf16.msra.mxu1 %v8815_v40 }
 0x1d3   : > { %7854 = vmatmul.mubr.msk.bf16.gmra.mrb[8].mxu0 %vm906_vm3, %v8795_v32  ;;  %7969 = vmatprep.subr.bf16.mxu1 %v2690_v48  ;;  %v8859_v32 = vld [vmem:[#allocation16 + $0x30] sm:$0xff]   ;;  %p9505_p9 = pnand %p9504_p6, %p9498_p3 }
 0x1d4   : > { %7857 = vmatprep.mubr.msk.bf16.mxu0 %vm906_vm3, %v8799_v35  ;;  %7928 = vmatpush3.bf16.msra.mxu0 %v2124_v44 }
 0x1d5   : > { %7896 = vmatmul.mubr.msk.bf16.gmra.mrb[8].mxu1 %vm906_vm3, %v8798_v34  ;;  %8003 = vmatprep.subr.bf16.mxu0 %v8857_v30  ;;  %v10313_v34 = vld [vmem:[#allocation15] ss:$0 sm:$0xff] }
 0x1d6   : > { %7899 = vmatprep.mubr.msk.bf16.mxu1 %vm906_vm3, %v8802_v36  ;;  %7970 = vmatpush3.bf16.msra.mxu1 %v2690_v48 }
 0x1db   : > { %7858 = vmatmul.mubr.msk.bf16.gmra.mrb[12].mxu0 %vm906_vm3, %v8800_v38 }
 0x1dc   : > { %7861 = vmatprep.mubr.msk.bf16.mxu0 %vm906_vm3, %v8804_v41 }
 0x1dd   : > { %7900 = vmatmul.mubr.msk.bf16.gmra.mrb[12].mxu1 %vm906_vm3, %v8803_v39 }
 0x1de   : > { %7903 = vmatprep.mubr.msk.bf16.mxu1 %vm906_vm3, %v8807_v43 }
 0x1e3   : > { %7862 = vmatmul.mubr.msk.bf16.gmra.mrb[16].mxu0 %vm906_vm3, %v8805_v46 }
 0x1e4   : > { %7865 = vmatprep.mubr.msk.bf16.mxu0 %vm906_vm3, %v8809_v47 }
 0x1e5   : > { %7904 = vmatmul.mubr.msk.bf16.gmra.mrb[16].mxu1 %vm906_vm3, %v8808_v49 }
 0x1e6   : > { %7907 = vmatprep.mubr.msk.bf16.mxu1 %vm906_vm3, %v8812_v50 }
 0x1eb   : > { %7866 = vmatmul.mubr.msk.bf16.gmra.mrb[20].mxu0 %vm906_vm3, %v8811_v51 }
 0x1ec   : > { %7869 = vmatprep.mubr.msk.bf16.mxu0 %vm906_vm3, %v8814_v52 }
 0x1ed   : > { %7908 = vmatmul.mubr.msk.bf16.gmra.mrb[20].mxu1 %vm906_vm3, %v8813_v53 }
 0x1ee   : > { %7911 = vmatprep.mubr.msk.bf16.mxu1 %vm906_vm3, %v8818_v54 }
 0x1f3   : > { %7870 = vmatmul.mubr.msk.bf16.gmra.mrb[24].mxu0 %vm906_vm3, %v8816_v55 }
 0x1f4   : > { %7873 = vmatprep.mubr.msk.bf16.mxu0 %vm906_vm3, %v8820_v56 }
 0x1f5   : > { %7912 = vmatmul.mubr.msk.bf16.gmra.mrb[24].mxu1 %vm906_vm3, %v8819_v57 }
 0x1f6   : > { %7915 = vmatprep.mubr.msk.bf16.mxu1 %vm906_vm3, %v8823_v58 }
 0x1fb   : > { %7874 = vmatmul.mubr.msk.bf16.gmra.mrb[28].mxu0 %vm906_vm3, %v8821_v59 }
 0x1fc   : > { %7929 = vmatprep.mubr.msk.bf16.mxu0 %vm906_vm3, %v8825_v60 }
 0x1fd   : > { %7916 = vmatmul.mubr.msk.bf16.gmra.mrb[28].mxu1 %vm906_vm3, %v8824_v61 }
 0x1fe   : > { %7971 = vmatprep.mubr.msk.bf16.mxu1 %vm906_vm3, %v8827_v62 }
 0x203   : > { %7930 = vmatmul.mubr.msk.bf16.vlgmr.msra.gmra.mrb[32].mxu0 %vm906_vm3, %v8826_v63 }
 0x204   : > { %7933 = vmatprep.mubr.msk.bf16.mxu0 %vm906_vm3, %v8829_v2  ;;  %8004 = vmatpush3.bf16.msra.mxu0 %v8857_v30 }
 0x205   : > { %7972 = vmatmul.mubr.msk.bf16.vlgmr.msra.gmra.mrb[32].mxu1 %vm906_vm3, %v8828_v0  ;;  %8005 = vmatprep.subr.bf16.mxu0 %v8858_v31 }
 0x206   : > { %7975 = vmatprep.mubr.msk.bf16.mxu1 %vm906_vm3, %v8831_v3 }
 0x208   : > { %8006 = vmatpush3.bf16.msra.mxu0 %v8858_v31 }
 0x209   : > { %8007 = vmatprep.subr.bf16.mxu0 %v8859_v32 }
 0x20b   : > { %7934 = vmatmul.mubr.msk.bf16.gmra.mrb[36].mxu0 %vm906_vm3, %v8830_v4 }
 0x20c   : > { %7937 = vmatprep.mubr.msk.bf16.mxu0 %vm906_vm3, %v8833_v5  ;;  %8008 = vmatpush3.bf16.msra.mxu0 %v8859_v32 }
 0x20d   : > { %7976 = vmatmul.mubr.msk.bf16.gmra.mrb[36].mxu1 %vm906_vm3, %v8832_v6  ;;  %8009 = vmatprep.subr.bf16.mxu0 %v8860_v33 }
 0x20e   : > { %7979 = vmatprep.mubr.msk.bf16.mxu1 %vm906_vm3, %v8835_v7 }
 0x210   : > { %8010 = vmatpush3.bf16.msra.mxu0 %v8860_v33 }
 0x213   : > { %7938 = vmatmul.mubr.msk.bf16.gmra.mrb[40].mxu0 %vm906_vm3, %v8834_v8 }
 0x214   : > { %7941 = vmatprep.mubr.msk.bf16.mxu0 %vm906_vm3, %v8837_v9 }
 0x215   : > { %7980 = vmatmul.mubr.msk.bf16.gmra.mrb[40].mxu1 %vm906_vm3, %v8836_v10 }
 0x216   : > { %7983 = vmatprep.mubr.msk.bf16.mxu1 %vm906_vm3, %v8839_v11 }
 0x21b   : > { %7942 = vmatmul.mubr.msk.bf16.gmra.mrb[44].mxu0 %vm906_vm3, %v8838_v12 }
 0x21c   : > { %7945 = vmatprep.mubr.msk.bf16.mxu0 %vm906_vm3, %v8841_v14 }
 0x21d   : > { %7984 = vmatmul.mubr.msk.bf16.gmra.mrb[44].mxu1 %vm906_vm3, %v8840_v13 }
 0x21e   : > { %7987 = vmatprep.mubr.msk.bf16.mxu1 %vm906_vm3, %v8843_v15 }
 0x223   : > { %7946 = vmatmul.mubr.msk.bf16.gmra.mrb[48].mxu0 %vm906_vm3, %v8842_v16 }
 0x224   : > { %7949 = vmatprep.mubr.msk.bf16.mxu0 %vm906_vm3, %v8845_v17 }
 0x225   : > { %7988 = vmatmul.mubr.msk.bf16.gmra.mrb[48].mxu1 %vm906_vm3, %v8844_v18 }
 0x226   : > { %7991 = vmatprep.mubr.msk.bf16.mxu1 %vm906_vm3, %v8847_v19 }
 0x22b   : > { %7950 = vmatmul.mubr.msk.bf16.gmra.mrb[52].mxu0 %vm906_vm3, %v8846_v20 }
 0x22c   : > { %7953 = vmatprep.mubr.msk.bf16.mxu0 %vm906_vm3, %v8849_v21 }
 0x22d   : > { %7992 = vmatmul.mubr.msk.bf16.gmra.mrb[52].mxu1 %vm906_vm3, %v8848_v22 }
 0x22e   : > { %7995 = vmatprep.mubr.msk.bf16.mxu1 %vm906_vm3, %v8851_v23 }
 0x233   : > { %7954 = vmatmul.mubr.msk.bf16.gmra.mrb[56].mxu0 %vm906_vm3, %v8850_v24 }
 0x234   : > { %7957 = vmatprep.mubr.msk.bf16.mxu0 %vm906_vm3, %v8853_v25 }
 0x235   : > { %7996 = vmatmul.mubr.msk.bf16.gmra.mrb[56].mxu1 %vm906_vm3, %v8852_v26 }
 0x236   : > { %7999 = vmatprep.mubr.msk.bf16.mxu1 %vm906_vm3, %v8855_v27 }
 0x23b   : > { %7958 = vmatmul.mubr.msk.bf16.gmra.mrb[60].mxu0 %vm906_vm3, %v8854_v28 }
 0x23d   : > { %8000 = vmatmul.mubr.msk.bf16.gmra.mrb[60].mxu1 %vm906_vm3, %v8856_v29 }
 0x296   : > { %v7847_v35 = vpop.f32.mrb[0].mxu0 }
 0x297   : > { %v1005_v36 = vadd.f32 %v7847_v35, %v10313_v34  ;;  %v996_v37 = vpop.f32.mrb[1].mxu0 }
 0x298   : > { %v997_v38 = vadd.f32 %v10313_v34, %v996_v37  ;;  %v7848_v39 = vpop.f32.mrb[2].mxu0  ;;  %v7889_v40 = vpop.f32.mrb[0].mxu1 }
 0x299   : > { %1126 = vst.msk [vmem:[#allocation6 + $0x10] sm:$0xff] %vm1123_vm5, %v1005_v36  ;;  %v1008_v41 = vadd.f32 %v7848_v39, %v10313_v34  ;;  %v999_v42 = vpop.f32.mrb[3].mxu0  ;;  %v1594_v43 = vpop.f32.mrb[1].mxu1  ;;  %v1603_v0 = vadd.f32 %v7889_v40, %v10313_v34 }
 0x29a   : > { %1124 = vst.msk [vmem:[#allocation6] sm:$0xff] %vm1123_vm5, %v997_v38  ;;  %v1000_v44 = vadd.f32 %v10313_v34, %v999_v42  ;;  %v7890_v45 = vpop.f32.mrb[2].mxu1  ;;  %v1595_v2 = vadd.f32 %v10313_v34, %v1594_v43 }
 0x29b   : > { %1127 = vst.msk [vmem:[#allocation6 + $0x18] sm:$0xff] %vm1123_vm5, %v1008_v41  ;;  %v1597_v46 = vpop.f32.mrb[3].mxu1  ;;  %v1606_v3 = vadd.f32 %v7890_v45, %v10313_v34 }
 0x29c   : > { %1125 = vst.msk [vmem:[#allocation6 + $0x8] sm:$0xff] %vm1123_vm5, %v1000_v44  ;;  %v1598_v4 = vadd.f32 %v10313_v34, %v1597_v46 }
 0x29e   : > { %v7851_v47 = vpop.f32.mrb[4].mxu0 }
 0x29f   : > { %v1021_v48 = vadd.f32 %v7851_v47, %v10313_v34  ;;  %v1012_v49 = vpop.f32.mrb[5].mxu0 }
 0x2a0   : > { %v1013_v50 = vadd.f32 %v10313_v34, %v1012_v49  ;;  %v7852_v51 = vpop.f32.mrb[6].mxu0  ;;  %v7893_v52 = vpop.f32.mrb[4].mxu1 }
 0x2a1   : > { %1130 = vst.msk [vmem:[#allocation6 + $0x30] sm:$0xff] %vm1123_vm5, %v1021_v48  ;;  %v1024_v53 = vadd.f32 %v7852_v51, %v10313_v34  ;;  %v1015_v54 = vpop.f32.mrb[7].mxu0  ;;  %v1610_v55 = vpop.f32.mrb[5].mxu1  ;;  %v1619_v27 = vadd.f32 %v7893_v52, %v10313_v34 }
 0x2a2   : > { %1128 = vst.msk [vmem:[#allocation6 + $0x20] sm:$0xff] %vm1123_vm5, %v1013_v50  ;;  %v1016_v56 = vadd.f32 %v10313_v34, %v1015_v54  ;;  %v7894_v57 = vpop.f32.mrb[6].mxu1  ;;  %v1611_v28 = vadd.f32 %v10313_v34, %v1610_v55 }
 0x2a3   : > { %v1156_v58 = vld [vmem:[#allocation6] ss:$8 sm:$0xf]  ;;  %v1172_v59 = vld [vmem:[#allocation6 + $0x1] ss:$8 sm:$0xf]  ;;  %v1622_v29 = vadd.f32 %v7894_v57, %v10313_v34 }
 0x2a4   : > { %1131 = vst.msk [vmem:[#allocation6 + $0x38] sm:$0xff] %vm1123_vm5, %v1024_v53  ;;  %v1192_v60 = vld [vmem:[#allocation6 + $0x2] ss:$8 sm:$0xf]  ;;  %1129 = vst.msk [vmem:[#allocation6 + $0x28] sm:$0xff] %vm1123_vm5, %v1016_v56  ;;  %v1613_v8 = vpop.f32.mrb[7].mxu1 }
 0x2a5   : > { %v1212_v61 = vld [vmem:[#allocation6 + $0x3] ss:$8 sm:$0xf]  ;;  %v10331_v62 = vld [vmem:[#allocation6 + $0x4] ss:$8 sm:$0xf]  ;;  %v1614_v30 = vadd.f32 %v10313_v34, %v1613_v8 }
 0x2a6   : > { %v10333_v63 = vld [vmem:[#allocation6 + $0x5] ss:$8 sm:$0xf]  ;;  %v10339_v5 = vld [vmem:[#allocation6 + $0x6] ss:$8 sm:$0xf] }
 0x2a7   : > { %v10341_v6 = vld [vmem:[#allocation6 + $0x7] ss:$8 sm:$0xf]  ;;  %v7855_v7 = vpop.f32.mrb[8].mxu0 }
 0x2a8   : > { %1723 = vst.msk [vmem:[#allocation6 + $0x10] sm:$0xff] %vm1123_vm5, %v1603_v0  ;;  %1721 = vst.msk [vmem:[#allocation6] sm:$0xff] %vm1123_vm5, %v1595_v2  ;;  %v1037_v9 = vadd.f32 %v7855_v7, %v10313_v34  ;;  %v1028_v10 = vpop.f32.mrb[9].mxu0  ;;  %v7897_v11 = vpop.f32.mrb[8].mxu1 }
 0x2a9   : > { %1724 = vst.msk [vmem:[#allocation6 + $0x18] sm:$0xff] %vm1123_vm5, %v1606_v3  ;;  %1722 = vst.msk [vmem:[#allocation6 + $0x8] sm:$0xff] %vm1123_vm5, %v1598_v4  ;;  %v1029_v12 = vadd.f32 %v10313_v34, %v1028_v10  ;;  %v7856_v13 = vpop.f32.mrb[10].mxu0  ;;  %v1626_v14 = vpop.f32.mrb[9].mxu1 }
 0x2aa   : > { %1134 = vst.msk [vmem:[#allocation6 + $0x50] sm:$0xff] %vm1123_vm5, %v1037_v9  ;;  %v1040_v15 = vadd.f32 %v7856_v13, %v10313_v34  ;;  %v1031_v16 = vpop.f32.mrb[11].mxu0  ;;  %v7898_v17 = vpop.f32.mrb[10].mxu1 }
 0x2ab   : > { %v1157_v18 = vld [vmem:[#allocation6] ss:$8 sm:$0xf0]  ;;  %v1173_v19 = vld [vmem:[#allocation6 + $0x1] ss:$8 sm:$0xf0]  ;;  %v1032_v20 = vadd.f32 %v10313_v34, %v1031_v16 }
 0x2ac   : > { %1132 = vst.msk [vmem:[#allocation6 + $0x40] sm:$0xff] %vm1123_vm5, %v1029_v12  ;;  %v1158_v21 = vor.u32 %v1157_v18, %v1156_v58  ;;  %v1174_v22 = vor.u32 %v1173_v19, %v1172_v59  ;;  %v1193_v23 = vld [vmem:[#allocation6 + $0x2] ss:$8 sm:$0xf0]  ;;  %1135 = vst.msk [vmem:[#allocation6 + $0x58] sm:$0xff] %vm1123_vm5, %v1040_v15  ;;  %v1629_v37 = vpop.f32.mrb[11].mxu1  ;;  %v1635_v59 = vadd.f32 %v7897_v11, %v10313_v34 }
 0x2ad   : > { %v1213_v24 = vld [vmem:[#allocation6 + $0x3] ss:$8 sm:$0xf0]  ;;  %v1233_v25 = vld [vmem:[#allocation6 + $0x4] ss:$8 sm:$0xf0]  ;;  %v1194_v32 = vor.u32 %v1193_v23, %v1192_v60  ;;  %v1627_v60 = vadd.f32 %v10313_v34, %v1626_v14  ;;  %v1630_v3 = vadd.f32 %v10313_v34, %v1629_v37 }
 0x2ae   : > { %v1253_v26 = vld [vmem:[#allocation6 + $0x5] ss:$8 sm:$0xf0]  ;;  %1133 = vst.msk [vmem:[#allocation6 + $0x48] sm:$0xff] %vm1123_vm5, %v1032_v20  ;;  %v1187_v31 = vmax.f32 %v1158_v21, %v1174_v22  ;;  %v7859_v36 = vpop.f32.mrb[12].mxu0  ;;  %v1214_v39 = vor.u32 %v1213_v24, %v1212_v61  ;;  %v1234_v47 = vor.u32 %v1233_v25, %v10331_v62 }
 0x2af   : > { %v1273_v33 = vld [vmem:[#allocation6 + $0x6] ss:$8 sm:$0xf0]  ;;  %v1293_v35 = vld [vmem:[#allocation6 + $0x7] ss:$8 sm:$0xf0]  ;;  %v1053_v40 = vadd.f32 %v7859_v36, %v10313_v34  ;;  %v1254_v54 = vor.u32 %v1253_v26, %v10333_v63  ;;  %v1638_v63 = vadd.f32 %v7898_v17, %v10313_v34 }
 0x2b0   : > { %1727 = vst.msk [vmem:[#allocation6 + $0x30] sm:$0xff] %vm1123_vm5, %v1619_v27  ;;  %1725 = vst.msk [vmem:[#allocation6 + $0x20] sm:$0xff] %vm1123_vm5, %v1611_v28  ;;  %v1207_v38 = vmax.f32 %v1187_v31, %v1194_v32  ;;  %v1044_v41 = vpop.f32.mrb[13].mxu0  ;;  %v7901_v42 = vpop.f32.mrb[12].mxu1  ;;  %v1274_v62 = vor.u32 %v1273_v33, %v10339_v5  ;;  %v1294_v13 = vor.u32 %v1293_v35, %v10341_v6 }
 0x2b1   : > { %1728 = vst.msk [vmem:[#allocation6 + $0x38] sm:$0xff] %vm1123_vm5, %v1622_v29  ;;  %1726 = vst.msk [vmem:[#allocation6 + $0x28] sm:$0xff] %vm1123_vm5, %v1614_v30  ;;  %v1045_v43 = vadd.f32 %v10313_v34, %v1044_v41  ;;  %v7860_v44 = vpop.f32.mrb[14].mxu0  ;;  %v1642_v45 = vpop.f32.mrb[13].mxu1  ;;  %v1651_v29 = vadd.f32 %v7901_v42, %v10313_v34 }
 0x2b2   : > { %v1227_v46 = vmax.f32 %v1207_v38, %v1214_v39  ;;  %1138 = vst.msk [vmem:[#allocation6 + $0x70] sm:$0xff] %vm1123_vm5, %v1053_v40  ;;  %v1056_v48 = vadd.f32 %v7860_v44, %v10313_v34  ;;  %v1047_v49 = vpop.f32.mrb[15].mxu0  ;;  %v7902_v50 = vpop.f32.mrb[14].mxu1  ;;  %v1643_v30 = vadd.f32 %v10313_v34, %v1642_v45 }
 0x2b3   : > { %1136 = vst.msk [vmem:[#allocation6 + $0x60] sm:$0xff] %vm1123_vm5, %v1045_v43  ;;  %v1048_v51 = vadd.f32 %v10313_v34, %v1047_v49  ;;  %v1645_v52 = vpop.f32.mrb[15].mxu1  ;;  %v1654_v31 = vadd.f32 %v7902_v50, %v10313_v34 }
 0x2b4   : > { %v1247_v53 = vmax.f32 %v1227_v46, %v1234_v47  ;;  %1139 = vst.msk [vmem:[#allocation6 + $0x78] sm:$0xff] %vm1123_vm5, %v1056_v48  ;;  %v1646_v32 = vadd.f32 %v10313_v34, %v1645_v52 }
 0x2b5   : > { %v1160_v55 = vld [vmem:[#allocation6 + $0x40] ss:$8 sm:$0xf]  ;;  %v1176_v56 = vld [vmem:[#allocation6 + $0x41] ss:$8 sm:$0xf] }
 0x2b6   : > { %v1196_v57 = vld [vmem:[#allocation6 + $0x42] ss:$8 sm:$0xf]  ;;  %v10372_v58 = vld [vmem:[#allocation6 + $0x43] ss:$8 sm:$0xf]  ;;  %v1267_v61 = vmax.f32 %v1247_v53, %v1254_v54 }
 0x2b7   : > { %1137 = vst.msk [vmem:[#allocation6 + $0x68] sm:$0xff] %vm1123_vm5, %v1048_v51  ;;  %v10378_v0 = vld [vmem:[#allocation6 + $0x44] ss:$8 sm:$0xf]  ;;  %v7863_v5 = vpop.f32.mrb[16].mxu0 }
 0x2b8   : > { %v10380_v2 = vld [vmem:[#allocation6 + $0x45] ss:$8 sm:$0xf]  ;;  %v10384_v4 = vld [vmem:[#allocation6 + $0x46] ss:$8 sm:$0xf]  ;;  %v1287_v8 = vmax.f32 %v1267_v61, %v1274_v62  ;;  %v1069_v10 = vadd.f32 %v7863_v5, %v10313_v34 }
 0x2b9   : > { %v10386_v7 = vld [vmem:[#allocation6 + $0x47] ss:$8 sm:$0xf]  ;;  %v10392_v9 = vpop.f32.mrb[16].mxu1  ;;  %v1060_v11 = vpop.f32.mrb[17].mxu0 }
 0x2ba   : > { %1731 = vst.msk [vmem:[#allocation6 + $0x50] sm:$0xff] %vm1123_vm5, %v1635_v59  ;;  %1729 = vst.msk [vmem:[#allocation6 + $0x40] sm:$0xff] %vm1123_vm5, %v1627_v60  ;;  %v10395_v12 = vpop.f32.mrb[17].mxu1  ;;  %v1061_v14 = vadd.f32 %v10313_v34, %v1060_v11  ;;  %v7864_v15 = vpop.f32.mrb[18].mxu0  ;;  %v10405_v20 = vmax.f32 %v1287_v8, %v1294_v13 }
 0x2bb   : > { %1732 = vst.msk [vmem:[#allocation6 + $0x58] sm:$0xff] %vm1123_vm5, %v1638_v63  ;;  %1730 = vst.msk [vmem:[#allocation6 + $0x48] sm:$0xff] %vm1123_vm5, %v1630_v3  ;;  %v10399_v16 = vpop.f32.mrb[18].mxu1  ;;  %v1072_v17 = vadd.f32 %v7864_v15, %v10313_v34  ;;  %v1063_v18 = vpop.f32.mrb[19].mxu0  ;;  %v1659_v63 = vadd.f32 %v10313_v34, %v10395_v12 }
 0x2bc   : > { %1142 = vst.msk [vmem:[#allocation6 + $0x90] sm:$0xff] %vm1123_vm5, %v1069_v10  ;;  %v10403_v19 = vpop.f32.mrb[19].mxu1  ;;  %1140 = vst.msk [vmem:[#allocation6 + $0x80] sm:$0xff] %vm1123_vm5, %v1061_v14  ;;  %v1064_v6 = vadd.f32 %v10313_v34, %v1063_v18  ;;  %v1315_v40 = vmul.f32 0.044715, %v10405_v20  ;;  %v1670_v11 = vadd.f32 %v10399_v16, %v10313_v34 }
 0x2bd   : > { %1143 = vst.msk [vmem:[#allocation6 + $0x98] sm:$0xff] %vm1123_vm5, %v1072_v17  ;;  %v10465_v13 = vld [vmem:[#allocation6] ss:$8 sm:$0xf0] }
 0x2be   : > { %v1161_v21 = vld [vmem:[#allocation6 + $0x40] ss:$8 sm:$0xf0]  ;;  %v1177_v22 = vld [vmem:[#allocation6 + $0x41] ss:$8 sm:$0xf0]  ;;  %v1319_v49 = vmul.f32 %v1315_v40, %v10405_v20 }
 0x2bf   : > { %v1162_v23 = vor.u32 %v1161_v21, %v1160_v55  ;;  %v1178_v24 = vor.u32 %v1177_v22, %v1176_v56  ;;  %v1197_v25 = vld [vmem:[#allocation6 + $0x42] ss:$8 sm:$0xf0]  ;;  %v1217_v26 = vld [vmem:[#allocation6 + $0x43] ss:$8 sm:$0xf0] }
 0x2c0   : > { %v1237_v27 = vld [vmem:[#allocation6 + $0x44] ss:$8 sm:$0xf0]  ;;  %v1257_v28 = vld [vmem:[#allocation6 + $0x45] ss:$8 sm:$0xf0]  ;;  %v1198_v35 = vor.u32 %v1197_v25, %v1196_v57  ;;  %v1218_v42 = vor.u32 %v1217_v26, %v10372_v58  ;;  %v1323_v56 = vmul.f32 %v1319_v49, %v10405_v20 }
 0x2c1   : > { %1141 = vst.msk [vmem:[#allocation6 + $0x88] sm:$0xff] %vm1123_vm5, %v1064_v6  ;;  %v1188_v33 = vmax.f32 %v1162_v23, %v1178_v24  ;;  %v1277_v36 = vld [vmem:[#allocation6 + $0x46] ss:$8 sm:$0xf0]  ;;  %v7867_v38 = vpop.f32.mrb[20].mxu0  ;;  %v10421_v39 = vpop.f32.mrb[20].mxu1  ;;  %v1238_v51 = vor.u32 %v1237_v27, %v10378_v0  ;;  %v1258_v58 = vor.u32 %v1257_v28, %v10380_v2  ;;  %v1667_v0 = vadd.f32 %v10392_v9, %v10313_v34 }
 0x2c2   : > { %v10415_v37 = vld [vmem:[#allocation6 + $0x47] ss:$8 sm:$0xf0]  ;;  %v1085_v43 = vadd.f32 %v7867_v38, %v10313_v34  ;;  %v1076_v44 = vpop.f32.mrb[21].mxu0  ;;  %v10426_v45 = vpop.f32.mrb[21].mxu1  ;;  %v1327_v2 = vadd.f32 %v1323_v56, %v10405_v20  ;;  %v1278_v8 = vor.u32 %v1277_v36, %v10384_v4  ;;  %v1662_v9 = vadd.f32 %v10313_v34, %v10403_v19 }
 0x2c3   : > { %1735 = vst.msk [vmem:[#allocation6 + $0x70] sm:$0xff] %vm1123_vm5, %v1651_v29  ;;  %1733 = vst.msk [vmem:[#allocation6 + $0x60] sm:$0xff] %vm1123_vm5, %v1643_v30  ;;  %v1208_v41 = vmax.f32 %v1188_v33, %v1198_v35  ;;  %v1077_v46 = vadd.f32 %v10313_v34, %v1076_v44  ;;  %v7868_v47 = vpop.f32.mrb[22].mxu0  ;;  %v10429_v48 = vpop.f32.mrb[22].mxu1  ;;  %v10477_v19 = vld [vmem:[#allocation16] sm:$0xff]   ;;  %v1298_v25 = vor.u32 %v10415_v37, %v10386_v7 }
 0x2c4   : > { %1736 = vst.msk [vmem:[#allocation6 + $0x78] sm:$0xff] %vm1123_vm5, %v1654_v31  ;;  %1734 = vst.msk [vmem:[#allocation6 + $0x68] sm:$0xff] %vm1123_vm5, %v1646_v32  ;;  %v1088_v52 = vadd.f32 %v7868_v47, %v10313_v34  ;;  %v1079_v53 = vpop.f32.mrb[23].mxu0  ;;  %v10435_v54 = vpop.f32.mrb[23].mxu1  ;;  %v1331_v17 = vmul.f32 0.7978846, %v1327_v2  ;;  %8027 = vmatprep.subr.bf16.mxu0 %v10477_v19 }
 0x2c5   : > { %v1228_v50 = vmax.f32 %v1208_v41, %v1218_v42  ;;  %1146 = vst.msk [vmem:[#allocation6 + $0xb0] sm:$0xff] %vm1123_vm5, %v1085_v43  ;;  %1144 = vst.msk [vmem:[#allocation6 + $0xa0] sm:$0xff] %vm1123_vm5, %v1077_v46  ;;  %v1080_v55 = vadd.f32 %v10313_v34, %v1079_v53  ;;  %v1753_v18 = vld [vmem:[#allocation6] ss:$8 sm:$0xf]  ;;  %v1675_v53 = vadd.f32 %v10313_v34, %v10426_v45 }
 0x2c6   : > { %1147 = vst.msk [vmem:[#allocation6 + $0xb8] sm:$0xff] %vm1123_vm5, %v1088_v52  ;;  %v7871_v4 = vpop.f32.mrb[24].mxu0  ;;  %v1765_v23 = vld [vmem:[#allocation6 + $0x1] ss:$8 sm:$0xf]  ;;  %v1755_v33 = vor.u32 %v10465_v13, %v1753_v18  ;;  %9004 = vtanh.f32 %v1331_v17  ;;  %v1683_v52 = vadd.f32 %v10421_v39, %v10313_v34  ;;  %v1678_v56 = vadd.f32 %v10313_v34, %v10435_v54 }
 0x2c7   : > { %v1248_v57 = vmax.f32 %v1228_v50, %v1238_v51  ;;  %1145 = vst.msk [vmem:[#allocation6 + $0xa8] sm:$0xff] %vm1123_vm5, %v1080_v55  ;;  %v1101_v21 = vadd.f32 %v7871_v4, %v10313_v34  ;;  %v1092_v22 = vpop.f32.mrb[25].mxu0  ;;  %v1766_v24 = vld [vmem:[#allocation6 + $0x1] ss:$8 sm:$0xf0]  ;;  %v1686_v55 = vadd.f32 %v10429_v48, %v10313_v34 }
 0x2c8   : > { %v10441_v59 = vld [vmem:[#allocation6 + $0x80] ss:$8 sm:$0xf]  ;;  %v10443_v60 = vld [vmem:[#allocation6 + $0x81] ss:$8 sm:$0xf]  ;;  %v1093_v26 = vadd.f32 %v10313_v34, %v1092_v22  ;;  %v1767_v41 = vor.u32 %v1766_v24, %v1765_v23 }
 0x2c9   : > { %v10446_v61 = vld [vmem:[#allocation6 + $0x82] ss:$8 sm:$0xf]  ;;  %v10448_v62 = vld [vmem:[#allocation6 + $0x83] ss:$8 sm:$0xf]  ;;  %v1268_v3 = vmax.f32 %v1248_v57, %v1258_v58 }
 0x2ca   : > { %v10457_v5 = vld [vmem:[#allocation6 + $0x84] ss:$8 sm:$0xf]  ;;  %v10459_v10 = vld [vmem:[#allocation6 + $0x85] ss:$8 sm:$0xf] }
 0x2cb   : > { %v10467_v12 = vld [vmem:[#allocation6 + $0x86] ss:$8 sm:$0xf]  ;;  %v10469_v14 = vld [vmem:[#allocation6 + $0x87] ss:$8 sm:$0xf]  ;;  %v1288_v15 = vmax.f32 %v1268_v3, %v1278_v8 }
 0x2cc   : > { %1739 = vst.msk [vmem:[#allocation6 + $0x90] sm:$0xff] %vm1123_vm5, %v1667_v0  ;;  %1737 = vst.msk [vmem:[#allocation6 + $0x80] sm:$0xff] %vm1123_vm5, %v1659_v63  ;;  %v10475_v16 = vpop.f32.mrb[24].mxu1  ;;  %v7872_v27 = vpop.f32.mrb[26].mxu0 }
 0x2cd   : > { %1740 = vst.msk [vmem:[#allocation6 + $0x98] sm:$0xff] %vm1123_vm5, %v1670_v11  ;;  %1738 = vst.msk [vmem:[#allocation6 + $0x88] sm:$0xff] %vm1123_vm5, %v1662_v9  ;;  %v10480_v6 = vpop.f32.mrb[25].mxu1  ;;  %v10487_v29 = vld [vmem:[#allocation6 + $0x40] ss:$8 sm:$0xf0]  ;;  %v1104_v30 = vadd.f32 %v7872_v27, %v10313_v34  ;;  %v10495_v7 = vmax.f32 %v1288_v15, %v1298_v25 }
 0x2ce   : > { %v10485_v28 = vpop.f32.mrb[26].mxu1  ;;  %1150 = vst.msk [vmem:[#allocation6 + $0xd0] sm:$0xff] %vm1123_vm5, %v1101_v21  ;;  %v1095_v31 = vpop.f32.mrb[27].mxu0  ;;  %v1769_v35 = vld [vmem:[#allocation6 + $0x41] ss:$8 sm:$0xf0] }
 0x2cf   : > { %v10492_v32 = vpop.f32.mrb[27].mxu1  ;;  %v1165_v36 = vld [vmem:[#allocation6 + $0x80] ss:$8 sm:$0xf0]  ;;  %1148 = vst.msk [vmem:[#allocation6 + $0xc0] sm:$0xff] %vm1123_vm5, %v1093_v26  ;;  %v1096_v38 = vadd.f32 %v10313_v34, %v1095_v31  ;;  %1151 = vst.msk [vmem:[#allocation6 + $0xd8] sm:$0xff] %vm1123_vm5, %v1104_v30 }
 0x2d0   : > { %v1181_v37 = vld [vmem:[#allocation6 + $0x81] ss:$8 sm:$0xf0]  ;;  %v1756_v40 = vld [vmem:[#allocation6 + $0x40] ss:$8 sm:$0xf]  ;;  %v1166_v43 = vor.u32 %v1165_v36, %v10441_v59 }
 0x2d1   : > { %v1768_v42 = vld [vmem:[#allocation6 + $0x41] ss:$8 sm:$0xf]  ;;  %v1182_v44 = vor.u32 %v1181_v37, %v10443_v60  ;;  %v1201_v46 = vld [vmem:[#allocation6 + $0x82] ss:$8 sm:$0xf0]  ;;  %v1758_v39 = vor.u32 %v10487_v29, %v1756_v40 }
 0x2d2   : > { %v1221_v47 = vld [vmem:[#allocation6 + $0x83] ss:$8 sm:$0xf0]  ;;  %v1782_v49 = vld [vmem:[#allocation6 + $0x2] ss:$8 sm:$0xf0]  ;;  %v1202_v58 = vor.u32 %v1201_v46, %v10446_v61  ;;  %v1770_v0 = vor.u32 %v1769_v35, %v1768_v42  ;;  %v1777_v61 = vmax.f32 %v1755_v33, %v1767_v41 }
 0x2d3   : > { %v1241_v50 = vld [vmem:[#allocation6 + $0x84] ss:$8 sm:$0xf0]  ;;  %v10502_v51 = vld [vmem:[#allocation6 + $0x85] ss:$8 sm:$0xf0]  ;;  %v1189_v57 = vmax.f32 %v1166_v43, %v1182_v44  ;;  %v1222_v3 = vor.u32 %v1221_v47, %v10448_v62  ;;  %v9005_v44 = vpop.eup %9004 }
 0x2d4   : > { %1149 = vst.msk [vmem:[#allocation6 + $0xc8] sm:$0xff] %vm1123_vm5, %v1096_v38  ;;  %v10514_v59 = vld [vmem:[#allocation6 + $0x86] ss:$8 sm:$0xf0]  ;;  %v7875_v45 = vpop.f32.mrb[28].mxu0  ;;  %v10523_v48 = vpop.f32.mrb[28].mxu1  ;;  %v1242_v24 = vor.u32 %v1241_v50, %v10457_v5  ;;  %v1778_v27 = vmax.f32 %v1758_v39, %v1770_v0  ;;  %v1262_v5 = vor.u32 %v10502_v51, %v10459_v10  ;;  %v1691_v10 = vadd.f32 %v10313_v34, %v10480_v6 }
 0x2d5   : > { %v10516_v60 = vld [vmem:[#allocation6 + $0x87] ss:$8 sm:$0xf0]  ;;  %v1781_v63 = vld [vmem:[#allocation6 + $0x2] ss:$8 sm:$0xf]  ;;  %v1209_v2 = vmax.f32 %v1189_v57, %v1202_v58  ;;  %v1117_v8 = vadd.f32 %v7875_v45, %v10313_v34  ;;  %v1702_v50 = vadd.f32 %v10485_v28, %v10313_v34 }
 0x2d6   : > { %1743 = vst.msk [vmem:[#allocation6 + $0xb0] sm:$0xff] %vm1123_vm5, %v1683_v52  ;;  %1741 = vst.msk [vmem:[#allocation6 + $0xa0] sm:$0xff] %vm1123_vm5, %v1675_v53  ;;  %v1316_v54 = vmul.f32 0.044715, %v10495_v7  ;;  %v1108_v11 = vpop.f32.mrb[29].mxu0  ;;  %v10528_v9 = vpop.f32.mrb[29].mxu1  ;;  %v1783_v21 = vor.u32 %v1782_v49, %v1781_v63  ;;  %v1699_v49 = vadd.f32 %v10475_v16, %v10313_v34  ;;  %v1694_v16 = vadd.f32 %v10313_v34, %v10492_v32 }
 0x2d7   : > { %1744 = vst.msk [vmem:[#allocation6 + $0xb8] sm:$0xff] %vm1123_vm5, %v1686_v55  ;;  %1742 = vst.msk [vmem:[#allocation6 + $0xa8] sm:$0xff] %vm1123_vm5, %v1678_v56  ;;  %v1798_v13 = vld [vmem:[#allocation6 + $0x3] ss:$8 sm:$0xf0]  ;;  %v1109_v15 = vadd.f32 %v10313_v34, %v1108_v11  ;;  %v7876_v4 = vpop.f32.mrb[30].mxu0  ;;  %v1229_v23 = vmax.f32 %v1209_v2, %v1222_v3  ;;  %v1282_v55 = vor.u32 %v10514_v59, %v10467_v12 }
 0x2d8   : > { %v10531_v17 = vpop.f32.mrb[30].mxu1  ;;  %v1320_v18 = vmul.f32 %v1316_v54, %v10495_v7  ;;  %v1785_v22 = vld [vmem:[#allocation6 + $0x42] ss:$8 sm:$0xf0]  ;;  %1154 = vst.msk [vmem:[#allocation6 + $0xf0] sm:$0xff] %vm1123_vm5, %v1117_v8  ;;  %v1120_v62 = vadd.f32 %v7876_v4, %v10313_v34  ;;  %v1111_v25 = vpop.f32.mrb[31].mxu0  ;;  %v1793_v35 = vmax.f32 %v1777_v61, %v1783_v21 }
 0x2d9   : > { %v10537_v26 = vpop.f32.mrb[31].mxu1  ;;  %v1797_v29 = vld [vmem:[#allocation6 + $0x3] ss:$8 sm:$0xf]  ;;  %1152 = vst.msk [vmem:[#allocation6 + $0xe0] sm:$0xff] %vm1123_vm5, %v1109_v15  ;;  %v1112_v30 = vadd.f32 %v10313_v34, %v1111_v25  ;;  %v1249_v37 = vmax.f32 %v1229_v23, %v1242_v24  ;;  %v7931_v12 = vpop.f32.mrb[32].mxu0  ;;  %v1302_v15 = vor.u32 %v10516_v60, %v10469_v14 }
 0x2da   : > { %v1324_v31 = vmul.f32 %v1320_v18, %v10495_v7  ;;  %v1784_v33 = vld [vmem:[#allocation6 + $0x42] ss:$8 sm:$0xf]  ;;  %v1801_v36 = vld [vmem:[#allocation6 + $0x43] ss:$8 sm:$0xf0]  ;;  %v1799_v42 = vor.u32 %v1798_v13, %v1797_v29 }
 0x2db   : > { %v10544_v38 = vld [vmem:[#allocation6 + $0xc0] ss:$8 sm:$0xf]  ;;  %v10546_v40 = vld [vmem:[#allocation6 + $0xc1] ss:$8 sm:$0xf]  ;;  %v1786_v41 = vor.u32 %v1785_v22, %v1784_v33  ;;  %v1269_v53 = vmax.f32 %v1249_v37, %v1262_v5  ;;  %v1715_v5 = vadd.f32 %v10523_v48, %v10313_v34 }
 0x2dc   : > { %1155 = vst.msk [vmem:[#allocation6 + $0xf8] sm:$0xff] %vm1123_vm5, %v1120_v62  ;;  %v1814_v43 = vld [vmem:[#allocation6 + $0x4] ss:$8 sm:$0xf0]  ;;  %1153 = vst.msk [vmem:[#allocation6 + $0xe8] sm:$0xff] %vm1123_vm5, %v1112_v30  ;;  %v1328_v51 = vadd.f32 %v1324_v31, %v10495_v7  ;;  %v1809_v0 = vmax.f32 %v1793_v35, %v1799_v42  ;;  %v10577_v59 = vpop.f32.mrb[32].mxu1 }
 0x2dd   : > { %v10549_v46 = vld [vmem:[#allocation6 + $0xc2] ss:$8 sm:$0xf]  ;;  %v10551_v47 = vld [vmem:[#allocation6 + $0xc3] ss:$8 sm:$0xf]  ;;  %v1794_v6 = vmax.f32 %v1778_v27, %v1786_v41  ;;  %v1289_v63 = vmax.f32 %v1269_v53, %v1282_v55 }
 0x2de   : > { %v1800_v52 = vld [vmem:[#allocation6 + $0x43] ss:$8 sm:$0xf]  ;;  %v10563_v56 = vld [vmem:[#allocation6 + $0xc4] ss:$8 sm:$0xf] }
 0x2df   : > { %v10565_v57 = vld [vmem:[#allocation6 + $0xc5] ss:$8 sm:$0xf]  ;;  %v1813_v58 = vld [vmem:[#allocation6 + $0x4] ss:$8 sm:$0xf]  ;;  %v1802_v54 = vor.u32 %v1801_v36, %v1800_v52  ;;  %v10591_v30 = vmax.f32 %v1289_v63, %v1302_v15 }
 0x2e0   : > { %v10569_v39 = vld [vmem:[#allocation6 + $0xc6] ss:$8 sm:$0xf]  ;;  %v10571_v28 = vld [vmem:[#allocation6 + $0xc7] ss:$8 sm:$0xf]  ;;  %v1815_v8 = vor.u32 %v1814_v43, %v1813_v58 }
 0x2e1   : > { %1747 = vst.msk [vmem:[#allocation6 + $0xd0] sm:$0xff] %vm1123_vm5, %v1699_v49  ;;  %1745 = vst.msk [vmem:[#allocation6 + $0xc0] sm:$0xff] %vm1123_vm5, %v1691_v10  ;;  %v1332_v32 = vmul.f32 0.7978846, %v1328_v51  ;;  %v1339_v45 = vadd.f32 1.0, %v9005_v44  ;;  %v2160_v61 = vpop.f32.mrb[33].mxu0  ;;  %v1810_v21 = vmax.f32 %v1794_v6, %v1802_v54  ;;  %v1707_v44 = vadd.f32 %v10313_v34, %v10528_v9 }
 0x2e2   : > { %1748 = vst.msk [vmem:[#allocation6 + $0xd8] sm:$0xff] %vm1123_vm5, %v1702_v50  ;;  %1746 = vst.msk [vmem:[#allocation6 + $0xc8] sm:$0xff] %vm1123_vm5, %v1694_v16  ;;  %v10579_v2 = vpop.f32.mrb[33].mxu1  ;;  %v1311_v3 = vmul.f32 0.5, %v10405_v20  ;;  %v7932_v4 = vpop.f32.mrb[34].mxu0  ;;  %v10589_v25 = vmul.f32 0.5, %v10495_v7  ;;  %v1825_v27 = vmax.f32 %v1809_v0, %v1815_v8  ;;  %v2169_v9 = vadd.f32 %v7931_v12, %v10313_v34 }
 0x2e3   : > { %v1816_v11 = vld [vmem:[#allocation6 + $0x44] ss:$8 sm:$0xf]  ;;  %v10584_v18 = vpop.f32.mrb[34].mxu1  ;;  %9006 = vtanh.f32 %v1332_v32  ;;  %v2163_v24 = vpop.f32.mrb[35].mxu0  ;;  %v2172_v0 = vadd.f32 %v7932_v4, %v10313_v34 }
 0x2e4   : > { %v1817_v13 = vld [vmem:[#allocation6 + $0x44] ss:$8 sm:$0xf0]  ;;  %v1829_v22 = vld [vmem:[#allocation6 + $0x5] ss:$8 sm:$0xf]  ;;  %v1343_v20 = vmul.f32 %v1339_v45, %v1311_v3  ;;  %v2164_v63 = vadd.f32 %v10313_v34, %v2163_v24 }
 0x2e5   : > { %v1830_v23 = vld [vmem:[#allocation6 + $0x5] ss:$8 sm:$0xf0]  ;;  %v10586_v62 = vpop.f32.mrb[35].mxu1  ;;  %v1818_v60 = vor.u32 %v1817_v13, %v1816_v11 }
 0x2e6   : > { %v1833_v29 = vld [vmem:[#allocation6 + $0x45] ss:$8 sm:$0xf0]  ;;  %v1169_v31 = vld [vmem:[#allocation6 + $0xc0] ss:$8 sm:$0xf0]  ;;  %v1831_v7 = vor.u32 %v1830_v23, %v1829_v22 }
 0x2e7   : > { %v1185_v14 = vld [vmem:[#allocation6 + $0xc1] ss:$8 sm:$0xf0]  ;;  %v1170_v33 = vor.u32 %v1169_v31, %v10544_v38  ;;  %v1205_v36 = vld [vmem:[#allocation6 + $0xc2] ss:$8 sm:$0xf0]  ;;  %v1718_v38 = vadd.f32 %v10531_v17, %v10313_v34  ;;  %v1826_v49 = vmax.f32 %v1810_v21, %v1818_v60  ;;  %v2161_v17 = vadd.f32 %v10313_v34, %v2160_v61 }
 0x2e8   : > { %v1186_v35 = vor.u32 %v1185_v14, %v10546_v40  ;;  %v1225_v37 = vld [vmem:[#allocation6 + $0xc3] ss:$8 sm:$0xf0]  ;;  %1347 = vst.msk [vmem:[#allocation2 + $0x3] sm:$0xff] %vm1123_vm5, %v1343_v20  ;;  %v1710_v40 = vadd.f32 %v10313_v34, %v10537_v26  ;;  %v1206_v48 = vor.u32 %v1205_v36, %v10549_v46  ;;  %v1841_v52 = vmax.f32 %v1825_v27, %v1831_v7  ;;  %v7935_v26 = vpop.f32.mrb[36].mxu0  ;;  %v10617_v53 = vpop.f32.mrb[36].mxu1 }
 0x2e9   : > { %v1832_v41 = vld [vmem:[#allocation6 + $0x45] ss:$8 sm:$0xf]  ;;  %v1245_v42 = vld [vmem:[#allocation6 + $0xc4] ss:$8 sm:$0xf0]  ;;  %v1226_v58 = vor.u32 %v1225_v37, %v10551_v47  ;;  %v2185_v54 = vadd.f32 %v7935_v26, %v10313_v34 }
 0x2ea   : > { %v10598_v43 = vld [vmem:[#allocation6 + $0xc5] ss:$8 sm:$0xf0]  ;;  %v1190_v10 = vmax.f32 %v1170_v33, %v1186_v35  ;;  %v10607_v50 = vld [vmem:[#allocation6 + $0xc6] ss:$8 sm:$0xf0]  ;;  %v1834_v55 = vor.u32 %v1833_v29, %v1832_v41  ;;  %v1246_v4 = vor.u32 %v1245_v42, %v10563_v56 }
 0x2eb   : > { %v10609_v51 = vld [vmem:[#allocation6 + $0xc7] ss:$8 sm:$0xf0]  ;;  %v1317_v46 = vmul.f32 0.044715, %v10591_v30  ;;  %v2176_v32 = vpop.f32.mrb[37].mxu0  ;;  %v1266_v29 = vor.u32 %v10598_v43, %v10565_v57  ;;  %v1286_v57 = vor.u32 %v10607_v50, %v10569_v39 }
 0x2ec   : > { %1751 = vst.msk [vmem:[#allocation6 + $0xf0] sm:$0xff] %vm1123_vm5, %v1715_v5  ;;  %1749 = vst.msk [vmem:[#allocation6 + $0xe0] sm:$0xff] %vm1123_vm5, %v1707_v44  ;;  %v1845_v16 = vld [vmem:[#allocation6 + $0x6] ss:$8 sm:$0xf]  ;;  %v1210_v6 = vmax.f32 %v1190_v10, %v1206_v48  ;;  %v10623_v12 = vpop.f32.mrb[37].mxu1  ;;  %v2177_v61 = vadd.f32 %v10313_v34, %v2176_v32  ;;  %v1842_v13 = vmax.f32 %v1826_v49, %v1834_v55 }
 0x2ed   : > { %1752 = vst.msk [vmem:[#allocation6 + $0xf8] sm:$0xff] %vm1123_vm5, %v1718_v38  ;;  %1750 = vst.msk [vmem:[#allocation6 + $0xe8] sm:$0xff] %vm1123_vm5, %v1710_v40  ;;  %v1846_v45 = vld [vmem:[#allocation6 + $0x6] ss:$8 sm:$0xf0]  ;;  %v7936_v3 = vpop.f32.mrb[38].mxu0  ;;  %v1321_v11 = vmul.f32 %v1317_v46, %v10591_v30  ;;  %v9007_v27 = vpop.eup %9006 }
 0x2ee   : > { %v10627_v8 = vpop.f32.mrb[38].mxu1  ;;  %v1848_v15 = vld [vmem:[#allocation6 + $0x46] ss:$8 sm:$0xf]  ;;  %v1230_v47 = vmax.f32 %v1210_v6, %v1226_v58  ;;  %v2188_v21 = vadd.f32 %v7936_v3, %v10313_v34  ;;  %v2179_v22 = vpop.f32.mrb[39].mxu0  ;;  %v1847_v24 = vor.u32 %v1846_v45, %v1845_v16  ;;  %v1340_v5 = vadd.f32 1.0, %v9007_v27 }
 0x2ef   : > { %v10632_v23 = vpop.f32.mrb[39].mxu1  ;;  %v1849_v20 = vld [vmem:[#allocation6 + $0x46] ss:$8 sm:$0xf0]  ;;  %v2180_v31 = vadd.f32 %v10313_v34, %v2179_v22  ;;  %v7939_v14 = vpop.f32.mrb[40].mxu0  ;;  %v1325_v60 = vmul.f32 %v1321_v11, %v10591_v30  ;;  %v1306_v58 = vor.u32 %v10609_v51, %v10571_v28 }
 0x2f0   : > { %v1850_v33 = vor.u32 %v1849_v20, %v1848_v15  ;;  %v1861_v35 = vld [vmem:[#allocation6 + $0x7] ss:$8 sm:$0xf]  ;;  %v1250_v36 = vmax.f32 %v1230_v47, %v1246_v4  ;;  %v2201_v56 = vadd.f32 %v7939_v14, %v10313_v34  ;;  %v2192_v37 = vpop.f32.mrb[41].mxu0  ;;  %v1857_v7 = vmax.f32 %v1841_v52, %v1847_v24  ;;  %v10646_v44 = vpop.f32.mrb[40].mxu1 }
 0x2f1   : > { %v1862_v41 = vld [vmem:[#allocation6 + $0x7] ss:$8 sm:$0xf0]  ;;  %2287 = vst.msk [vmem:[#allocation6] sm:$0xff] %vm1123_vm5, %v2161_v17  ;;  %2288 = vst.msk [vmem:[#allocation6 + $0x8] sm:$0xff] %vm1123_vm5, %v2164_v63  ;;  %v2193_v42 = vadd.f32 %v10313_v34, %v2192_v37  ;;  %v7940_v43 = vpop.f32.mrb[42].mxu0  ;;  %v1329_v38 = vadd.f32 %v1325_v60, %v10591_v30  ;;  %v1344_v52 = vmul.f32 %v1340_v5, %v10589_v25 }
 0x2f2   : > { %2289 = vst.msk [vmem:[#allocation6 + $0x10] sm:$0xff] %vm1123_vm5, %v2169_v9  ;;  %2290 = vst.msk [vmem:[#allocation6 + $0x18] sm:$0xff] %vm1123_vm5, %v2172_v0  ;;  %v1858_v40 = vmax.f32 %v1842_v13, %v1850_v33  ;;  %v1864_v49 = vld [vmem:[#allocation6 + $0x47] ss:$8 sm:$0xf]  ;;  %v1270_v10 = vmax.f32 %v1250_v36, %v1266_v29  ;;  %v2204_v39 = vadd.f32 %v7940_v43, %v10313_v34  ;;  %v2195_v48 = vpop.f32.mrb[43].mxu0 }
 0x2f3   : > { %2291 = vst.msk [vmem:[#allocation6 + $0x20] sm:$0xff] %vm1123_vm5, %v2177_v61  ;;  %2292 = vst.msk [vmem:[#allocation6 + $0x28] sm:$0xff] %vm1123_vm5, %v2180_v31  ;;  %v10654_v50 = vpop.f32.mrb[41].mxu1  ;;  %v1863_v9 = vor.u32 %v1862_v41, %v1861_v35  ;;  %v1865_v17 = vld [vmem:[#allocation6 + $0x47] ss:$8 sm:$0xf0]  ;;  %v2196_v26 = vadd.f32 %v10313_v34, %v2195_v48 }
 0x2f4   : > { %2293 = vst.msk [vmem:[#allocation6 + $0x30] sm:$0xff] %vm1123_vm5, %v2185_v54  ;;  %2294 = vst.msk [vmem:[#allocation6 + $0x38] sm:$0xff] %vm1123_vm5, %v2188_v21  ;;  %v10659_v46 = vpop.f32.mrb[42].mxu1  ;;  %v1333_v55 = vmul.f32 0.7978846, %v1329_v38  ;;  %v1866_v16 = vor.u32 %v1865_v17, %v1864_v49  ;;  %v1290_v6 = vmax.f32 %v1270_v10, %v1286_v57  ;;  %v7943_v61 = vpop.f32.mrb[44].mxu0 }
 0x2f5   : > { %2297 = vst.msk [vmem:[#allocation6 + $0x50] sm:$0xff] %vm1123_vm5, %v2201_v56  ;;  %2295 = vst.msk [vmem:[#allocation6 + $0x40] sm:$0xff] %vm1123_vm5, %v2193_v42  ;;  %v10664_v0 = vpop.f32.mrb[43].mxu1  ;;  %v10667_v25 = vmax.f32 %v1857_v7, %v1863_v9  ;;  %v1760_v54 = vld [vmem:[#allocation6 + $0x80] ss:$8 sm:$0xf0]  ;;  %v2217_v3 = vadd.f32 %v7943_v61, %v10313_v34 }
 0x2f6   : > { %1348 = vst.msk [vmem:[#allocation2 + $0xb] sm:$0xff] %vm1123_vm5, %v1344_v52  ;;  %2298 = vst.msk [vmem:[#allocation6 + $0x58] sm:$0xff] %vm1123_vm5, %v2204_v39  ;;  %9008 = vtanh.f32 %v1333_v55  ;;  %v10670_v63 = vmax.f32 %v1858_v40, %v1866_v16  ;;  %v10673_v32 = vmax.f32 %v1290_v6, %v1306_v58  ;;  %v1759_v51 = vld [vmem:[#allocation6 + $0x80] ss:$8 sm:$0xf]  ;;  %v2208_v11 = vpop.f32.mrb[45].mxu0 }
 0x2f7   : > { %2296 = vst.msk [vmem:[#allocation6 + $0x48] sm:$0xff] %vm1123_vm5, %v2196_v26  ;;  %v1881_v45 = vmul.f32 0.044715, %v10667_v25  ;;  %v1762_v47 = vld [vmem:[#allocation6 + $0xc0] ss:$8 sm:$0xf]  ;;  %v2209_v21 = vadd.f32 %v10313_v34, %v2208_v11  ;;  %v1761_v27 = vor.u32 %v1760_v54, %v1759_v51 }
 0x2f8   : > { %v1882_v28 = vmul.f32 0.044715, %v10670_v63  ;;  %v1318_v13 = vmul.f32 0.044715, %v10673_v32  ;;  %v7944_v22 = vpop.f32.mrb[46].mxu0  ;;  %v10681_v24 = vpop.f32.mrb[44].mxu1 }
 0x2f9   : > { %v1885_v15 = vmul.f32 %v1881_v45, %v10667_v25  ;;  %v1763_v4 = vld [vmem:[#allocation6 + $0xc0] ss:$8 sm:$0xf0]  ;;  %v1772_v29 = vld [vmem:[#allocation6 + $0x81] ss:$8 sm:$0xf0]  ;;  %v2220_v31 = vadd.f32 %v7944_v22, %v10313_v34 }
 0x2fa   : > { %v1886_v20 = vmul.f32 %v1882_v28, %v10670_v63  ;;  %v2211_v14 = vpop.f32.mrb[47].mxu0  ;;  %v10685_v60 = vpop.f32.mrb[45].mxu1  ;;  %v1322_v33 = vmul.f32 %v1318_v13, %v10673_v32  ;;  %2301 = vst.msk [vmem:[#allocation6 + $0x70] sm:$0xff] %vm1123_vm5, %v2217_v3  ;;  %v1771_v36 = vld [vmem:[#allocation6 + $0x81] ss:$8 sm:$0xf]  ;;  %v1764_v57 = vor.u32 %v1763_v4, %v1762_v47 }
 0x2fb   : > { %v1889_v35 = vmul.f32 %v1885_v15, %v10667_v25  ;;  %v3081_v56 = vld [vmem:[#allocation2 + $0x1] sm:$0xff]  ;;  %v2212_v5 = vadd.f32 %v10313_v34, %v2211_v14  ;;  %v10691_v7 = vpop.f32.mrb[46].mxu1  ;;  %2299 = vst.msk [vmem:[#allocation6 + $0x60] sm:$0xff] %vm1123_vm5, %v2209_v21  ;;  %v1773_v42 = vor.u32 %v1772_v29, %v1771_v36  ;;  %2302 = vst.msk [vmem:[#allocation6 + $0x78] sm:$0xff] %vm1123_vm5, %v2220_v31  ;;  %v1313_v26 = vmul.f32 0.5, %v10591_v30  ;;  %v7947_v45 = vpop.f32.mrb[48].mxu0 }
 0x2fc   : > { %v1890_v41 = vmul.f32 %v1886_v20, %v10670_v63  ;;  %v1775_v43 = vld [vmem:[#allocation6 + $0xc1] ss:$8 sm:$0xf0]  ;;  %v10695_v40 = vpop.f32.mrb[47].mxu1  ;;  %v1326_v49 = vmul.f32 %v1322_v33, %v10673_v32  ;;  %v2224_v3 = vpop.f32.mrb[49].mxu0 }
 0x2fd   : > { %v3082_v37 = vld [vmem:[#allocation2 + $0x9] sm:$0xff]  ;;  %v1893_v10 = vadd.f32 %v1889_v35, %v10667_v25  ;;  %2300 = vst.msk [vmem:[#allocation6 + $0x68] sm:$0xff] %vm1123_vm5, %v2212_v5  ;;  %v1779_v52 = vmax.f32 %v1761_v27, %v1773_v42  ;;  %v7948_v4 = vpop.f32.mrb[50].mxu0  ;;  %v10705_v21 = vpop.f32.mrb[48].mxu1 }
 0x2fe   : > { %v3097_v38 = vpack.c.bf16 %v3082_v37, %v3081_v56  ;;  %v1774_v39 = vld [vmem:[#allocation6 + $0xc1] ss:$8 sm:$0xf]  ;;  %v1894_v34 = vadd.f32 %v1890_v41, %v10670_v63  ;;  %v1787_v9 = vld [vmem:[#allocation6 + $0x82] ss:$8 sm:$0xf]  ;;  %v1330_v55 = vadd.f32 %v1326_v49, %v10673_v32 }
 0x2ff   : > { %v1776_v48 = vor.u32 %v1775_v43, %v1774_v39  ;;  %v1788_v17 = vld [vmem:[#allocation6 + $0x82] ss:$8 sm:$0xf0]  ;;  %v1897_v16 = vmul.f32 0.7978846, %v1893_v10  ;;  %v2227_v20 = vpop.f32.mrb[51].mxu0 }
 0x300   : > { %8011 = vmatprep.mubr.msk.bf16.mxu0 %vm1123_vm5, %v3097_v38  ;;  %v1791_v6 = vld [vmem:[#allocation6 + $0xc2] ss:$8 sm:$0xf0]  ;;  %v9009_v58 = vpop.eup %9008  ;;  %v1898_v54 = vmul.f32 0.7978846, %v1894_v34  ;;  %v1789_v28 = vor.u32 %v1788_v17, %v1787_v9  ;;  %v10707_v27 = vpop.f32.mrb[49].mxu1 }
 0x301   : > { %v1780_v61 = vmax.f32 %v1764_v57, %v1776_v48  ;;  %v1790_v51 = vld [vmem:[#allocation6 + $0xc2] ss:$8 sm:$0xf]  ;;  %v1334_v11 = vmul.f32 0.7978846, %v1330_v55  ;;  %v1341_v13 = vadd.f32 1.0, %v9009_v58  ;;  %9010 = vtanh.f32 %v1897_v16 }
 0x302   : > { %v1792_v15 = vor.u32 %v1791_v6, %v1790_v51  ;;  %v1803_v47 = vld [vmem:[#allocation6 + $0x83] ss:$8 sm:$0xf]  ;;  %9012 = vtanh.f32 %v1898_v54  ;;  %v1795_v30 = vmax.f32 %v1779_v52, %v1789_v28  ;;  %v10709_v33 = vpop.f32.mrb[50].mxu1  ;;  %v7951_v39 = vpop.f32.mrb[52].mxu0  ;;  %v1877_v9 = vmul.f32 0.5, %v10667_v25 }
 0x303   : > { %v1804_v22 = vld [vmem:[#allocation6 + $0x83] ss:$8 sm:$0xf0]  ;;  %9014 = vtanh.f32 %v1334_v11  ;;  %v1345_v29 = vmul.f32 %v1341_v13, %v1313_v26  ;;  %v10711_v56 = vpop.f32.mrb[51].mxu1  ;;  %v2240_v52 = vpop.f32.mrb[53].mxu0 }
 0x304   : > { %v1796_v31 = vmax.f32 %v1780_v61, %v1792_v15  ;;  %v1806_v14 = vld [vmem:[#allocation6 + $0xc3] ss:$8 sm:$0xf]  ;;  %v1805_v35 = vor.u32 %v1804_v22, %v1803_v47  ;;  %v1819_v5 = vld [vmem:[#allocation6 + $0x84] ss:$8 sm:$0xf] }
 0x305   : > { %v1807_v36 = vld [vmem:[#allocation6 + $0xc3] ss:$8 sm:$0xf0]  ;;  %1349 = vst.msk [vmem:[#allocation2 + $0x13] sm:$0xff] %vm1123_vm5, %v1345_v29  ;;  %v10715_v16 = vld [vmem:[#allocation15] ss:$0 sm:$0xff] }
 0x306   : > { %v1808_v37 = vor.u32 %v1807_v36, %v1806_v14  ;;  %v1811_v41 = vmax.f32 %v1795_v30, %v1805_v35  ;;  %v1820_v57 = vld [vmem:[#allocation6 + $0x84] ss:$8 sm:$0xf0]  ;;  %v1835_v10 = vld [vmem:[#allocation6 + $0x85] ss:$8 sm:$0xf]  ;;  %v2233_v6 = vadd.f32 %v10715_v16, %v7947_v45  ;;  %v2225_v58 = vadd.f32 %v10715_v16, %v2224_v3 }
 0x307   : > { %v1822_v42 = vld [vmem:[#allocation6 + $0xc4] ss:$8 sm:$0xf]  ;;  %v1821_v38 = vor.u32 %v1820_v57, %v1819_v5  ;;  %v1836_v48 = vld [vmem:[#allocation6 + $0x85] ss:$8 sm:$0xf0]  ;;  %v2236_v54 = vadd.f32 %v10715_v16, %v7948_v4  ;;  %v2228_v15 = vadd.f32 %v10715_v16, %v2227_v20  ;;  %v2249_v25 = vadd.f32 %v10715_v16, %v7951_v39 }
 0x308   : > { %v1812_v43 = vmax.f32 %v1796_v31, %v1808_v37  ;;  %v1823_v49 = vld [vmem:[#allocation6 + $0xc4] ss:$8 sm:$0xf0]  ;;  %v1837_v26 = vor.u32 %v1836_v48, %v1835_v10  ;;  %v1838_v55 = vld [vmem:[#allocation6 + $0xc5] ss:$8 sm:$0xf]  ;;  %v2241_v3 = vadd.f32 %v10715_v16, %v2240_v52 }
 0x309   : > { %v1824_v34 = vor.u32 %v1823_v49, %v1822_v42  ;;  %v1827_v17 = vmax.f32 %v1811_v41, %v1821_v38  ;;  %v7952_v61 = vpop.f32.mrb[54].mxu0  ;;  %v10720_v28 = vpop.f32.mrb[52].mxu1  ;;  %v1839_v11 = vld [vmem:[#allocation6 + $0xc5] ss:$8 sm:$0xf0]  ;;  %v1878_v41 = vmul.f32 0.5, %v10670_v63 }
 0x30a   : > { %v2243_v47 = vpop.f32.mrb[55].mxu0  ;;  %v10724_v30 = vpop.f32.mrb[53].mxu1  ;;  %v1840_v22 = vor.u32 %v1839_v11, %v1838_v55  ;;  %v1851_v45 = vld [vmem:[#allocation6 + $0x86] ss:$8 sm:$0xf]  ;;  %v2252_v4 = vadd.f32 %v10715_v16, %v7952_v61  ;;  %v1314_v49 = vmul.f32 0.5, %v10673_v32 }
 0x30b   : > { %v1828_v51 = vmax.f32 %v1812_v43, %v1824_v34  ;;  %v9011_v13 = vpop.eup %9010  ;;  %v1843_v29 = vmax.f32 %v1827_v17, %v1837_v26  ;;  %v2244_v14 = vadd.f32 %v10715_v16, %v2243_v47  ;;  %v10729_v35 = vpop.f32.mrb[54].mxu1  ;;  %v1852_v37 = vld [vmem:[#allocation6 + $0x86] ss:$8 sm:$0xf0] }
 0x30c   : > { %v9013_v31 = vpop.eup %9012  ;;  %v1905_v36 = vadd.f32 1.0, %v9011_v13  ;;  %v10731_v5 = vpop.f32.mrb[55].mxu1  ;;  %v1853_v43 = vor.u32 %v1852_v37, %v1851_v45  ;;  %v1854_v38 = vld [vmem:[#allocation6 + $0xc6] ss:$8 sm:$0xf] }
 0x30d   : > { %v9015_v20 = vpop.eup %9014  ;;  %v1906_v57 = vadd.f32 1.0, %v9013_v31  ;;  %v1844_v42 = vmax.f32 %v1828_v51, %v1840_v22  ;;  %v1855_v34 = vld [vmem:[#allocation6 + $0xc6] ss:$8 sm:$0xf0]  ;;  %v7955_v61 = vpop.f32.mrb[56].mxu0 }
 0x30e   : > { %v1342_v10 = vadd.f32 1.0, %v9015_v20  ;;  %v1909_v39 = vmul.f32 %v1905_v36, %v1877_v9  ;;  %v1856_v52 = vor.u32 %v1855_v34, %v1854_v38  ;;  %v1859_v17 = vmax.f32 %v1843_v29, %v1853_v43  ;;  %v1867_v26 = vld [vmem:[#allocation6 + $0x87] ss:$8 sm:$0xf]  ;;  %v2256_v9 = vpop.f32.mrb[57].mxu0  ;;  %v10747_v47 = vpop.f32.mrb[56].mxu1 }
 0x30f   : > { %v1910_v48 = vmul.f32 %v1906_v57, %v1878_v41  ;;  %v1868_v55 = vld [vmem:[#allocation6 + $0x87] ss:$8 sm:$0xf0]  ;;  %2303 = vst.msk [vmem:[#allocation6 + $0x80] sm:$0xff] %vm1123_vm5, %v2225_v58  ;;  %2304 = vst.msk [vmem:[#allocation6 + $0x88] sm:$0xff] %vm1123_vm5, %v2228_v15  ;;  %v2265_v32 = vadd.f32 %v10715_v16, %v7955_v61  ;;  %v2257_v15 = vadd.f32 %v10715_v16, %v2256_v9  ;;  %v10753_v45 = vpop.f32.mrb[57].mxu1 }
 0x310   : > { %v1346_v11 = vmul.f32 %v1342_v10, %v1314_v49  ;;  %1913 = vst.msk [vmem:[#allocation2 + $0x23] sm:$0xff] %vm1123_vm5, %v1909_v39  ;;  %v1869_v13 = vor.u32 %v1868_v55, %v1867_v26  ;;  %v1870_v63 = vld [vmem:[#allocation6 + $0xc7] ss:$8 sm:$0xf]  ;;  %2305 = vst.msk [vmem:[#allocation6 + $0x90] sm:$0xff] %vm1123_vm5, %v2233_v6  ;;  %v1860_v58 = vmax.f32 %v1844_v42, %v1856_v52  ;;  %v7956_v6 = vpop.f32.mrb[58].mxu0 }
 0x311   : > { %2306 = vst.msk [vmem:[#allocation6 + $0x98] sm:$0xff] %vm1123_vm5, %v2236_v54  ;;  %2307 = vst.msk [vmem:[#allocation6 + $0xa0] sm:$0xff] %vm1123_vm5, %v2241_v3  ;;  %v1871_v51 = vld [vmem:[#allocation6 + $0xc7] ss:$8 sm:$0xf0]  ;;  %v2259_v29 = vpop.f32.mrb[59].mxu0 }
 0x312   : > { %2308 = vst.msk [vmem:[#allocation6 + $0xa8] sm:$0xff] %vm1123_vm5, %v2244_v14  ;;  %2309 = vst.msk [vmem:[#allocation6 + $0xb0] sm:$0xff] %vm1123_vm5, %v2249_v25  ;;  %v1872_v54 = vor.u32 %v1871_v51, %v1870_v63  ;;  %v10750_v22 = vmax.f32 %v1859_v17, %v1869_v13  ;;  %v2268_v25 = vadd.f32 %v10715_v16, %v7956_v6  ;;  %v10757_v3 = vpop.f32.mrb[58].mxu1  ;;  %v2319_v14 = vld [vmem:[#allocation6] ss:$8 sm:$0xf] }
 0x313   : > { %2310 = vst.msk [vmem:[#allocation6 + $0xb8] sm:$0xff] %vm1123_vm5, %v2252_v4  ;;  %1914 = vst.msk [vmem:[#allocation2 + $0x2b] sm:$0xff] %vm1123_vm5, %v1910_v48  ;;  %v2260_v31 = vadd.f32 %v10715_v16, %v2259_v29  ;;  %v2320_v36 = vld [vmem:[#allocation6] ss:$8 sm:$0xf0]  ;;  %v10762_v37 = vpop.f32.mrb[59].mxu1 }
 0x314   : > { %1350 = vst.msk [vmem:[#allocation2 + $0x1b] sm:$0xff] %vm1123_vm5, %v1346_v11  ;;  %2313 = vst.msk [vmem:[#allocation6 + $0xd0] sm:$0xff] %vm1123_vm5, %v2265_v32  ;;  %v10759_v4 = vmax.f32 %v1860_v58, %v1872_v54  ;;  %v1883_v20 = vmul.f32 0.044715, %v10750_v22  ;;  %v2321_v49 = vor.u32 %v2320_v36, %v2319_v14  ;;  %v7959_v34 = vpop.f32.mrb[60].mxu0  ;;  %v3083_v48 = vld [vmem:[#allocation2 + $0x11] sm:$0xff] }
 0x315   : > { %2311 = vst.msk [vmem:[#allocation6 + $0xc0] sm:$0xff] %vm1123_vm5, %v2257_v15  ;;  %2314 = vst.msk [vmem:[#allocation6 + $0xd8] sm:$0xff] %vm1123_vm5, %v2268_v25  ;;  %v2322_v41 = vld [vmem:[#allocation6 + $0x40] ss:$8 sm:$0xf]  ;;  %v2281_v61 = vadd.f32 %v10715_v16, %v7959_v34  ;;  %v2272_v11 = vpop.f32.mrb[61].mxu0 }
 0x316   : > { %v2323_v57 = vld [vmem:[#allocation6 + $0x40] ss:$8 sm:$0xf0]  ;;  %v1884_v42 = vmul.f32 0.044715, %v10759_v4  ;;  %2312 = vst.msk [vmem:[#allocation6 + $0xc8] sm:$0xff] %vm1123_vm5, %v2260_v31  ;;  %v1887_v38 = vmul.f32 %v1883_v20, %v10750_v22  ;;  %v2273_v51 = vadd.f32 %v10715_v16, %v2272_v11 }
 0x317   : > { %v2331_v43 = vld [vmem:[#allocation6 + $0x1] ss:$8 sm:$0xf]  ;;  %v2324_v17 = vor.u32 %v2323_v57, %v2322_v41  ;;  %v7960_v6 = vpop.f32.mrb[62].mxu0  ;;  %v10773_v25 = vpop.f32.mrb[60].mxu1  ;;  %2317 = vst.msk [vmem:[#allocation6 + $0xf0] sm:$0xff] %vm1123_vm5, %v2281_v61 }
 0x318   : > { %v2332_v10 = vld [vmem:[#allocation6 + $0x1] ss:$8 sm:$0xf0]  ;;  %v1888_v52 = vmul.f32 %v1884_v42, %v10759_v4  ;;  %v1891_v9 = vmul.f32 %v1887_v38, %v10750_v22  ;;  %v2347_v31 = vld [vmem:[#allocation6 + $0x2] ss:$8 sm:$0xf]  ;;  %v2284_v20 = vadd.f32 %v10715_v16, %v7960_v6 }
 0x319   : > { %v2334_v39 = vld [vmem:[#allocation6 + $0x41] ss:$8 sm:$0xf]  ;;  %v2333_v26 = vor.u32 %v2332_v10, %v2331_v43  ;;  %v2348_v14 = vld [vmem:[#allocation6 + $0x2] ss:$8 sm:$0xf0] }
 0x31a   : > { %v2335_v55 = vld [vmem:[#allocation6 + $0x41] ss:$8 sm:$0xf0]  ;;  %v1892_v29 = vmul.f32 %v1888_v52, %v10759_v4  ;;  %v2275_v41 = vpop.f32.mrb[63].mxu0  ;;  %v10777_v57 = vpop.f32.mrb[61].mxu1  ;;  %v1895_v42 = vadd.f32 %v1891_v9, %v10750_v22  ;;  %2315 = vst.msk [vmem:[#allocation6 + $0xe0] sm:$0xff] %vm1123_vm5, %v2273_v51 }
 0x31b   : > { %v3084_v13 = vld [vmem:[#allocation2 + $0x19] sm:$0xff]  ;;  %v3085_v63 = vld [vmem:[#allocation2 + $0x21] sm:$0xff]  ;;  %v3086_v32 = vld [vmem:[#allocation2 + $0x29] sm:$0xff]  ;;  %v2336_v58 = vor.u32 %v2335_v55, %v2334_v39  ;;  %v2343_v43 = vmax.f32 %v2321_v49, %v2333_v26  ;;  %v2276_v10 = vadd.f32 %v10715_v16, %v2275_v41  ;;  %v10783_v39 = vpop.f32.mrb[62].mxu1  ;;  %2318 = vst.msk [vmem:[#allocation6 + $0xf8] sm:$0xff] %vm1123_vm5, %v2284_v20  ;;  %v2349_v49 = vor.u32 %v2348_v14, %v2347_v31 }
 0x31c   : > { %v3098_v15 = vpack.c.bf16 %v3084_v13, %v3083_v48  ;;  %v3099_v54 = vpack.c.bf16 %v3086_v32, %v3085_v63  ;;  %v8862_v36 = vld [vmem:[#allocation16 + $0x8] sm:$0xff]   ;;  %v1896_v34 = vadd.f32 %v1892_v29, %v10759_v4  ;;  %v10788_v55 = vpop.f32.mrb[63].mxu1  ;;  %v1899_v11 = vmul.f32 0.7978846, %v1895_v42  ;;  %v8863_v9 = vld [vmem:[#allocation16 + $0x10] sm:$0xff]   ;;  %v10805_v14 = vld [vmem:[#allocation16 + $0x18] sm:$0xff]  }
 0x31d   : > { %v2350_v38 = vld [vmem:[#allocation6 + $0x42] ss:$8 sm:$0xf]  ;;  %v2344_v48 = vmax.f32 %v2324_v17, %v2336_v58  ;;  %v2363_v61 = vld [vmem:[#allocation6 + $0x3] ss:$8 sm:$0xf]  ;;  %v10794_v13 = vadd.f32 %v10715_v16, %v10577_v59  ;;  %v10798_v17 = vadd.f32 %v10715_v16, %v10579_v2  ;;  %v2359_v58 = vmax.f32 %v2343_v43, %v2349_v49 }
 0x31e   : > { %8012 = vmatmul.mubr.msk.bf16.vlgmr.msra.gmra.mrb[64].mxu0 %vm1123_vm5, %v3098_v15  ;;  %v2351_v52 = vld [vmem:[#allocation6 + $0x42] ss:$8 sm:$0xf0]  ;;  %v1900_v63 = vmul.f32 0.7978846, %v1896_v34  ;;  %2316 = vst.msk [vmem:[#allocation6 + $0xe8] sm:$0xff] %vm1123_vm5, %v2276_v10  ;;  %9016 = vtanh.f32 %v1899_v11  ;;  %v2738_v59 = vadd.f32 %v10715_v16, %v10584_v18  ;;  %v2751_v20 = vadd.f32 %v10715_v16, %v10617_v53 }
 0x31f   : > { %8015 = vmatprep.mubr.msk.bf16.mxu0 %vm1123_vm5, %v3099_v54  ;;  %v2352_v26 = vor.u32 %v2351_v52, %v2350_v38  ;;  %8028 = vmatpush3.bf16.msra.mxu0 %v10477_v19  ;;  %v2364_v32 = vld [vmem:[#allocation6 + $0x3] ss:$8 sm:$0xf0]  ;;  %v2730_v54 = vadd.f32 %v10715_v16, %v10586_v62  ;;  %v2379_v29 = vld [vmem:[#allocation6 + $0x4] ss:$8 sm:$0xf]  ;;  %v2743_v41 = vadd.f32 %v10715_v16, %v10623_v12 }
 0x320   : > { %8029 = vmatprep.subr.bf16.mxu0 %v8862_v36  ;;  %v2365_v15 = vor.u32 %v2364_v32, %v2363_v61  ;;  %v2366_v6 = vld [vmem:[#allocation6 + $0x43] ss:$8 sm:$0xf]  ;;  %9018 = vtanh.f32 %v1900_v63  ;;  %v2380_v31 = vld [vmem:[#allocation6 + $0x4] ss:$8 sm:$0xf0]  ;;  %v2754_v18 = vadd.f32 %v10715_v16, %v10627_v8  ;;  %v2746_v62 = vadd.f32 %v10715_v16, %v10632_v23 }
 0x321   : > { %v2360_v51 = vmax.f32 %v2344_v48, %v2352_v26  ;;  %v2367_v19 = vld [vmem:[#allocation6 + $0x43] ss:$8 sm:$0xf0]  ;;  %v2381_v43 = vor.u32 %v2380_v31, %v2379_v29  ;;  %v2382_v38 = vld [vmem:[#allocation6 + $0x44] ss:$8 sm:$0xf]  ;;  %v2767_v53 = vadd.f32 %v10715_v16, %v10646_v44  ;;  %v2759_v12 = vadd.f32 %v10715_v16, %v10654_v50 }
 0x322   : > { %v2368_v2 = vor.u32 %v2367_v19, %v2366_v6  ;;  %v2375_v42 = vmax.f32 %v2359_v58, %v2365_v15  ;;  %v2383_v10 = vld [vmem:[#allocation6 + $0x44] ss:$8 sm:$0xf0]  ;;  %v2395_v52 = vld [vmem:[#allocation6 + $0x5] ss:$8 sm:$0xf]  ;;  %v2770_v8 = vadd.f32 %v10715_v16, %v10659_v46  ;;  %v2762_v23 = vadd.f32 %v10715_v16, %v10664_v0 }
 0x323   : > { %8030 = vmatpush3.bf16.msra.mxu0 %v8862_v36  ;;  %v2384_v48 = vor.u32 %v2383_v10, %v2382_v38  ;;  %v2396_v11 = vld [vmem:[#allocation6 + $0x5] ss:$8 sm:$0xf0]  ;;  %v2411_v58 = vld [vmem:[#allocation6 + $0x6] ss:$8 sm:$0xf]  ;;  %v2783_v44 = vadd.f32 %v10715_v16, %v10681_v24  ;;  %v2775_v50 = vadd.f32 %v10715_v16, %v10685_v60  ;;  %v2786_v46 = vadd.f32 %v10715_v16, %v10691_v7 }
 0x324   : > { %v2376_v34 = vmax.f32 %v2360_v51, %v2368_v2  ;;  %8031 = vmatprep.subr.bf16.mxu0 %v8863_v9  ;;  %v2391_v49 = vmax.f32 %v2375_v42, %v2381_v43  ;;  %v2397_v26 = vor.u32 %v2396_v11, %v2395_v52  ;;  %v2398_v36 = vld [vmem:[#allocation6 + $0x45] ss:$8 sm:$0xf]  ;;  %v2412_v51 = vld [vmem:[#allocation6 + $0x6] ss:$8 sm:$0xf0]  ;;  %v2778_v0 = vadd.f32 %v10715_v16, %v10695_v40 }
 0x325   : > { %v2399_v61 = vld [vmem:[#allocation6 + $0x45] ss:$8 sm:$0xf0]  ;;  %v2413_v19 = vor.u32 %v2412_v51, %v2411_v58  ;;  %v2414_v2 = vld [vmem:[#allocation6 + $0x46] ss:$8 sm:$0xf] }
 0x326   : > { %v2392_v63 = vmax.f32 %v2376_v34, %v2384_v48  ;;  %v2400_v32 = vor.u32 %v2399_v61, %v2398_v36  ;;  %v10823_v15 = vld [vmem:[#allocation16 + $0x40] sm:$0xff]   ;;  %v2407_v6 = vmax.f32 %v2391_v49, %v2397_v26 }
 0x327   : > { %v2415_v29 = vld [vmem:[#allocation6 + $0x46] ss:$8 sm:$0xf0]  ;;  %8032 = vmatpush3.bf16.msra.mxu0 %v8863_v9  ;;  %v2427_v43 = vld [vmem:[#allocation6 + $0x7] ss:$8 sm:$0xf] }
 0x328   : > { %v2408_v31 = vmax.f32 %v2392_v63, %v2400_v32  ;;  %v2416_v42 = vor.u32 %v2415_v29, %v2414_v2  ;;  %v2428_v38 = vld [vmem:[#allocation6 + $0x7] ss:$8 sm:$0xf0]  ;;  %8033 = vmatprep.subr.bf16.mxu0 %v10805_v14  ;;  %v2423_v24 = vmax.f32 %v2407_v6, %v2413_v19  ;;  %2853 = vst.msk [vmem:[#allocation6] sm:$0xff] %vm1123_vm5, %v10798_v17  ;;  %2854 = vst.msk [vmem:[#allocation6 + $0x8] sm:$0xff] %vm1123_vm5, %v2730_v54  ;;  %v9017_v17 = vpop.eup %9016 }
 0x329   : > { %v2429_v10 = vor.u32 %v2428_v38, %v2427_v43  ;;  %v2430_v60 = vld [vmem:[#allocation6 + $0x47] ss:$8 sm:$0xf]  ;;  %2855 = vst.msk [vmem:[#allocation6 + $0x10] sm:$0xff] %vm1123_vm5, %v10794_v13  ;;  %2856 = vst.msk [vmem:[#allocation6 + $0x18] sm:$0xff] %vm1123_vm5, %v2738_v59 }
 0x32a   : > { %v2431_v34 = vld [vmem:[#allocation6 + $0x47] ss:$8 sm:$0xf0]  ;;  %2857 = vst.msk [vmem:[#allocation6 + $0x20] sm:$0xff] %vm1123_vm5, %v2743_v41  ;;  %2858 = vst.msk [vmem:[#allocation6 + $0x28] sm:$0xff] %vm1123_vm5, %v2746_v62  ;;  %v2424_v7 = vmax.f32 %v2408_v31, %v2416_v42  ;;  %v1879_v41 = vmul.f32 0.5, %v10750_v22 }
 0x32b   : > { %2859 = vst.msk [vmem:[#allocation6 + $0x30] sm:$0xff] %vm1123_vm5, %v2751_v20  ;;  %2860 = vst.msk [vmem:[#allocation6 + $0x38] sm:$0xff] %vm1123_vm5, %v2754_v18  ;;  %v2432_v40 = vor.u32 %v2431_v34, %v2430_v60  ;;  %v2326_v13 = vld [vmem:[#allocation6 + $0x80] ss:$8 sm:$0xf0]  ;;  %v10852_v9 = vmax.f32 %v2423_v24, %v2429_v10  ;;  %8034 = vmatpush3.bf16.msra.mxu0 %v10805_v14  ;;  %v9019_v20 = vpop.eup %9018  ;;  %v1880_v18 = vmul.f32 0.5, %v10759_v4 }
 0x32c   : > { %2861 = vst.msk [vmem:[#allocation6 + $0x40] sm:$0xff] %vm1123_vm5, %v2759_v12  ;;  %2862 = vst.msk [vmem:[#allocation6 + $0x48] sm:$0xff] %vm1123_vm5, %v2762_v23  ;;  %v2325_v59 = vld [vmem:[#allocation6 + $0x80] ss:$8 sm:$0xf]  ;;  %v1907_v62 = vadd.f32 1.0, %v9017_v17  ;;  %8051 = vmatprep.subr.bf16.mxu0 %v10823_v15 }
 0x32d   : > { %2863 = vst.msk [vmem:[#allocation6 + $0x50] sm:$0xff] %vm1123_vm5, %v2767_v53  ;;  %2864 = vst.msk [vmem:[#allocation6 + $0x58] sm:$0xff] %vm1123_vm5, %v2770_v8  ;;  %v2329_v54 = vld [vmem:[#allocation6 + $0xc0] ss:$8 sm:$0xf0]  ;;  %v10857_v48 = vmax.f32 %v2424_v7, %v2432_v40  ;;  %v1908_v11 = vadd.f32 1.0, %v9019_v20  ;;  %v2327_v12 = vor.u32 %v2326_v13, %v2325_v59  ;;  %v2799_v7 = vadd.f32 %v10715_v16, %v10705_v21 }
 0x32e   : > { %2865 = vst.msk [vmem:[#allocation6 + $0x60] sm:$0xff] %vm1123_vm5, %v2775_v50  ;;  %2866 = vst.msk [vmem:[#allocation6 + $0x68] sm:$0xff] %vm1123_vm5, %v2778_v0  ;;  %v2328_v52 = vld [vmem:[#allocation6 + $0xc0] ss:$8 sm:$0xf]  ;;  %v1911_v26 = vmul.f32 %v1907_v62, %v1879_v41  ;;  %v2791_v20 = vadd.f32 %v10715_v16, %v10707_v27 }
 0x32f   : > { %2867 = vst.msk [vmem:[#allocation6 + $0x70] sm:$0xff] %vm1123_vm5, %v2783_v44  ;;  %2868 = vst.msk [vmem:[#allocation6 + $0x78] sm:$0xff] %vm1123_vm5, %v2786_v46  ;;  %v2447_v53 = vmul.f32 0.044715, %v10852_v9  ;;  %v2448_v36 = vmul.f32 0.044715, %v10857_v48  ;;  %v2330_v14 = vor.u32 %v2329_v54, %v2328_v52  ;;  %v1912_v8 = vmul.f32 %v1908_v11, %v1880_v18 }
 0x330   : > { %v2337_v49 = vld [vmem:[#allocation6 + $0x81] ss:$8 sm:$0xf]  ;;  %1915 = vst.msk [vmem:[#allocation2 + $0x33] sm:$0xff] %vm1123_vm5, %v1911_v26  ;;  %v2802_v11 = vadd.f32 %v10715_v16, %v10709_v33  ;;  %v2815_v26 = vadd.f32 %v10715_v16, %v10720_v28  ;;  %v2810_v33 = vadd.f32 %v10715_v16, %v10731_v5  ;;  %v2831_v28 = vadd.f32 %v10715_v16, %v10747_v47 }
 0x331   : > { %v2338_v61 = vld [vmem:[#allocation6 + $0x81] ss:$8 sm:$0xf0]  ;;  %v2451_v22 = vmul.f32 %v2447_v53, %v10852_v9  ;;  %v2452_v32 = vmul.f32 %v2448_v36, %v10857_v48  ;;  %v2353_v51 = vld [vmem:[#allocation6 + $0x82] ss:$8 sm:$0xf]  ;;  %v2794_v53 = vadd.f32 %v10715_v16, %v10711_v56  ;;  %v2826_v5 = vadd.f32 %v10715_v16, %v10762_v37 }
 0x332   : > { %v2339_v4 = vor.u32 %v2338_v61, %v2337_v49  ;;  %v2340_v23 = vld [vmem:[#allocation6 + $0xc1] ss:$8 sm:$0xf]  ;;  %v2354_v44 = vld [vmem:[#allocation6 + $0x82] ss:$8 sm:$0xf0]  ;;  %v2807_v61 = vadd.f32 %v10715_v16, %v10724_v30  ;;  %v2823_v30 = vadd.f32 %v10715_v16, %v10753_v45  ;;  %v2847_v47 = vadd.f32 %v10715_v16, %v10773_v25 }
 0x333   : > { %v2341_v63 = vld [vmem:[#allocation6 + $0xc1] ss:$8 sm:$0xf0]  ;;  %1916 = vst.msk [vmem:[#allocation2 + $0x3b] sm:$0xff] %vm1123_vm5, %v1912_v8  ;;  %v2455_v50 = vmul.f32 %v2451_v22, %v10852_v9  ;;  %v2355_v19 = vor.u32 %v2354_v44, %v2353_v51  ;;  %v2456_v46 = vmul.f32 %v2452_v32, %v10857_v48  ;;  %v2818_v8 = vadd.f32 %v10715_v16, %v10729_v35 }
 0x334   : > { %v2342_v58 = vor.u32 %v2341_v63, %v2340_v23  ;;  %v2345_v6 = vmax.f32 %v2327_v12, %v2339_v4  ;;  %v2356_v2 = vld [vmem:[#allocation6 + $0xc2] ss:$8 sm:$0xf]  ;;  %v2369_v42 = vld [vmem:[#allocation6 + $0x83] ss:$8 sm:$0xf]  ;;  %v2834_v35 = vadd.f32 %v10715_v16, %v10757_v3  ;;  %v2850_v3 = vadd.f32 %v10715_v16, %v10783_v39 }
 0x335   : > { %v2357_v29 = vld [vmem:[#allocation6 + $0xc2] ss:$8 sm:$0xf0]  ;;  %v2370_v43 = vld [vmem:[#allocation6 + $0x83] ss:$8 sm:$0xf0]  ;;  %v2459_v38 = vadd.f32 %v2455_v50, %v10852_v9  ;;  %v2460_v40 = vadd.f32 %v2456_v46, %v10857_v48  ;;  %v2842_v37 = vadd.f32 %v10715_v16, %v10788_v55 }
 0x336   : > { %v2346_v0 = vmax.f32 %v2330_v14, %v2342_v58  ;;  %v2358_v31 = vor.u32 %v2357_v29, %v2356_v2  ;;  %v2361_v24 = vmax.f32 %v2345_v6, %v2355_v19  ;;  %v2371_v10 = vor.u32 %v2370_v43, %v2369_v42  ;;  %v2372_v60 = vld [vmem:[#allocation6 + $0xc3] ss:$8 sm:$0xf]  ;;  %v2385_v59 = vld [vmem:[#allocation6 + $0x84] ss:$8 sm:$0xf] }
 0x337   : > { %v2373_v34 = vld [vmem:[#allocation6 + $0xc3] ss:$8 sm:$0xf0]  ;;  %v2386_v54 = vld [vmem:[#allocation6 + $0x84] ss:$8 sm:$0xf0]  ;;  %v2839_v19 = vadd.f32 %v10715_v16, %v10777_v57 }
 0x338   : > { %v2362_v13 = vmax.f32 %v2346_v0, %v2358_v31  ;;  %v2374_v17 = vor.u32 %v2373_v34, %v2372_v60  ;;  %v2463_v41 = vmul.f32 0.7978846, %v2459_v38  ;;  %v2377_v18 = vmax.f32 %v2361_v24, %v2371_v10  ;;  %v2388_v52 = vld [vmem:[#allocation6 + $0xc4] ss:$8 sm:$0xf] }
 0x339   : > { %v2387_v62 = vor.u32 %v2386_v54, %v2385_v59  ;;  %v2464_v21 = vmul.f32 0.7978846, %v2460_v40  ;;  %v2389_v49 = vld [vmem:[#allocation6 + $0xc4] ss:$8 sm:$0xf0]  ;;  %v2443_v54 = vmul.f32 0.5, %v10852_v9 }
 0x33a   : > { %v2378_v12 = vmax.f32 %v2362_v13, %v2374_v17  ;;  %9020 = vtanh.f32 %v2463_v41  ;;  %v2390_v36 = vor.u32 %v2389_v49, %v2388_v52  ;;  %v2401_v27 = vld [vmem:[#allocation6 + $0x85] ss:$8 sm:$0xf]  ;;  %v2417_v50 = vld [vmem:[#allocation6 + $0x86] ss:$8 sm:$0xf] }
 0x33b   : > { %v2393_v14 = vmax.f32 %v2377_v18, %v2387_v62  ;;  %v3087_v56 = vld [vmem:[#allocation2 + $0x31] sm:$0xff]  ;;  %v3088_v22 = vld [vmem:[#allocation2 + $0x39] sm:$0xff]  ;;  %9022 = vtanh.f32 %v2464_v21 }
 0x33c   : > { %v2402_v4 = vld [vmem:[#allocation6 + $0x85] ss:$8 sm:$0xf0]  ;;  %v3100_v23 = vpack.c.bf16 %v3088_v22, %v3087_v56  ;;  %v2394_v63 = vmax.f32 %v2378_v12, %v2390_v36  ;;  %v2418_v6 = vld [vmem:[#allocation6 + $0x86] ss:$8 sm:$0xf0] }
 0x33d   : > { %v2403_v32 = vor.u32 %v2402_v4, %v2401_v27  ;;  %v2404_v58 = vld [vmem:[#allocation6 + $0xc5] ss:$8 sm:$0xf]  ;;  %v2419_v29 = vor.u32 %v2418_v6, %v2417_v50  ;;  %v2420_v45 = vld [vmem:[#allocation6 + $0xc6] ss:$8 sm:$0xf] }
 0x33e   : > { %v2405_v51 = vld [vmem:[#allocation6 + $0xc5] ss:$8 sm:$0xf0]  ;;  %8016 = vmatmul.mubr.msk.bf16.gmra.mrb[68].mxu0 %vm1123_vm5, %v3100_v23  ;;  %v2421_v46 = vld [vmem:[#allocation6 + $0xc6] ss:$8 sm:$0xf0] }
 0x33f   : > { %v2406_v44 = vor.u32 %v2405_v51, %v2404_v58  ;;  %v2409_v2 = vmax.f32 %v2393_v14, %v2403_v32  ;;  %v2422_v31 = vor.u32 %v2421_v46, %v2420_v45  ;;  %v2433_v42 = vld [vmem:[#allocation6 + $0x87] ss:$8 sm:$0xf]  ;;  %v2885_v55 = vld [vmem:[#allocation6] ss:$8 sm:$0xf] }
 0x340   : > { %v2434_v43 = vld [vmem:[#allocation6 + $0x87] ss:$8 sm:$0xf0]  ;;  %2869 = vst.msk [vmem:[#allocation6 + $0x80] sm:$0xff] %vm1123_vm5, %v2791_v20  ;;  %2870 = vst.msk [vmem:[#allocation6 + $0x88] sm:$0xff] %vm1123_vm5, %v2794_v53  ;;  %v2444_v12 = vmul.f32 0.5, %v10857_v48 }
 0x341   : > { %v2410_v0 = vmax.f32 %v2394_v63, %v2406_v44  ;;  %v2425_v25 = vmax.f32 %v2409_v2, %v2419_v29  ;;  %v2435_v38 = vor.u32 %v2434_v43, %v2433_v42  ;;  %v2436_v24 = vld [vmem:[#allocation6 + $0xc7] ss:$8 sm:$0xf]  ;;  %2871 = vst.msk [vmem:[#allocation6 + $0x90] sm:$0xff] %vm1123_vm5, %v2799_v7  ;;  %2872 = vst.msk [vmem:[#allocation6 + $0x98] sm:$0xff] %vm1123_vm5, %v2802_v11 }
 0x342   : > { %v2437_v57 = vld [vmem:[#allocation6 + $0xc7] ss:$8 sm:$0xf0]  ;;  %2873 = vst.msk [vmem:[#allocation6 + $0xa0] sm:$0xff] %vm1123_vm5, %v2807_v61  ;;  %2874 = vst.msk [vmem:[#allocation6 + $0xa8] sm:$0xff] %vm1123_vm5, %v2810_v33 }
 0x343   : > { %2875 = vst.msk [vmem:[#allocation6 + $0xb0] sm:$0xff] %vm1123_vm5, %v2815_v26  ;;  %2876 = vst.msk [vmem:[#allocation6 + $0xb8] sm:$0xff] %vm1123_vm5, %v2818_v8  ;;  %v2426_v16 = vmax.f32 %v2410_v0, %v2422_v31  ;;  %v2438_v39 = vor.u32 %v2437_v57, %v2436_v24  ;;  %v2886_v10 = vld [vmem:[#allocation6] ss:$8 sm:$0xf0]  ;;  %v10919_v60 = vmax.f32 %v2425_v25, %v2435_v38 }
 0x344   : > { %2877 = vst.msk [vmem:[#allocation6 + $0xc0] sm:$0xff] %vm1123_vm5, %v2823_v30  ;;  %2878 = vst.msk [vmem:[#allocation6 + $0xc8] sm:$0xff] %vm1123_vm5, %v2826_v5  ;;  %v2887_v34 = vor.u32 %v2886_v10, %v2885_v55  ;;  %v2889_v7 = vld [vmem:[#allocation6 + $0x40] ss:$8 sm:$0xf0]  ;;  %v9021_v59 = vpop.eup %9020 }
 0x345   : > { %2879 = vst.msk [vmem:[#allocation6 + $0xd0] sm:$0xff] %vm1123_vm5, %v2831_v28  ;;  %2880 = vst.msk [vmem:[#allocation6 + $0xd8] sm:$0xff] %vm1123_vm5, %v2834_v35  ;;  %v10921_v40 = vmax.f32 %v2426_v16, %v2438_v39  ;;  %v2897_v13 = vld [vmem:[#allocation6 + $0x1] ss:$8 sm:$0xf]  ;;  %v9023_v62 = vpop.eup %9022  ;;  %v2471_v52 = vadd.f32 1.0, %v9021_v59 }
 0x346   : > { %2881 = vst.msk [vmem:[#allocation6 + $0xe0] sm:$0xff] %vm1123_vm5, %v2839_v19  ;;  %2882 = vst.msk [vmem:[#allocation6 + $0xe8] sm:$0xff] %vm1123_vm5, %v2842_v37  ;;  %v2898_v17 = vld [vmem:[#allocation6 + $0x1] ss:$8 sm:$0xf0]  ;;  %v2472_v49 = vadd.f32 1.0, %v9023_v62 }
 0x347   : > { %2883 = vst.msk [vmem:[#allocation6 + $0xf0] sm:$0xff] %vm1123_vm5, %v2847_v47  ;;  %2884 = vst.msk [vmem:[#allocation6 + $0xf8] sm:$0xff] %vm1123_vm5, %v2850_v3  ;;  %v2449_v20 = vmul.f32 0.044715, %v10919_v60  ;;  %v2899_v18 = vor.u32 %v2898_v17, %v2897_v13  ;;  %v2450_v11 = vmul.f32 0.044715, %v10921_v40  ;;  %v2475_v27 = vmul.f32 %v2471_v52, %v2443_v54 }
 0x348   : > { %v2888_v41 = vld [vmem:[#allocation6 + $0x40] ss:$8 sm:$0xf]  ;;  %v2900_v21 = vld [vmem:[#allocation6 + $0x41] ss:$8 sm:$0xf]  ;;  %v2476_v56 = vmul.f32 %v2472_v49, %v2444_v12 }
 0x349   : > { %v2890_v53 = vor.u32 %v2889_v7, %v2888_v41  ;;  %v2453_v26 = vmul.f32 %v2449_v20, %v10919_v60  ;;  %v2901_v36 = vld [vmem:[#allocation6 + $0x41] ss:$8 sm:$0xf0]  ;;  %v2909_v14 = vmax.f32 %v2887_v34, %v2899_v18  ;;  %v2454_v9 = vmul.f32 %v2450_v11, %v10921_v40  ;;  %v2913_v8 = vld [vmem:[#allocation6 + $0x2] ss:$8 sm:$0xf] }
 0x34a   : > { %v2902_v61 = vor.u32 %v2901_v36, %v2900_v21  ;;  %v2914_v33 = vld [vmem:[#allocation6 + $0x2] ss:$8 sm:$0xf0]  ;;  %2479 = vst.msk [vmem:[#allocation2 + $0x43] sm:$0xff] %vm1123_vm5, %v2475_v27  ;;  %2480 = vst.msk [vmem:[#allocation2 + $0x4b] sm:$0xff] %vm1123_vm5, %v2476_v56 }
 0x34b   : > { %v2457_v22 = vmul.f32 %v2453_v26, %v10919_v60  ;;  %v2915_v4 = vor.u32 %v2914_v33, %v2913_v8  ;;  %v2916_v28 = vld [vmem:[#allocation6 + $0x42] ss:$8 sm:$0xf]  ;;  %v2458_v48 = vmul.f32 %v2454_v9, %v10921_v40  ;;  %v2929_v58 = vld [vmem:[#allocation6 + $0x3] ss:$8 sm:$0xf] }
 0x34c   : > { %v2917_v23 = vld [vmem:[#allocation6 + $0x42] ss:$8 sm:$0xf0]  ;;  %v2910_v63 = vmax.f32 %v2890_v53, %v2902_v61  ;;  %v2930_v51 = vld [vmem:[#allocation6 + $0x3] ss:$8 sm:$0xf0] }
 0x34d   : > { %v2918_v32 = vor.u32 %v2917_v23, %v2916_v28  ;;  %v2461_v30 = vadd.f32 %v2457_v22, %v10919_v60  ;;  %v2925_v35 = vmax.f32 %v2909_v14, %v2915_v4  ;;  %v2931_v5 = vor.u32 %v2930_v51, %v2929_v58  ;;  %v2932_v44 = vld [vmem:[#allocation6 + $0x43] ss:$8 sm:$0xf]  ;;  %v2945_v2 = vld [vmem:[#allocation6 + $0x4] ss:$8 sm:$0xf] }
 0x34e   : > { %v2933_v50 = vld [vmem:[#allocation6 + $0x43] ss:$8 sm:$0xf0]  ;;  %v2462_v6 = vadd.f32 %v2458_v48, %v10921_v40  ;;  %v2946_v29 = vld [vmem:[#allocation6 + $0x4] ss:$8 sm:$0xf0] }
 0x34f   : > { %v2926_v47 = vmax.f32 %v2910_v63, %v2918_v32  ;;  %v2934_v19 = vor.u32 %v2933_v50, %v2932_v44  ;;  %v2465_v45 = vmul.f32 0.7978846, %v2461_v30  ;;  %v2941_v46 = vmax.f32 %v2925_v35, %v2931_v5  ;;  %v2948_v37 = vld [vmem:[#allocation6 + $0x44] ss:$8 sm:$0xf] }
 0x350   : > { %v2947_v3 = vor.u32 %v2946_v29, %v2945_v2  ;;  %v2466_v0 = vmul.f32 0.7978846, %v2462_v6  ;;  %v2949_v42 = vld [vmem:[#allocation6 + $0x44] ss:$8 sm:$0xf0]  ;;  %v2445_v23 = vmul.f32 0.5, %v10919_v60 }
 0x351   : > { %v2942_v31 = vmax.f32 %v2926_v47, %v2934_v19  ;;  %9024 = vtanh.f32 %v2465_v45  ;;  %v2950_v43 = vor.u32 %v2949_v42, %v2948_v37  ;;  %v2961_v38 = vld [vmem:[#allocation6 + $0x5] ss:$8 sm:$0xf]  ;;  %v2977_v34 = vld [vmem:[#allocation6 + $0x6] ss:$8 sm:$0xf] }
 0x352   : > { %v2957_v25 = vmax.f32 %v2941_v46, %v2947_v3  ;;  %v2962_v24 = vld [vmem:[#allocation6 + $0x5] ss:$8 sm:$0xf0]  ;;  %9026 = vtanh.f32 %v2466_v0  ;;  %v2978_v59 = vld [vmem:[#allocation6 + $0x6] ss:$8 sm:$0xf0] }
 0x353   : > { %v2963_v57 = vor.u32 %v2962_v24, %v2961_v38  ;;  %v2964_v16 = vld [vmem:[#allocation6 + $0x45] ss:$8 sm:$0xf]  ;;  %v2958_v55 = vmax.f32 %v2942_v31, %v2950_v43  ;;  %v2979_v41 = vor.u32 %v2978_v59, %v2977_v34  ;;  %v2980_v18 = vld [vmem:[#allocation6 + $0x46] ss:$8 sm:$0xf] }
 0x354   : > { %v2965_v39 = vld [vmem:[#allocation6 + $0x45] ss:$8 sm:$0xf0]  ;;  %v2981_v62 = vld [vmem:[#allocation6 + $0x46] ss:$8 sm:$0xf0] }
 0x355   : > { %v2966_v10 = vor.u32 %v2965_v39, %v2964_v16  ;;  %v3089_v7 = vld [vmem:[#allocation2 + $0x41] sm:$0xff]  ;;  %v3090_v13 = vld [vmem:[#allocation2 + $0x49] sm:$0xff]  ;;  %v2973_v17 = vmax.f32 %v2957_v25, %v2963_v57  ;;  %v2982_v52 = vor.u32 %v2981_v62, %v2980_v18  ;;  %v2446_v44 = vmul.f32 0.5, %v10921_v40 }
 0x356   : > { %v3101_v54 = vpack.c.bf16 %v3090_v13, %v3089_v7  ;;  %v2993_v11 = vld [vmem:[#allocation6 + $0x7] ss:$8 sm:$0xf]  ;;  %v2891_v27 = vld [vmem:[#allocation6 + $0x80] ss:$8 sm:$0xf] }
 0x357   : > { %v2974_v20 = vmax.f32 %v2958_v55, %v2966_v10  ;;  %v2994_v53 = vld [vmem:[#allocation6 + $0x7] ss:$8 sm:$0xf0]  ;;  %v2989_v21 = vmax.f32 %v2973_v17, %v2979_v41  ;;  %v2892_v9 = vld [vmem:[#allocation6 + $0x80] ss:$8 sm:$0xf0] }
 0x358   : > { %8019 = vmatprep.mubr.msk.bf16.mxu0 %vm1123_vm5, %v3101_v54  ;;  %v2995_v12 = vor.u32 %v2994_v53, %v2993_v11  ;;  %v2996_v49 = vld [vmem:[#allocation6 + $0x47] ss:$8 sm:$0xf]  ;;  %v2893_v8 = vor.u32 %v2892_v9, %v2891_v27  ;;  %v2895_v33 = vld [vmem:[#allocation6 + $0xc0] ss:$8 sm:$0xf0] }
 0x359   : > { %v2997_v26 = vld [vmem:[#allocation6 + $0x47] ss:$8 sm:$0xf0]  ;;  %v2990_v36 = vmax.f32 %v2974_v20, %v2982_v52  ;;  %v2903_v22 = vld [vmem:[#allocation6 + $0x81] ss:$8 sm:$0xf] }
 0x35a   : > { %v2998_v14 = vor.u32 %v2997_v26, %v2996_v49  ;;  %v10936_v61 = vmax.f32 %v2989_v21, %v2995_v12  ;;  %v2904_v4 = vld [vmem:[#allocation6 + $0x81] ss:$8 sm:$0xf0]  ;;  %v2894_v63 = vld [vmem:[#allocation6 + $0xc0] ss:$8 sm:$0xf] }
 0x35b   : > { %v9025_v28 = vpop.eup %9024  ;;  %v2905_v32 = vor.u32 %v2904_v4, %v2903_v22  ;;  %v2896_v35 = vor.u32 %v2895_v33, %v2894_v63  ;;  %v2906_v5 = vld [vmem:[#allocation6 + $0xc1] ss:$8 sm:$0xf]  ;;  %v2919_v45 = vld [vmem:[#allocation6 + $0x82] ss:$8 sm:$0xf] }
 0x35c   : > { %v10938_v56 = vmax.f32 %v2990_v36, %v2998_v14  ;;  %v3013_v48 = vmul.f32 0.044715, %v10936_v61  ;;  %v9027_v58 = vpop.eup %9026  ;;  %v2473_v51 = vadd.f32 1.0, %v9025_v28  ;;  %v2907_v47 = vld [vmem:[#allocation6 + $0xc1] ss:$8 sm:$0xf0] }
 0x35d   : > { %v2474_v50 = vadd.f32 1.0, %v9027_v58  ;;  %v2911_v19 = vmax.f32 %v2893_v8, %v2905_v32  ;;  %v2908_v29 = vor.u32 %v2907_v47, %v2906_v5  ;;  %v2920_v46 = vld [vmem:[#allocation6 + $0x82] ss:$8 sm:$0xf0] }
 0x35e   : > { %v3014_v30 = vmul.f32 0.044715, %v10938_v56  ;;  %v3017_v6 = vmul.f32 %v3013_v48, %v10936_v61  ;;  %v2477_v2 = vmul.f32 %v2473_v51, %v2445_v23  ;;  %v2921_v0 = vor.u32 %v2920_v46, %v2919_v45  ;;  %v2922_v31 = vld [vmem:[#allocation6 + $0xc2] ss:$8 sm:$0xf] }
 0x35f   : > { %v2478_v3 = vmul.f32 %v2474_v50, %v2446_v44  ;;  %v2923_v42 = vld [vmem:[#allocation6 + $0xc2] ss:$8 sm:$0xf0]  ;;  %v2912_v43 = vmax.f32 %v2896_v35, %v2908_v29  ;;  %v2935_v38 = vld [vmem:[#allocation6 + $0x83] ss:$8 sm:$0xf] }
 0x360   : > { %v3018_v60 = vmul.f32 %v3014_v30, %v10938_v56  ;;  %v3021_v37 = vmul.f32 %v3017_v6, %v10936_v61  ;;  %2481 = vst.msk [vmem:[#allocation2 + $0x53] sm:$0xff] %vm1123_vm5, %v2477_v2  ;;  %v2924_v25 = vor.u32 %v2923_v42, %v2922_v31  ;;  %v2936_v24 = vld [vmem:[#allocation6 + $0x83] ss:$8 sm:$0xf0]  ;;  %v2927_v16 = vmax.f32 %v2911_v19, %v2921_v0 }
 0x361   : > { %2482 = vst.msk [vmem:[#allocation2 + $0x5b] sm:$0xff] %vm1123_vm5, %v2478_v3  ;;  %v2937_v39 = vor.u32 %v2936_v24, %v2935_v38  ;;  %v2938_v55 = vld [vmem:[#allocation6 + $0xc3] ss:$8 sm:$0xf]  ;;  %v3009_v3 = vmul.f32 0.5, %v10936_v61  ;;  %v3010_v31 = vmul.f32 0.5, %v10938_v56 }
 0x362   : > { %v3022_v40 = vmul.f32 %v3018_v60, %v10938_v56  ;;  %v3025_v57 = vadd.f32 %v3021_v37, %v10936_v61  ;;  %v2939_v10 = vld [vmem:[#allocation6 + $0xc3] ss:$8 sm:$0xf0]  ;;  %v2928_v7 = vmax.f32 %v2912_v43, %v2924_v25  ;;  %v2951_v17 = vld [vmem:[#allocation6 + $0x84] ss:$8 sm:$0xf] }
 0x363   : > { %v2940_v13 = vor.u32 %v2939_v10, %v2938_v55  ;;  %v2952_v59 = vld [vmem:[#allocation6 + $0x84] ss:$8 sm:$0xf0]  ;;  %v2943_v20 = vmax.f32 %v2927_v16, %v2937_v39  ;;  %v2967_v12 = vld [vmem:[#allocation6 + $0x85] ss:$8 sm:$0xf] }
 0x364   : > { %v3026_v34 = vadd.f32 %v3022_v40, %v10938_v56  ;;  %v3029_v54 = vmul.f32 0.7978846, %v3025_v57  ;;  %v2953_v41 = vor.u32 %v2952_v59, %v2951_v17  ;;  %v2954_v18 = vld [vmem:[#allocation6 + $0xc4] ss:$8 sm:$0xf] }
 0x365   : > { %v2944_v52 = vmax.f32 %v2928_v7, %v2940_v13  ;;  %v2955_v11 = vld [vmem:[#allocation6 + $0xc4] ss:$8 sm:$0xf0]  ;;  %v2968_v49 = vld [vmem:[#allocation6 + $0x85] ss:$8 sm:$0xf0] }
 0x366   : > { %v3030_v62 = vmul.f32 0.7978846, %v3026_v34  ;;  %9028 = vtanh.f32 %v3029_v54  ;;  %v2956_v53 = vor.u32 %v2955_v11, %v2954_v18  ;;  %v2959_v21 = vmax.f32 %v2943_v20, %v2953_v41  ;;  %v2970_v36 = vld [vmem:[#allocation6 + $0xc5] ss:$8 sm:$0xf] }
 0x367   : > { %v2969_v26 = vor.u32 %v2968_v49, %v2967_v12  ;;  %v2971_v14 = vld [vmem:[#allocation6 + $0xc5] ss:$8 sm:$0xf0]  ;;  %v2983_v8 = vld [vmem:[#allocation6 + $0x86] ss:$8 sm:$0xf] }
 0x368   : > { %9030 = vtanh.f32 %v3030_v62  ;;  %v2960_v27 = vmax.f32 %v2944_v52, %v2956_v53  ;;  %v2972_v9 = vor.u32 %v2971_v14, %v2970_v36  ;;  %v3091_v33 = vld [vmem:[#allocation2 + $0x51] sm:$0xff]  ;;  %v3092_v22 = vld [vmem:[#allocation2 + $0x59] sm:$0xff]  ;;  %v3050_v62 = vld [vmem:[#allocation2 + $0x8] sm:$0xff] }
 0x369   : > { %v2975_v4 = vmax.f32 %v2959_v21, %v2969_v26  ;;  %v2984_v28 = vld [vmem:[#allocation6 + $0x86] ss:$8 sm:$0xf0]  ;;  %v3102_v23 = vpack.c.bf16 %v3092_v22, %v3091_v33  ;;  %v2999_v30 = vld [vmem:[#allocation6 + $0x87] ss:$8 sm:$0xf] }
 0x36a   : > { %v2976_v48 = vmax.f32 %v2960_v27, %v2972_v9  ;;  %v2985_v63 = vor.u32 %v2984_v28, %v2983_v8  ;;  %v2986_v32 = vld [vmem:[#allocation6 + $0xc6] ss:$8 sm:$0xf]  ;;  %v3000_v35 = vld [vmem:[#allocation6 + $0x87] ss:$8 sm:$0xf0] }
 0x36b   : > { %v2987_v58 = vld [vmem:[#allocation6 + $0xc6] ss:$8 sm:$0xf0]  ;;  %8020 = vmatmul.mubr.msk.bf16.gmra.mrb[72].mxu0 %vm1123_vm5, %v3102_v23  ;;  %v3001_v44 = vor.u32 %v3000_v35, %v2999_v30  ;;  %v3002_v50 = vld [vmem:[#allocation6 + $0xc7] ss:$8 sm:$0xf] }
 0x36c   : > { %v2988_v51 = vor.u32 %v2987_v58, %v2986_v32  ;;  %v2991_v5 = vmax.f32 %v2975_v4, %v2985_v63  ;;  %v3003_v6 = vld [vmem:[#allocation6 + $0xc7] ss:$8 sm:$0xf0] }
 0x36d   : > { %v3004_v19 = vor.u32 %v3003_v6, %v3002_v50  ;;  %v3049_v21 = vld [vmem:[#allocation2] sm:$0xff]  ;;  %v3052_v49 = vld [vmem:[#allocation2 + $0x18] sm:$0xff]  ;;  %v3051_v36 = vld [vmem:[#allocation2 + $0x10] sm:$0xff] }
 0x36e   : > { %v2992_v47 = vmax.f32 %v2976_v48, %v2988_v51  ;;  %v3007_v2 = vmax.f32 %v2991_v5, %v3001_v44  ;;  %v3065_v12 = vpack.c.bf16 %v3050_v62, %v3049_v21  ;;  %v3053_v26 = vld [vmem:[#allocation2 + $0x20] sm:$0xff]  ;;  %v3066_v14 = vpack.c.bf16 %v3052_v49, %v3051_v36  ;;  %v3054_v27 = vld [vmem:[#allocation2 + $0x28] sm:$0xff]  ;;  %v8866_v9 = vld [vmem:[#allocation16 + $0x48] sm:$0xff]  }
 0x36f   : > { %v3067_v8 = vpack.c.bf16 %v3054_v27, %v3053_v26  ;;  %v8867_v33 = vld [vmem:[#allocation16 + $0x50] sm:$0xff]   ;;  %v3058_v4 = vld [vmem:[#allocation2 + $0x48] sm:$0xff]  ;;  %v3055_v28 = vld [vmem:[#allocation2 + $0x30] sm:$0xff] }
 0x370   : > { %v3008_v60 = vmax.f32 %v2992_v47, %v3004_v19  ;;  %v9029_v29 = vpop.eup %9028  ;;  %v3015_v45 = vmul.f32 0.044715, %v3007_v2  ;;  %v3011_v17 = vmul.f32 0.5, %v3007_v2  ;;  %v3056_v22 = vld [vmem:[#allocation2 + $0x38] sm:$0xff]  ;;  %v3057_v48 = vld [vmem:[#allocation2 + $0x40] sm:$0xff]  ;;  %v8869_v58 = vld [vmem:[#allocation16 + $0x60] sm:$0xff]  }
 0x371   : > { %v3037_v37 = vadd.f32 1.0, %v9029_v29  ;;  %v3068_v23 = vpack.c.bf16 %v3056_v22, %v3055_v28  ;;  %v8868_v63 = vld [vmem:[#allocation16 + $0x58] sm:$0xff]   ;;  %v3069_v32 = vpack.c.bf16 %v3058_v4, %v3057_v48  ;;  %v3060_v51 = vld [vmem:[#allocation2 + $0x58] sm:$0xff]  ;;  %v3059_v30 = vld [vmem:[#allocation2 + $0x50] sm:$0xff] }
 0x372   : > { %v9031_v46 = vpop.eup %9030  ;;  %v3016_v0 = vmul.f32 0.044715, %v3008_v60  ;;  %v3019_v40 = vmul.f32 %v3015_v45, %v3007_v2  ;;  %v3012_v54 = vmul.f32 0.5, %v3008_v60  ;;  %v3070_v35 = vpack.c.bf16 %v3060_v51, %v3059_v30  ;;  %v3405_v6 = vld [vmem:[#allocation2 + $0xa] sm:$0xff]  ;;  %v3407_v29 = vld [vmem:[#allocation2 + $0x1a] sm:$0xff]  ;;  %v3408_v45 = vld [vmem:[#allocation2 + $0x22] sm:$0xff] }
 0x373   : > { %v3038_v42 = vadd.f32 1.0, %v9031_v46  ;;  %v3041_v43 = vmul.f32 %v3037_v37, %v3009_v3  ;;  %v3406_v46 = vld [vmem:[#allocation2 + $0x12] sm:$0xff]  ;;  %v3409_v37 = vld [vmem:[#allocation2 + $0x2a] sm:$0xff]  ;;  %v8875_v49 = vld [vmem:[#allocation16 + $0x90] sm:$0xff]  }
 0x374   : > { %v3020_v25 = vmul.f32 %v3016_v0, %v3008_v60  ;;  %v3023_v24 = vmul.f32 %v3019_v40, %v3007_v2  ;;  %v3421_v3 = vpack.c.bf16 %v3407_v29, %v3406_v46  ;;  %v8870_v0 = vld [vmem:[#allocation16 + $0x68] sm:$0xff]   ;;  %v3603_v62 = vld [vmem:[#allocation2 + $0x2b] sm:$0xff]  ;;  %v3605_v26 = vld [vmem:[#allocation2 + $0x3b] sm:$0xff] }
 0x375   : > { %v3042_v38 = vmul.f32 %v3038_v42, %v3010_v31  ;;  %3045 = vst.msk [vmem:[#allocation2 + $0x63] sm:$0xff] %vm1123_vm5, %v3041_v43  ;;  %v3422_v31 = vpack.c.bf16 %v3409_v37, %v3408_v45  ;;  %v8871_v42 = vld [vmem:[#allocation16 + $0x70] sm:$0xff]   ;;  %v3413_v43 = vld [vmem:[#allocation2 + $0x4a] sm:$0xff]  ;;  %v8874_v21 = vld [vmem:[#allocation16 + $0x88] sm:$0xff]  }
 0x376   : > { %v3024_v57 = vmul.f32 %v3020_v25, %v3008_v60  ;;  %v3027_v16 = vadd.f32 %v3023_v24, %v3007_v2  ;;  %v3404_v2 = vld [vmem:[#allocation2 + $0x2] sm:$0xff]  ;;  %v3411_v40 = vld [vmem:[#allocation2 + $0x3a] sm:$0xff]  ;;  %v3410_v25 = vld [vmem:[#allocation2 + $0x32] sm:$0xff] }
 0x377   : > { %3046 = vst.msk [vmem:[#allocation2 + $0x6b] sm:$0xff] %vm1123_vm5, %v3042_v38  ;;  %v3423_v38 = vpack.c.bf16 %v3411_v40, %v3410_v25  ;;  %v3412_v24 = vld [vmem:[#allocation2 + $0x42] sm:$0xff]  ;;  %v3607_v36 = vld [vmem:[#allocation2 + $0x4b] sm:$0xff]  ;;  %v3608_v28 = vld [vmem:[#allocation2 + $0x53] sm:$0xff] }
 0x378   : > { %v3028_v39 = vadd.f32 %v3024_v57, %v3008_v60  ;;  %v3031_v55 = vmul.f32 0.7978846, %v3027_v16  ;;  %v3420_v60 = vpack.c.bf16 %v3405_v6, %v3404_v2  ;;  %v8872_v57 = vld [vmem:[#allocation16 + $0x78] sm:$0xff]   ;;  %v3424_v16 = vpack.c.bf16 %v3413_v43, %v3412_v24  ;;  %v3609_v22 = vld [vmem:[#allocation2 + $0x5b] sm:$0xff] }
 0x379   : > { %v3792_v30 = vld [vmem:[#allocation2 + $0x4] sm:$0xff]  ;;  %v3799_v2 = vld [vmem:[#allocation2 + $0x3c] sm:$0xff]  ;;  %v3798_v29 = vld [vmem:[#allocation2 + $0x34] sm:$0xff] }
 0x37a   : > { %v3032_v10 = vmul.f32 0.7978846, %v3028_v39  ;;  %9032 = vtanh.f32 %v3031_v55  ;;  %v8873_v39 = vld [vmem:[#allocation16 + $0x80] sm:$0xff]   ;;  %v3415_v55 = vld [vmem:[#allocation2 + $0x5a] sm:$0xff]  ;;  %v3811_v45 = vpack.c.bf16 %v3799_v2, %v3798_v29 }
 0x37b   : > { %v3800_v46 = vld [vmem:[#allocation2 + $0x44] sm:$0xff]  ;;  %v3802_v37 = vld [vmem:[#allocation2 + $0x54] sm:$0xff] }
 0x37c   : > { %9034 = vtanh.f32 %v3032_v10  ;;  %v3093_v61 = vld [vmem:[#allocation2 + $0x61] sm:$0xff] }
 0x37d   : > { %v3416_v10 = vld [vmem:[#allocation2 + $0x62] sm:$0xff] }
 0x37e   : > { %v3094_v34 = vld [vmem:[#allocation2 + $0x69] sm:$0xff] }
 0x37f   : > { %v3103_v56 = vpack.c.bf16 %v3094_v34, %v3093_v61  ;;  %v3062_v5 = vld [vmem:[#allocation2 + $0x68] sm:$0xff]  ;;  %v3414_v61 = vld [vmem:[#allocation2 + $0x52] sm:$0xff] }
 0x380   : > { %v3425_v34 = vpack.c.bf16 %v3415_v55, %v3414_v61  ;;  %v3611_v4 = vld [vmem:[#allocation2 + $0x6b] sm:$0xff]  ;;  %v3610_v48 = vld [vmem:[#allocation2 + $0x63] sm:$0xff] }
 0x381   : > { %8023 = vmatprep.mubr.msk.bf16.mxu0 %vm1123_vm5, %v3103_v56  ;;  %v3417_v56 = vld [vmem:[#allocation2 + $0x6a] sm:$0xff] }
 0x382   : > { %v3804_v40 = vld [vmem:[#allocation2 + $0x64] sm:$0xff] }
 0x383   : > { %v8880_v55 = vld [vmem:[#allocation19 + $0x38] sm:$0xff]  }
 0x384   : > { %v9033_v7 = vpop.eup %9032  ;;  %v10998_v61 = vld [vmem:[#allocation18] ss:$0 sm:$0xff] }
 0x385   : > { %v3039_v59 = vadd.f32 1.0, %v9033_v7  ;;  %v3426_v7 = vpack.c.bf16 %v3417_v56, %v3416_v10  ;;  %v10995_v10 = vld [vmem:[#allocation19] sm:$0xff]  }
 0x386   : > { %v9035_v13 = vpop.eup %9034 }
 0x387   : > { %v3040_v20 = vadd.f32 1.0, %v9035_v13  ;;  %v3043_v41 = vmul.f32 %v3039_v59, %v3011_v17  ;;  %v3599_v17 = vld [vmem:[#allocation2 + $0xb] sm:$0xff] }
 0x389   : > { %v3044_v18 = vmul.f32 %v3040_v20, %v3012_v54  ;;  %3047 = vst.msk [vmem:[#allocation2 + $0x73] sm:$0xff] %vm1123_vm5, %v3043_v41  ;;  %v3598_v20 = vld [vmem:[#allocation2 + $0x3] sm:$0xff] }
 0x38a   : > { %v3614_v41 = vpack.c.bf16 %v3599_v17, %v3598_v20 }
 0x38b   : > { %3048 = vst.msk [vmem:[#allocation2 + $0x7b] sm:$0xff] %vm1123_vm5, %v3044_v18  ;;  %v3601_v18 = vld [vmem:[#allocation2 + $0x1b] sm:$0xff] }
 0x390   : > { %v3095_v52 = vld [vmem:[#allocation2 + $0x71] sm:$0xff] }
 0x391   : > { %v3063_v47 = vld [vmem:[#allocation2 + $0x70] sm:$0xff] }
 0x392   : > { %v3096_v11 = vld [vmem:[#allocation2 + $0x79] sm:$0xff] }
 0x393   : > { %v3104_v53 = vpack.c.bf16 %v3096_v11, %v3095_v52  ;;  %v3064_v50 = vld [vmem:[#allocation2 + $0x78] sm:$0xff] }
 0x394   : > { %v3072_v19 = vpack.c.bf16 %v3064_v50, %v3063_v47  ;;  %v3419_v13 = vld [vmem:[#allocation2 + $0x7a] sm:$0xff]  ;;  %v3418_v59 = vld [vmem:[#allocation2 + $0x72] sm:$0xff]  ;;  %v3796_v47 = vld [vmem:[#allocation2 + $0x24] sm:$0xff] }
 0x395   : > { %8024 = vmatmul.mubr.msk.bf16.gmra.mrb[76].mxu0 %vm1123_vm5, %v3104_v53  ;;  %v3427_v54 = vpack.c.bf16 %v3419_v13, %v3418_v59  ;;  %v3600_v52 = vld [vmem:[#allocation2 + $0x13] sm:$0xff]  ;;  %v3602_v53 = vld [vmem:[#allocation2 + $0x23] sm:$0xff] }
 0x396   : > { %8035 = vmatprep.mubr.msk.bf16.mxu0 %vm1123_vm5, %v3065_v12  ;;  %v3615_v11 = vpack.c.bf16 %v3601_v18, %v3600_v52  ;;  %v3616_v12 = vpack.c.bf16 %v3603_v62, %v3602_v53  ;;  %v3612_v51 = vld [vmem:[#allocation2 + $0x73] sm:$0xff] }
 0x397   : > { %v3797_v50 = vld [vmem:[#allocation2 + $0x2c] sm:$0xff]  ;;  %v3806_v25 = vld [vmem:[#allocation2 + $0x74] sm:$0xff] }
 0x39d   : > { %8036 = vmatmul.mubr.msk.bf16.vlgmr.msra.gmra.mrb[64].mxu0 %vm1123_vm5, %v3066_v14  ;;  %v3604_v14 = vld [vmem:[#allocation2 + $0x33] sm:$0xff] }
 0x39e   : > { %8039 = vmatprep.mubr.msk.bf16.mxu0 %vm1123_vm5, %v3067_v8  ;;  %8052 = vmatpush3.bf16.msra.mxu0 %v10823_v15  ;;  %v3061_v15 = vld [vmem:[#allocation2 + $0x60] sm:$0xff]  ;;  %v3617_v27 = vpack.c.bf16 %v3605_v26, %v3604_v14 }
 0x39f   : > { %8053 = vmatprep.subr.bf16.mxu0 %v8866_v9  ;;  %v3071_v44 = vpack.c.bf16 %v3062_v5, %v3061_v15  ;;  %v8876_v8 = vld [vmem:[#allocation16 + $0x98] sm:$0xff]   ;;  %v3794_v5 = vld [vmem:[#allocation2 + $0x14] sm:$0xff] }
 0x3a2   : > { %8054 = vmatpush3.bf16.msra.mxu0 %v8866_v9  ;;  %v3606_v9 = vld [vmem:[#allocation2 + $0x43] sm:$0xff] }
 0x3a3   : > { %8055 = vmatprep.subr.bf16.mxu0 %v8867_v33 }
 0x3a5   : > { %8040 = vmatmul.mubr.msk.bf16.gmra.mrb[68].mxu0 %vm1123_vm5, %v3068_v23  ;;  %v3619_v23 = vpack.c.bf16 %v3609_v22, %v3608_v28 }
 0x3a6   : > { %8043 = vmatprep.mubr.msk.bf16.mxu0 %vm1123_vm5, %v3069_v32  ;;  %8056 = vmatpush3.bf16.msra.mxu0 %v8867_v33  ;;  %v3618_v33 = vpack.c.bf16 %v3607_v36, %v3606_v9  ;;  %v3613_v32 = vld [vmem:[#allocation2 + $0x7b] sm:$0xff] }
 0x3a7   : > { %8057 = vmatprep.subr.bf16.mxu0 %v8868_v63  ;;  %v3621_v15 = vpack.c.bf16 %v3613_v32, %v3612_v51 }
 0x3aa   : > { %8058 = vmatpush3.bf16.msra.mxu0 %v8868_v63  ;;  %v3620_v63 = vpack.c.bf16 %v3611_v4, %v3610_v48 }
 0x3ab   : > { %8075 = vmatprep.subr.bf16.mxu0 %v8869_v58 }
 0x3ad   : > { %8044 = vmatmul.mubr.msk.bf16.gmra.mrb[72].mxu0 %vm1123_vm5, %v3070_v35 }
 0x3ae   : > { %8047 = vmatprep.mubr.msk.bf16.mxu0 %vm1123_vm5, %v3071_v44  ;;  %v3795_v44 = vld [vmem:[#allocation2 + $0x1c] sm:$0xff] }
 0x3af   : > { %v3809_v6 = vpack.c.bf16 %v3795_v44, %v3794_v5 }
 0x3b5   : > { %8048 = vmatmul.mubr.msk.bf16.gmra.mrb[76].mxu0 %vm1123_vm5, %v3072_v19  ;;  %v3810_v19 = vpack.c.bf16 %v3797_v50, %v3796_v47 }
 0x3b6   : > { %8059 = vmatprep.mubr.msk.bf16.mxu0 %vm1123_vm5, %v3420_v60  ;;  %v3801_v60 = vld [vmem:[#allocation2 + $0x4c] sm:$0xff] }
 0x3bd   : > { %8060 = vmatmul.mubr.msk.bf16.vlgmr.msra.gmra.mrb[64].mxu0 %vm1123_vm5, %v3421_v3  ;;  %v3812_v3 = vpack.c.bf16 %v3801_v60, %v3800_v46 }
 0x3be   : > { %8063 = vmatprep.mubr.msk.bf16.mxu0 %vm1123_vm5, %v3422_v31  ;;  %8076 = vmatpush3.bf16.msra.mxu0 %v8869_v58  ;;  %v3793_v58 = vld [vmem:[#allocation2 + $0xc] sm:$0xff] }
 0x3bf   : > { %8077 = vmatprep.subr.bf16.mxu0 %v8870_v0  ;;  %v3808_v35 = vpack.c.bf16 %v3793_v58, %v3792_v30  ;;  %v3805_v31 = vld [vmem:[#allocation2 + $0x6c] sm:$0xff] }
 0x3c0   : > { %v3814_v43 = vpack.c.bf16 %v3805_v31, %v3804_v40 }
 0x3c2   : > { %8078 = vmatpush3.bf16.msra.mxu0 %v8870_v0  ;;  %v3803_v0 = vld [vmem:[#allocation2 + $0x5c] sm:$0xff] }
 0x3c3   : > { %8079 = vmatprep.subr.bf16.mxu0 %v8871_v42 }
 0x3c5   : > { %8064 = vmatmul.mubr.msk.bf16.gmra.mrb[68].mxu0 %vm1123_vm5, %v3423_v38  ;;  %v3807_v38 = vld [vmem:[#allocation2 + $0x7c] sm:$0xff] }
 0x3c6   : > { %8067 = vmatprep.mubr.msk.bf16.mxu0 %vm1123_vm5, %v3424_v16  ;;  %8080 = vmatpush3.bf16.msra.mxu0 %v8871_v42  ;;  %v3813_v42 = vpack.c.bf16 %v3803_v0, %v3802_v37  ;;  %v3815_v24 = vpack.c.bf16 %v3807_v38, %v3806_v25  ;;  %v8878_v16 = vld [vmem:[#allocation19 + $0x28] sm:$0xff]  }
 0x3c7   : > { %8081 = vmatprep.subr.bf16.mxu0 %v8872_v57 }
 0x3ca   : > { %8082 = vmatpush3.bf16.msra.mxu0 %v8872_v57  ;;  %v8877_v57 = vld [vmem:[#allocation19 + $0x20] sm:$0xff]  }
 0x3cb   : > { %8099 = vmatprep.subr.bf16.mxu0 %v8873_v39  ;;  %8123 = vmatprep.subr.bf16.mxu1 %v8877_v57 }
 0x3cc   : > { %8124 = vmatpush3.bf16.msra.mxu1 %v8877_v57 }
 0x3cd   : > { %8068 = vmatmul.mubr.msk.bf16.gmra.mrb[72].mxu0 %vm1123_vm5, %v3425_v34  ;;  %8125 = vmatprep.subr.bf16.mxu1 %v8878_v16 }
 0x3ce   : > { %8071 = vmatprep.mubr.msk.bf16.mxu0 %vm1123_vm5, %v3426_v7 }
 0x3d0   : > { %8126 = vmatpush3.bf16.msra.mxu1 %v8878_v16 }
 0x3d5   : > { %8072 = vmatmul.mubr.msk.bf16.gmra.mrb[76].mxu0 %vm1123_vm5, %v3427_v54 }
 0x3d6   : > { %8083 = vmatprep.mubr.msk.bf16.mxu0 %vm1123_vm5, %v3614_v41 }
 0x3dd   : > { %8084 = vmatmul.mubr.msk.bf16.vlgmr.msra.gmra.mrb[64].mxu0 %vm1123_vm5, %v3615_v11 }
 0x3de   : > { %8087 = vmatprep.mubr.msk.bf16.mxu0 %vm1123_vm5, %v3616_v12  ;;  %8100 = vmatpush3.bf16.msra.mxu0 %v8873_v39  ;;  %v8879_v39 = vld [vmem:[#allocation19 + $0x30] sm:$0xff]  }
 0x3df   : > { %8101 = vmatprep.subr.bf16.mxu0 %v8874_v21  ;;  %8127 = vmatprep.subr.bf16.mxu1 %v8879_v39 }
 0x3e0   : > { %8128 = vmatpush3.bf16.msra.mxu1 %v8879_v39 }
 0x3e1   : > { %8129 = vmatprep.subr.bf16.mxu1 %v8880_v55 }
 0x3e2   : > { %8102 = vmatpush3.bf16.msra.mxu0 %v8874_v21 }
 0x3e3   : > { %8103 = vmatprep.subr.bf16.mxu0 %v8875_v49 }
 0x3e4   : > { %8130 = vmatpush3.bf16.msra.mxu1 %v8880_v55 }
 0x3e5   : > { %8088 = vmatmul.mubr.msk.bf16.gmra.mrb[68].mxu0 %vm1123_vm5, %v3617_v27  ;;  %8135 = vmatprep.subr.bf16.mxu1 %v10995_v10 }
 0x3e6   : > { %8091 = vmatprep.mubr.msk.bf16.mxu0 %vm1123_vm5, %v3618_v33  ;;  %8104 = vmatpush3.bf16.msra.mxu0 %v8875_v49 }
 0x3e7   : > { %8105 = vmatprep.subr.bf16.mxu0 %v8876_v8 }
 0x3ea   : > { %8106 = vmatpush3.bf16.msra.mxu0 %v8876_v8 }
 0x3eb   : > { %8247 = vmatprep.subr.bf16.mxu0 %v9610_v1 }
 0x3ed   : > { %8092 = vmatmul.mubr.msk.bf16.gmra.mrb[72].mxu0 %vm1123_vm5, %v3619_v23 }
 0x3ee   : > { %8095 = vmatprep.mubr.msk.bf16.mxu0 %vm1123_vm5, %v3620_v63 }
 0x3f5   : > { %8096 = vmatmul.mubr.msk.bf16.gmra.mrb[76].mxu0 %vm1123_vm5, %v3621_v15 }
 0x3f6   : > { %8107 = vmatprep.mubr.msk.bf16.mxu0 %vm1123_vm5, %v3808_v35 }
 0x3fd   : > { %8108 = vmatmul.mubr.msk.bf16.vlgmr.msra.gmra.mrb[64].mxu0 %vm1123_vm5, %v3809_v6 }
 0x3fe   : > { %8111 = vmatprep.mubr.msk.bf16.mxu0 %vm1123_vm5, %v3810_v19 }
 0x405   : > { %8112 = vmatmul.mubr.msk.bf16.gmra.mrb[68].mxu0 %vm1123_vm5, %v3811_v45 }
 0x406   : > { %8115 = vmatprep.mubr.msk.bf16.mxu0 %vm1123_vm5, %v3812_v3 }
 0x40d   : > { %8116 = vmatmul.mubr.msk.bf16.gmra.mrb[72].mxu0 %vm1123_vm5, %v3813_v42 }
 0x40e   : > { %8119 = vmatprep.mubr.msk.bf16.mxu0 %vm1123_vm5, %v3814_v43 }
 0x415   : > { %8120 = vmatmul.mubr.msk.bf16.gmra.mrb[76].mxu0 %vm1123_vm5, %v3815_v24 }
 0x416   : > { %8257 = vmatprep.mubr.msk.bf16.mxu0 %vm9612_vm6, %v9610_v1 }
 0x4d0   : > { %v8109_v34 = vpop.f32.mrb[64].mxu0 }
 0x4d1   : > { %v3995_v56 = vadd.f32 %v8109_v34, %v10998_v61  ;;  %v3907_v7 = vpop.f32.mrb[65].mxu0 }
 0x4d2   : > { %v3993_v13 = vadd.f32 %v10998_v61, %v3907_v7  ;;  %v8110_v17 = vpop.f32.mrb[66].mxu0 }
 0x4d3   : > { %4011 = vst.msk [vmem:[#allocation7 + $0x10] sm:$0xff] %vm1123_vm5, %v3995_v56  ;;  %v3996_v59 = vadd.f32 %v8110_v17, %v10998_v61  ;;  %v3910_v54 = vpop.f32.mrb[67].mxu0 }
 0x4d4   : > { %4009 = vst.msk [vmem:[#allocation7] sm:$0xff] %vm1123_vm5, %v3993_v13  ;;  %v3994_v20 = vadd.f32 %v10998_v61, %v3910_v54 }
 0x4d5   : > { %4012 = vst.msk [vmem:[#allocation7 + $0x18] sm:$0xff] %vm1123_vm5, %v3996_v59 }
 0x4d6   : > { %4010 = vst.msk [vmem:[#allocation7 + $0x8] sm:$0xff] %vm1123_vm5, %v3994_v20 }
 0x4d8   : > { %v8113_v41 = vpop.f32.mrb[68].mxu0 }
 0x4d9   : > { %v3999_v18 = vadd.f32 %v8113_v41, %v10998_v61  ;;  %v3923_v62 = vpop.f32.mrb[69].mxu0 }
 0x4da   : > { %v3997_v52 = vadd.f32 %v10998_v61, %v3923_v62  ;;  %v8114_v11 = vpop.f32.mrb[70].mxu0 }
 0x4db   : > { %4015 = vst.msk [vmem:[#allocation7 + $0x30] sm:$0xff] %vm1123_vm5, %v3999_v18  ;;  %v4000_v53 = vadd.f32 %v8114_v11, %v10998_v61  ;;  %v3926_v21 = vpop.f32.mrb[71].mxu0 }
 0x4dc   : > { %4013 = vst.msk [vmem:[#allocation7 + $0x20] sm:$0xff] %vm1123_vm5, %v3997_v52  ;;  %v3998_v12 = vadd.f32 %v10998_v61, %v3926_v21 }
 0x4dd   : > { %v4025_v49 = vld [vmem:[#allocation7] ss:$4 sm:$0xff]  ;;  %v4033_v26 = vld [vmem:[#allocation7 + $0x1] ss:$4 sm:$0xff]  ;;  %4016 = vst.msk [vmem:[#allocation7 + $0x38] sm:$0xff] %vm1123_vm5, %v4000_v53 }
 0x4de   : > { %v4040_v36 = vmax.f32 %v4025_v49, %v4033_v26  ;;  %4014 = vst.msk [vmem:[#allocation7 + $0x28] sm:$0xff] %vm1123_vm5, %v3998_v12  ;;  %v4045_v14 = vld [vmem:[#allocation7 + $0x2] ss:$4 sm:$0xff]  ;;  %v4057_v8 = vld [vmem:[#allocation7 + $0x3] ss:$4 sm:$0xff] }
 0x4e0   : > { %v4052_v27 = vmax.f32 %v4040_v36, %v4045_v14  ;;  %v8117_v9 = vpop.f32.mrb[72].mxu0 }
 0x4e1   : > { %v4003_v33 = vadd.f32 %v8117_v9, %v10998_v61  ;;  %v3939_v22 = vpop.f32.mrb[73].mxu0 }
 0x4e2   : > { %v4064_v4 = vmax.f32 %v4052_v27, %v4057_v8  ;;  %v4001_v28 = vadd.f32 %v10998_v61, %v3939_v22  ;;  %v8118_v23 = vpop.f32.mrb[74].mxu0 }
 0x4e3   : > { %4019 = vst.msk [vmem:[#allocation7 + $0x50] sm:$0xff] %vm1123_vm5, %v4003_v33  ;;  %v4004_v48 = vadd.f32 %v8118_v23, %v10998_v61  ;;  %v3942_v63 = vpop.f32.mrb[75].mxu0 }
 0x4e4   : > { %v4072_v32 = vmul.f32 0.044715, %v4064_v4  ;;  %4017 = vst.msk [vmem:[#allocation7 + $0x40] sm:$0xff] %vm1123_vm5, %v4001_v28  ;;  %v4002_v58 = vadd.f32 %v10998_v61, %v3942_v63  ;;  %v4068_v52 = vmul.f32 0.5, %v4064_v4 }
 0x4e5   : > { %v4027_v51 = vld [vmem:[#allocation7 + $0x20] ss:$4 sm:$0xff]  ;;  %v4035_v15 = vld [vmem:[#allocation7 + $0x21] ss:$4 sm:$0xff]  ;;  %4020 = vst.msk [vmem:[#allocation7 + $0x58] sm:$0xff] %vm1123_vm5, %v4004_v48 }
 0x4e6   : > { %v4076_v30 = vmul.f32 %v4072_v32, %v4064_v4  ;;  %v4041_v35 = vmax.f32 %v4027_v51, %v4035_v15  ;;  %4018 = vst.msk [vmem:[#allocation7 + $0x48] sm:$0xff] %vm1123_vm5, %v4002_v58  ;;  %v4047_v5 = vld [vmem:[#allocation7 + $0x22] ss:$4 sm:$0xff]  ;;  %v4059_v47 = vld [vmem:[#allocation7 + $0x23] ss:$4 sm:$0xff] }
 0x4e8   : > { %v4080_v44 = vmul.f32 %v4076_v30, %v4064_v4  ;;  %v4053_v50 = vmax.f32 %v4041_v35, %v4047_v5  ;;  %v8121_v6 = vpop.f32.mrb[76].mxu0 }
 0x4e9   : > { %v4007_v19 = vadd.f32 %v8121_v6, %v10998_v61  ;;  %v3955_v2 = vpop.f32.mrb[77].mxu0 }
 0x4ea   : > { %v4084_v60 = vadd.f32 %v4080_v44, %v4064_v4  ;;  %v4065_v29 = vmax.f32 %v4053_v50, %v4059_v47  ;;  %v4005_v45 = vadd.f32 %v10998_v61, %v3955_v2  ;;  %v8122_v46 = vpop.f32.mrb[78].mxu0  ;;  %v8882_v2 = vld [vmem:[#allocation19 + $0x8] sm:$0xff]  }
 0x4eb   : > { %4023 = vst.msk [vmem:[#allocation7 + $0x70] sm:$0xff] %vm1123_vm5, %v4007_v19  ;;  %v4008_v3 = vadd.f32 %v8122_v46, %v10998_v61  ;;  %v3958_v37 = vpop.f32.mrb[79].mxu0  ;;  %v8885_v46 = vld [vmem:[#allocation19 + $0x40] sm:$0xff]  }
 0x4ec   : > { %v4073_v0 = vmul.f32 0.044715, %v4065_v29  ;;  %4021 = vst.msk [vmem:[#allocation7 + $0x60] sm:$0xff] %vm1123_vm5, %v4005_v45  ;;  %v4006_v31 = vadd.f32 %v10998_v61, %v3958_v37  ;;  %v4088_v42 = vmul.f32 0.7978846, %v4084_v60  ;;  %v4069_v9 = vmul.f32 0.5, %v4065_v29 }
 0x4ed   : > { %v4029_v40 = vld [vmem:[#allocation7 + $0x40] ss:$4 sm:$0xff]  ;;  %v4037_v43 = vld [vmem:[#allocation7 + $0x41] ss:$4 sm:$0xff]  ;;  %4024 = vst.msk [vmem:[#allocation7 + $0x78] sm:$0xff] %vm1123_vm5, %v4008_v3 }
 0x4ee   : > { %v4077_v25 = vmul.f32 %v4073_v0, %v4065_v29  ;;  %v4042_v38 = vmax.f32 %v4029_v40, %v4037_v43  ;;  %4022 = vst.msk [vmem:[#allocation7 + $0x68] sm:$0xff] %vm1123_vm5, %v4006_v31  ;;  %9036 = vtanh.f32 %v4088_v42  ;;  %v4049_v24 = vld [vmem:[#allocation7 + $0x42] ss:$4 sm:$0xff]  ;;  %v4061_v39 = vld [vmem:[#allocation7 + $0x43] ss:$4 sm:$0xff] }
 0x4ef   : > { %v8884_v45 = vld [vmem:[#allocation19 + $0x18] sm:$0xff]   ;;  %v8886_v40 = vld [vmem:[#allocation19 + $0x48] sm:$0xff]  }
 0x4f0   : > { %v4081_v57 = vmul.f32 %v4077_v25, %v4065_v29  ;;  %v4054_v16 = vmax.f32 %v4042_v38, %v4049_v24  ;;  %v8888_v25 = vld [vmem:[#allocation19 + $0x58] sm:$0xff]   ;;  %v8889_v38 = vld [vmem:[#allocation19 + $0x60] sm:$0xff]  }
 0x4f2   : > { %v4085_v55 = vadd.f32 %v4081_v57, %v4065_v29  ;;  %v4066_v34 = vmax.f32 %v4054_v16, %v4061_v39  ;;  %v8883_v29 = vld [vmem:[#allocation19 + $0x10] sm:$0xff]  }
 0x4f4   : > { %v4074_v56 = vmul.f32 0.044715, %v4066_v34  ;;  %v4089_v7 = vmul.f32 0.7978846, %v4085_v55  ;;  %v4070_v23 = vmul.f32 0.5, %v4066_v34 }
 0x4f5   : > { %v4031_v13 = vld [vmem:[#allocation7 + $0x60] ss:$4 sm:$0xff]  ;;  %v4039_v61 = vld [vmem:[#allocation7 + $0x61] ss:$4 sm:$0xff]  ;;  %v4051_v54 = vld [vmem:[#allocation7 + $0x62] ss:$4 sm:$0xff] }
 0x4f6   : > { %v4078_v17 = vmul.f32 %v4074_v56, %v4066_v34  ;;  %v4043_v59 = vmax.f32 %v4031_v13, %v4039_v61  ;;  %9038 = vtanh.f32 %v4089_v7  ;;  %v4063_v62 = vld [vmem:[#allocation7 + $0x63] ss:$4 sm:$0xff] }
 0x4f7   : > { %v8891_v7 = vld [vmem:[#allocation19 + $0x70] sm:$0xff]   ;;  %v8892_v13 = vld [vmem:[#allocation19 + $0x78] sm:$0xff]   ;;  %v8893_v61 = vld [vmem:[#allocation19 + $0x80] sm:$0xff]  }
 0x4f8   : > { %v9037_v20 = vpop.eup %9036  ;;  %v4082_v41 = vmul.f32 %v4078_v17, %v4066_v34  ;;  %v4055_v18 = vmax.f32 %v4043_v59, %v4051_v54 }
 0x4f9   : > { %v4096_v11 = vadd.f32 1.0, %v9037_v20 }
 0x4fa   : > { %v4086_v53 = vadd.f32 %v4082_v41, %v4066_v34  ;;  %v4067_v21 = vmax.f32 %v4055_v18, %v4063_v62  ;;  %v8890_v34 = vld [vmem:[#allocation19 + $0x68] sm:$0xff]  }
 0x4fb   : > { %v4100_v12 = vmul.f32 %v4096_v11, %v4068_v52  ;;  %v8894_v18 = vld [vmem:[#allocation19 + $0x88] sm:$0xff]   ;;  %v8895_v52 = vld [vmem:[#allocation19 + $0x90] sm:$0xff]   ;;  %v8896_v11 = vld [vmem:[#allocation19 + $0x98] sm:$0xff]  }
 0x4fc   : > { %v4090_v49 = vmul.f32 0.7978846, %v4086_v53  ;;  %v4075_v26 = vmul.f32 0.044715, %v4067_v21  ;;  %v4071_v30 = vmul.f32 0.5, %v4067_v21 }
 0x4fd   : > { %4104 = vst.msk [vmem:[#allocation3 + $0x3] sm:$0xff] %vm1123_vm5, %v4100_v12 }
 0x4fe   : > { %9040 = vtanh.f32 %v4090_v49  ;;  %v4079_v36 = vmul.f32 %v4075_v26, %v4067_v21  ;;  %v8897_v49 = vld [vmem:[#allocation22 + $0x24] sm:$0xff]   ;;  %v8898_v26 = vld [vmem:[#allocation22 + $0x2c] sm:$0xff]  }
 0x500   : > { %v9039_v14 = vpop.eup %9038  ;;  %v4083_v27 = vmul.f32 %v4079_v36, %v4067_v21  ;;  %v8899_v36 = vld [vmem:[#allocation22 + $0x34] sm:$0xff]  }
 0x501   : > { %v4097_v8 = vadd.f32 1.0, %v9039_v14  ;;  %v8900_v14 = vld [vmem:[#allocation22 + $0x3c] sm:$0xff]  }
 0x502   : > { %v4087_v33 = vadd.f32 %v4083_v27, %v4067_v21  ;;  %v8901_v27 = vld [vmem:[#allocation22 + $0x44] ss:$0 sps:$4 sm:$0xff]  }
 0x503   : > { %v4101_v22 = vmul.f32 %v4097_v8, %v4069_v9  ;;  %v4681_v9 = vsel %vm4679_vm7, %v8901_v27, 0  ;;  %v7379_v8 = vld [vmem:[#allocation21] ss:$0 sm:$0xff] }
 0x504   : > { %v4091_v28 = vmul.f32 0.7978846, %v4087_v33  ;;  %v4122_v32 = vld [vmem:[#allocation3 + $0x1] sm:$0xff] }
 0x505   : > { %4105 = vst.msk [vmem:[#allocation3 + $0xb] sm:$0xff] %vm1123_vm5, %v4101_v22  ;;  %v4108_v19 = vld [vmem:[#allocation3] sm:$0xff] }
 0x506   : > { %9042 = vtanh.f32 %v4091_v28  ;;  %v4295_v42 = vld [vmem:[#allocation3 + $0x2] sm:$0xff] }
 0x507   : > { %v4393_v55 = vld [vmem:[#allocation3 + $0x3] sm:$0xff] }
 0x508   : > { %v9041_v4 = vpop.eup %9040 }
 0x509   : > { %v4098_v48 = vadd.f32 1.0, %v9041_v4 }
 0x50b   : > { %v4102_v63 = vmul.f32 %v4098_v48, %v4070_v23 }
 0x50c   : > { %v4123_v58 = vld [vmem:[#allocation3 + $0x9] sm:$0xff] }
 0x50d   : > { %4106 = vst.msk [vmem:[#allocation3 + $0x13] sm:$0xff] %vm1123_vm5, %v4102_v63  ;;  %v4126_v51 = vpack.c.bf16 %v4123_v58, %v4122_v32  ;;  %v4109_v44 = vld [vmem:[#allocation3 + $0x8] sm:$0xff] }
 0x50e   : > { %v4112_v60 = vpack.c.bf16 %v4109_v44, %v4108_v19  ;;  %v4296_v37 = vld [vmem:[#allocation3 + $0xa] sm:$0xff] }
 0x50f   : > { %8131 = vmatprep.mubr.msk.bf16.mxu1 %vm1123_vm5, %v4126_v51  ;;  %v4299_v43 = vpack.c.bf16 %v4296_v37, %v4295_v42  ;;  %v4394_v57 = vld [vmem:[#allocation3 + $0xb] sm:$0xff] }
 0x510   : > { %v9043_v15 = vpop.eup %9042  ;;  %v4397_v56 = vpack.c.bf16 %v4394_v57, %v4393_v55  ;;  %v4491_v41 = vld [vmem:[#allocation3 + $0x4] sm:$0xff]  ;;  %v8903_v42 = vld [vmem:[#allocation22 + $0x8] sm:$0xff]  }
 0x511   : > { %v4099_v35 = vadd.f32 1.0, %v9043_v15  ;;  %v8910_v55 = vld [vmem:[#allocation22 + $0x60] sm:$0xff]  }
 0x513   : > { %v4103_v5 = vmul.f32 %v4099_v35, %v4071_v30 }
 0x514   : > { %v4124_v50 = vld [vmem:[#allocation3 + $0x11] sm:$0xff] }
 0x515   : > { %4107 = vst.msk [vmem:[#allocation3 + $0x1b] sm:$0xff] %vm1123_vm5, %v4103_v5  ;;  %v4110_v0 = vld [vmem:[#allocation3 + $0x10] sm:$0xff] }
 0x516   : > { %v4297_v16 = vld [vmem:[#allocation3 + $0x12] sm:$0xff] }
 0x517   : > { %v4492_v59 = vld [vmem:[#allocation3 + $0xc] sm:$0xff] }
 0x518   : > { %v4395_v54 = vld [vmem:[#allocation3 + $0x13] sm:$0xff]  ;;  %v4495_v62 = vpack.c.bf16 %v4492_v59, %v4491_v41 }
 0x51c   : > { %v4125_v6 = vld [vmem:[#allocation3 + $0x19] sm:$0xff] }
 0x51d   : > { %v4127_v47 = vpack.c.bf16 %v4125_v6, %v4124_v50  ;;  %v4111_v3 = vld [vmem:[#allocation3 + $0x18] sm:$0xff] }
 0x51e   : > { %v4113_v31 = vpack.c.bf16 %v4111_v3, %v4110_v0  ;;  %v4298_v24 = vld [vmem:[#allocation3 + $0x1a] sm:$0xff]  ;;  %v8902_v0 = vld [vmem:[#allocation22] sm:$0xff]  }
 0x51f   : > { %8132 = vmatmul.mubr.msk.bf16.vlgmr.msra.gmra.mrb[64].mxu1 %vm1123_vm5, %v4127_v47  ;;  %v4300_v39 = vpack.c.bf16 %v4298_v24, %v4297_v16  ;;  %v4396_v17 = vld [vmem:[#allocation3 + $0x1b] sm:$0xff]  ;;  %v8907_v24 = vld [vmem:[#allocation22 + $0x48] sm:$0xff]  }
 0x520   : > { %8136 = vmatpush3.bf16.msra.mxu1 %v10995_v10  ;;  %8143 = vmatprep.mubr.msk.bf16.mxu1 %vm1123_vm5, %v4112_v60  ;;  %v8887_v10 = vld [vmem:[#allocation19 + $0x50] sm:$0xff]   ;;  %v4398_v20 = vpack.c.bf16 %v4396_v17, %v4395_v54  ;;  %v8913_v17 = vld [vmem:[#allocation25 + $0x8] sm:$0xff]  }
 0x521   : > { %8137 = vmatprep.subr.bf16.mxu1 %v8882_v2  ;;  %v4493_v53 = vld [vmem:[#allocation3 + $0x14] sm:$0xff]  ;;  %v4494_v21 = vld [vmem:[#allocation3 + $0x1c] sm:$0xff] }
 0x522   : > { %v4496_v12 = vpack.c.bf16 %v4494_v21, %v4493_v53  ;;  %v8908_v16 = vld [vmem:[#allocation22 + $0x50] sm:$0xff]  }
 0x524   : > { %8138 = vmatpush3.bf16.msra.mxu1 %v8882_v2 }
 0x525   : > { %8139 = vmatprep.subr.bf16.mxu1 %v8883_v29 }
 0x528   : > { %8140 = vmatpush3.bf16.msra.mxu1 %v8883_v29 }
 0x529   : > { %8141 = vmatprep.subr.bf16.mxu1 %v8884_v45 }
 0x52c   : > { %8142 = vmatpush3.bf16.msra.mxu1 %v8884_v45 }
 0x52d   : > { %8147 = vmatprep.subr.bf16.mxu1 %v8885_v46 }
 0x52f   : > { %8144 = vmatmul.mubr.msk.bf16.vlgmr.msra.gmra.mrb[64].mxu1 %vm1123_vm5, %v4113_v31 }
 0x530   : > { %8148 = vmatpush3.bf16.msra.mxu1 %v8885_v46  ;;  %8155 = vmatprep.mubr.msk.bf16.mxu1 %vm1123_vm5, %v4299_v43  ;;  %v8905_v43 = vld [vmem:[#allocation22 + $0x18] sm:$0xff]  }
 0x531   : > { %8149 = vmatprep.subr.bf16.mxu1 %v8886_v40 }
 0x534   : > { %8150 = vmatpush3.bf16.msra.mxu1 %v8886_v40  ;;  %v8904_v40 = vld [vmem:[#allocation22 + $0x10] sm:$0xff]  }
 0x535   : > { %8151 = vmatprep.subr.bf16.mxu1 %v8887_v10 }
 0x538   : > { %8152 = vmatpush3.bf16.msra.mxu1 %v8887_v10  ;;  %v8906_v10 = vld [vmem:[#allocation22 + $0x20] ss:$0 sps:$4 sm:$0xff]  }
 0x539   : > { %8153 = vmatprep.subr.bf16.mxu1 %v8888_v25 }
 0x53c   : > { %8154 = vmatpush3.bf16.msra.mxu1 %v8888_v25  ;;  %v4754_v25 = vsel %vm4679_vm7, %v8906_v10, 0 }
 0x53d   : > { %8159 = vmatprep.subr.bf16.mxu1 %v8889_v38 }
 0x53f   : > { %8156 = vmatmul.mubr.msk.bf16.vlgmr.msra.gmra.mrb[64].mxu1 %vm1123_vm5, %v4300_v39  ;;  %v8909_v39 = vld [vmem:[#allocation22 + $0x58] sm:$0xff]  }
 0x540   : > { %8160 = vmatpush3.bf16.msra.mxu1 %v8889_v38  ;;  %8167 = vmatprep.mubr.msk.bf16.mxu1 %vm1123_vm5, %v4397_v56 }
 0x541   : > { %8161 = vmatprep.subr.bf16.mxu1 %v8890_v34 }
 0x544   : > { %8162 = vmatpush3.bf16.msra.mxu1 %v8890_v34  ;;  %v8911_v34 = vld [vmem:[#allocation22 + $0x68] ss:$0 sps:$4 sm:$0xff]  }
 0x545   : > { %8163 = vmatprep.subr.bf16.mxu1 %v8891_v7  ;;  %v4839_v56 = vsel %vm4679_vm7, %v8911_v34, 0  ;;  %v8924_v34 = vld [vmem:[#allocation22 + $0xb4] sm:$0xff]  }
 0x548   : > { %8164 = vmatpush3.bf16.msra.mxu1 %v8891_v7 }
 0x549   : > { %8165 = vmatprep.subr.bf16.mxu1 %v8892_v13 }
 0x54c   : > { %8166 = vmatpush3.bf16.msra.mxu1 %v8892_v13 }
 0x54d   : > { %8171 = vmatprep.subr.bf16.mxu1 %v8893_v61 }
 0x54f   : > { %8168 = vmatmul.mubr.msk.bf16.vlgmr.msra.gmra.mrb[64].mxu1 %vm1123_vm5, %v4398_v20 }
 0x550   : > { %8172 = vmatpush3.bf16.msra.mxu1 %v8893_v61  ;;  %8179 = vmatprep.mubr.msk.bf16.mxu1 %vm1123_vm5, %v4495_v62  ;;  %v8912_v61 = vld [vmem:[#allocation25] sm:$0xff]  }
 0x551   : > { %8173 = vmatprep.subr.bf16.mxu1 %v8894_v18 }
 0x554   : > { %8174 = vmatpush3.bf16.msra.mxu1 %v8894_v18 }
 0x555   : > { %8175 = vmatprep.subr.bf16.mxu1 %v8895_v52 }
 0x558   : > { %8176 = vmatpush3.bf16.msra.mxu1 %v8895_v52 }
 0x559   : > { %8177 = vmatprep.subr.bf16.mxu1 %v8896_v11 }
 0x55c   : > { %8178 = vmatpush3.bf16.msra.mxu1 %v8896_v11 }
 0x55d   : > { %8183 = vmatprep.subr.bf16.mxu1 %v9610_v1 }
 0x55f   : > { %8180 = vmatmul.mubr.msk.bf16.vlgmr.msra.gmra.mrb[64].mxu1 %vm1123_vm5, %v4496_v12  ;;  %v7398_v12 = vld [vmem:[#allocation24] ss:$0 sm:$0xff] }
 0x560   : > { %8193 = vmatprep.mubr.msk.bf16.mxu1 %vm9612_vm6, %v9610_v1  ;;  %8184 = vmatpush3.bf16.msra.mxu1 %v8897_v49 }
 0x561   : > { %8185 = vmatprep.subr.bf16.mxu1 %v9610_v1 }
 0x564   : > { %8186 = vmatpush3.bf16.msra.mxu1 %v8898_v26 }
 0x565   : > { %8187 = vmatprep.subr.bf16.mxu1 %v9610_v1 }
 0x568   : > { %8188 = vmatpush3.bf16.msra.mxu1 %v8899_v36 }
 0x569   : > { %8189 = vmatprep.subr.bf16.mxu1 %v9610_v1 }
 0x56c   : > { %8190 = vmatpush3.bf16.msra.mxu1 %v8900_v14 }
 0x56d   : > { %8191 = vmatprep.subr.bf16.mxu1 %v9610_v1 }
 0x570   : > { %8192 = vmatpush3.bf16.msra.mxu1 %v4681_v9 }
 0x571   : > { %8197 = vmatprep.subr.bf16.mxu1 %v9610_v1 }
 0x632   : > { %v8181_v33 = vpop.f32.mrb[64].mxu1 }
 0x633   : > { %v4598_v22 = vadd.f32 %v8181_v33, %v7379_v8  ;;  %v4570_v28 = vpop.f32.mrb[65].mxu1 }
 0x634   : > { %v4596_v4 = vadd.f32 %v7379_v8, %v4570_v28  ;;  %v8182_v23 = vpop.f32.mrb[66].mxu1 }
 0x635   : > { %4602 = vst.msk [vmem:[#allocation8 + $0x10] sm:$0xff] %vm738_vm0, %v4598_v22  ;;  %v4599_v48 = vadd.f32 %v8182_v23, %v7379_v8  ;;  %v4573_v63 = vpop.f32.mrb[67].mxu1 }
 0x636   : > { %4600 = vst.msk [vmem:[#allocation8] sm:$0xff] %vm738_vm0, %v4596_v4  ;;  %v4597_v32 = vadd.f32 %v7379_v8, %v4573_v63 }
 0x637   : > { %4603 = vst.msk [vmem:[#allocation8 + $0x18] sm:$0xff] %vm738_vm0, %v4599_v48 }
 0x638   : > { %4601 = vst.msk [vmem:[#allocation8 + $0x8] sm:$0xff] %vm738_vm0, %v4597_v32 }
 0x63f   : > { %v4604_v58 = vld [vmem:[#allocation8] ss:$4 sm:$0xff]  ;;  %v4606_v51 = vld [vmem:[#allocation8 + $0x1] ss:$4 sm:$0xff]  ;;  %v4609_v30 = vld [vmem:[#allocation8 + $0x2] ss:$4 sm:$0xff] }
 0x640   : > { %v4607_v15 = vmax.f32 %v4604_v58, %v4606_v51  ;;  %v4612_v5 = vld [vmem:[#allocation8 + $0x3] ss:$4 sm:$0xff] }
 0x641   : > { %v8914_v58 = vld [vmem:[#allocation22 + $0x90] sm:$0xff]  }
 0x642   : > { %v4610_v35 = vmax.f32 %v4607_v15, %v4609_v30  ;;  %v8915_v51 = vld [vmem:[#allocation22 + $0x6c] sm:$0xff]   ;;  %v8916_v15 = vld [vmem:[#allocation22 + $0x98] sm:$0xff]  }
 0x643   : > { %8248 = vmatpush3.bf16.msra.mxu0 %v8915_v51  ;;  %v8917_v30 = vld [vmem:[#allocation22 + $0x74] sm:$0xff]  }
 0x644   : > { %v4613_v44 = vmax.f32 %v4610_v35, %v4612_v5  ;;  %8249 = vmatprep.subr.bf16.mxu0 %v9610_v1  ;;  %v8918_v35 = vld [vmem:[#allocation22 + $0xa0] sm:$0xff]  }
 0x645   : > { %v8919_v5 = vld [vmem:[#allocation22 + $0x7c] sm:$0xff]  }
 0x646   : > { %4614 = vst.msk [vmem:[#allocation5] sm:$0xff] %vm738_vm0, %v4613_v44  ;;  %v8920_v44 = vld [vmem:[#allocation22 + $0xa8] sm:$0xff]  }
 0x647   : > { %8250 = vmatpush3.bf16.msra.mxu0 %v8917_v30 }
 0x648   : > { %8251 = vmatprep.subr.bf16.mxu0 %v9610_v1 }
 0x64b   : > { %8252 = vmatpush3.bf16.msra.mxu0 %v8919_v5 }
 0x64c   : > { %8253 = vmatprep.subr.bf16.mxu0 %v9610_v1 }
 0x64d   : > { %v11063_v50 = vld [vmem:[#allocation5] sm:$0xff] }
 0x64e   : > { %v4617_v6 = vmul.f32 0.044715, %v11063_v50  ;;  %v4616_v45 = vmul.f32 0.5, %v11063_v50 }
 0x650   : > { %v4618_v47 = vmul.f32 %v4617_v6, %v11063_v50  ;;  %v8921_v6 = vld [vmem:[#allocation22 + $0x84] sm:$0xff]  }
 0x651   : > { %8254 = vmatpush3.bf16.msra.mxu0 %v8921_v6  ;;  %v8932_v6 = vld [vmem:[#allocation22 + $0xd8] sm:$0xff]  }
 0x652   : > { %v4619_v19 = vmul.f32 %v4618_v47, %v11063_v50  ;;  %v8922_v47 = vld [vmem:[#allocation22 + $0xb0] ss:$0 sps:$4 sm:$0xff]   ;;  %8255 = vmatprep.subr.bf16.mxu0 %v9610_v1 }
 0x654   : > { %v4620_v2 = vadd.f32 %v4619_v19, %v11063_v50  ;;  %v8923_v19 = vld [vmem:[#allocation22 + $0x8c] ss:$0 sps:$4 sm:$0xff]  }
 0x656   : > { %v4621_v60 = vmul.f32 0.7978846, %v4620_v2  ;;  %v5036_v2 = vsel %vm4679_vm7, %v8922_v47, 0  ;;  %v8933_v47 = vld [vmem:[#allocation22 + $0x104] sm:$0xff]  }
 0x658   : > { %9044 = vtanh.f32 %v4621_v60  ;;  %v5109_v60 = vsel %vm4679_vm7, %v8923_v19, 0  ;;  %v8934_v19 = vld [vmem:[#allocation22 + $0xe0] sm:$0xff]  }
 0x659   : > { %8256 = vmatpush3.bf16.msra.mxu0 %v5109_v60  ;;  %v8936_v60 = vld [vmem:[#allocation22 + $0xe8] sm:$0xff]  }
 0x65a   : > { %8283 = vmatprep.subr.bf16.mxu0 %v9610_v1 }
 0x662   : > { %v9045_v29 = vpop.eup %9044 }
 0x663   : > { %v4623_v46 = vadd.f32 1.0, %v9045_v29  ;;  %v7399_v29 = vld [vmem:[#allocation27] ss:$0 sm:$0xff] }
 0x665   : > { %v4624_v3 = vmul.f32 %v4623_v46, %v4616_v45 }
 0x667   : > { %4625 = vst.msk [vmem:[#allocation4 + $0x20] sm:$0xff] %vm738_vm0, %v4624_v3 }
 0x66e   : > { %v4637_v37 = vld [vmem:[#allocation4 + $0x20] sm:$0xff] }
 0x66f   : > { %v4638_v31 = vpack.c.bf16 %v4637_v37, %v4637_v37  ;;  %v4626_v38 = vld [vmem:[#allocation4 + $0x1f] sm:$0xff] }
 0x670   : > { %v4627_v57 = vpack.c.bf16 %v4626_v38, %v4626_v38  ;;  %v4796_v7 = vld [vmem:[#allocation4 + $0x21] sm:$0xff] }
 0x671   : > { %8194 = vmatmul.mubr.msk.bf16.vlgmr.msra.gmra.mrb[68].mxu1 %vm738_vm0, %v4638_v31  ;;  %v4797_v13 = vpack.c.bf16 %v4796_v7, %v4796_v7 }
 0x672   : > { %8198 = vmatpush3.bf16.msra.mxu1 %v8902_v0  ;;  %8207 = vmatprep.mubr.msk.bf16.mxu1 %vm9612_vm6, %v9610_v1 }
 0x673   : > { %8199 = vmatprep.subr.bf16.mxu1 %v9610_v1 }
 0x676   : > { %8200 = vmatpush3.bf16.msra.mxu1 %v8903_v42 }
 0x677   : > { %8201 = vmatprep.subr.bf16.mxu1 %v9610_v1 }
 0x67a   : > { %8202 = vmatpush3.bf16.msra.mxu1 %v8904_v40 }
 0x67b   : > { %8203 = vmatprep.subr.bf16.mxu1 %v9610_v1 }
 0x67e   : > { %8204 = vmatpush3.bf16.msra.mxu1 %v8905_v43 }
 0x67f   : > { %8205 = vmatprep.subr.bf16.mxu1 %v9610_v1 }
 0x682   : > { %8206 = vmatpush3.bf16.msra.mxu1 %v4754_v25 }
 0x683   : > { %8211 = vmatprep.subr.bf16.mxu1 %v9610_v1 }
 0x685   : > { %8208 = vmatmul.mubr.msk.bf16.vlgmr.msra.gmra.mrb[72].mxu1 %vm738_vm0, %v4627_v57 }
 0x686   : > { %8212 = vmatpush3.bf16.msra.mxu1 %v8907_v24  ;;  %8221 = vmatprep.mubr.msk.bf16.mxu1 %vm9612_vm6, %v9610_v1 }
 0x687   : > { %8213 = vmatprep.subr.bf16.mxu1 %v9610_v1 }
 0x68a   : > { %8214 = vmatpush3.bf16.msra.mxu1 %v8908_v16 }
 0x68b   : > { %8215 = vmatprep.subr.bf16.mxu1 %v9610_v1 }
 0x68e   : > { %8216 = vmatpush3.bf16.msra.mxu1 %v8909_v39 }
 0x68f   : > { %8217 = vmatprep.subr.bf16.mxu1 %v9610_v1 }
 0x692   : > { %8218 = vmatpush3.bf16.msra.mxu1 %v8910_v55 }
 0x693   : > { %8219 = vmatprep.subr.bf16.mxu1 %v9610_v1 }
 0x696   : > { %8220 = vmatpush3.bf16.msra.mxu1 %v4839_v56 }
 0x697   : > { %8225 = vmatprep.subr.bf16.mxu1 %v9610_v1 }
 0x699   : > { %8222 = vmatmul.mubr.msk.bf16.vlgmr.msra.gmra.mrb[76].mxu1 %vm738_vm0, %v4797_v13  ;;  %v8925_v13 = vld [vmem:[#allocation22 + $0xbc] sm:$0xff]  }
 0x69a   : > { %8229 = vmatprep.mubr.msk.bf16.mxu1 %vm9612_vm6, %v9610_v1  ;;  %8226 = vmatpush3.bf16.msra.mxu1 %v8912_v61  ;;  %v8926_v61 = vld [vmem:[#allocation22 + $0xc4] sm:$0xff]  }
 0x69b   : > { %8227 = vmatprep.subr.bf16.mxu1 %v9610_v1 }
 0x69e   : > { %8228 = vmatpush3.bf16.msra.mxu1 %v8913_v17  ;;  %v8927_v17 = vld [vmem:[#allocation22 + $0xcc] sm:$0xff]  }
 0x69f   : > { %8233 = vmatprep.subr.bf16.mxu1 %v9610_v1 }
 0x744   : > { %v4717_v59 = vpop.f32.mrb[68].mxu1 }
 0x745   : > { %v8195_v54 = vpop.f32.mrb[69].mxu1 }
 0x746   : > { %v4720_v20 = vpop.f32.mrb[70].mxu1 }
 0x747   : > { %v8196_v41 = vpop.f32.mrb[71].mxu1 }
 0x758   : > { %v4790_v18 = vpop.f32.mrb[72].mxu1 }
 0x759   : > { %v4791_v62 = vadd.f32 %v4790_v18, %v4717_v59  ;;  %v8209_v52 = vpop.f32.mrb[73].mxu1  ;;  %v8928_v59 = vld [vmem:[#allocation22 + $0xd4] ss:$0 sps:$4 sm:$0xff]   ;;  %v8929_v18 = vld [vmem:[#allocation25 + $0x10] sm:$0xff]  }
 0x75a   : > { %v4793_v11 = vpop.f32.mrb[74].mxu1  ;;  %v5194_v54 = vsel %vm4679_vm7, %v8928_v59, 0  ;;  %v8941_v59 = vld [vmem:[#allocation22 + $0x120] sm:$0xff]  }
 0x75b   : > { %v8210_v53 = vpop.f32.mrb[75].mxu1 }
 0x76c   : > { %v4875_v21 = vpop.f32.mrb[76].mxu1 }
 0x76d   : > { %v4881_v49 = vadd.f32 %v4875_v21, %v4791_v62  ;;  %v8223_v26 = vpop.f32.mrb[77].mxu1  ;;  %v8930_v62 = vld [vmem:[#allocation25 + $0x18] sm:$0xff]  }
 0x76e   : > { %v4878_v36 = vpop.f32.mrb[78].mxu1 }
 0x76f   : > { %v4889_v14 = vadd.f32 %v7398_v12, %v4881_v49  ;;  %v8224_v27 = vpop.f32.mrb[79].mxu1 }
 0x771   : > { %v4891_v9 = vmul.f32 0.044715, %v4889_v14  ;;  %v4890_v23 = vmul.f32 0.5, %v4889_v14 }
 0x773   : > { %v4892_v8 = vmul.f32 %v4891_v9, %v4889_v14  ;;  %v7421_v9 = vld [vmem:[#allocation24 + $0x1] ss:$0 sm:$0xff] }
 0x775   : > { %v4893_v33 = vmul.f32 %v4892_v8, %v4889_v14 }
 0x777   : > { %v4894_v22 = vadd.f32 %v4893_v33, %v4889_v14 }
 0x779   : > { %v4895_v28 = vmul.f32 0.7978846, %v4894_v22 }
 0x77b   : > { %9046 = vtanh.f32 %v4895_v28 }
 0x785   : > { %v9047_v4 = vpop.eup %9046 }
 0x786   : > { %v4897_v48 = vadd.f32 1.0, %v9047_v4 }
 0x788   : > { %v4898_v63 = vmul.f32 %v4897_v48, %v4890_v23 }
 0x78a   : > { %v4899_v32 = vpack.c.bf16 %v4898_v63, %v4898_v63 }
 0x78c   : > { %8230 = vmatmul.mubr.msk.bf16.vlgmr.msra.gmra.mrb[80].mxu1 %vm4923_vm8, %v4899_v32 }
 0x78d   : > { %8243 = vmatprep.mubr.msk.bf16.mxu1 %vm9612_vm6, %v9610_v1  ;;  %8234 = vmatpush3.bf16.msra.mxu1 %v8914_v58 }
 0x78e   : > { %8235 = vmatprep.subr.bf16.mxu1 %v9610_v1 }
 0x791   : > { %8236 = vmatpush3.bf16.msra.mxu1 %v8916_v15 }
 0x792   : > { %8237 = vmatprep.subr.bf16.mxu1 %v9610_v1 }
 0x795   : > { %8238 = vmatpush3.bf16.msra.mxu1 %v8918_v35 }
 0x796   : > { %8239 = vmatprep.subr.bf16.mxu1 %v9610_v1 }
 0x799   : > { %8240 = vmatpush3.bf16.msra.mxu1 %v8920_v44  ;;  %v8931_v44 = vld [vmem:[#allocation22 + $0xfc] sm:$0xff]  }
 0x79a   : > { %8241 = vmatprep.subr.bf16.mxu1 %v9610_v1 }
 0x79d   : > { %8242 = vmatpush3.bf16.msra.mxu1 %v5036_v2  ;;  %v8935_v2 = vld [vmem:[#allocation22 + $0x10c] sm:$0xff]  }
 0x79e   : > { %8261 = vmatprep.subr.bf16.mxu1 %v9610_v1 }
 0x85f   : > { %v4961_v45 = vpop.f32.mrb[80].mxu1 }
 0x860   : > { %v4962_v46 = vadd.f32 %v7399_v29, %v4961_v45  ;;  %v8231_v3 = vpop.f32.mrb[81].mxu1  ;;  %v8937_v29 = vld [vmem:[#allocation22 + $0x114] sm:$0xff]  }
 0x861   : > { %v4964_v37 = vpop.f32.mrb[82].mxu1  ;;  %v8938_v45 = vld [vmem:[#allocation22 + $0xf0] sm:$0xff]   ;;  %v8940_v3 = vld [vmem:[#allocation22 + $0xf8] ss:$0 sps:$4 sm:$0xff]  }
 0x862   : > { %v4968_v0 = vadd.f32 %v4962_v46, %v11063_v50  ;;  %v8232_v31 = vpop.f32.mrb[83].mxu1  ;;  %v8939_v46 = vld [vmem:[#allocation22 + $0x11c] ss:$0 sps:$4 sm:$0xff]  }
 0x863   : > { %v5393_v37 = vsel %vm4679_vm7, %v8939_v46, 0  ;;  %v7422_v31 = vld [vmem:[#allocation27 + $0x1] ss:$0 sm:$0xff]  ;;  %v8950_v46 = vld [vmem:[#allocation22 + $0x170] sm:$0xff]  }
 0x864   : > { %4969 = vst.msk [vmem:[#allocation5] sm:$0xff] %vm738_vm0, %v4968_v0  ;;  %v5466_v0 = vsel %vm4679_vm7, %v8940_v3, 0  ;;  %v8951_v3 = vld [vmem:[#allocation22 + $0x14c] sm:$0xff]  }
 0x86b   : > { %v11111_v42 = vld [vmem:[#allocation5] sm:$0xff] }
 0x86c   : > { %v4972_v40 = vmul.f32 0.044715, %v11111_v42  ;;  %v4971_v57 = vmul.f32 0.5, %v11111_v42 }
 0x86e   : > { %v4973_v43 = vmul.f32 %v4972_v40, %v11111_v42 }
 0x870   : > { %v4974_v10 = vmul.f32 %v4973_v43, %v11111_v42 }
 0x872   : > { %v4975_v25 = vadd.f32 %v4974_v10, %v11111_v42 }
 0x874   : > { %v4976_v38 = vmul.f32 0.7978846, %v4975_v25 }
 0x876   : > { %9048 = vtanh.f32 %v4976_v38 }
 0x880   : > { %v9049_v24 = vpop.eup %9048 }
 0x881   : > { %v4978_v16 = vadd.f32 1.0, %v9049_v24 }
 0x883   : > { %v4979_v50 = vmul.f32 %v4978_v16, %v4971_v57 }
 0x885   : > { %4980 = vst.msk [vmem:[#allocation4 + $0x20] sm:$0xff] %vm738_vm0, %v4979_v50 }
 0x88c   : > { %v4993_v39 = vld [vmem:[#allocation4 + $0x20] sm:$0xff] }
 0x88d   : > { %v4981_v55 = vld [vmem:[#allocation4 + $0x1e] sm:$0xff]  ;;  %v4994_v56 = vpack.c.bf16 %v4993_v39, %v4993_v39 }
 0x88e   : > { %v4982_v7 = vpack.c.bf16 %v4981_v55, %v4981_v55  ;;  %v5151_v20 = vld [vmem:[#allocation4 + $0x22] sm:$0xff] }
 0x88f   : > { %8244 = vmatmul.mubr.msk.bf16.vlgmr.msra.gmra.mrb[84].mxu1 %vm738_vm0, %v4994_v56  ;;  %v5152_v41 = vpack.c.bf16 %v5151_v20, %v5151_v20 }
 0x890   : > { %8258 = vmatmul.mubr.msk.bf16.vlgmr.msra.gmra.mrb[80].mxu0 %vm738_vm0, %v4982_v7  ;;  %8262 = vmatpush3.bf16.msra.mxu1 %v8924_v34 }
 0x891   : > { %8271 = vmatprep.mubr.msk.bf16.mxu1 %vm9612_vm6, %v9610_v1  ;;  %8263 = vmatprep.subr.bf16.mxu1 %v9610_v1 }
 0x892   : > { %8293 = vmatprep.mubr.msk.bf16.mxu0 %vm9612_vm6, %v9610_v1  ;;  %8284 = vmatpush3.bf16.msra.mxu0 %v8931_v44 }
 0x893   : > { %8285 = vmatprep.subr.bf16.mxu0 %v9610_v1 }
 0x894   : > { %8264 = vmatpush3.bf16.msra.mxu1 %v8925_v13 }
 0x895   : > { %8265 = vmatprep.subr.bf16.mxu1 %v9610_v1 }
 0x896   : > { %8286 = vmatpush3.bf16.msra.mxu0 %v8933_v47 }
 0x897   : > { %8287 = vmatprep.subr.bf16.mxu0 %v9610_v1 }
 0x898   : > { %8266 = vmatpush3.bf16.msra.mxu1 %v8926_v61 }
 0x899   : > { %8267 = vmatprep.subr.bf16.mxu1 %v9610_v1 }
 0x89a   : > { %8288 = vmatpush3.bf16.msra.mxu0 %v8935_v2 }
 0x89b   : > { %8289 = vmatprep.subr.bf16.mxu0 %v9610_v1 }
 0x89c   : > { %8268 = vmatpush3.bf16.msra.mxu1 %v8927_v17 }
 0x89d   : > { %8269 = vmatprep.subr.bf16.mxu1 %v9610_v1 }
 0x89e   : > { %8290 = vmatpush3.bf16.msra.mxu0 %v8937_v29  ;;  %v8948_v29 = vld [vmem:[#allocation22 + $0x168] sm:$0xff]  }
 0x89f   : > { %8291 = vmatprep.subr.bf16.mxu0 %v9610_v1 }
 0x8a0   : > { %8270 = vmatpush3.bf16.msra.mxu1 %v5194_v54 }
 0x8a1   : > { %8275 = vmatprep.subr.bf16.mxu1 %v9610_v1 }
 0x8a2   : > { %8292 = vmatpush3.bf16.msra.mxu0 %v5393_v37  ;;  %v8952_v37 = vld [vmem:[#allocation22 + $0x178] sm:$0xff]  }
 0x8a3   : > { %8272 = vmatmul.mubr.msk.bf16.vlgmr.msra.gmra.mrb[88].mxu1 %vm738_vm0, %v5152_v41  ;;  %8311 = vmatprep.subr.bf16.mxu0 %v9610_v1  ;;  %v8942_v41 = vld [vmem:[#allocation22 + $0x128] sm:$0xff]  }
 0x8a4   : > { %8279 = vmatprep.mubr.msk.bf16.mxu1 %vm9612_vm6, %v9610_v1  ;;  %8276 = vmatpush3.bf16.msra.mxu1 %v8929_v18  ;;  %v8943_v18 = vld [vmem:[#allocation22 + $0x130] sm:$0xff]  }
 0x8a5   : > { %8277 = vmatprep.subr.bf16.mxu1 %v9610_v1 }
 0x8a8   : > { %8278 = vmatpush3.bf16.msra.mxu1 %v8930_v62  ;;  %v8944_v62 = vld [vmem:[#allocation22 + $0x138] sm:$0xff]  }
 0x8a9   : > { %8297 = vmatprep.subr.bf16.mxu1 %v9610_v1 }
 0x962   : > { %v5072_v52 = vpop.f32.mrb[84].mxu1 }
 0x963   : > { %v5145_v11 = vpop.f32.mrb[80].mxu0  ;;  %v8245_v21 = vpop.f32.mrb[85].mxu1 }
 0x964   : > { %v5146_v53 = vadd.f32 %v5145_v11, %v5072_v52  ;;  %v8259_v12 = vpop.f32.mrb[81].mxu0  ;;  %v5075_v49 = vpop.f32.mrb[86].mxu1  ;;  %v8945_v52 = vld [vmem:[#allocation22 + $0x140] ss:$0 sps:$4 sm:$0xff]  }
 0x965   : > { %v5148_v26 = vpop.f32.mrb[82].mxu0  ;;  %v8246_v36 = vpop.f32.mrb[87].mxu1  ;;  %v5551_v11 = vsel %vm4679_vm7, %v8945_v52, 0  ;;  %v8946_v12 = vld [vmem:[#allocation25 + $0x20] sm:$0xff]   ;;  %v8947_v49 = vld [vmem:[#allocation25 + $0x28] sm:$0xff]  }
 0x966   : > { %v8260_v14 = vpop.f32.mrb[83].mxu0 }
 0x976   : > { %v5230_v27 = vpop.f32.mrb[88].mxu1 }
 0x977   : > { %v5236_v8 = vadd.f32 %v5230_v27, %v5146_v53  ;;  %v8273_v33 = vpop.f32.mrb[89].mxu1 }
 0x978   : > { %v5233_v22 = vpop.f32.mrb[90].mxu1 }
 0x979   : > { %v5245_v28 = vadd.f32 %v7421_v9, %v5236_v8  ;;  %v8274_v4 = vpop.f32.mrb[91].mxu1 }
 0x97b   : > { %v5247_v23 = vmul.f32 0.044715, %v5245_v28  ;;  %v5246_v15 = vmul.f32 0.5, %v5245_v28 }
 0x97d   : > { %v5248_v48 = vmul.f32 %v5247_v23, %v5245_v28  ;;  %v7444_v23 = vld [vmem:[#allocation24 + $0x2] ss:$0 sm:$0xff] }
 0x97f   : > { %v5249_v63 = vmul.f32 %v5248_v48, %v5245_v28 }
 0x981   : > { %v5250_v32 = vadd.f32 %v5249_v63, %v5245_v28 }
 0x983   : > { %v5251_v58 = vmul.f32 0.7978846, %v5250_v32 }
 0x985   : > { %9050 = vtanh.f32 %v5251_v58 }
 0x98f   : > { %v9051_v51 = vpop.eup %9050 }
 0x990   : > { %v5253_v30 = vadd.f32 1.0, %v9051_v51 }
 0x992   : > { %v5254_v35 = vmul.f32 %v5253_v30, %v5246_v15 }
 0x994   : > { %v5255_v5 = vpack.c.bf16 %v5254_v35, %v5254_v35 }
 0x996   : > { %8280 = vmatmul.mubr.msk.bf16.vlgmr.msra.gmra.mrb[92].mxu1 %vm4923_vm8, %v5255_v5 }
 0x997   : > { %8307 = vmatprep.mubr.msk.bf16.mxu1 %vm9612_vm6, %v9610_v1  ;;  %8298 = vmatpush3.bf16.msra.mxu1 %v8932_v6 }
 0x998   : > { %8299 = vmatprep.subr.bf16.mxu1 %v9610_v1 }
 0x99b   : > { %8300 = vmatpush3.bf16.msra.mxu1 %v8934_v19 }
 0x99c   : > { %8301 = vmatprep.subr.bf16.mxu1 %v9610_v1 }
 0x99f   : > { %8302 = vmatpush3.bf16.msra.mxu1 %v8936_v60 }
 0x9a0   : > { %8303 = vmatprep.subr.bf16.mxu1 %v9610_v1 }
 0x9a3   : > { %8304 = vmatpush3.bf16.msra.mxu1 %v8938_v45  ;;  %v8949_v45 = vld [vmem:[#allocation22 + $0x144] sm:$0xff]  }
 0x9a4   : > { %8305 = vmatprep.subr.bf16.mxu1 %v9610_v1 }
 0x9a7   : > { %8306 = vmatpush3.bf16.msra.mxu1 %v5466_v0  ;;  %v8953_v0 = vld [vmem:[#allocation22 + $0x154] sm:$0xff]  }
 0x9a8   : > { %8325 = vmatprep.subr.bf16.mxu1 %v9610_v1 }
 0xa69   : > { %v5318_v40 = vpop.f32.mrb[92].mxu1 }
 0xa6a   : > { %v5319_v43 = vadd.f32 %v7422_v31, %v5318_v40  ;;  %v8281_v10 = vpop.f32.mrb[93].mxu1  ;;  %v8954_v31 = vld [vmem:[#allocation22 + $0x180] sm:$0xff]  }
 0xa6b   : > { %v5321_v25 = vpop.f32.mrb[94].mxu1  ;;  %v8955_v40 = vld [vmem:[#allocation22 + $0x15c] sm:$0xff]   ;;  %v8957_v10 = vld [vmem:[#allocation22 + $0x164] ss:$0 sps:$4 sm:$0xff]  }
 0xa6c   : > { %v5325_v38 = vadd.f32 %v5319_v43, %v11111_v42  ;;  %v8282_v24 = vpop.f32.mrb[95].mxu1  ;;  %v8956_v43 = vld [vmem:[#allocation22 + $0x188] ss:$0 sps:$4 sm:$0xff]   ;;  %v5695_v25 = vld [vmem:[#allocation4 + $0x18] sm:$0xff] }
 0xa6d   : > { %v5823_v24 = vsel %vm4679_vm7, %v8957_v10, 0  ;;  %v8968_v10 = vld [vmem:[#allocation22 + $0x1b8] sm:$0xff]  }
 0xa6e   : > { %5326 = vst.msk [vmem:[#allocation5] sm:$0xff] %vm738_vm0, %v5325_v38  ;;  %v5750_v38 = vsel %vm4679_vm7, %v8956_v43, 0  ;;  %v8967_v43 = vld [vmem:[#allocation22 + $0x1dc] sm:$0xff]  }
 0xa75   : > { %v11153_v57 = vld [vmem:[#allocation5] sm:$0xff] }
 0xa76   : > { %v5329_v16 = vmul.f32 0.044715, %v11153_v57  ;;  %v5328_v7 = vmul.f32 0.5, %v11153_v57 }
 0xa78   : > { %v5330_v50 = vmul.f32 %v5329_v16, %v11153_v57  ;;  %v5696_v16 = vpack.c.bf16 %v5695_v25, %v5695_v25  ;;  %v8969_v25 = vld [vmem:[#allocation22 + $0x1e4] sm:$0xff]  }
 0xa7a   : > { %v5331_v39 = vmul.f32 %v5330_v50, %v11153_v57  ;;  %v7445_v50 = vld [vmem:[#allocation27 + $0x2] ss:$0 sm:$0xff] }
 0xa7c   : > { %v5332_v55 = vadd.f32 %v5331_v39, %v11153_v57 }
 0xa7e   : > { %v5333_v34 = vmul.f32 0.7978846, %v5332_v55 }
 0xa80   : > { %9052 = vtanh.f32 %v5333_v34 }
 0xa8a   : > { %v9053_v56 = vpop.eup %9052 }
 0xa8b   : > { %v5335_v13 = vadd.f32 1.0, %v9053_v56 }
 0xa8d   : > { %v5336_v42 = vmul.f32 %v5335_v13, %v5328_v7 }
 0xa8f   : > { %5337 = vst.msk [vmem:[#allocation4 + $0x20] sm:$0xff] %vm738_vm0, %v5336_v42 }
 0xa96   : > { %v5350_v61 = vld [vmem:[#allocation4 + $0x20] sm:$0xff] }
 0xa97   : > { %v5338_v17 = vld [vmem:[#allocation4 + $0x1c] sm:$0xff]  ;;  %v5351_v54 = vpack.c.bf16 %v5350_v61, %v5350_v61  ;;  %v5508_v53 = vld [vmem:[#allocation4 + $0x24] sm:$0xff] }
 0xa98   : > { %v5339_v20 = vpack.c.bf16 %v5338_v17, %v5338_v17  ;;  %v5509_v21 = vpack.c.bf16 %v5508_v53, %v5508_v53 }
 0xa99   : > { %8294 = vmatmul.mubr.msk.bf16.vlgmr.msra.gmra.mrb[84].mxu0 %vm738_vm0, %v5351_v54 }
 0xa9a   : > { %8308 = vmatmul.mubr.msk.bf16.vlgmr.msra.gmra.mrb[96].mxu1 %vm738_vm0, %v5339_v20  ;;  %8312 = vmatpush3.bf16.msra.mxu0 %v8941_v59 }
 0xa9b   : > { %8321 = vmatprep.mubr.msk.bf16.mxu0 %vm9612_vm6, %v9610_v1  ;;  %8313 = vmatprep.subr.bf16.mxu0 %v9610_v1 }
 0xa9c   : > { %8329 = vmatprep.mubr.msk.bf16.mxu1 %vm9612_vm6, %v9610_v1  ;;  %8326 = vmatpush3.bf16.msra.mxu1 %v8946_v12  ;;  %v8960_v12 = vld [vmem:[#allocation22 + $0x19c] sm:$0xff]  }
 0xa9d   : > { %8327 = vmatprep.subr.bf16.mxu1 %v9610_v1 }
 0xa9e   : > { %8314 = vmatpush3.bf16.msra.mxu0 %v8942_v41 }
 0xa9f   : > { %8315 = vmatprep.subr.bf16.mxu0 %v9610_v1 }
 0xaa0   : > { %8328 = vmatpush3.bf16.msra.mxu1 %v8947_v49  ;;  %v8961_v49 = vld [vmem:[#allocation22 + $0x1a4] sm:$0xff]  }
 0xaa1   : > { %8333 = vmatprep.subr.bf16.mxu1 %v9610_v1 }
 0xaa2   : > { %8316 = vmatpush3.bf16.msra.mxu0 %v8943_v18 }
 0xaa3   : > { %8317 = vmatprep.subr.bf16.mxu0 %v9610_v1 }
 0xaa6   : > { %8318 = vmatpush3.bf16.msra.mxu0 %v8944_v62 }
 0xaa7   : > { %8319 = vmatprep.subr.bf16.mxu0 %v9610_v1 }
 0xaaa   : > { %8320 = vmatpush3.bf16.msra.mxu0 %v5551_v11  ;;  %v8958_v11 = vld [vmem:[#allocation22 + $0x18c] sm:$0xff]  }
 0xaab   : > { %8347 = vmatprep.subr.bf16.mxu0 %v9610_v1 }
 0xaad   : > { %8322 = vmatmul.mubr.msk.bf16.vlgmr.msra.gmra.mrb[88].mxu0 %vm738_vm0, %v5509_v21  ;;  %v8959_v21 = vld [vmem:[#allocation22 + $0x194] sm:$0xff]  }
 0xaae   : > { %8357 = vmatprep.mubr.msk.bf16.mxu0 %vm9612_vm6, %v9610_v1  ;;  %8348 = vmatpush3.bf16.msra.mxu0 %v8949_v45 }
 0xaaf   : > { %8349 = vmatprep.subr.bf16.mxu0 %v9610_v1 }
 0xab2   : > { %8350 = vmatpush3.bf16.msra.mxu0 %v8951_v3 }
 0xab3   : > { %8351 = vmatprep.subr.bf16.mxu0 %v9610_v1 }
 0xab6   : > { %8352 = vmatpush3.bf16.msra.mxu0 %v8953_v0 }
 0xab7   : > { %8353 = vmatprep.subr.bf16.mxu0 %v9610_v1 }
 0xaba   : > { %8354 = vmatpush3.bf16.msra.mxu0 %v8955_v40  ;;  %v8966_v40 = vld [vmem:[#allocation22 + $0x1b0] sm:$0xff]  }
 0xabb   : > { %8355 = vmatprep.subr.bf16.mxu0 %v9610_v1 }
 0xabe   : > { %8356 = vmatpush3.bf16.msra.mxu0 %v5823_v24  ;;  %v8971_v24 = vld [vmem:[#allocation22 + $0x1ec] sm:$0xff]  }
 0xabf   : > { %8375 = vmatprep.subr.bf16.mxu0 %v9610_v1 }
 0xac1   : > { %8358 = vmatmul.mubr.msk.bf16.vlgmr.msra.gmra.mrb[92].mxu0 %vm738_vm0, %v5696_v16  ;;  %v8972_v16 = vld [vmem:[#allocation22 + $0x1c8] sm:$0xff]  }
 0xac2   : > { %8379 = vmatprep.mubr.msk.bf16.mxu0 %vm9612_vm6, %v9610_v1 }
 0xb6c   : > { %v5429_v26 = vpop.f32.mrb[84].mxu0 }
 0xb6d   : > { %v5502_v36 = vpop.f32.mrb[96].mxu1  ;;  %v8295_v27 = vpop.f32.mrb[85].mxu0 }
 0xb6e   : > { %v5503_v14 = vadd.f32 %v5502_v36, %v5429_v26  ;;  %v8309_v9 = vpop.f32.mrb[97].mxu1  ;;  %v5432_v8 = vpop.f32.mrb[86].mxu0  ;;  %v8962_v26 = vld [vmem:[#allocation22 + $0x1ac] ss:$0 sps:$4 sm:$0xff]  }
 0xb6f   : > { %v5505_v33 = vpop.f32.mrb[98].mxu1  ;;  %v8296_v22 = vpop.f32.mrb[87].mxu0  ;;  %v5865_v36 = vld [vmem:[#allocation4 + $0x28] sm:$0xff] }
 0xb70   : > { %v8310_v28 = vpop.f32.mrb[99].mxu1  ;;  %v5866_v27 = vpack.c.bf16 %v5865_v36, %v5865_v36  ;;  %v8975_v36 = vld [vmem:[#allocation22 + $0x1f8] sm:$0xff]  }
 0xb71   : > { %v8963_v28 = vld [vmem:[#allocation25 + $0x30] sm:$0xff]  }
 0xb72   : > { %8376 = vmatpush3.bf16.msra.mxu0 %v8963_v28 }
 0xb73   : > { %8377 = vmatprep.subr.bf16.mxu0 %v9610_v1 }
 0xb80   : > { %v5587_v4 = vpop.f32.mrb[88].mxu0 }
 0xb81   : > { %v5593_v48 = vadd.f32 %v5587_v4, %v5503_v14  ;;  %v8323_v63 = vpop.f32.mrb[89].mxu0  ;;  %v5908_v14 = vsel %vm4679_vm7, %v8962_v26, 0  ;;  %v8964_v4 = vld [vmem:[#allocation25 + $0x38] sm:$0xff]  }
 0xb82   : > { %v5590_v32 = vpop.f32.mrb[90].mxu0  ;;  %8378 = vmatpush3.bf16.msra.mxu0 %v8964_v4 }
 0xb83   : > { %v5602_v58 = vadd.f32 %v7444_v23, %v5593_v48  ;;  %v8324_v51 = vpop.f32.mrb[91].mxu0  ;;  %8383 = vmatprep.subr.bf16.mxu0 %v9610_v1 }
 0xb85   : > { %v5604_v15 = vmul.f32 0.044715, %v5602_v58  ;;  %v5603_v47 = vmul.f32 0.5, %v5602_v58 }
 0xb87   : > { %v5605_v30 = vmul.f32 %v5604_v15, %v5602_v58  ;;  %v7467_v15 = vld [vmem:[#allocation24 + $0x3] ss:$0 sm:$0xff] }
 0xb89   : > { %v5606_v35 = vmul.f32 %v5605_v30, %v5602_v58 }
 0xb8b   : > { %v5607_v5 = vadd.f32 %v5606_v35, %v5602_v58 }
 0xb8d   : > { %v5608_v44 = vmul.f32 0.7978846, %v5607_v5 }
 0xb8f   : > { %9054 = vtanh.f32 %v5608_v44 }
 0xb94   : > { %v5859_v9 = vpop.f32.mrb[92].mxu0 }
 0xb95   : > { %v8359_v8 = vpop.f32.mrb[93].mxu0 }
 0xb96   : > { %v5862_v33 = vpop.f32.mrb[94].mxu0  ;;  %v8978_v8 = vld [vmem:[#allocation22 + $0x210] sm:$0xff]  }
 0xb97   : > { %v8360_v22 = vpop.f32.mrb[95].mxu0  ;;  %v8979_v33 = vld [vmem:[#allocation22 + $0x218] ss:$0 sps:$4 sm:$0xff]  }
 0xb98   : > { %v6222_v22 = vld [vmem:[#allocation4 + $0x30] sm:$0xff]  ;;  %v6265_v28 = vsel %vm4679_vm7, %v8979_v33, 0 }
 0xb99   : > { %v9055_v6 = vpop.eup %9054  ;;  %v6223_v4 = vpack.c.bf16 %v6222_v22, %v6222_v22  ;;  %v8992_v22 = vld [vmem:[#allocation22 + $0x264] sm:$0xff]  }
 0xb9a   : > { %v5610_v19 = vadd.f32 1.0, %v9055_v6 }
 0xb9c   : > { %v5611_v2 = vmul.f32 %v5610_v19, %v5603_v47 }
 0xb9e   : > { %v5612_v60 = vpack.c.bf16 %v5611_v2, %v5611_v2 }
 0xba0   : > { %8330 = vmatmul.mubr.msk.bf16.vlgmr.msra.gmra.mrb[100].mxu1 %vm4923_vm8, %v5612_v60 }
 0xba1   : > { %8343 = vmatprep.mubr.msk.bf16.mxu1 %vm9612_vm6, %v9610_v1  ;;  %8334 = vmatpush3.bf16.msra.mxu1 %v8948_v29 }
 0xba2   : > { %8335 = vmatprep.subr.bf16.mxu1 %v9610_v1 }
 0xba5   : > { %8336 = vmatpush3.bf16.msra.mxu1 %v8950_v46 }
 0xba6   : > { %8337 = vmatprep.subr.bf16.mxu1 %v9610_v1 }
 0xba9   : > { %8338 = vmatpush3.bf16.msra.mxu1 %v8952_v37 }
 0xbaa   : > { %8339 = vmatprep.subr.bf16.mxu1 %v9610_v1 }
 0xbad   : > { %8340 = vmatpush3.bf16.msra.mxu1 %v8954_v31  ;;  %v8965_v31 = vld [vmem:[#allocation22 + $0x1d4] sm:$0xff]  }
 0xbae   : > { %8341 = vmatprep.subr.bf16.mxu1 %v9610_v1 }
 0xbb1   : > { %8342 = vmatpush3.bf16.msra.mxu1 %v5750_v38  ;;  %v8970_v38 = vld [vmem:[#allocation22 + $0x1c0] sm:$0xff]  }
 0xbb2   : > { %8361 = vmatprep.subr.bf16.mxu1 %v9610_v1 }
 0xc73   : > { %v5675_v39 = vpop.f32.mrb[100].mxu1 }
 0xc74   : > { %v5676_v55 = vadd.f32 %v7445_v50, %v5675_v39  ;;  %v8331_v34 = vpop.f32.mrb[101].mxu1  ;;  %v8973_v50 = vld [vmem:[#allocation22 + $0x1f4] ss:$0 sps:$4 sm:$0xff]   ;;  %v8974_v39 = vld [vmem:[#allocation22 + $0x1d0] ss:$0 sps:$4 sm:$0xff]  }
 0xc75   : > { %v5678_v56 = vpop.f32.mrb[102].mxu1  ;;  %v6107_v34 = vsel %vm4679_vm7, %v8973_v50, 0  ;;  %v8984_v50 = vld [vmem:[#allocation22 + $0x248] sm:$0xff]  }
 0xc76   : > { %v5682_v7 = vadd.f32 %v5676_v55, %v11153_v57  ;;  %v8332_v13 = vpop.f32.mrb[103].mxu1  ;;  %v6052_v55 = vld [vmem:[#allocation4 + $0x10] sm:$0xff]  ;;  %v6180_v56 = vsel %vm4679_vm7, %v8974_v39, 0  ;;  %v8985_v39 = vld [vmem:[#allocation22 + $0x224] sm:$0xff]  }
 0xc77   : > { %v7468_v13 = vld [vmem:[#allocation27 + $0x3] ss:$0 sm:$0xff] }
 0xc78   : > { %5683 = vst.msk [vmem:[#allocation5] sm:$0xff] %vm738_vm0, %v5682_v7  ;;  %v6053_v7 = vpack.c.bf16 %v6052_v55, %v6052_v55  ;;  %v8986_v55 = vld [vmem:[#allocation22 + $0x250] sm:$0xff]  }
 0xc7f   : > { %v11198_v42 = vld [vmem:[#allocation5] sm:$0xff] }
 0xc80   : > { %v5686_v61 = vmul.f32 0.044715, %v11198_v42  ;;  %v5685_v18 = vmul.f32 0.5, %v11198_v42 }
 0xc82   : > { %v5687_v17 = vmul.f32 %v5686_v61, %v11198_v42 }
 0xc84   : > { %v5688_v59 = vmul.f32 %v5687_v17, %v11198_v42 }
 0xc86   : > { %v5689_v54 = vadd.f32 %v5688_v59, %v11198_v42 }
 0xc88   : > { %v5690_v20 = vmul.f32 0.7978846, %v5689_v54 }
 0xc8a   : > { %9056 = vtanh.f32 %v5690_v20 }
 0xc94   : > { %v9057_v41 = vpop.eup %9056 }
 0xc95   : > { %v5692_v62 = vadd.f32 1.0, %v9057_v41 }
 0xc97   : > { %v5693_v57 = vmul.f32 %v5692_v62, %v5685_v18 }
 0xc99   : > { %5694 = vst.msk [vmem:[#allocation4 + $0x20] sm:$0xff] %vm738_vm0, %v5693_v57 }
 0xca0   : > { %v5707_v52 = vld [vmem:[#allocation4 + $0x20] sm:$0xff] }
 0xca1   : > { %v5708_v53 = vpack.c.bf16 %v5707_v52, %v5707_v52 }
 0xca3   : > { %8344 = vmatmul.mubr.msk.bf16.vlgmr.msra.gmra.mrb[104].mxu1 %vm738_vm0, %v5708_v53 }
 0xca4   : > { %8362 = vmatpush3.bf16.msra.mxu1 %v8958_v11  ;;  %8371 = vmatprep.mubr.msk.bf16.mxu1 %vm9612_vm6, %v9610_v1 }
 0xca5   : > { %8363 = vmatprep.subr.bf16.mxu1 %v9610_v1 }
 0xca8   : > { %8364 = vmatpush3.bf16.msra.mxu1 %v8959_v21 }
 0xca9   : > { %8365 = vmatprep.subr.bf16.mxu1 %v9610_v1 }
 0xcac   : > { %8366 = vmatpush3.bf16.msra.mxu1 %v8960_v12 }
 0xcad   : > { %8367 = vmatprep.subr.bf16.mxu1 %v9610_v1 }
 0xcb0   : > { %8368 = vmatpush3.bf16.msra.mxu1 %v8961_v49 }
 0xcb1   : > { %8369 = vmatprep.subr.bf16.mxu1 %v9610_v1 }
 0xcb4   : > { %8370 = vmatpush3.bf16.msra.mxu1 %v5908_v14 }
 0xcb5   : > { %8397 = vmatprep.subr.bf16.mxu1 %v9610_v1 }
 0xcb7   : > { %8372 = vmatmul.mubr.msk.bf16.vlgmr.msra.gmra.mrb[108].mxu1 %vm738_vm0, %v5866_v27  ;;  %v8976_v27 = vld [vmem:[#allocation22 + $0x200] sm:$0xff]  }
 0xcb8   : > { %8407 = vmatprep.mubr.msk.bf16.mxu1 %vm9612_vm6, %v9610_v1  ;;  %8398 = vmatpush3.bf16.msra.mxu1 %v8966_v40 }
 0xcb9   : > { %8399 = vmatprep.subr.bf16.mxu1 %v9610_v1 }
 0xcbc   : > { %8400 = vmatpush3.bf16.msra.mxu1 %v8968_v10 }
 0xcbd   : > { %8401 = vmatprep.subr.bf16.mxu1 %v9610_v1 }
 0xcc0   : > { %8402 = vmatpush3.bf16.msra.mxu1 %v8970_v38 }
 0xcc1   : > { %8403 = vmatprep.subr.bf16.mxu1 %v9610_v1 }
 0xcc4   : > { %8404 = vmatpush3.bf16.msra.mxu1 %v8972_v16  ;;  %v8983_v16 = vld [vmem:[#allocation22 + $0x21c] sm:$0xff]  }
 0xcc5   : > { %8405 = vmatprep.subr.bf16.mxu1 %v9610_v1 }
 0xcc8   : > { %8406 = vmatpush3.bf16.msra.mxu1 %v6180_v56  ;;  %v8988_v56 = vld [vmem:[#allocation22 + $0x258] sm:$0xff]  }
 0xcc9   : > { %8425 = vmatprep.subr.bf16.mxu1 %v9610_v1 }
 0xccb   : > { %8408 = vmatmul.mubr.msk.bf16.vlgmr.msra.gmra.mrb[112].mxu1 %vm738_vm0, %v6053_v7  ;;  %v8989_v7 = vld [vmem:[#allocation22 + $0x234] sm:$0xff]  }
 0xccc   : > { %8429 = vmatprep.mubr.msk.bf16.mxu1 %vm9612_vm6, %v9610_v1 }
 0xd76   : > { %v5786_v23 = vpop.f32.mrb[104].mxu1 }
 0xd77   : > { %v5860_v48 = vadd.f32 %v5859_v9, %v5786_v23  ;;  %v8345_v63 = vpop.f32.mrb[105].mxu1  ;;  %v8977_v9 = vld [vmem:[#allocation22 + $0x208] sm:$0xff]  }
 0xd78   : > { %v5789_v32 = vpop.f32.mrb[106].mxu1 }
 0xd79   : > { %v8346_v58 = vpop.f32.mrb[107].mxu1 }
 0xd7a   : > { %v8980_v58 = vld [vmem:[#allocation25 + $0x40] sm:$0xff]  }
 0xd7b   : > { %8426 = vmatpush3.bf16.msra.mxu1 %v8980_v58 }
 0xd7c   : > { %8427 = vmatprep.subr.bf16.mxu1 %v9610_v1 }
 0xd8a   : > { %v5944_v51 = vpop.f32.mrb[108].mxu1 }
 0xd8b   : > { %v5950_v30 = vadd.f32 %v5944_v51, %v5860_v48  ;;  %v8373_v35 = vpop.f32.mrb[109].mxu1  ;;  %v8981_v51 = vld [vmem:[#allocation25 + $0x48] sm:$0xff]  }
 0xd8c   : > { %v5947_v5 = vpop.f32.mrb[110].mxu1  ;;  %8428 = vmatpush3.bf16.msra.mxu1 %v8981_v51 }
 0xd8d   : > { %v5959_v44 = vadd.f32 %v7467_v15, %v5950_v30  ;;  %v8374_v6 = vpop.f32.mrb[111].mxu1  ;;  %8433 = vmatprep.subr.bf16.mxu1 %v9610_v1 }
 0xd8f   : > { %v5961_v47 = vmul.f32 0.044715, %v5959_v44  ;;  %v5960_v46 = vmul.f32 0.5, %v5959_v44 }
 0xd91   : > { %v5962_v19 = vmul.f32 %v5961_v47, %v5959_v44  ;;  %v7490_v47 = vld [vmem:[#allocation24 + $0x4] ss:$0 sm:$0xff] }
 0xd93   : > { %v5963_v2 = vmul.f32 %v5962_v19, %v5959_v44 }
 0xd95   : > { %v5964_v60 = vadd.f32 %v5963_v2, %v5959_v44 }
 0xd97   : > { %v5965_v29 = vmul.f32 0.7978846, %v5964_v60 }
 0xd99   : > { %9058 = vtanh.f32 %v5965_v29 }
 0xd9e   : > { %v6216_v23 = vpop.f32.mrb[112].mxu1 }
 0xd9f   : > { %v8409_v48 = vpop.f32.mrb[113].mxu1 }
 0xda0   : > { %v6219_v63 = vpop.f32.mrb[114].mxu1  ;;  %v8995_v48 = vld [vmem:[#allocation22 + $0x27c] sm:$0xff]  }
 0xda1   : > { %v8410_v32 = vpop.f32.mrb[115].mxu1  ;;  %v8996_v63 = vld [vmem:[#allocation22 + $0x284] ss:$0 sps:$4 sm:$0xff]  }
 0xda2   : > { %v6579_v32 = vld [vmem:[#allocation4 + $0x40] sm:$0xff]  ;;  %v6622_v58 = vsel %vm4679_vm7, %v8996_v63, 0 }
 0xda3   : > { %v9059_v45 = vpop.eup %9058  ;;  %v6580_v51 = vpack.c.bf16 %v6579_v32, %v6579_v32 }
 0xda4   : > { %v5967_v3 = vadd.f32 1.0, %v9059_v45 }
 0xda6   : > { %v5968_v37 = vmul.f32 %v5967_v3, %v5960_v46 }
 0xda8   : > { %v5969_v0 = vpack.c.bf16 %v5968_v37, %v5968_v37 }
 0xdaa   : > { %8380 = vmatmul.mubr.msk.bf16.vlgmr.msra.gmra.mrb[96].mxu0 %vm4923_vm8, %v5969_v0 }
 0xdab   : > { %8393 = vmatprep.mubr.msk.bf16.mxu0 %vm9612_vm6, %v9610_v1  ;;  %8384 = vmatpush3.bf16.msra.mxu0 %v8965_v31 }
 0xdac   : > { %8385 = vmatprep.subr.bf16.mxu0 %v9610_v1 }
 0xdaf   : > { %8386 = vmatpush3.bf16.msra.mxu0 %v8967_v43 }
 0xdb0   : > { %8387 = vmatprep.subr.bf16.mxu0 %v9610_v1 }
 0xdb3   : > { %8388 = vmatpush3.bf16.msra.mxu0 %v8969_v25 }
 0xdb4   : > { %8389 = vmatprep.subr.bf16.mxu0 %v9610_v1 }
 0xdb7   : > { %8390 = vmatpush3.bf16.msra.mxu0 %v8971_v24  ;;  %v8982_v24 = vld [vmem:[#allocation22 + $0x240] sm:$0xff]  }
 0xdb8   : > { %8391 = vmatprep.subr.bf16.mxu0 %v9610_v1 }
 0xdbb   : > { %8392 = vmatpush3.bf16.msra.mxu0 %v6107_v34  ;;  %v8987_v34 = vld [vmem:[#allocation22 + $0x22c] sm:$0xff]  }
 0xdbc   : > { %8411 = vmatprep.subr.bf16.mxu0 %v9610_v1 }
 0xe7d   : > { %v6032_v61 = vpop.f32.mrb[96].mxu0 }
 0xe7e   : > { %v6033_v17 = vadd.f32 %v7468_v13, %v6032_v61  ;;  %v8381_v59 = vpop.f32.mrb[97].mxu0  ;;  %v8990_v13 = vld [vmem:[#allocation22 + $0x260] ss:$0 sps:$4 sm:$0xff]   ;;  %v8991_v61 = vld [vmem:[#allocation22 + $0x23c] ss:$0 sps:$4 sm:$0xff]  }
 0xe7f   : > { %v6035_v54 = vpop.f32.mrb[98].mxu0  ;;  %v6464_v59 = vsel %vm4679_vm7, %v8990_v13, 0  ;;  %v9001_v13 = vld [vmem:[#allocation28 + $0x10] sm:$0xff]  }
 0xe80   : > { %v6039_v20 = vadd.f32 %v6033_v17, %v11198_v42  ;;  %v8382_v41 = vpop.f32.mrb[99].mxu0  ;;  %v6409_v17 = vld [vmem:[#allocation4] sm:$0xff]  ;;  %v6537_v54 = vsel %vm4679_vm7, %v8991_v61, 0  ;;  %v9002_v61 = vld [vmem:[#allocation28 + $0x18] sm:$0xff]  }
 0xe81   : > { %v7491_v41 = vld [vmem:[#allocation27 + $0x4] ss:$0 sm:$0xff] }
 0xe82   : > { %6040 = vst.msk [vmem:[#allocation5] sm:$0xff] %vm738_vm0, %v6039_v20  ;;  %v6410_v20 = vpack.c.bf16 %v6409_v17, %v6409_v17  ;;  %v9003_v17 = vld [vmem:[#allocation28 + $0x20] ss:$0 sps:$4 sm:$0xff]  }
 0xe89   : > { %v11240_v18 = vld [vmem:[#allocation5] sm:$0xff] }
 0xe8a   : > { %v6043_v62 = vmul.f32 0.044715, %v11240_v18  ;;  %v6042_v12 = vmul.f32 0.5, %v11240_v18 }
 0xe8c   : > { %v6044_v57 = vmul.f32 %v6043_v62, %v11240_v18 }
 0xe8e   : > { %v6045_v52 = vmul.f32 %v6044_v57, %v11240_v18 }
 0xe90   : > { %v6046_v11 = vadd.f32 %v6045_v52, %v11240_v18 }
 0xe92   : > { %v6047_v53 = vmul.f32 0.7978846, %v6046_v11 }
 0xe94   : > { %9060 = vtanh.f32 %v6047_v53 }
 0xe9e   : > { %v9061_v21 = vpop.eup %9060 }
 0xe9f   : > { %v6049_v49 = vadd.f32 1.0, %v9061_v21 }
 0xea1   : > { %v6050_v42 = vmul.f32 %v6049_v49, %v6042_v12 }
 0xea3   : > { %6051 = vst.msk [vmem:[#allocation4 + $0x20] sm:$0xff] %vm738_vm0, %v6050_v42 }
 0xeaa   : > { %v6064_v26 = vld [vmem:[#allocation4 + $0x20] sm:$0xff] }
 0xeab   : > { %v6065_v14 = vpack.c.bf16 %v6064_v26, %v6064_v26 }
 0xead   : > { %8394 = vmatmul.mubr.msk.bf16.vlgmr.msra.gmra.mrb[100].mxu0 %vm738_vm0, %v6065_v14 }
 0xeae   : > { %8412 = vmatpush3.bf16.msra.mxu0 %v8975_v36  ;;  %8421 = vmatprep.mubr.msk.bf16.mxu0 %vm9612_vm6, %v9610_v1 }
 0xeaf   : > { %8413 = vmatprep.subr.bf16.mxu0 %v9610_v1 }
 0xeb2   : > { %8414 = vmatpush3.bf16.msra.mxu0 %v8976_v27 }
 0xeb3   : > { %8415 = vmatprep.subr.bf16.mxu0 %v9610_v1 }
 0xeb6   : > { %8416 = vmatpush3.bf16.msra.mxu0 %v8977_v9 }
 0xeb7   : > { %8417 = vmatprep.subr.bf16.mxu0 %v9610_v1 }
 0xeba   : > { %8418 = vmatpush3.bf16.msra.mxu0 %v8978_v8 }
 0xebb   : > { %8419 = vmatprep.subr.bf16.mxu0 %v9610_v1 }
 0xebe   : > { %8420 = vmatpush3.bf16.msra.mxu0 %v6265_v28 }
 0xebf   : > { %8447 = vmatprep.subr.bf16.mxu0 %v9610_v1 }
 0xec1   : > { %8422 = vmatmul.mubr.msk.bf16.vlgmr.msra.gmra.mrb[104].mxu0 %vm738_vm0, %v6223_v4  ;;  %v8993_v4 = vld [vmem:[#allocation22 + $0x26c] sm:$0xff]  }
 0xec2   : > { %8457 = vmatprep.mubr.msk.bf16.mxu0 %vm9612_vm6, %v9610_v1  ;;  %8448 = vmatpush3.bf16.msra.mxu0 %v8983_v16 }
 0xec3   : > { %8449 = vmatprep.subr.bf16.mxu0 %v9610_v1 }
 0xec6   : > { %8450 = vmatpush3.bf16.msra.mxu0 %v8985_v39 }
 0xec7   : > { %8451 = vmatprep.subr.bf16.mxu0 %v9610_v1 }
 0xeca   : > { %8452 = vmatpush3.bf16.msra.mxu0 %v8987_v34 }
 0xecb   : > { %8453 = vmatprep.subr.bf16.mxu0 %v9610_v1 }
 0xece   : > { %8454 = vmatpush3.bf16.msra.mxu0 %v8989_v7  ;;  %v9000_v7 = vld [vmem:[#allocation28 + $0x8] sm:$0xff]  }
 0xecf   : > { %8455 = vmatprep.subr.bf16.mxu0 %v9610_v1 }
 0xed2   : > { %8456 = vmatpush3.bf16.msra.mxu0 %v6537_v54  ;;  %v6864_v54 = vld [vmem:[#allocation33] sm:$0xff] }
 0xed3   : > { %8475 = vmatprep.subr.bf16.mxu0 %v9610_v1 }
 0xed5   : > { %8458 = vmatmul.mubr.msk.bf16.vlgmr.msra.gmra.mrb[108].mxu0 %vm738_vm0, %v6410_v20  ;;  %v9613_v20 = vmov 0  }
 0xed6   : > { %8479 = vmatprep.mubr.msk.bf16.mxu0 %vm9612_vm6, %v9610_v1  ;;  %8772 = vset.pattern.permute.xlu0 %v9613_v20 }
 0xed7   : > { %6867 = vperm.xlu0 %8772, %v6864_v54  }
 0xf80   : > { %v6143_v15 = vpop.f32.mrb[100].mxu0 }
 0xf81   : > { %v6217_v30 = vadd.f32 %v6216_v23, %v6143_v15  ;;  %v8395_v35 = vpop.f32.mrb[101].mxu0  ;;  %v8994_v23 = vld [vmem:[#allocation22 + $0x274] sm:$0xff]  }
 0xf82   : > { %v6146_v5 = vpop.f32.mrb[102].mxu0 }
 0xf83   : > { %v8396_v44 = vpop.f32.mrb[103].mxu0 }
 0xf84   : > { %v8997_v44 = vld [vmem:[#allocation25 + $0x50] sm:$0xff]  }
 0xf85   : > { %8476 = vmatpush3.bf16.msra.mxu0 %v8997_v44  ;;  %v6868_v44 = vpop.permute.xlu0 %6867 }
 0xf86   : > { %8477 = vmatprep.subr.bf16.mxu0 %v9610_v1 }
 0xf94   : > { %v6301_v6 = vpop.f32.mrb[104].mxu0 }
 0xf95   : > { %v6307_v19 = vadd.f32 %v6301_v6, %v6217_v30  ;;  %v8423_v2 = vpop.f32.mrb[105].mxu0  ;;  %v8998_v6 = vld [vmem:[#allocation25 + $0x58] sm:$0xff]  }
 0xf96   : > { %v6304_v60 = vpop.f32.mrb[106].mxu0  ;;  %8478 = vmatpush3.bf16.msra.mxu0 %v8998_v6 }
 0xf97   : > { %v6316_v29 = vadd.f32 %v7490_v47, %v6307_v19  ;;  %v8424_v45 = vpop.f32.mrb[107].mxu0  ;;  %8483 = vmatprep.subr.bf16.mxu0 %v9610_v1 }
 0xf99   : > { %v6318_v46 = vmul.f32 0.044715, %v6316_v29  ;;  %v6317_v43 = vmul.f32 0.5, %v6316_v29 }
 0xf9b   : > { %v6319_v3 = vmul.f32 %v6318_v46, %v6316_v29  ;;  %v7513_v46 = vld [vmem:[#allocation24 + $0x5] ss:$0 sm:$0xff] }
 0xf9d   : > { %v6320_v37 = vmul.f32 %v6319_v3, %v6316_v29 }
 0xf9f   : > { %v6321_v0 = vadd.f32 %v6320_v37, %v6316_v29 }
 0xfa1   : > { %v6322_v31 = vmul.f32 0.7978846, %v6321_v0 }
 0xfa3   : > { %9062 = vtanh.f32 %v6322_v31 }
 0xfa8   : > { %v6573_v15 = vpop.f32.mrb[108].mxu0 }
 0xfa9   : > { %v8459_v30 = vpop.f32.mrb[109].mxu0 }
 0xfaa   : > { %v6576_v35 = vpop.f32.mrb[110].mxu0 }
 0xfab   : > { %v8460_v5 = vpop.f32.mrb[111].mxu0 }
 0xfad   : > { %v9063_v40 = vpop.eup %9062 }
 0xfae   : > { %v6324_v10 = vadd.f32 1.0, %v9063_v40 }
 0xfb0   : > { %v6325_v25 = vmul.f32 %v6324_v10, %v6317_v43 }
 0xfb2   : > { %v6326_v38 = vpack.c.bf16 %v6325_v25, %v6325_v25 }
 0xfb4   : > { %8430 = vmatmul.mubr.msk.bf16.vlgmr.msra.gmra.mrb[116].mxu1 %vm4923_vm8, %v6326_v38 }
 0xfb5   : > { %8443 = vmatprep.mubr.msk.bf16.mxu1 %vm9612_vm6, %v9610_v1  ;;  %8434 = vmatpush3.bf16.msra.mxu1 %v8982_v24 }
 0xfb6   : > { %8435 = vmatprep.subr.bf16.mxu1 %v9610_v1 }
 0xfb9   : > { %8436 = vmatpush3.bf16.msra.mxu1 %v8984_v50 }
 0xfba   : > { %8437 = vmatprep.subr.bf16.mxu1 %v9610_v1 }
 0xfbd   : > { %8438 = vmatpush3.bf16.msra.mxu1 %v8986_v55 }
 0xfbe   : > { %8439 = vmatprep.subr.bf16.mxu1 %v9610_v1 }
 0xfc1   : > { %8440 = vmatpush3.bf16.msra.mxu1 %v8988_v56  ;;  %v8999_v56 = vld [vmem:[#allocation28] sm:$0xff]  }
 0xfc2   : > { %8441 = vmatprep.subr.bf16.mxu1 %v9610_v1 }
 0xfc5   : > { %8442 = vmatpush3.bf16.msra.mxu1 %v6464_v59  ;;  %v6813_v59 = vsel %vm4679_vm7, %v9003_v17, 0 }
 0xfc6   : > { %8461 = vmatprep.subr.bf16.mxu1 %v9610_v1 }
0x1087   : > { %v6389_v62 = vpop.f32.mrb[116].mxu1 }
0x1088   : > { %v6390_v57 = vadd.f32 %v7491_v41, %v6389_v62  ;;  %v8431_v52 = vpop.f32.mrb[117].mxu1  ;;  %v7514_v41 = vld [vmem:[#allocation27 + $0x5] ss:$0 sm:$0xff] }
0x1089   : > { %v6392_v11 = vpop.f32.mrb[118].mxu1 }
0x108a   : > { %v6396_v53 = vadd.f32 %v6390_v57, %v11240_v18  ;;  %v8432_v21 = vpop.f32.mrb[119].mxu1 }
0x108c   : > { %6397 = vst.msk [vmem:[#allocation5] sm:$0xff] %vm738_vm0, %v6396_v53 }
0x1093   : > { %v11282_v12 = vld [vmem:[#allocation5] sm:$0xff] }
0x1094   : > { %v6400_v49 = vmul.f32 0.044715, %v11282_v12  ;;  %v6399_v9 = vmul.f32 0.5, %v11282_v12 }
0x1096   : > { %v6401_v42 = vmul.f32 %v6400_v49, %v11282_v12 }
0x1098   : > { %v6402_v26 = vmul.f32 %v6401_v42, %v11282_v12 }
0x109a   : > { %v6403_v36 = vadd.f32 %v6402_v26, %v11282_v12 }
0x109c   : > { %v6404_v14 = vmul.f32 0.7978846, %v6403_v36 }
0x109e   : > { %9064 = vtanh.f32 %v6404_v14 }
0x10a8   : > { %v9065_v27 = vpop.eup %9064 }
0x10a9   : > { %v6406_v8 = vadd.f32 1.0, %v9065_v27 }
0x10ab   : > { %v6407_v18 = vmul.f32 %v6406_v8, %v6399_v9 }
0x10ad   : > { %6408 = vst.msk [vmem:[#allocation4 + $0x20] sm:$0xff] %vm738_vm0, %v6407_v18 }
0x10b4   : > { %v6421_v33 = vld [vmem:[#allocation4 + $0x20] sm:$0xff] }
0x10b5   : > { %v6422_v28 = vpack.c.bf16 %v6421_v33, %v6421_v33 }
0x10b7   : > { %8444 = vmatmul.mubr.msk.bf16.vlgmr.msra.gmra.mrb[120].mxu1 %vm738_vm0, %v6422_v28 }
0x10b8   : > { %8462 = vmatpush3.bf16.msra.mxu1 %v8992_v22  ;;  %8471 = vmatprep.mubr.msk.bf16.mxu1 %vm9612_vm6, %v9610_v1  ;;  %v7518_v22 = vld [vmem:[#allocation30] ss:$0 sm:$0xff] }
0x10b9   : > { %8463 = vmatprep.subr.bf16.mxu1 %v9610_v1 }
0x10bc   : > { %8464 = vmatpush3.bf16.msra.mxu1 %v8993_v4 }
0x10bd   : > { %8465 = vmatprep.subr.bf16.mxu1 %v9610_v1 }
0x10c0   : > { %8466 = vmatpush3.bf16.msra.mxu1 %v8994_v23 }
0x10c1   : > { %8467 = vmatprep.subr.bf16.mxu1 %v9610_v1 }
0x10c4   : > { %8468 = vmatpush3.bf16.msra.mxu1 %v8995_v48 }
0x10c5   : > { %8469 = vmatprep.subr.bf16.mxu1 %v9610_v1 }
0x10c8   : > { %8470 = vmatpush3.bf16.msra.mxu1 %v6622_v58 }
0x10cb   : > { %8472 = vmatmul.mubr.msk.bf16.vlgmr.msra.gmra.mrb[124].mxu1 %vm738_vm0, %v6580_v51 }
0x118a   : > { %v6500_v47 = vpop.f32.mrb[120].mxu1 }
0x118b   : > { %v6574_v19 = vadd.f32 %v6573_v15, %v6500_v47  ;;  %v8445_v2 = vpop.f32.mrb[121].mxu1 }
0x118c   : > { %v6503_v60 = vpop.f32.mrb[122].mxu1 }
0x118d   : > { %v8446_v29 = vpop.f32.mrb[123].mxu1 }
0x119e   : > { %v6658_v45 = vpop.f32.mrb[124].mxu1 }
0x119f   : > { %v6664_v3 = vadd.f32 %v6658_v45, %v6574_v19  ;;  %v8473_v37 = vpop.f32.mrb[125].mxu1 }
0x11a0   : > { %v6661_v0 = vpop.f32.mrb[126].mxu1 }
0x11a1   : > { %v6673_v31 = vadd.f32 %v7513_v46, %v6664_v3  ;;  %v8474_v40 = vpop.f32.mrb[127].mxu1  ;;  %v6878_v3 = vld [vmem:[#allocation31] sm:$0x1] }
0x11a2   : > { %v6884_v40 = vld [vmem:[#allocation9] sm:$0x1] }
0x11a3   : > { %v6675_v43 = vmul.f32 0.044715, %v6673_v31  ;;  %v6674_v50 = vmul.f32 0.5, %v6673_v31 }
0x11a5   : > { %v6676_v10 = vmul.f32 %v6675_v43, %v6673_v31 }
0x11a7   : > { %v6677_v25 = vmul.f32 %v6676_v10, %v6673_v31 }
0x11a9   : > { %v6678_v38 = vadd.f32 %v6677_v25, %v6673_v31 }
0x11ab   : > { %v6679_v24 = vmul.f32 0.7978846, %v6678_v38 }
0x11ad   : > { %9066 = vtanh.f32 %v6679_v24 }
0x11b7   : > { %v9067_v16 = vpop.eup %9066 }
0x11b8   : > { %v6681_v39 = vadd.f32 1.0, %v9067_v16 }
0x11ba   : > { %v6682_v55 = vmul.f32 %v6681_v39, %v6674_v50 }
0x11bc   : > { %v6683_v34 = vpack.c.bf16 %v6682_v55, %v6682_v55 }
0x11be   : > { %8480 = vmatmul.mubr.msk.bf16.vlgmr.msra.gmra.mrb[112].mxu0 %vm4923_vm8, %v6683_v34 }
0x11bf   : > { %8493 = vmatprep.mubr.msk.bf16.mxu0 %vm9612_vm6, %v9610_v1  ;;  %8484 = vmatpush3.bf16.msra.mxu0 %v8999_v56 }
0x11c0   : > { %8485 = vmatprep.subr.bf16.mxu0 %v9610_v1 }
0x11c3   : > { %8486 = vmatpush3.bf16.msra.mxu0 %v9000_v7 }
0x11c4   : > { %8487 = vmatprep.subr.bf16.mxu0 %v9610_v1 }
0x11c7   : > { %8488 = vmatpush3.bf16.msra.mxu0 %v9001_v13 }
0x11c8   : > { %8489 = vmatprep.subr.bf16.mxu0 %v9610_v1 }
0x11cb   : > { %8490 = vmatpush3.bf16.msra.mxu0 %v9002_v61 }
0x11cc   : > { %8491 = vmatprep.subr.bf16.mxu0 %v9610_v1 }
0x11cf   : > { %8492 = vmatpush3.bf16.msra.mxu0 %v6813_v59 }
0x1291   : > { %v6746_v62 = vpop.f32.mrb[112].mxu0 }
0x1292   : > { %v6747_v57 = vadd.f32 %v7514_v41, %v6746_v62  ;;  %v8481_v52 = vpop.f32.mrb[113].mxu0 }
0x1293   : > { %v6749_v11 = vpop.f32.mrb[114].mxu0 }
0x1294   : > { %v6753_v53 = vadd.f32 %v6747_v57, %v11282_v12  ;;  %v8482_v21 = vpop.f32.mrb[115].mxu0 }
0x1296   : > { %6754 = vst.msk [vmem:[#allocation5] sm:$0xff] %vm738_vm0, %v6753_v53 }
0x129d   : > { %v6755_v49 = vld [vmem:[#allocation5] sm:$0xff] }
0x129e   : > { %v6757_v42 = vmul.f32 0.044715, %v6755_v49  ;;  %v6756_v9 = vmul.f32 0.5, %v6755_v49 }
0x12a0   : > { %v6758_v1 = vmul.f32 %v6757_v42, %v6755_v49 }
0x12a2   : > { %v6759_v26 = vmul.f32 %v6758_v1, %v6755_v49 }
0x12a4   : > { %v6760_v36 = vadd.f32 %v6759_v26, %v6755_v49 }
0x12a6   : > { %v6761_v14 = vmul.f32 0.7978846, %v6760_v36 }
0x12a8   : > { %9068 = vtanh.f32 %v6761_v14 }
0x12b2   : > { %v9069_v27 = vpop.eup %9068 }
0x12b3   : > { %v6763_v8 = vadd.f32 1.0, %v9069_v27 }
0x12b5   : > { %v6764_v18 = vmul.f32 %v6763_v8, %v6756_v9 }
0x12b7   : > { %v6765_v33 = vpack.c.bf16 %v6764_v18, %v6764_v18 }
0x12b9   : > { %8494 = vmatmul.mubr.msk.bf16.vlgmr.msra.gmra.mrb[116].mxu0 %vm738_vm0, %v6765_v33 }
0x138c   : > { %v6849_v28 = vpop.f32.mrb[116].mxu0 }
0x138d   : > { %v6850_v12 = vadd.f32 %v7518_v22, %v6849_v28  ;;  %v8495_v4 = vpop.f32.mrb[117].mxu0 }
0x138e   : > { %v6852_v23 = vpop.f32.mrb[118].mxu0 }
0x138f   : > { %v6856_v48 = vmul.f32 0.044715, %v6850_v12  ;;  %v8496_v63 = vpop.f32.mrb[119].mxu0  ;;  %v6855_v35 = vmul.f32 0.5, %v6850_v12 }
0x1391   : > { %v6857_v32 = vmul.f32 %v6856_v48, %v6850_v12 }
0x1393   : > { %v6858_v58 = vmul.f32 %v6857_v32, %v6850_v12 }
0x1395   : > { %v6859_v51 = vadd.f32 %v6858_v58, %v6850_v12 }
0x1397   : > { %v6860_v15 = vmul.f32 0.7978846, %v6859_v51 }
0x1399   : > { %9070 = vtanh.f32 %v6860_v15 }
0x13a3   : > { %v9071_v30 = vpop.eup %9070 }
0x13a4   : > { %v6862_v5 = vadd.f32 1.0, %v9071_v30 }
0x13a6   : > { %v6863_v6 = vmul.f32 %v6862_v5, %v6855_v35 }
0x13a8   : > { %v6870_v47 = vmul.f32 %v6868_v44, %v6863_v6 }
0x13aa   : > { %v6871_v19 = vsel %vm1123_vm5, %v6870_v47, 0.0 }
0x13ab   : > { %v6872_v2 = vrot.slane %v6871_v19, 4 }
0x13ad   : > { %v6873_v60 = vadd.f32 %v6872_v2, %v6871_v19 }
0x13af   : > { %v6874_v29 = vrot.slane %v6873_v60, 2 }
0x13b1   : > { %v6875_v45 = vadd.f32 %v6874_v29, %v6873_v60 }
0x13b3   : > { %v6876_v46 = vrot.slane %v6875_v45, 1 }
0x13b5   : > { %v6877_v37 = vadd.f32 %v6876_v46, %v6875_v45 }
0x13b7   : > { %v6879_v0 = vmul.f32 %v6878_v3, %v6877_v37 }
0x13b9   : > { %v6881_v31 = vsel %vm6880_vm9, %v6879_v0, 0.0 }
0x13ba   : > { %6882 = vadd.xlane.f32.xlu0 %v6881_v31 }
0x1447   : > { %v6883_v43 = vpop.xlane.xlu0 %6882 }
0x1448   : > { %v6885_v10 = vadd.f32 %v6884_v40, %v6883_v43 }
0x144a   : > { %6887 = vst.msk [vmem:[%s731_s30] sm:$0x1] %vm6886_vm10, %v6885_v10 }
0x144b   : > { %9508 = shalt.err (!%p9505_p9)
}
0x144c   : > { %s9509_s19 = scalar_lea.hbm %s11318_s28, 16  ;;  %s9513_s15 = scalar_lea.hbm %s11437_s2, 32 }
0x144d   : > { %p9510_p12 = scmp.ne.s32.totalorder %s11318_s28, %s9509_s19  ;;  %p9514_p0 = scmp.lt.u32.totalorder %s11318_s28, %s11437_s2 }
0x144e   : > { %p9515_p2 = scmp.lt.u32.totalorder %s9513_s15, %s9509_s19  ;;  %p9517_p4 = scmp.lt.u32.totalorder %s9509_s19, %s11318_s28 }
0x144f   : > { %p9511_p1 = pnand %p9510_p12, %p11438_p10 }
0x1450   : > { %p9516_p8 = por %p9515_p2, %p9514_p0 }
0x1451   : > { %p9512_p13 = pneg %p9511_p1 }
0x1452   : > { %p9518_p11 = por %p9517_p4, %p9516_p8 }
0x1454   : > { %p9519_p3 = pnand %p9518_p11, %p9512_p13 }
0x1456   : > { %9522 = shalt.err (!%p9519_p3)
}
0x1457   : > { %8635 = dma.vmem_to_hbm [thread:$0]  (%p11438_p10), %s11320_s1, 16, %s11318_s28, %s6889_s24  }
0x1458 PF: > { %s11439_s29 = sld [smem:[#allocation44_spill]]  ;;  %p11440_p5 = scmp.ne.s32.totalorder %s11414_s27, 0 }
0x1459   : > { %p11441_p7 = scmp.ge.s32.totalorder %s9589_s26, 2 }
0x145b   : > { %p8685_p6 = pnand %p11441_p7, %p11440_p5 }
0x145e   : > { %s6913_s21 = sand.u32 1, %s11439_s29  }
0x145f   : > { %s6914_s25 = scalar_lea.sflag [#allocation12], %s6913_s21 }
0x1460   : > { %9572 = dma.done.wait (!%p8685_p6), %s6914_s25, 16  }
0x1461   : > { %9574 = vsyncadd (!%p8685_p6), %s6914_s25, 4294967280  ;;  %s11442_s23 = sld [smem:[#allocation45_spill]]  ;;  %s11443_s24 = sld [smem:[#allocation46_spill]] }
0x1462   : > { %p38_p9 = scmp.ge.s32.totalorder %s10041_s17, 4   ;;  %s11444_s25 = smov %s10052_s22 }
0x1463   : > { %s11445_s26 = smov %s10041_s17 }
0x1464   :  { %40 = sbr.rel (!%p38_p9) target bundleno = 17 (0x11), region = 274 }
0x146b   :  { %6918 = vsyncpa [#allocation11], 1 }
0x146c   :  { %6920 = vsyncpa [#allocation11 + $0x1], 1 }
0x146d   :  { %6921 = vsyncpa [#allocation14], 1 }
0x146e   :  { %6922 = vsyncpa [#allocation17], 1 }
0x146f   :  { %6923 = vsyncpa [#allocation20], 1 }
0x1470   :  { %6924 = vsyncpa [#allocation23], 1 }
0x1471   :  { %6925 = vsyncpa [#allocation26], 1 }
0x1472   :  { %6926 = vsyncpa [#allocation29], 1 }
0x1473   :  { %6927 = vsyncpa [#allocation32], 1 }
0x1474   :  { %6928 = vsyncpa [#allocation12], 1 }
0x1475   :  { %6930 = vsyncpa [#allocation12 + $0x1], 1 }

</bundles_post_ra>
